<compile_context>
chip_gen: v6e
topology: v6e:2x2x1
jax: 0.10.0
libtpu: 0.0.40
codegen_flags: <defaults>
</compile_context>

<pallas_src>
import jax
import jax.numpy as jnp
from jax.experimental import pallas as pl
from jax.experimental.pallas import tpu as pltpu


NUM_CLASSES = 5
ANCHORS_PER_FMAP = (4, 6)


# ----------------------------------------------------------------------------
# In-kernel helpers.
# ----------------------------------------------------------------------------
def _fill_pad(pad_ref, x):
    """Fill a (H+2, W+2, C) VMEM scratch with a zero-bordered copy of x.

    Plain vst of zeros + one windowed ref store of the interior; replaces the
    old value-level lane/sublane concatenations.
    """
    H, W, C = x.shape
    pad_ref[...] = jnp.zeros(pad_ref.shape, pad_ref.dtype)
    pad_ref[1:H + 1, 1:W + 1, :] = x


def _conv3x3_from_pad(pad_ref, w_ref, b, relu):
    """3x3 conv (pad=1, stride=1) as 9 per-tap MXU matmuls accumulated in f32.

    pad_ref: (H+2, W+2, Cin) zero-bordered scratch (already filled).
    w_ref:   (9, Cin, Cout) weights, tap-major (ky, kx) order.
    b:       (1, Cout) bias value.
    Returns the matmul-native (H*W, Cout) float32 result.
    """
    Hp, Wp, Cin = pad_ref.shape
    H, W = Hp - 2, Wp - 2
    xp = pad_ref[...]                                    # (H+2, W+2, Cin)
    acc = None
    for ky in range(3):
        for kx in range(3):
            tap = xp[ky:ky + H, kx:kx + W, :].reshape(H * W, Cin)
            part = jnp.dot(tap, w_ref[3 * ky + kx],
                           preferred_element_type=jnp.float32)
            acc = part if acc is None else acc + part
    acc = acc + b
    if relu:
        acc = jnp.maximum(acc, 0.0)
    return acc                                           # (H*W, Cout)


def _downsample2(y):
    """Even rows/cols of (H, W, C) -> (H//2, W//2, C).

    Equivalent to the stride-2 output of a pad-1 3x3 conv computed at stride 1.
    Row pick is a free leading-dim select; column pick is a small sublane pick.
    """
    H, W, C = y.shape
    y = y.reshape(H // 2, 2, W, C)[:, 0]                 # even rows
    y = y.reshape(H // 2, W // 2, 2, C)[:, :, 0]         # even cols
    return y


# ----------------------------------------------------------------------------
# Fused SSD forward kernel: one grid step == one image.
# ----------------------------------------------------------------------------
def _make_ssd_kernel(c3):
    """c3 = number of conv3 output channels (split point in the fused head0)."""

    def kernel(x_ref,
               w1, b1, w2, b2, w3h0, b3h0, wh1, bh1,
               o0_ref, o1_ref,
               pad_a, pad_b, pad_c, pad_d):
        x = x_ref[0]                                     # (H, W, Cin)
        H, W, _ = x.shape
        H0, W0 = H // 2, W // 2

        # --- backbone: conv1 + ReLU ---
        _fill_pad(pad_a, x)
        y1 = _conv3x3_from_pad(pad_a, w1, b1[...], relu=True)      # (H*W, 16)

        # --- conv2 + ReLU, stride-2 subsample -> f0 ---
        _fill_pad(pad_b, y1.reshape(H, W, -1))
        y2 = _conv3x3_from_pad(pad_b, w2, b2[...], relu=True)      # (H*W, 32)
        f0 = _downsample2(y2.reshape(H, W, -1))                    # (H0, W0, 32)

        # --- conv3 and head0 share f0's taps (fused Cout = 32 + 36) ---
        _fill_pad(pad_c, f0)
        r = _conv3x3_from_pad(pad_c, w3h0, b3h0[...], relu=False)  # (H0*W0, 68)
        y3 = jnp.maximum(r[:, :c3], 0.0)                           # conv3+ReLU
        h0 = r[:, c3:]                                             # cls0|reg0
        f1 = _downsample2(y3.reshape(H0, W0, -1))                  # (H1, W1, 32)

        # --- head1 (fused cls1|reg1) ---
        _fill_pad(pad_d, f1)
        h1 = _conv3x3_from_pad(pad_d, wh1, bh1[...], relu=False)   # (H1*W1, 54)

        # Store matmul-native shapes directly: no in-kernel relayout.
        o0_ref[0] = h0
        o1_ref[0] = h1

    return kernel


# ----------------------------------------------------------------------------
# Wrapper: pack weights, call the fused kernel, unpack cls/reg predictions.
# ----------------------------------------------------------------------------
def ssd_forward_pallas(params, images_nchw):
    """images_nchw: (N, C, H, W) float32 -> (cls_logits, bbox_pred)."""
    x = jnp.transpose(images_nchw, (0, 2, 3, 1)).astype(jnp.float32)  # NHWC
    N, H, W, Cin = x.shape

    w1, b1 = params["conv1"]
    w2, b2 = params["conv2"]
    w3, b3 = params["conv3"]
    wc0, bc0 = params["cls0"]
    wr0, br0 = params["reg0"]
    wc1, bc1 = params["cls1"]
    wr1, br1 = params["reg1"]

    c1 = w1.shape[-1]                    # 16
    c2 = w2.shape[-1]                    # 32
    c3 = w3.shape[-1]                    # 32

    # Fuse conv3 with head0 (they share f0's taps) and cls+reg within each head.
    w3h0 = jnp.concatenate([w3, wc0, wr0], axis=-1)      # (3,3,32, 32+20+16)
    b3h0 = jnp.concatenate([b3, bc0, br0], axis=-1)
    wh1 = jnp.concatenate([wc1, wr1], axis=-1)           # (3,3,32, 30+24)
    bh1 = jnp.concatenate([bc1, br1], axis=-1)

    def pack_w(w):                       # (3,3,Cin,Cout) -> (9, Cin, Cout)
        kh, kw, ci, co = w.shape
        return w.reshape(kh * kw, ci, co)

    def pack_b(b):
        return b.reshape(1, -1)

    weights = [pack_w(w1), pack_b(b1), pack_w(w2), pack_b(b2),
               pack_w(w3h0), pack_b(b3h0), pack_w(wh1), pack_b(bh1)]

    H0, W0 = H // 2, W // 2              # f0 spatial
    H1, W1 = H // 4, W // 4              # f1 spatial
    Ch0 = w3h0.shape[-1] - c3            # 36
    Ch1 = wh1.shape[-1]                  # 54

    # Weights are resident in VMEM across all grid steps (constant index map).
    in_specs = [pl.BlockSpec((1, H, W, Cin), lambda n: (n, 0, 0, 0))]
    in_specs += [pl.BlockSpec(wgt.shape, lambda n, nd=wgt.ndim: (0,) * nd)
                 for wgt in weights]

    o0, o1 = pl.pallas_call(
        _make_ssd_kernel(c3),
        out_shape=(jax.ShapeDtypeStruct((N, H0 * W0, Ch0), jnp.float32),
                   jax.ShapeDtypeStruct((N, H1 * W1, Ch1), jnp.float32)),
        grid_spec=pltpu.PrefetchScalarGridSpec(
            num_scalar_prefetch=0,
            grid=(N,),
            in_specs=in_specs,
            out_specs=(pl.BlockSpec((1, H0 * W0, Ch0), lambda n: (n, 0, 0)),
                       pl.BlockSpec((1, H1 * W1, Ch1), lambda n: (n, 0, 0))),
            scratch_shapes=[
                pltpu.VMEM((H + 2, W + 2, Cin), jnp.float32),   # pad for conv1
                pltpu.VMEM((H + 2, W + 2, c1), jnp.float32),    # pad for conv2
                pltpu.VMEM((H0 + 2, W0 + 2, c2), jnp.float32),  # pad for conv3+head0
                pltpu.VMEM((H1 + 2, W1 + 2, c3), jnp.float32),  # pad for head1
            ]),
        compiler_params=pltpu.CompilerParams(
            dimension_semantics=("parallel",)),
    )(x, *weights)

    # Unpack: split fused head channels, flatten like PyTorch
    # (N, H*W, A*C) -> (N, H*W*A, C).
    A0, A1 = ANCHORS_PER_FMAP
    NC = NUM_CLASSES
    cls0 = o0[..., :A0 * NC].reshape(N, -1, NC)
    reg0 = o0[..., A0 * NC:].reshape(N, -1, 4)
    cls1 = o1[..., :A1 * NC].reshape(N, -1, NC)
    reg1 = o1[..., A1 * NC:].reshape(N, -1, 4)

    cls_logits = jnp.concatenate([cls0, cls1], axis=1)
    bbox_pred = jnp.concatenate([reg0, reg1], axis=1)
    return cls_logits, bbox_pred


# ----------------------------------------------------------------------------
# Pure-JAX reference (for correctness check only; uses the UNfused params).
# ----------------------------------------------------------------------------
def _conv3x3_ref(x, w, b, *, relu, stride):
    out = jax.lax.conv_general_dilated(
        x, w, window_strides=(stride, stride), padding=((1, 1), (1, 1)),
        dimension_numbers=("NHWC", "HWIO", "NHWC"))
    out = out + b
    if relu:
        out = jnp.maximum(out, 0.0)
    return out


def ssd_forward_ref(params, images_nchw):
    x = jnp.transpose(images_nchw, (0, 2, 3, 1))
    x = _conv3x3_ref(x, *params["conv1"], relu=True, stride=1)
    f0 = _conv3x3_ref(x, *params["conv2"], relu=True, stride=2)
    f1 = _conv3x3_ref(f0, *params["conv3"], relu=True, stride=2)
    cls_chunks, reg_chunks = [], []
    for i, f in enumerate([f0, f1]):
        n = f.shape[0]
        cls = _conv3x3_ref(f, *params[f"cls{i}"], relu=False, stride=1)
        reg = _conv3x3_ref(f, *params[f"reg{i}"], relu=False, stride=1)
        cls_chunks.append(cls.reshape(n, -1, NUM_CLASSES))
        reg_chunks.append(reg.reshape(n, -1, 4))
    return (jnp.concatenate(cls_chunks, axis=1),
            jnp.concatenate(reg_chunks, axis=1))


# ----------------------------------------------------------------------------
# Synthetic deterministic params.
# ----------------------------------------------------------------------------
def _init_conv(key, cin, cout):
    kw, kb = jax.random.split(key)
    fan_in = 3 * 3 * cin
    w = jax.random.normal(kw, (3, 3, cin, cout), jnp.float32) / jnp.sqrt(fan_in)
    b = 0.01 * jax.random.normal(kb, (cout,), jnp.float32)
    return w, b


def init_ssd_params(key, in_channels=4):
    keys = jax.random.split(key, 7)
    return {
        "conv1": _init_conv(keys[0], in_channels, 16),
        "conv2": _init_conv(keys[1], 16, 32),
        "conv3": _init_conv(keys[2], 32, 32),
        "cls0": _init_conv(keys[3], 32, ANCHORS_PER_FMAP[0] * NUM_CLASSES),
        "reg0": _init_conv(keys[4], 32, ANCHORS_PER_FMAP[0] * 4),
        "cls1": _init_conv(keys[5], 32, ANCHORS_PER_FMAP[1] * NUM_CLASSES),
        "reg1": _init_conv(keys[6], 32, ANCHORS_PER_FMAP[1] * 4),
    }


if __name__ == "__main__":
    key = jax.random.PRNGKey(0)
    k_img, k_par = jax.random.split(key)

    images = jax.random.normal(k_img, (2, 4, 16, 16), jnp.float32)  # NCHW
    params = init_ssd_params(k_par, in_channels=4)

    # Fused Pallas forward.
    cls_logits, bbox_pred = jax.jit(ssd_forward_pallas)(params, images)
    cls_logits = jax.block_until_ready(cls_logits)
    bbox_pred = jax.block_until_ready(bbox_pred)

    # Pure-JAX reference check (validates per-tap matmuls, pad scratch,
    # conv3+head fusion and stride handling).
    cls_ref, bbox_ref = ssd_forward_ref(params, images)
    n_anchors = 8 * 8 * ANCHORS_PER_FMAP[0] + 4 * 4 * ANCHORS_PER_FMAP[1]
    assert cls_logits.shape == (2, n_anchors, NUM_CLASSES)
    assert bbox_pred.shape == (2, n_anchors, 4)
    assert jnp.allclose(cls_logits, cls_ref, atol=1e-4, rtol=1e-4)
    assert jnp.allclose(bbox_pred, bbox_ref, atol=1e-4, rtol=1e-4)

    print("KERNEL_OK")
</pallas_src>

<mosaic_0001>
module attributes {stable_mosaic.version = 11 : i64} {
  func.func @kernel(%arg0: i32, %arg1: memref<1x16x16x4xf32, #tpu.memory_space<vmem>>, %arg2: memref<9x4x16xf32, #tpu.memory_space<vmem>>, %arg3: memref<1x16xf32, #tpu.memory_space<vmem>>, %arg4: memref<9x16x32xf32, #tpu.memory_space<vmem>>, %arg5: memref<1x32xf32, #tpu.memory_space<vmem>>, %arg6: memref<9x32x68xf32, #tpu.memory_space<vmem>>, %arg7: memref<1x68xf32, #tpu.memory_space<vmem>>, %arg8: memref<9x32x54xf32, #tpu.memory_space<vmem>>, %arg9: memref<1x54xf32, #tpu.memory_space<vmem>>, %arg10: memref<1x64x36xf32, #tpu.memory_space<vmem>>, %arg11: memref<1x16x54xf32, #tpu.memory_space<vmem>>, %arg12: memref<18x18x4xf32, #tpu.memory_space<vmem>>, %arg13: memref<18x18x16xf32, #tpu.memory_space<vmem>>, %arg14: memref<10x10x32xf32, #tpu.memory_space<vmem>>, %arg15: memref<6x6x32xf32, #tpu.memory_space<vmem>>) attributes {dimension_semantics = [#tpu.dimension_semantics<parallel>], iteration_bounds = array<i64: 2>, scalar_prefetch = 0 : i64, scratch_operands = 4 : i64, tpu.core_type = #tpu.core_type<tc>, window_params = [{transform_indices = @transform_0, window_bounds = array<i64: 1, 16, 16, 4>}, {pipeline_mode = #tpu.pipeline_mode<synchronous>, transform_indices = @transform_1, window_bounds = array<i64: 9, 4, 16>}, {pipeline_mode = #tpu.pipeline_mode<synchronous>, transform_indices = @transform_2, window_bounds = array<i64: 1, 16>}, {pipeline_mode = #tpu.pipeline_mode<synchronous>, transform_indices = @transform_3, window_bounds = array<i64: 9, 16, 32>}, {pipeline_mode = #tpu.pipeline_mode<synchronous>, transform_indices = @transform_4, window_bounds = array<i64: 1, 32>}, {pipeline_mode = #tpu.pipeline_mode<synchronous>, transform_indices = @transform_5, window_bounds = array<i64: 9, 32, 68>}, {pipeline_mode = #tpu.pipeline_mode<synchronous>, transform_indices = @transform_6, window_bounds = array<i64: 1, 68>}, {pipeline_mode = #tpu.pipeline_mode<synchronous>, transform_indices = @transform_7, window_bounds = array<i64: 9, 32, 54>}, {pipeline_mode = #tpu.pipeline_mode<synchronous>, transform_indices = @transform_8, window_bounds = array<i64: 1, 54>}, {transform_indices = @transform_9, window_bounds = array<i64: 1, 64, 36>}, {transform_indices = @transform_10, window_bounds = array<i64: 1, 16, 54>}]} {
    %c0 = arith.constant 0 : index
    %c0_0 = arith.constant 0 : index
    %c0_1 = arith.constant 0 : index
    %c0_2 = arith.constant 0 : index
    %0 = vector.load %arg1[%c0, %c0_0, %c0_1, %c0_2] : memref<1x16x16x4xf32, #tpu.memory_space<vmem>>, vector<1x16x16x4xf32>
    %1 = vector.shape_cast %0 : vector<1x16x16x4xf32> to vector<16x16x4xf32>
    %cst = arith.constant 0.000000e+00 : f32
    %2 = vector.broadcast %cst : f32 to vector<18x18x4xf32>
    %c0_3 = arith.constant 0 : index
    %c0_4 = arith.constant 0 : index
    %c0_5 = arith.constant 0 : index
    %3 = vector.load %arg12[%c0_3, %c0_4, %c0_5] : memref<18x18x4xf32, #tpu.memory_space<vmem>>, vector<18x18x4xf32>
    tpu.vector_store %arg12[%c0_3, %c0_4, %c0_5], %2 {strides = array<i32>} : memref<18x18x4xf32, #tpu.memory_space<vmem>>, vector<18x18x4xf32>,
    %c1 = arith.constant 1 : index
    %c1_6 = arith.constant 1 : index
    %c0_7 = arith.constant 0 : index
    %4 = vector.load %arg12[%c1, %c1_6, %c0_7] : memref<18x18x4xf32, #tpu.memory_space<vmem>>, vector<16x16x4xf32>
    tpu.vector_store %arg12[%c1, %c1_6, %c0_7], %1 {strides = array<i32>} : memref<18x18x4xf32, #tpu.memory_space<vmem>>, vector<16x16x4xf32>,
    %c0_8 = arith.constant 0 : index
    %c0_9 = arith.constant 0 : index
    %5 = vector.load %arg3[%c0_8, %c0_9] : memref<1x16xf32, #tpu.memory_space<vmem>>, vector<1x16xf32>
    %c0_10 = arith.constant 0 : index
    %c0_11 = arith.constant 0 : index
    %c0_12 = arith.constant 0 : index
    %6 = vector.load %arg12[%c0_10, %c0_11, %c0_12] : memref<18x18x4xf32, #tpu.memory_space<vmem>>, vector<18x18x4xf32>
    %7 = vector.extract_strided_slice %6 {offsets = [0, 0, 0], sizes = [16, 16, 4], strides = [1, 1, 1]} : vector<18x18x4xf32> to vector<16x16x4xf32>
    %8 = vector.shape_cast %7 : vector<16x16x4xf32> to vector<256x4xf32>
    %c0_13 = arith.constant 0 : index
    %c0_14 = arith.constant 0 : index
    %c0_15 = arith.constant 0 : index
    %9 = vector.load %arg2[%c0_13, %c0_14, %c0_15] : memref<9x4x16xf32, #tpu.memory_space<vmem>>, vector<1x4x16xf32>
    %10 = vector.shape_cast %9 : vector<1x4x16xf32> to vector<4x16xf32>
    %cst_16 = arith.constant dense<0.000000e+00> : vector<256x16xf32>
    %11 = tpu.matmul %8, %10, %cst_16 {dimension_numbers = #tpu.dot_dimension_numbers<[1], [0], [0], [1], [0, 0, 1, 1], [], []>} : vector<256x4xf32>, vector<4x16xf32>, vector<256x16xf32> -> vector<256x16xf32>
    %12 = vector.extract_strided_slice %6 {offsets = [0, 1, 0], sizes = [16, 16, 4], strides = [1, 1, 1]} : vector<18x18x4xf32> to vector<16x16x4xf32>
    %13 = vector.shape_cast %12 : vector<16x16x4xf32> to vector<256x4xf32>
    %c1_17 = arith.constant 1 : index
    %c0_18 = arith.constant 0 : index
    %c0_19 = arith.constant 0 : index
    %14 = vector.load %arg2[%c1_17, %c0_18, %c0_19] : memref<9x4x16xf32, #tpu.memory_space<vmem>>, vector<1x4x16xf32>
    %15 = vector.shape_cast %14 : vector<1x4x16xf32> to vector<4x16xf32>
    %cst_20 = arith.constant dense<0.000000e+00> : vector<256x16xf32>
    %16 = tpu.matmul %13, %15, %cst_20 {dimension_numbers = #tpu.dot_dimension_numbers<[1], [0], [0], [1], [0, 0, 1, 1], [], []>} : vector<256x4xf32>, vector<4x16xf32>, vector<256x16xf32> -> vector<256x16xf32>
    %17 = arith.addf %11, %16 : vector<256x16xf32>
    %18 = vector.extract_strided_slice %6 {offsets = [0, 2, 0], sizes = [16, 16, 4], strides = [1, 1, 1]} : vector<18x18x4xf32> to vector<16x16x4xf32>
    %19 = vector.shape_cast %18 : vector<16x16x4xf32> to vector<256x4xf32>
    %c2 = arith.constant 2 : index
    %c0_21 = arith.constant 0 : index
    %c0_22 = arith.constant 0 : index
    %20 = vector.load %arg2[%c2, %c0_21, %c0_22] : memref<9x4x16xf32, #tpu.memory_space<vmem>>, vector<1x4x16xf32>
    %21 = vector.shape_cast %20 : vector<1x4x16xf32> to vector<4x16xf32>
    %cst_23 = arith.constant dense<0.000000e+00> : vector<256x16xf32>
    %22 = tpu.matmul %19, %21, %cst_23 {dimension_numbers = #tpu.dot_dimension_numbers<[1], [0], [0], [1], [0, 0, 1, 1], [], []>} : vector<256x4xf32>, vector<4x16xf32>, vector<256x16xf32> -> vector<256x16xf32>
    %23 = arith.addf %17, %22 : vector<256x16xf32>
    %24 = vector.extract_strided_slice %6 {offsets = [1, 0, 0], sizes = [16, 16, 4], strides = [1, 1, 1]} : vector<18x18x4xf32> to vector<16x16x4xf32>
    %25 = vector.shape_cast %24 : vector<16x16x4xf32> to vector<256x4xf32>
    %c3 = arith.constant 3 : index
    %c0_24 = arith.constant 0 : index
    %c0_25 = arith.constant 0 : index
    %26 = vector.load %arg2[%c3, %c0_24, %c0_25] : memref<9x4x16xf32, #tpu.memory_space<vmem>>, vector<1x4x16xf32>
    %27 = vector.shape_cast %26 : vector<1x4x16xf32> to vector<4x16xf32>
    %cst_26 = arith.constant dense<0.000000e+00> : vector<256x16xf32>
    %28 = tpu.matmul %25, %27, %cst_26 {dimension_numbers = #tpu.dot_dimension_numbers<[1], [0], [0], [1], [0, 0, 1, 1], [], []>} : vector<256x4xf32>, vector<4x16xf32>, vector<256x16xf32> -> vector<256x16xf32>
    %29 = arith.addf %23, %28 : vector<256x16xf32>
    %30 = vector.extract_strided_slice %6 {offsets = [1, 1, 0], sizes = [16, 16, 4], strides = [1, 1, 1]} : vector<18x18x4xf32> to vector<16x16x4xf32>
    %31 = vector.shape_cast %30 : vector<16x16x4xf32> to vector<256x4xf32>
    %c4 = arith.constant 4 : index
    %c0_27 = arith.constant 0 : index
    %c0_28 = arith.constant 0 : index
    %32 = vector.load %arg2[%c4, %c0_27, %c0_28] : memref<9x4x16xf32, #tpu.memory_space<vmem>>, vector<1x4x16xf32>
    %33 = vector.shape_cast %32 : vector<1x4x16xf32> to vector<4x16xf32>
    %cst_29 = arith.constant dense<0.000000e+00> : vector<256x16xf32>
    %34 = tpu.matmul %31, %33, %cst_29 {dimension_numbers = #tpu.dot_dimension_numbers<[1], [0], [0], [1], [0, 0, 1, 1], [], []>} : vector<256x4xf32>, vector<4x16xf32>, vector<256x16xf32> -> vector<256x16xf32>
    %35 = arith.addf %29, %34 : vector<256x16xf32>
    %36 = vector.extract_strided_slice %6 {offsets = [1, 2, 0], sizes = [16, 16, 4], strides = [1, 1, 1]} : vector<18x18x4xf32> to vector<16x16x4xf32>
    %37 = vector.shape_cast %36 : vector<16x16x4xf32> to vector<256x4xf32>
    %c5 = arith.constant 5 : index
    %c0_30 = arith.constant 0 : index
    %c0_31 = arith.constant 0 : index
    %38 = vector.load %arg2[%c5, %c0_30, %c0_31] : memref<9x4x16xf32, #tpu.memory_space<vmem>>, vector<1x4x16xf32>
    %39 = vector.shape_cast %38 : vector<1x4x16xf32> to vector<4x16xf32>
    %cst_32 = arith.constant dense<0.000000e+00> : vector<256x16xf32>
    %40 = tpu.matmul %37, %39, %cst_32 {dimension_numbers = #tpu.dot_dimension_numbers<[1], [0], [0], [1], [0, 0, 1, 1], [], []>} : vector<256x4xf32>, vector<4x16xf32>, vector<256x16xf32> -> vector<256x16xf32>
    %41 = arith.addf %35, %40 : vector<256x16xf32>
    %42 = vector.extract_strided_slice %6 {offsets = [2, 0, 0], sizes = [16, 16, 4], strides = [1, 1, 1]} : vector<18x18x4xf32> to vector<16x16x4xf32>
    %43 = vector.shape_cast %42 : vector<16x16x4xf32> to vector<256x4xf32>
    %c6 = arith.constant 6 : index
    %c0_33 = arith.constant 0 : index
    %c0_34 = arith.constant 0 : index
    %44 = vector.load %arg2[%c6, %c0_33, %c0_34] : memref<9x4x16xf32, #tpu.memory_space<vmem>>, vector<1x4x16xf32>
    %45 = vector.shape_cast %44 : vector<1x4x16xf32> to vector<4x16xf32>
    %cst_35 = arith.constant dense<0.000000e+00> : vector<256x16xf32>
    %46 = tpu.matmul %43, %45, %cst_35 {dimension_numbers = #tpu.dot_dimension_numbers<[1], [0], [0], [1], [0, 0, 1, 1], [], []>} : vector<256x4xf32>, vector<4x16xf32>, vector<256x16xf32> -> vector<256x16xf32>
    %47 = arith.addf %41, %46 : vector<256x16xf32>
    %48 = vector.extract_strided_slice %6 {offsets = [2, 1, 0], sizes = [16, 16, 4], strides = [1, 1, 1]} : vector<18x18x4xf32> to vector<16x16x4xf32>
    %49 = vector.shape_cast %48 : vector<16x16x4xf32> to vector<256x4xf32>
    %c7 = arith.constant 7 : index
    %c0_36 = arith.constant 0 : index
    %c0_37 = arith.constant 0 : index
    %50 = vector.load %arg2[%c7, %c0_36, %c0_37] : memref<9x4x16xf32, #tpu.memory_space<vmem>>, vector<1x4x16xf32>
    %51 = vector.shape_cast %50 : vector<1x4x16xf32> to vector<4x16xf32>
    %cst_38 = arith.constant dense<0.000000e+00> : vector<256x16xf32>
    %52 = tpu.matmul %49, %51, %cst_38 {dimension_numbers = #tpu.dot_dimension_numbers<[1], [0], [0], [1], [0, 0, 1, 1], [], []>} : vector<256x4xf32>, vector<4x16xf32>, vector<256x16xf32> -> vector<256x16xf32>
    %53 = arith.addf %47, %52 : vector<256x16xf32>
    %54 = vector.extract_strided_slice %6 {offsets = [2, 2, 0], sizes = [16, 16, 4], strides = [1, 1, 1]} : vector<18x18x4xf32> to vector<16x16x4xf32>
    %55 = vector.shape_cast %54 : vector<16x16x4xf32> to vector<256x4xf32>
    %c8 = arith.constant 8 : index
    %c0_39 = arith.constant 0 : index
    %c0_40 = arith.constant 0 : index
    %56 = vector.load %arg2[%c8, %c0_39, %c0_40] : memref<9x4x16xf32, #tpu.memory_space<vmem>>, vector<1x4x16xf32>
    %57 = vector.shape_cast %56 : vector<1x4x16xf32> to vector<4x16xf32>
    %cst_41 = arith.constant dense<0.000000e+00> : vector<256x16xf32>
    %58 = tpu.matmul %55, %57, %cst_41 {dimension_numbers = #tpu.dot_dimension_numbers<[1], [0], [0], [1], [0, 0, 1, 1], [], []>} : vector<256x4xf32>, vector<4x16xf32>, vector<256x16xf32> -> vector<256x16xf32>
    %59 = arith.addf %53, %58 : vector<256x16xf32>
    %60 = vector.broadcast %5 : vector<1x16xf32> to vector<256x16xf32>
    %61 = arith.addf %59, %60 : vector<256x16xf32>
    %cst_42 = arith.constant 0.000000e+00 : f32
    %62 = vector.broadcast %cst_42 : f32 to vector<256x16xf32>
    %63 = arith.maximumf %61, %62 : vector<256x16xf32>
    %64 = vector.shape_cast %63 : vector<256x16xf32> to vector<16x16x16xf32>
    %cst_43 = arith.constant 0.000000e+00 : f32
    %65 = vector.broadcast %cst_43 : f32 to vector<18x18x16xf32>
    %c0_44 = arith.constant 0 : index
    %c0_45 = arith.constant 0 : index
    %c0_46 = arith.constant 0 : index
    %66 = vector.load %arg13[%c0_44, %c0_45, %c0_46] : memref<18x18x16xf32, #tpu.memory_space<vmem>>, vector<18x18x16xf32>
    tpu.vector_store %arg13[%c0_44, %c0_45, %c0_46], %65 {strides = array<i32>} : memref<18x18x16xf32, #tpu.memory_space<vmem>>, vector<18x18x16xf32>,
    %c1_47 = arith.constant 1 : index
    %c1_48 = arith.constant 1 : index
    %c0_49 = arith.constant 0 : index
    %67 = vector.load %arg13[%c1_47, %c1_48, %c0_49] : memref<18x18x16xf32, #tpu.memory_space<vmem>>, vector<16x16x16xf32>
    tpu.vector_store %arg13[%c1_47, %c1_48, %c0_49], %64 {strides = array<i32>} : memref<18x18x16xf32, #tpu.memory_space<vmem>>, vector<16x16x16xf32>,
    %c0_50 = arith.constant 0 : index
    %c0_51 = arith.constant 0 : index
    %68 = vector.load %arg5[%c0_50, %c0_51] : memref<1x32xf32, #tpu.memory_space<vmem>>, vector<1x32xf32>
    %c0_52 = arith.constant 0 : index
    %c0_53 = arith.constant 0 : index
    %c0_54 = arith.constant 0 : index
    %69 = vector.load %arg13[%c0_52, %c0_53, %c0_54] : memref<18x18x16xf32, #tpu.memory_space<vmem>>, vector<18x18x16xf32>
    %70 = vector.extract_strided_slice %69 {offsets = [0, 0, 0], sizes = [16, 16, 16], strides = [1, 1, 1]} : vector<18x18x16xf32> to vector<16x16x16xf32>
    %71 = vector.shape_cast %70 : vector<16x16x16xf32> to vector<256x16xf32>
    %c0_55 = arith.constant 0 : index
    %c0_56 = arith.constant 0 : index
    %c0_57 = arith.constant 0 : index
    %72 = vector.load %arg4[%c0_55, %c0_56, %c0_57] : memref<9x16x32xf32, #tpu.memory_space<vmem>>, vector<1x16x32xf32>
    %73 = vector.shape_cast %72 : vector<1x16x32xf32> to vector<16x32xf32>
    %cst_58 = arith.constant dense<0.000000e+00> : vector<256x32xf32>
    %74 = tpu.matmul %71, %73, %cst_58 {dimension_numbers = #tpu.dot_dimension_numbers<[1], [0], [0], [1], [0, 0, 1, 1], [], []>} : vector<256x16xf32>, vector<16x32xf32>, vector<256x32xf32> -> vector<256x32xf32>
    %75 = vector.extract_strided_slice %69 {offsets = [0, 1, 0], sizes = [16, 16, 16], strides = [1, 1, 1]} : vector<18x18x16xf32> to vector<16x16x16xf32>
    %76 = vector.shape_cast %75 : vector<16x16x16xf32> to vector<256x16xf32>
    %c1_59 = arith.constant 1 : index
    %c0_60 = arith.constant 0 : index
    %c0_61 = arith.constant 0 : index
    %77 = vector.load %arg4[%c1_59, %c0_60, %c0_61] : memref<9x16x32xf32, #tpu.memory_space<vmem>>, vector<1x16x32xf32>
    %78 = vector.shape_cast %77 : vector<1x16x32xf32> to vector<16x32xf32>
    %cst_62 = arith.constant dense<0.000000e+00> : vector<256x32xf32>
    %79 = tpu.matmul %76, %78, %cst_62 {dimension_numbers = #tpu.dot_dimension_numbers<[1], [0], [0], [1], [0, 0, 1, 1], [], []>} : vector<256x16xf32>, vector<16x32xf32>, vector<256x32xf32> -> vector<256x32xf32>
    %80 = arith.addf %74, %79 : vector<256x32xf32>
    %81 = vector.extract_strided_slice %69 {offsets = [0, 2, 0], sizes = [16, 16, 16], strides = [1, 1, 1]} : vector<18x18x16xf32> to vector<16x16x16xf32>
    %82 = vector.shape_cast %81 : vector<16x16x16xf32> to vector<256x16xf32>
    %c2_63 = arith.constant 2 : index
    %c0_64 = arith.constant 0 : index
    %c0_65 = arith.constant 0 : index
    %83 = vector.load %arg4[%c2_63, %c0_64, %c0_65] : memref<9x16x32xf32, #tpu.memory_space<vmem>>, vector<1x16x32xf32>
    %84 = vector.shape_cast %83 : vector<1x16x32xf32> to vector<16x32xf32>
    %cst_66 = arith.constant dense<0.000000e+00> : vector<256x32xf32>
    %85 = tpu.matmul %82, %84, %cst_66 {dimension_numbers = #tpu.dot_dimension_numbers<[1], [0], [0], [1], [0, 0, 1, 1], [], []>} : vector<256x16xf32>, vector<16x32xf32>, vector<256x32xf32> -> vector<256x32xf32>
    %86 = arith.addf %80, %85 : vector<256x32xf32>
    %87 = vector.extract_strided_slice %69 {offsets = [1, 0, 0], sizes = [16, 16, 16], strides = [1, 1, 1]} : vector<18x18x16xf32> to vector<16x16x16xf32>
    %88 = vector.shape_cast %87 : vector<16x16x16xf32> to vector<256x16xf32>
    %c3_67 = arith.constant 3 : index
    %c0_68 = arith.constant 0 : index
    %c0_69 = arith.constant 0 : index
    %89 = vector.load %arg4[%c3_67, %c0_68, %c0_69] : memref<9x16x32xf32, #tpu.memory_space<vmem>>, vector<1x16x32xf32>
    %90 = vector.shape_cast %89 : vector<1x16x32xf32> to vector<16x32xf32>
    %cst_70 = arith.constant dense<0.000000e+00> : vector<256x32xf32>
    %91 = tpu.matmul %88, %90, %cst_70 {dimension_numbers = #tpu.dot_dimension_numbers<[1], [0], [0], [1], [0, 0, 1, 1], [], []>} : vector<256x16xf32>, vector<16x32xf32>, vector<256x32xf32> -> vector<256x32xf32>
    %92 = arith.addf %86, %91 : vector<256x32xf32>
    %93 = vector.extract_strided_slice %69 {offsets = [1, 1, 0], sizes = [16, 16, 16], strides = [1, 1, 1]} : vector<18x18x16xf32> to vector<16x16x16xf32>
    %94 = vector.shape_cast %93 : vector<16x16x16xf32> to vector<256x16xf32>
    %c4_71 = arith.constant 4 : index
    %c0_72 = arith.constant 0 : index
    %c0_73 = arith.constant 0 : index
    %95 = vector.load %arg4[%c4_71, %c0_72, %c0_73] : memref<9x16x32xf32, #tpu.memory_space<vmem>>, vector<1x16x32xf32>
    %96 = vector.shape_cast %95 : vector<1x16x32xf32> to vector<16x32xf32>
    %cst_74 = arith.constant dense<0.000000e+00> : vector<256x32xf32>
    %97 = tpu.matmul %94, %96, %cst_74 {dimension_numbers = #tpu.dot_dimension_numbers<[1], [0], [0], [1], [0, 0, 1, 1], [], []>} : vector<256x16xf32>, vector<16x32xf32>, vector<256x32xf32> -> vector<256x32xf32>
    %98 = arith.addf %92, %97 : vector<256x32xf32>
    %99 = vector.extract_strided_slice %69 {offsets = [1, 2, 0], sizes = [16, 16, 16], strides = [1, 1, 1]} : vector<18x18x16xf32> to vector<16x16x16xf32>
    %100 = vector.shape_cast %99 : vector<16x16x16xf32> to vector<256x16xf32>
    %c5_75 = arith.constant 5 : index
    %c0_76 = arith.constant 0 : index
    %c0_77 = arith.constant 0 : index
    %101 = vector.load %arg4[%c5_75, %c0_76, %c0_77] : memref<9x16x32xf32, #tpu.memory_space<vmem>>, vector<1x16x32xf32>
    %102 = vector.shape_cast %101 : vector<1x16x32xf32> to vector<16x32xf32>
    %cst_78 = arith.constant dense<0.000000e+00> : vector<256x32xf32>
    %103 = tpu.matmul %100, %102, %cst_78 {dimension_numbers = #tpu.dot_dimension_numbers<[1], [0], [0], [1], [0, 0, 1, 1], [], []>} : vector<256x16xf32>, vector<16x32xf32>, vector<256x32xf32> -> vector<256x32xf32>
    %104 = arith.addf %98, %103 : vector<256x32xf32>
    %105 = vector.extract_strided_slice %69 {offsets = [2, 0, 0], sizes = [16, 16, 16], strides = [1, 1, 1]} : vector<18x18x16xf32> to vector<16x16x16xf32>
    %106 = vector.shape_cast %105 : vector<16x16x16xf32> to vector<256x16xf32>
    %c6_79 = arith.constant 6 : index
    %c0_80 = arith.constant 0 : index
    %c0_81 = arith.constant 0 : index
    %107 = vector.load %arg4[%c6_79, %c0_80, %c0_81] : memref<9x16x32xf32, #tpu.memory_space<vmem>>, vector<1x16x32xf32>
    %108 = vector.shape_cast %107 : vector<1x16x32xf32> to vector<16x32xf32>
    %cst_82 = arith.constant dense<0.000000e+00> : vector<256x32xf32>
    %109 = tpu.matmul %106, %108, %cst_82 {dimension_numbers = #tpu.dot_dimension_numbers<[1], [0], [0], [1], [0, 0, 1, 1], [], []>} : vector<256x16xf32>, vector<16x32xf32>, vector<256x32xf32> -> vector<256x32xf32>
    %110 = arith.addf %104, %109 : vector<256x32xf32>
    %111 = vector.extract_strided_slice %69 {offsets = [2, 1, 0], sizes = [16, 16, 16], strides = [1, 1, 1]} : vector<18x18x16xf32> to vector<16x16x16xf32>
    %112 = vector.shape_cast %111 : vector<16x16x16xf32> to vector<256x16xf32>
    %c7_83 = arith.constant 7 : index
    %c0_84 = arith.constant 0 : index
    %c0_85 = arith.constant 0 : index
    %113 = vector.load %arg4[%c7_83, %c0_84, %c0_85] : memref<9x16x32xf32, #tpu.memory_space<vmem>>, vector<1x16x32xf32>
    %114 = vector.shape_cast %113 : vector<1x16x32xf32> to vector<16x32xf32>
    %cst_86 = arith.constant dense<0.000000e+00> : vector<256x32xf32>
    %115 = tpu.matmul %112, %114, %cst_86 {dimension_numbers = #tpu.dot_dimension_numbers<[1], [0], [0], [1], [0, 0, 1, 1], [], []>} : vector<256x16xf32>, vector<16x32xf32>, vector<256x32xf32> -> vector<256x32xf32>
    %116 = arith.addf %110, %115 : vector<256x32xf32>
    %117 = vector.extract_strided_slice %69 {offsets = [2, 2, 0], sizes = [16, 16, 16], strides = [1, 1, 1]} : vector<18x18x16xf32> to vector<16x16x16xf32>
    %118 = vector.shape_cast %117 : vector<16x16x16xf32> to vector<256x16xf32>
    %c8_87 = arith.constant 8 : index
    %c0_88 = arith.constant 0 : index
    %c0_89 = arith.constant 0 : index
    %119 = vector.load %arg4[%c8_87, %c0_88, %c0_89] : memref<9x16x32xf32, #tpu.memory_space<vmem>>, vector<1x16x32xf32>
    %120 = vector.shape_cast %119 : vector<1x16x32xf32> to vector<16x32xf32>
    %cst_90 = arith.constant dense<0.000000e+00> : vector<256x32xf32>
    %121 = tpu.matmul %118, %120, %cst_90 {dimension_numbers = #tpu.dot_dimension_numbers<[1], [0], [0], [1], [0, 0, 1, 1], [], []>} : vector<256x16xf32>, vector<16x32xf32>, vector<256x32xf32> -> vector<256x32xf32>
    %122 = arith.addf %116, %121 : vector<256x32xf32>
    %123 = vector.broadcast %68 : vector<1x32xf32> to vector<256x32xf32>
    %124 = arith.addf %122, %123 : vector<256x32xf32>
    %cst_91 = arith.constant 0.000000e+00 : f32
    %125 = vector.broadcast %cst_91 : f32 to vector<256x32xf32>
    %126 = arith.maximumf %124, %125 : vector<256x32xf32>
    %127 = vector.shape_cast %126 : vector<256x32xf32> to vector<16x16x32xf32>
    %128 = vector.shape_cast %127 : vector<16x16x32xf32> to vector<8x2x16x32xf32>
    %129 = vector.extract_strided_slice %128 {offsets = [0, 0, 0, 0], sizes = [8, 1, 16, 32], strides = [1, 1, 1, 1]} : vector<8x2x16x32xf32> to vector<8x1x16x32xf32>
    %130 = vector.shape_cast %129 : vector<8x1x16x32xf32> to vector<8x16x32xf32>
    %131 = vector.shape_cast %130 : vector<8x16x32xf32> to vector<8x8x2x32xf32>
    %132 = vector.extract_strided_slice %131 {offsets = [0, 0, 0, 0], sizes = [8, 8, 1, 32], strides = [1, 1, 1, 1]} : vector<8x8x2x32xf32> to vector<8x8x1x32xf32>
    %133 = vector.shape_cast %132 : vector<8x8x1x32xf32> to vector<8x8x32xf32>
    %cst_92 = arith.constant 0.000000e+00 : f32
    %134 = vector.broadcast %cst_92 : f32 to vector<10x10x32xf32>
    %c0_93 = arith.constant 0 : index
    %c0_94 = arith.constant 0 : index
    %c0_95 = arith.constant 0 : index
    %135 = vector.load %arg14[%c0_93, %c0_94, %c0_95] : memref<10x10x32xf32, #tpu.memory_space<vmem>>, vector<10x10x32xf32>
    tpu.vector_store %arg14[%c0_93, %c0_94, %c0_95], %134 {strides = array<i32>} : memref<10x10x32xf32, #tpu.memory_space<vmem>>, vector<10x10x32xf32>,
    %c1_96 = arith.constant 1 : index
    %c1_97 = arith.constant 1 : index
    %c0_98 = arith.constant 0 : index
    %136 = vector.load %arg14[%c1_96, %c1_97, %c0_98] : memref<10x10x32xf32, #tpu.memory_space<vmem>>, vector<8x8x32xf32>
    tpu.vector_store %arg14[%c1_96, %c1_97, %c0_98], %133 {strides = array<i32>} : memref<10x10x32xf32, #tpu.memory_space<vmem>>, vector<8x8x32xf32>,
    %c0_99 = arith.constant 0 : index
    %c0_100 = arith.constant 0 : index
    %137 = vector.load %arg7[%c0_99, %c0_100] : memref<1x68xf32, #tpu.memory_space<vmem>>, vector<1x68xf32>
    %c0_101 = arith.constant 0 : index
    %c0_102 = arith.constant 0 : index
    %c0_103 = arith.constant 0 : index
    %138 = vector.load %arg14[%c0_101, %c0_102, %c0_103] : memref<10x10x32xf32, #tpu.memory_space<vmem>>, vector<10x10x32xf32>
    %139 = vector.extract_strided_slice %138 {offsets = [0, 0, 0], sizes = [8, 8, 32], strides = [1, 1, 1]} : vector<10x10x32xf32> to vector<8x8x32xf32>
    %140 = vector.shape_cast %139 : vector<8x8x32xf32> to vector<64x32xf32>
    %c0_104 = arith.constant 0 : index
    %c0_105 = arith.constant 0 : index
    %c0_106 = arith.constant 0 : index
    %141 = vector.load %arg6[%c0_104, %c0_105, %c0_106] : memref<9x32x68xf32, #tpu.memory_space<vmem>>, vector<1x32x68xf32>
    %142 = vector.shape_cast %141 : vector<1x32x68xf32> to vector<32x68xf32>
    %cst_107 = arith.constant dense<0.000000e+00> : vector<64x68xf32>
    %143 = tpu.matmul %140, %142, %cst_107 {dimension_numbers = #tpu.dot_dimension_numbers<[1], [0], [0], [1], [0, 0, 1, 1], [], []>} : vector<64x32xf32>, vector<32x68xf32>, vector<64x68xf32> -> vector<64x68xf32>
    %144 = vector.extract_strided_slice %138 {offsets = [0, 1, 0], sizes = [8, 8, 32], strides = [1, 1, 1]} : vector<10x10x32xf32> to vector<8x8x32xf32>
    %145 = vector.shape_cast %144 : vector<8x8x32xf32> to vector<64x32xf32>
    %c1_108 = arith.constant 1 : index
    %c0_109 = arith.constant 0 : index
    %c0_110 = arith.constant 0 : index
    %146 = vector.load %arg6[%c1_108, %c0_109, %c0_110] : memref<9x32x68xf32, #tpu.memory_space<vmem>>, vector<1x32x68xf32>
    %147 = vector.shape_cast %146 : vector<1x32x68xf32> to vector<32x68xf32>
    %cst_111 = arith.constant dense<0.000000e+00> : vector<64x68xf32>
    %148 = tpu.matmul %145, %147, %cst_111 {dimension_numbers = #tpu.dot_dimension_numbers<[1], [0], [0], [1], [0, 0, 1, 1], [], []>} : vector<64x32xf32>, vector<32x68xf32>, vector<64x68xf32> -> vector<64x68xf32>
    %149 = arith.addf %143, %148 : vector<64x68xf32>
    %150 = vector.extract_strided_slice %138 {offsets = [0, 2, 0], sizes = [8, 8, 32], strides = [1, 1, 1]} : vector<10x10x32xf32> to vector<8x8x32xf32>
    %151 = vector.shape_cast %150 : vector<8x8x32xf32> to vector<64x32xf32>
    %c2_112 = arith.constant 2 : index
    %c0_113 = arith.constant 0 : index
    %c0_114 = arith.constant 0 : index
    %152 = vector.load %arg6[%c2_112, %c0_113, %c0_114] : memref<9x32x68xf32, #tpu.memory_space<vmem>>, vector<1x32x68xf32>
    %153 = vector.shape_cast %152 : vector<1x32x68xf32> to vector<32x68xf32>
    %cst_115 = arith.constant dense<0.000000e+00> : vector<64x68xf32>
    %154 = tpu.matmul %151, %153, %cst_115 {dimension_numbers = #tpu.dot_dimension_numbers<[1], [0], [0], [1], [0, 0, 1, 1], [], []>} : vector<64x32xf32>, vector<32x68xf32>, vector<64x68xf32> -> vector<64x68xf32>
    %155 = arith.addf %149, %154 : vector<64x68xf32>
    %156 = vector.extract_strided_slice %138 {offsets = [1, 0, 0], sizes = [8, 8, 32], strides = [1, 1, 1]} : vector<10x10x32xf32> to vector<8x8x32xf32>
    %157 = vector.shape_cast %156 : vector<8x8x32xf32> to vector<64x32xf32>
    %c3_116 = arith.constant 3 : index
    %c0_117 = arith.constant 0 : index
    %c0_118 = arith.constant 0 : index
    %158 = vector.load %arg6[%c3_116, %c0_117, %c0_118] : memref<9x32x68xf32, #tpu.memory_space<vmem>>, vector<1x32x68xf32>
    %159 = vector.shape_cast %158 : vector<1x32x68xf32> to vector<32x68xf32>
    %cst_119 = arith.constant dense<0.000000e+00> : vector<64x68xf32>
    %160 = tpu.matmul %157, %159, %cst_119 {dimension_numbers = #tpu.dot_dimension_numbers<[1], [0], [0], [1], [0, 0, 1, 1], [], []>} : vector<64x32xf32>, vector<32x68xf32>, vector<64x68xf32> -> vector<64x68xf32>
    %161 = arith.addf %155, %160 : vector<64x68xf32>
    %162 = vector.extract_strided_slice %138 {offsets = [1, 1, 0], sizes = [8, 8, 32], strides = [1, 1, 1]} : vector<10x10x32xf32> to vector<8x8x32xf32>
    %163 = vector.shape_cast %162 : vector<8x8x32xf32> to vector<64x32xf32>
    %c4_120 = arith.constant 4 : index
    %c0_121 = arith.constant 0 : index
    %c0_122 = arith.constant 0 : index
    %164 = vector.load %arg6[%c4_120, %c0_121, %c0_122] : memref<9x32x68xf32, #tpu.memory_space<vmem>>, vector<1x32x68xf32>
    %165 = vector.shape_cast %164 : vector<1x32x68xf32> to vector<32x68xf32>
    %cst_123 = arith.constant dense<0.000000e+00> : vector<64x68xf32>
    %166 = tpu.matmul %163, %165, %cst_123 {dimension_numbers = #tpu.dot_dimension_numbers<[1], [0], [0], [1], [0, 0, 1, 1], [], []>} : vector<64x32xf32>, vector<32x68xf32>, vector<64x68xf32> -> vector<64x68xf32>
    %167 = arith.addf %161, %166 : vector<64x68xf32>
    %168 = vector.extract_strided_slice %138 {offsets = [1, 2, 0], sizes = [8, 8, 32], strides = [1, 1, 1]} : vector<10x10x32xf32> to vector<8x8x32xf32>
    %169 = vector.shape_cast %168 : vector<8x8x32xf32> to vector<64x32xf32>
    %c5_124 = arith.constant 5 : index
    %c0_125 = arith.constant 0 : index
    %c0_126 = arith.constant 0 : index
    %170 = vector.load %arg6[%c5_124, %c0_125, %c0_126] : memref<9x32x68xf32, #tpu.memory_space<vmem>>, vector<1x32x68xf32>
    %171 = vector.shape_cast %170 : vector<1x32x68xf32> to vector<32x68xf32>
    %cst_127 = arith.constant dense<0.000000e+00> : vector<64x68xf32>
    %172 = tpu.matmul %169, %171, %cst_127 {dimension_numbers = #tpu.dot_dimension_numbers<[1], [0], [0], [1], [0, 0, 1, 1], [], []>} : vector<64x32xf32>, vector<32x68xf32>, vector<64x68xf32> -> vector<64x68xf32>
    %173 = arith.addf %167, %172 : vector<64x68xf32>
    %174 = vector.extract_strided_slice %138 {offsets = [2, 0, 0], sizes = [8, 8, 32], strides = [1, 1, 1]} : vector<10x10x32xf32> to vector<8x8x32xf32>
    %175 = vector.shape_cast %174 : vector<8x8x32xf32> to vector<64x32xf32>
    %c6_128 = arith.constant 6 : index
    %c0_129 = arith.constant 0 : index
    %c0_130 = arith.constant 0 : index
    %176 = vector.load %arg6[%c6_128, %c0_129, %c0_130] : memref<9x32x68xf32, #tpu.memory_space<vmem>>, vector<1x32x68xf32>
    %177 = vector.shape_cast %176 : vector<1x32x68xf32> to vector<32x68xf32>
    %cst_131 = arith.constant dense<0.000000e+00> : vector<64x68xf32>
    %178 = tpu.matmul %175, %177, %cst_131 {dimension_numbers = #tpu.dot_dimension_numbers<[1], [0], [0], [1], [0, 0, 1, 1], [], []>} : vector<64x32xf32>, vector<32x68xf32>, vector<64x68xf32> -> vector<64x68xf32>
    %179 = arith.addf %173, %178 : vector<64x68xf32>
    %180 = vector.extract_strided_slice %138 {offsets = [2, 1, 0], sizes = [8, 8, 32], strides = [1, 1, 1]} : vector<10x10x32xf32> to vector<8x8x32xf32>
    %181 = vector.shape_cast %180 : vector<8x8x32xf32> to vector<64x32xf32>
    %c7_132 = arith.constant 7 : index
    %c0_133 = arith.constant 0 : index
    %c0_134 = arith.constant 0 : index
    %182 = vector.load %arg6[%c7_132, %c0_133, %c0_134] : memref<9x32x68xf32, #tpu.memory_space<vmem>>, vector<1x32x68xf32>
    %183 = vector.shape_cast %182 : vector<1x32x68xf32> to vector<32x68xf32>
    %cst_135 = arith.constant dense<0.000000e+00> : vector<64x68xf32>
    %184 = tpu.matmul %181, %183, %cst_135 {dimension_numbers = #tpu.dot_dimension_numbers<[1], [0], [0], [1], [0, 0, 1, 1], [], []>} : vector<64x32xf32>, vector<32x68xf32>, vector<64x68xf32> -> vector<64x68xf32>
    %185 = arith.addf %179, %184 : vector<64x68xf32>
    %186 = vector.extract_strided_slice %138 {offsets = [2, 2, 0], sizes = [8, 8, 32], strides = [1, 1, 1]} : vector<10x10x32xf32> to vector<8x8x32xf32>
    %187 = vector.shape_cast %186 : vector<8x8x32xf32> to vector<64x32xf32>
    %c8_136 = arith.constant 8 : index
    %c0_137 = arith.constant 0 : index
    %c0_138 = arith.constant 0 : index
    %188 = vector.load %arg6[%c8_136, %c0_137, %c0_138] : memref<9x32x68xf32, #tpu.memory_space<vmem>>, vector<1x32x68xf32>
    %189 = vector.shape_cast %188 : vector<1x32x68xf32> to vector<32x68xf32>
    %cst_139 = arith.constant dense<0.000000e+00> : vector<64x68xf32>
    %190 = tpu.matmul %187, %189, %cst_139 {dimension_numbers = #tpu.dot_dimension_numbers<[1], [0], [0], [1], [0, 0, 1, 1], [], []>} : vector<64x32xf32>, vector<32x68xf32>, vector<64x68xf32> -> vector<64x68xf32>
    %191 = arith.addf %185, %190 : vector<64x68xf32>
    %192 = vector.broadcast %137 : vector<1x68xf32> to vector<64x68xf32>
    %193 = arith.addf %191, %192 : vector<64x68xf32>
    %194 = vector.extract_strided_slice %193 {offsets = [0, 0], sizes = [64, 32], strides = [1, 1]} : vector<64x68xf32> to vector<64x32xf32>
    %cst_140 = arith.constant 0.000000e+00 : f32
    %195 = vector.broadcast %cst_140 : f32 to vector<64x32xf32>
    %196 = arith.maximumf %194, %195 : vector<64x32xf32>
    %197 = vector.extract_strided_slice %193 {offsets = [0, 32], sizes = [64, 36], strides = [1, 1]} : vector<64x68xf32> to vector<64x36xf32>
    %198 = vector.shape_cast %196 : vector<64x32xf32> to vector<8x8x32xf32>
    %199 = vector.shape_cast %198 : vector<8x8x32xf32> to vector<4x2x8x32xf32>
    %200 = vector.extract_strided_slice %199 {offsets = [0, 0, 0, 0], sizes = [4, 1, 8, 32], strides = [1, 1, 1, 1]} : vector<4x2x8x32xf32> to vector<4x1x8x32xf32>
    %201 = vector.shape_cast %200 : vector<4x1x8x32xf32> to vector<4x8x32xf32>
    %202 = vector.shape_cast %201 : vector<4x8x32xf32> to vector<4x4x2x32xf32>
    %203 = vector.extract_strided_slice %202 {offsets = [0, 0, 0, 0], sizes = [4, 4, 1, 32], strides = [1, 1, 1, 1]} : vector<4x4x2x32xf32> to vector<4x4x1x32xf32>
    %204 = vector.shape_cast %203 : vector<4x4x1x32xf32> to vector<4x4x32xf32>
    %cst_141 = arith.constant 0.000000e+00 : f32
    %205 = vector.broadcast %cst_141 : f32 to vector<6x6x32xf32>
    %c0_142 = arith.constant 0 : index
    %c0_143 = arith.constant 0 : index
    %c0_144 = arith.constant 0 : index
    %206 = vector.load %arg15[%c0_142, %c0_143, %c0_144] : memref<6x6x32xf32, #tpu.memory_space<vmem>>, vector<6x6x32xf32>
    tpu.vector_store %arg15[%c0_142, %c0_143, %c0_144], %205 {strides = array<i32>} : memref<6x6x32xf32, #tpu.memory_space<vmem>>, vector<6x6x32xf32>,
    %c1_145 = arith.constant 1 : index
    %c1_146 = arith.constant 1 : index
    %c0_147 = arith.constant 0 : index
    %207 = vector.load %arg15[%c1_145, %c1_146, %c0_147] : memref<6x6x32xf32, #tpu.memory_space<vmem>>, vector<4x4x32xf32>
    tpu.vector_store %arg15[%c1_145, %c1_146, %c0_147], %204 {strides = array<i32>} : memref<6x6x32xf32, #tpu.memory_space<vmem>>, vector<4x4x32xf32>,
    %c0_148 = arith.constant 0 : index
    %c0_149 = arith.constant 0 : index
    %208 = vector.load %arg9[%c0_148, %c0_149] : memref<1x54xf32, #tpu.memory_space<vmem>>, vector<1x54xf32>
    %c0_150 = arith.constant 0 : index
    %c0_151 = arith.constant 0 : index
    %c0_152 = arith.constant 0 : index
    %209 = vector.load %arg15[%c0_150, %c0_151, %c0_152] : memref<6x6x32xf32, #tpu.memory_space<vmem>>, vector<6x6x32xf32>
    %210 = vector.extract_strided_slice %209 {offsets = [0, 0, 0], sizes = [4, 4, 32], strides = [1, 1, 1]} : vector<6x6x32xf32> to vector<4x4x32xf32>
    %211 = vector.shape_cast %210 : vector<4x4x32xf32> to vector<16x32xf32>
    %c0_153 = arith.constant 0 : index
    %c0_154 = arith.constant 0 : index
    %c0_155 = arith.constant 0 : index
    %212 = vector.load %arg8[%c0_153, %c0_154, %c0_155] : memref<9x32x54xf32, #tpu.memory_space<vmem>>, vector<1x32x54xf32>
    %213 = vector.shape_cast %212 : vector<1x32x54xf32> to vector<32x54xf32>
    %cst_156 = arith.constant dense<0.000000e+00> : vector<16x54xf32>
    %214 = tpu.matmul %211, %213, %cst_156 {dimension_numbers = #tpu.dot_dimension_numbers<[1], [0], [0], [1], [0, 0, 1, 1], [], []>} : vector<16x32xf32>, vector<32x54xf32>, vector<16x54xf32> -> vector<16x54xf32>
    %215 = vector.extract_strided_slice %209 {offsets = [0, 1, 0], sizes = [4, 4, 32], strides = [1, 1, 1]} : vector<6x6x32xf32> to vector<4x4x32xf32>
    %216 = vector.shape_cast %215 : vector<4x4x32xf32> to vector<16x32xf32>
    %c1_157 = arith.constant 1 : index
    %c0_158 = arith.constant 0 : index
    %c0_159 = arith.constant 0 : index
    %217 = vector.load %arg8[%c1_157, %c0_158, %c0_159] : memref<9x32x54xf32, #tpu.memory_space<vmem>>, vector<1x32x54xf32>
    %218 = vector.shape_cast %217 : vector<1x32x54xf32> to vector<32x54xf32>
    %cst_160 = arith.constant dense<0.000000e+00> : vector<16x54xf32>
    %219 = tpu.matmul %216, %218, %cst_160 {dimension_numbers = #tpu.dot_dimension_numbers<[1], [0], [0], [1], [0, 0, 1, 1], [], []>} : vector<16x32xf32>, vector<32x54xf32>, vector<16x54xf32> -> vector<16x54xf32>
    %220 = arith.addf %214, %219 : vector<16x54xf32>
    %221 = vector.extract_strided_slice %209 {offsets = [0, 2, 0], sizes = [4, 4, 32], strides = [1, 1, 1]} : vector<6x6x32xf32> to vector<4x4x32xf32>
    %222 = vector.shape_cast %221 : vector<4x4x32xf32> to vector<16x32xf32>
    %c2_161 = arith.constant 2 : index
    %c0_162 = arith.constant 0 : index
    %c0_163 = arith.constant 0 : index
    %223 = vector.load %arg8[%c2_161, %c0_162, %c0_163] : memref<9x32x54xf32, #tpu.memory_space<vmem>>, vector<1x32x54xf32>
    %224 = vector.shape_cast %223 : vector<1x32x54xf32> to vector<32x54xf32>
    %cst_164 = arith.constant dense<0.000000e+00> : vector<16x54xf32>
    %225 = tpu.matmul %222, %224, %cst_164 {dimension_numbers = #tpu.dot_dimension_numbers<[1], [0], [0], [1], [0, 0, 1, 1], [], []>} : vector<16x32xf32>, vector<32x54xf32>, vector<16x54xf32> -> vector<16x54xf32>
    %226 = arith.addf %220, %225 : vector<16x54xf32>
    %227 = vector.extract_strided_slice %209 {offsets = [1, 0, 0], sizes = [4, 4, 32], strides = [1, 1, 1]} : vector<6x6x32xf32> to vector<4x4x32xf32>
    %228 = vector.shape_cast %227 : vector<4x4x32xf32> to vector<16x32xf32>
    %c3_165 = arith.constant 3 : index
    %c0_166 = arith.constant 0 : index
    %c0_167 = arith.constant 0 : index
    %229 = vector.load %arg8[%c3_165, %c0_166, %c0_167] : memref<9x32x54xf32, #tpu.memory_space<vmem>>, vector<1x32x54xf32>
    %230 = vector.shape_cast %229 : vector<1x32x54xf32> to vector<32x54xf32>
    %cst_168 = arith.constant dense<0.000000e+00> : vector<16x54xf32>
    %231 = tpu.matmul %228, %230, %cst_168 {dimension_numbers = #tpu.dot_dimension_numbers<[1], [0], [0], [1], [0, 0, 1, 1], [], []>} : vector<16x32xf32>, vector<32x54xf32>, vector<16x54xf32> -> vector<16x54xf32>
    %232 = arith.addf %226, %231 : vector<16x54xf32>
    %233 = vector.extract_strided_slice %209 {offsets = [1, 1, 0], sizes = [4, 4, 32], strides = [1, 1, 1]} : vector<6x6x32xf32> to vector<4x4x32xf32>
    %234 = vector.shape_cast %233 : vector<4x4x32xf32> to vector<16x32xf32>
    %c4_169 = arith.constant 4 : index
    %c0_170 = arith.constant 0 : index
    %c0_171 = arith.constant 0 : index
    %235 = vector.load %arg8[%c4_169, %c0_170, %c0_171] : memref<9x32x54xf32, #tpu.memory_space<vmem>>, vector<1x32x54xf32>
    %236 = vector.shape_cast %235 : vector<1x32x54xf32> to vector<32x54xf32>
    %cst_172 = arith.constant dense<0.000000e+00> : vector<16x54xf32>
    %237 = tpu.matmul %234, %236, %cst_172 {dimension_numbers = #tpu.dot_dimension_numbers<[1], [0], [0], [1], [0, 0, 1, 1], [], []>} : vector<16x32xf32>, vector<32x54xf32>, vector<16x54xf32> -> vector<16x54xf32>
    %238 = arith.addf %232, %237 : vector<16x54xf32>
    %239 = vector.extract_strided_slice %209 {offsets = [1, 2, 0], sizes = [4, 4, 32], strides = [1, 1, 1]} : vector<6x6x32xf32> to vector<4x4x32xf32>
    %240 = vector.shape_cast %239 : vector<4x4x32xf32> to vector<16x32xf32>
    %c5_173 = arith.constant 5 : index
    %c0_174 = arith.constant 0 : index
    %c0_175 = arith.constant 0 : index
    %241 = vector.load %arg8[%c5_173, %c0_174, %c0_175] : memref<9x32x54xf32, #tpu.memory_space<vmem>>, vector<1x32x54xf32>
    %242 = vector.shape_cast %241 : vector<1x32x54xf32> to vector<32x54xf32>
    %cst_176 = arith.constant dense<0.000000e+00> : vector<16x54xf32>
    %243 = tpu.matmul %240, %242, %cst_176 {dimension_numbers = #tpu.dot_dimension_numbers<[1], [0], [0], [1], [0, 0, 1, 1], [], []>} : vector<16x32xf32>, vector<32x54xf32>, vector<16x54xf32> -> vector<16x54xf32>
    %244 = arith.addf %238, %243 : vector<16x54xf32>
    %245 = vector.extract_strided_slice %209 {offsets = [2, 0, 0], sizes = [4, 4, 32], strides = [1, 1, 1]} : vector<6x6x32xf32> to vector<4x4x32xf32>
    %246 = vector.shape_cast %245 : vector<4x4x32xf32> to vector<16x32xf32>
    %c6_177 = arith.constant 6 : index
    %c0_178 = arith.constant 0 : index
    %c0_179 = arith.constant 0 : index
    %247 = vector.load %arg8[%c6_177, %c0_178, %c0_179] : memref<9x32x54xf32, #tpu.memory_space<vmem>>, vector<1x32x54xf32>
    %248 = vector.shape_cast %247 : vector<1x32x54xf32> to vector<32x54xf32>
    %cst_180 = arith.constant dense<0.000000e+00> : vector<16x54xf32>
    %249 = tpu.matmul %246, %248, %cst_180 {dimension_numbers = #tpu.dot_dimension_numbers<[1], [0], [0], [1], [0, 0, 1, 1], [], []>} : vector<16x32xf32>, vector<32x54xf32>, vector<16x54xf32> -> vector<16x54xf32>
    %250 = arith.addf %244, %249 : vector<16x54xf32>
    %251 = vector.extract_strided_slice %209 {offsets = [2, 1, 0], sizes = [4, 4, 32], strides = [1, 1, 1]} : vector<6x6x32xf32> to vector<4x4x32xf32>
    %252 = vector.shape_cast %251 : vector<4x4x32xf32> to vector<16x32xf32>
    %c7_181 = arith.constant 7 : index
    %c0_182 = arith.constant 0 : index
    %c0_183 = arith.constant 0 : index
    %253 = vector.load %arg8[%c7_181, %c0_182, %c0_183] : memref<9x32x54xf32, #tpu.memory_space<vmem>>, vector<1x32x54xf32>
    %254 = vector.shape_cast %253 : vector<1x32x54xf32> to vector<32x54xf32>
    %cst_184 = arith.constant dense<0.000000e+00> : vector<16x54xf32>
    %255 = tpu.matmul %252, %254, %cst_184 {dimension_numbers = #tpu.dot_dimension_numbers<[1], [0], [0], [1], [0, 0, 1, 1], [], []>} : vector<16x32xf32>, vector<32x54xf32>, vector<16x54xf32> -> vector<16x54xf32>
    %256 = arith.addf %250, %255 : vector<16x54xf32>
    %257 = vector.extract_strided_slice %209 {offsets = [2, 2, 0], sizes = [4, 4, 32], strides = [1, 1, 1]} : vector<6x6x32xf32> to vector<4x4x32xf32>
    %258 = vector.shape_cast %257 : vector<4x4x32xf32> to vector<16x32xf32>
    %c8_185 = arith.constant 8 : index
    %c0_186 = arith.constant 0 : index
    %c0_187 = arith.constant 0 : index
    %259 = vector.load %arg8[%c8_185, %c0_186, %c0_187] : memref<9x32x54xf32, #tpu.memory_space<vmem>>, vector<1x32x54xf32>
    %260 = vector.shape_cast %259 : vector<1x32x54xf32> to vector<32x54xf32>
    %cst_188 = arith.constant dense<0.000000e+00> : vector<16x54xf32>
    %261 = tpu.matmul %258, %260, %cst_188 {dimension_numbers = #tpu.dot_dimension_numbers<[1], [0], [0], [1], [0, 0, 1, 1], [], []>} : vector<16x32xf32>, vector<32x54xf32>, vector<16x54xf32> -> vector<16x54xf32>
    %262 = arith.addf %256, %261 : vector<16x54xf32>
    %263 = vector.broadcast %208 : vector<1x54xf32> to vector<16x54xf32>
    %264 = arith.addf %262, %263 : vector<16x54xf32>
    %c0_189 = arith.constant 0 : index
    %c0_190 = arith.constant 0 : index
    %c0_191 = arith.constant 0 : index
    %265 = vector.load %arg10[%c0_189, %c0_190, %c0_191] : memref<1x64x36xf32, #tpu.memory_space<vmem>>, vector<1x64x36xf32>
    %266 = vector.shape_cast %265 : vector<1x64x36xf32> to vector<64x36xf32>
    %267 = vector.shape_cast %197 : vector<64x36xf32> to vector<1x64x36xf32>
    tpu.vector_store %arg10[%c0_189, %c0_190, %c0_191], %267 {strides = array<i32>} : memref<1x64x36xf32, #tpu.memory_space<vmem>>, vector<1x64x36xf32>,
    %c0_192 = arith.constant 0 : index
    %c0_193 = arith.constant 0 : index
    %c0_194 = arith.constant 0 : index
    %268 = vector.load %arg11[%c0_192, %c0_193, %c0_194] : memref<1x16x54xf32, #tpu.memory_space<vmem>>, vector<1x16x54xf32>
    %269 = vector.shape_cast %268 : vector<1x16x54xf32> to vector<16x54xf32>
    %270 = vector.shape_cast %264 : vector<16x54xf32> to vector<1x16x54xf32>
    tpu.vector_store %arg11[%c0_192, %c0_193, %c0_194], %270 {strides = array<i32>} : memref<1x16x54xf32, #tpu.memory_space<vmem>>, vector<1x16x54xf32>,
    return
  }
  func.func @transform_0(%arg0: i32) -> (i32, i32, i32, i32) {
    %c0_i32 = arith.constant 0 : i32
    %c0_i32_0 = arith.constant 0 : i32
    %c0_i32_1 = arith.constant 0 : i32
    %c0_i32_2 = arith.constant 0 : i32
    return %arg0, %c0_i32, %c0_i32_0, %c0_i32_1 : i32, i32, i32, i32
  }
  func.func @transform_1(%arg0: i32) -> (i32, i32, i32) {
    %c0_i32 = arith.constant 0 : i32
    %c0_i32_0 = arith.constant 0 : i32
    %c0_i32_1 = arith.constant 0 : i32
    %c0_i32_2 = arith.constant 0 : i32
    return %c0_i32, %c0_i32_0, %c0_i32_1 : i32, i32, i32
  }
  func.func @transform_2(%arg0: i32) -> (i32, i32) {
    %c0_i32 = arith.constant 0 : i32
    %c0_i32_0 = arith.constant 0 : i32
    %c0_i32_1 = arith.constant 0 : i32
    return %c0_i32, %c0_i32_0 : i32, i32
  }
  func.func @transform_3(%arg0: i32) -> (i32, i32, i32) {
    %c0_i32 = arith.constant 0 : i32
    %c0_i32_0 = arith.constant 0 : i32
    %c0_i32_1 = arith.constant 0 : i32
    %c0_i32_2 = arith.constant 0 : i32
    return %c0_i32, %c0_i32_0, %c0_i32_1 : i32, i32, i32
  }
  func.func @transform_4(%arg0: i32) -> (i32, i32) {
    %c0_i32 = arith.constant 0 : i32
    %c0_i32_0 = arith.constant 0 : i32
    %c0_i32_1 = arith.constant 0 : i32
    return %c0_i32, %c0_i32_0 : i32, i32
  }
  func.func @transform_5(%arg0: i32) -> (i32, i32, i32) {
    %c0_i32 = arith.constant 0 : i32
    %c0_i32_0 = arith.constant 0 : i32
    %c0_i32_1 = arith.constant 0 : i32
    %c0_i32_2 = arith.constant 0 : i32
    return %c0_i32, %c0_i32_0, %c0_i32_1 : i32, i32, i32
  }
  func.func @transform_6(%arg0: i32) -> (i32, i32) {
    %c0_i32 = arith.constant 0 : i32
    %c0_i32_0 = arith.constant 0 : i32
    %c0_i32_1 = arith.constant 0 : i32
    return %c0_i32, %c0_i32_0 : i32, i32
  }
  func.func @transform_7(%arg0: i32) -> (i32, i32, i32) {
    %c0_i32 = arith.constant 0 : i32
    %c0_i32_0 = arith.constant 0 : i32
    %c0_i32_1 = arith.constant 0 : i32
    %c0_i32_2 = arith.constant 0 : i32
    return %c0_i32, %c0_i32_0, %c0_i32_1 : i32, i32, i32
  }
  func.func @transform_8(%arg0: i32) -> (i32, i32) {
    %c0_i32 = arith.constant 0 : i32
    %c0_i32_0 = arith.constant 0 : i32
    %c0_i32_1 = arith.constant 0 : i32
    return %c0_i32, %c0_i32_0 : i32, i32
  }
  func.func @transform_9(%arg0: i32) -> (i32, i32, i32) {
    %c0_i32 = arith.constant 0 : i32
    %c0_i32_0 = arith.constant 0 : i32
    %c0_i32_1 = arith.constant 0 : i32
    return %arg0, %c0_i32, %c0_i32_0 : i32, i32, i32
  }
  func.func @transform_10(%arg0: i32) -> (i32, i32, i32) {
    %c0_i32 = arith.constant 0 : i32
    %c0_i32_0 = arith.constant 0 : i32
    %c0_i32_1 = arith.constant 0 : i32
    return %arg0, %c0_i32, %c0_i32_0 : i32, i32, i32
  }
}

</mosaic_0001>

<bundles_post_ra>
// kernel: ssd_forward_pallas.1
= control target key start
LH: loop header
LB: loop body
LE: loop exit
PB: predicated region body
PF: predicated region fallthrough
CT: control target
= control target key end

     0   :  { %s11905_s13 = smov 0   ;;  %s16333_s0 = inlined_call_operand.vmem [shape: f32[2,16,16,4], index: 0, kind: input, shape index: {}]   ;;  %s16334_s1 = inlined_call_operand.vmem [shape: f32[9,4,16], index: 1, kind: input, shape index: {}]   ;;  %s16335_s2 = inlined_call_operand.vmem [shape: f32[1,16], index: 2, kind: input, shape index: {}]   ;;  %s16336_s3 = inlined_call_operand.vmem [shape: f32[9,16,32], index: 3, kind: input, shape index: {}]   ;;  %s16337_s4 = inlined_call_operand.vmem [shape: f32[1,32], index: 4, kind: input, shape index: {}]   ;;  %s16338_s5 = inlined_call_operand.vmem [shape: f32[9,32,68], index: 5, kind: input, shape index: {}]   ;;  %s16339_s6 = inlined_call_operand.vmem [shape: f32[1,68], index: 6, kind: input, shape index: {}]   ;;  %s16340_s7 = inlined_call_operand.vmem [shape: f32[9,32,54], index: 7, kind: input, shape index: {}]   ;;  %s16341_s8 = inlined_call_operand.vmem [shape: f32[1,54], index: 8, kind: input, shape index: {}]   ;;  %s16342_s9 = inlined_call_operand.vmem [shape: f32[2,64,36], index: 9, kind: output, shape index: {0}]   ;;  %s16343_s10 = inlined_call_operand.vmem [shape: f32[2,16,54], index: 10, kind: output, shape index: {1}]  }
   0x1 LB: > { %s9042_s14 = sadd.s32 4294967295, %s11845_s13   ;;  %p9046_p0 = scmp.ge.s32.totalorder %s11845_s13, 1  ;;  %s11845_s13 = sphi %s11905_s13, %s21_s13  }
   0x2   : > { %p315_p1 = scmp.lt.s32.totalorder %s11845_s13, 3 }
   0x4   : > { %p316_p2 = pnand %p9046_p0, %p315_p1 }
   0x6   : > { %319 = sbr.rel (%p316_p2) target bundleno = 1587 (0x633), region = 56 }
   0xb   : > { %v11916_v0 = vld [vmem:[%s16334_s1 + $0x4] sm:$0xf]  ;;  %vm745_vm0 = vcmask 1043456   ;;  %vm405_vm1 = vcmask 31744   ;;  %v16344_v1 = vmov 0.0   ;;  %vm408_vm2 = vcmask 25600  }
   0xc   : > { %10602 = vmatprep.subr.msk.mxu0 %vm745_vm0, %v11916_v0  ;;  %406 = vst.msk [vmem:[#allocation2] sm:$0xff] %vm405_vm1, %v16344_v1  ;;  %407 = vst.msk [vmem:[#allocation2 + $0x8] sm:$0xff] %vm405_vm1, %v16344_v1  ;;  %v11995_v2 = vld [vmem:[%s16334_s1 + $0x8] sm:$0xf]  ;;  %11799 = vmatprep.subr.msk.mxu1 %vm745_vm0, %v11916_v0  ;;  %p12001_p3 = scmp.lt.s32.totalorder %s9042_s14, 1  ;;  %vm598_vm3 = vcmask 1046528  }
   0xd   : > { %410 = vst.msk [vmem:[#allocation2 + $0x18] sm:$0xff] %vm405_vm1, %v16344_v1  ;;  %411 = vst.msk [vmem:[#allocation2 + $0x20] sm:$0xff] %vm405_vm1, %v16344_v1  ;;  %v12008_v3 = vld [vmem:[%s16334_s1] sm:$0xf]  ;;  %10603 = vmatpush3.msk.msra.mxu0 %vm745_vm0, %v11916_v0  ;;  %11800 = vmatpush3.msk.msra.mxu1 %vm745_vm0, %v11916_v0  ;;  %v12093_v19 = vld [vmem:[%s16334_s1 + $0x10] sm:$0xf] }
   0xe   : > { %413 = vst.msk [vmem:[#allocation2 + $0x30] sm:$0xff] %vm405_vm1, %v16344_v1  ;;  %414 = vst.msk [vmem:[#allocation2 + $0x38] sm:$0xff] %vm405_vm1, %v16344_v1  ;;  %10702 = vmatprep.subr.msk.mxu0 %vm745_vm0, %v11995_v2  ;;  %s16915_s14 = smov (!%p12001_p3, %s9042_s14), 1  ;;  %10652 = vmatprep.subr.msk.mxu1 %vm745_vm0, %v12008_v3  ;;  %v9154_v0 = vld [vmem:[%s16334_s1 + $0xc] sm:$0xf]  ;;  %vm1266_vm4 = vcmask 1045504  }
   0xf   : > { %416 = vst.msk [vmem:[#allocation2 + $0x48] sm:$0xff] %vm405_vm1, %v16344_v1  ;;  %417 = vst.msk [vmem:[#allocation2 + $0x50] sm:$0xff] %vm405_vm1, %v16344_v1  ;;  %s9834_s22 = sshll.u32 %s16915_s14, 8  ;;  %vm3365_vm5 = vcmask 130048   ;;  %vm3368_vm6 = vcmask 123904   ;;  %vm6304_vm7 = vcmask 261120  }
  0x10   : > { %419 = vst.msk [vmem:[#allocation2 + $0x60] sm:$0xff] %vm405_vm1, %v16344_v1  ;;  %420 = vst.msk [vmem:[#allocation2 + $0x68] sm:$0xff] %vm405_vm1, %v16344_v1  ;;  %s12064_s25 = scalar_lea.vmem %s16333_s0, %s9834_s22  ;;  %vm6306_vm8 = vcmask 254976   ;;  %vm6582_vm9 = vcmask 1041409   ;;  %vm6584_vm10 = vcmask 1042434   ;;  %vm6586_vm11 = vcmask 1043459  }
  0x11   : > { %422 = vst.msk [vmem:[#allocation2 + $0x78] sm:$0xff] %vm405_vm1, %v16344_v1  ;;  %423 = vst.msk [vmem:[#allocation2 + $0x80] sm:$0xff] %vm405_vm1, %v16344_v1  ;;  %v373_v4 = vld [vmem:[%s12064_s25] sm:$0xff]  ;;  %v374_v5 = vld [vmem:[%s12064_s25 + $0x8] sm:$0xff]  ;;  %vm6588_vm12 = vcmask 1044484   ;;  %vm6590_vm13 = vcmask 1045509  }
  0x12   : > { %425 = vst.msk [vmem:[#allocation2 + $0x90] sm:$0xff] %vm405_vm1, %v16344_v1  ;;  %426 = vst.msk [vmem:[#allocation2 + $0x98] sm:$0xff] %vm405_vm1, %v16344_v1  ;;  %v401_v6 = vld [vmem:[%s12064_s25 + $0xe0] sm:$0xff]  ;;  %v402_v9 = vld [vmem:[%s12064_s25 + $0xe8] sm:$0xff]  ;;  %vm6592_vm14 = vcmask 1046534   ;;  %vm6594_vm15 = vcmask 1047559  }
  0x13   : > { %428 = vst.msk [vmem:[#allocation2 + $0xa8] sm:$0xff] %vm405_vm1, %v16344_v1  ;;  %429 = vst.msk [vmem:[#allocation2 + $0xb0] sm:$0xff] %vm405_vm1, %v16344_v1  ;;  %v12069_v7 = vld [vmem:[#allocation2] sm:$0xff]  ;;  %v12071_v8 = vld [vmem:[#allocation2 + $0x8] sm:$0xff]  ;;  %s11849_s30 = smov 96   ;;  %s9835_s29 = sshll.u32 %s16915_s14, 6 }
  0x14   : > { %431 = vst.msk [vmem:[#allocation2 + $0xc0] sm:$0xff] %vm405_vm1, %v16344_v1  ;;  %432 = vst.msk [vmem:[#allocation2 + $0xc8] sm:$0xff] %vm405_vm1, %v16344_v1  ;;  %v599_v10 = vrot.slane %v12069_v7, 1  ;;  %v600_v11 = vrot.slane %v12071_v8, 1  ;;  %v375_v13 = vld [vmem:[%s12064_s25 + $0x10] sm:$0xff]  ;;  %v376_v14 = vld [vmem:[%s12064_s25 + $0x18] sm:$0xff]  ;;  %s367_s12 = scalar_lea.vmem %s16342_s9, %s9835_s29 }
  0x15   : > { %434 = vst.msk [vmem:[#allocation2 + $0xd8] sm:$0xff] %vm405_vm1, %v16344_v1  ;;  %435 = vst.msk [vmem:[#allocation2 + $0xe0] sm:$0xff] %vm405_vm1, %v16344_v1  ;;  %v377_v16 = vld [vmem:[%s12064_s25 + $0x20] sm:$0xff]  ;;  %v378_v17 = vld [vmem:[%s12064_s25 + $0x28] sm:$0xff]  ;;  %s9836_s15 = sshll.u32 %s16915_s14, 4 }
  0x16   : > { %437 = vst.msk [vmem:[#allocation2 + $0xf0] sm:$0xff] %vm405_vm1, %v16344_v1  ;;  %438 = vst.msk [vmem:[#allocation2 + $0xf8] sm:$0xff] %vm405_vm1, %v16344_v1  ;;  %v379_v18 = vld [vmem:[%s12064_s25 + $0x30] sm:$0xff]  ;;  %v601_v20 = vsel %vm598_vm3, %v599_v10, %v600_v11  ;;  %v380_v21 = vld [vmem:[%s12064_s25 + $0x38] sm:$0xff]  ;;  %s372_s20 = scalar_lea.vmem %s16343_s10, %s9836_s15 }
  0x17   : > { %440 = vst.msk [vmem:[#allocation2 + $0x108] sm:$0xff] %vm405_vm1, %v16344_v1  ;;  %441 = vst.msk [vmem:[#allocation2 + $0x110] sm:$0xff] %vm405_vm1, %v16344_v1  ;;  %v381_v22 = vld [vmem:[%s12064_s25 + $0x40] sm:$0xff]  ;;  %v382_v23 = vld [vmem:[%s12064_s25 + $0x48] sm:$0xff]  ;;  %10604 = vmatprep.mubr.msk.f32.mxu0 %vm405_vm1, %v601_v20 }
  0x18   : > { %443 = vst.msk [vmem:[#allocation2 + $0x120] sm:$0xff] %vm405_vm1, %v16344_v1  ;;  %444 = vst.msk [vmem:[#allocation2 + $0x128] sm:$0xff] %vm405_vm1, %v16344_v1  ;;  %v383_v25 = vld [vmem:[%s12064_s25 + $0x50] sm:$0xff]  ;;  %v384_v26 = vld [vmem:[%s12064_s25 + $0x58] sm:$0xff] }
  0x19   : > { %446 = vst.msk [vmem:[#allocation2 + $0x138] sm:$0xff] %vm405_vm1, %v16344_v1  ;;  %447 = vst.msk [vmem:[#allocation2 + $0x140] sm:$0xff] %vm405_vm1, %v16344_v1  ;;  %v385_v27 = vld [vmem:[%s12064_s25 + $0x60] sm:$0xff]  ;;  %v386_v28 = vld [vmem:[%s12064_s25 + $0x68] sm:$0xff] }
  0x1a   : > { %449 = vst.msk [vmem:[#allocation2 + $0x150] sm:$0xff] %vm405_vm1, %v16344_v1  ;;  %450 = vst.msk [vmem:[#allocation2 + $0x158] sm:$0xff] %vm405_vm1, %v16344_v1  ;;  %v387_v29 = vld [vmem:[%s12064_s25 + $0x70] sm:$0xff]  ;;  %v388_v30 = vld [vmem:[%s12064_s25 + $0x78] sm:$0xff] }
  0x1b   : > { %452 = vst.msk [vmem:[#allocation2 + $0x168] sm:$0xff] %vm405_vm1, %v16344_v1  ;;  %453 = vst.msk [vmem:[#allocation2 + $0x170] sm:$0xff] %vm405_vm1, %v16344_v1  ;;  %v389_v31 = vld [vmem:[%s12064_s25 + $0x80] sm:$0xff]  ;;  %v390_v32 = vld [vmem:[%s12064_s25 + $0x88] sm:$0xff] }
  0x1c   : > { %455 = vst.msk [vmem:[#allocation2 + $0x180] sm:$0xff] %vm405_vm1, %v16344_v1  ;;  %456 = vst.msk [vmem:[#allocation2 + $0x188] sm:$0xff] %vm405_vm1, %v16344_v1  ;;  %v391_v33 = vld [vmem:[%s12064_s25 + $0x90] sm:$0xff] }
  0x1d   : > { %458 = vst.msk [vmem:[#allocation2 + $0x198] sm:$0xff] %vm405_vm1, %v16344_v1  ;;  %459 = vst.msk [vmem:[#allocation2 + $0x1a0] sm:$0xff] %vm405_vm1, %v16344_v1 }
  0x1e   : > { %409 = vst.msk [vmem:[#allocation2 + $0x10] sm:$0x3] %vm408_vm2, %v16344_v1  ;;  %412 = vst.msk [vmem:[#allocation2 + $0x28] sm:$0x3] %vm408_vm2, %v16344_v1 }
  0x1f   : > { %415 = vst.msk [vmem:[#allocation2 + $0x40] sm:$0x3] %vm408_vm2, %v16344_v1  ;;  %418 = vst.msk [vmem:[#allocation2 + $0x58] sm:$0x3] %vm408_vm2, %v16344_v1 }
  0x20   : > { %421 = vst.msk [vmem:[#allocation2 + $0x70] sm:$0x3] %vm408_vm2, %v16344_v1  ;;  %424 = vst.msk [vmem:[#allocation2 + $0x88] sm:$0x3] %vm408_vm2, %v16344_v1 }
  0x21   : > { %427 = vst.msk [vmem:[#allocation2 + $0xa0] sm:$0x3] %vm408_vm2, %v16344_v1  ;;  %430 = vst.msk [vmem:[#allocation2 + $0xb8] sm:$0x3] %vm408_vm2, %v16344_v1 }
  0x22   : > { %433 = vst.msk [vmem:[#allocation2 + $0xd0] sm:$0x3] %vm408_vm2, %v16344_v1  ;;  %436 = vst.msk [vmem:[#allocation2 + $0xe8] sm:$0x3] %vm408_vm2, %v16344_v1 }
  0x23   : > { %439 = vst.msk [vmem:[#allocation2 + $0x100] sm:$0x3] %vm408_vm2, %v16344_v1  ;;  %442 = vst.msk [vmem:[#allocation2 + $0x118] sm:$0x3] %vm408_vm2, %v16344_v1 }
  0x24   : > { %445 = vst.msk [vmem:[#allocation2 + $0x130] sm:$0x3] %vm408_vm2, %v16344_v1  ;;  %448 = vst.msk [vmem:[#allocation2 + $0x148] sm:$0x3] %vm408_vm2, %v16344_v1 }
  0x25   : > { %451 = vst.msk [vmem:[#allocation2 + $0x160] sm:$0x3] %vm408_vm2, %v16344_v1  ;;  %454 = vst.msk [vmem:[#allocation2 + $0x178] sm:$0x3] %vm408_vm2, %v16344_v1  ;;  %v12079_v12 = vld [vmem:[#allocation2 + $0x10] sm:$0x3] }
  0x26   : > { %457 = vst.msk [vmem:[#allocation2 + $0x190] sm:$0x3] %vm408_vm2, %v16344_v1  ;;  %460 = vst.msk [vmem:[#allocation2 + $0x1a8] sm:$0x3] %vm408_vm2, %v16344_v1  ;;  %v602_v15 = vrot.slane %v12079_v12, 1  ;;  %vm8070_vm2 = vcmask 1042432  }
  0x27   : > { %462 = vst.msk [vmem:[#allocation2 + $0x19] sm:$0xff] %vm405_vm1, %v373_v4  ;;  %463 = vst.msk [vmem:[#allocation2 + $0x21] sm:$0xff] %vm405_vm1, %v374_v5 }
  0x28   : > { %490 = vst.msk [vmem:[#allocation2 + $0x169] sm:$0xff] %vm405_vm1, %v401_v6  ;;  %491 = vst.msk [vmem:[#allocation2 + $0x171] sm:$0xff] %vm405_vm1, %v402_v9  ;;  %v603_v24 = vsel %vm598_vm3, %v600_v11, %v602_v15 }
  0x29   : > { %464 = vst.msk [vmem:[#allocation2 + $0x31] sm:$0xff] %vm405_vm1, %v375_v13  ;;  %465 = vst.msk [vmem:[#allocation2 + $0x39] sm:$0xff] %vm405_vm1, %v376_v14  ;;  %10605 = vmatmul.mubr.msk.f32.vlgmr.msra.gmra.mxu0 %vm405_vm1, %v603_v24  ;;  %v394_v24 = vld [vmem:[%s12064_s25 + $0xa8] sm:$0xff] }
  0x2a   : > { %466 = vst.msk [vmem:[#allocation2 + $0x49] sm:$0xff] %vm405_vm1, %v377_v16  ;;  %467 = vst.msk [vmem:[#allocation2 + $0x51] sm:$0xff] %vm405_vm1, %v378_v17  ;;  %10703 = vmatpush3.msk.msra.mxu0 %vm745_vm0, %v11995_v2 }
  0x2b   : > { %468 = vst.msk [vmem:[#allocation2 + $0x61] sm:$0xff] %vm405_vm1, %v379_v18  ;;  %469 = vst.msk [vmem:[#allocation2 + $0x69] sm:$0xff] %vm405_vm1, %v380_v21  ;;  %10802 = vmatprep.subr.msk.mxu0 %vm745_vm0, %v12093_v19 }
  0x2c   : > { %470 = vst.msk [vmem:[#allocation2 + $0x79] sm:$0xff] %vm405_vm1, %v381_v22  ;;  %471 = vst.msk [vmem:[#allocation2 + $0x81] sm:$0xff] %vm405_vm1, %v382_v23  ;;  %v392_v22 = vld [vmem:[%s12064_s25 + $0x98] sm:$0xff]  ;;  %v393_v23 = vld [vmem:[%s12064_s25 + $0xa0] sm:$0xff] }
  0x2d   : > { %472 = vst.msk [vmem:[#allocation2 + $0x91] sm:$0xff] %vm405_vm1, %v383_v25  ;;  %473 = vst.msk [vmem:[#allocation2 + $0x99] sm:$0xff] %vm405_vm1, %v384_v26  ;;  %v395_v25 = vld [vmem:[%s12064_s25 + $0xb0] sm:$0xff] }
  0x2e   : > { %474 = vst.msk [vmem:[#allocation2 + $0xa9] sm:$0xff] %vm405_vm1, %v385_v27  ;;  %475 = vst.msk [vmem:[#allocation2 + $0xb1] sm:$0xff] %vm405_vm1, %v386_v28  ;;  %v12125_v34 = vld [vmem:[#allocation2 + $0x18] sm:$0xff]  ;;  %v12127_v35 = vld [vmem:[#allocation2 + $0x20] sm:$0xff] }
  0x2f   : > { %476 = vst.msk [vmem:[#allocation2 + $0xc1] sm:$0xff] %vm405_vm1, %v387_v29  ;;  %477 = vst.msk [vmem:[#allocation2 + $0xc9] sm:$0xff] %vm405_vm1, %v388_v30  ;;  %v12129_v36 = vld [vmem:[#allocation2 + $0x168] sm:$0xff]  ;;  %v604_v37 = vrot.slane %v12125_v34, 1  ;;  %v605_v38 = vrot.slane %v12127_v35, 1  ;;  %v12138_v39 = vld [vmem:[#allocation2 + $0x170] sm:$0xff] }
  0x30   : > { %478 = vst.msk [vmem:[#allocation2 + $0xd9] sm:$0xff] %vm405_vm1, %v389_v31  ;;  %479 = vst.msk [vmem:[#allocation2 + $0xe1] sm:$0xff] %vm405_vm1, %v390_v32  ;;  %v674_v40 = vrot.slane %v12129_v36, 1  ;;  %v12141_v41 = vld [vmem:[#allocation2 + $0x28] sm:$0x3]  ;;  %v675_v42 = vrot.slane %v12138_v39, 1 }
  0x31   : > { %480 = vst.msk [vmem:[#allocation2 + $0xf1] sm:$0xff] %vm405_vm1, %v391_v33  ;;  %v607_v43 = vrot.slane %v12141_v41, 1  ;;  %v12145_v44 = vld [vmem:[#allocation2 + $0x178] sm:$0x3]  ;;  %v12147_v45 = vld [vmem:[#allocation2 + $0x30] sm:$0xff]  ;;  %v12152_v47 = vsel %vm598_vm3, %v604_v37, %v605_v38  ;;  %v12159_v52 = vld [vmem:[#allocation2 + $0x48] sm:$0xff] }
  0x32   : > { %v12149_v46 = vld [vmem:[#allocation2 + $0x38] sm:$0xff]  ;;  %v677_v48 = vrot.slane %v12145_v44, 1  ;;  %v609_v49 = vrot.slane %v12147_v45, 1  ;;  %v12157_v51 = vld [vmem:[#allocation2 + $0x40] sm:$0x3]  ;;  %10607 = vmatprep.mubr.msk.f32.mxu0 %vm405_vm1, %v12152_v47  ;;  %v12164_v53 = vsel %vm598_vm3, %v674_v40, %v675_v42  ;;  %v12170_v56 = vld [vmem:[#allocation2 + $0x50] sm:$0xff] }
  0x33   : > { %v610_v50 = vrot.slane %v12149_v46, 1  ;;  %16501 = vst [vmem:[#allocation6_spill] sm:$0xff] %v12164_v53  ;;  %v12167_v54 = vsel %vm598_vm3, %v605_v38, %v607_v43  ;;  %v612_v55 = vrot.slane %v12157_v51, 1  ;;  %v614_v57 = vrot.slane %v12159_v52, 1  ;;  %v12173_v58 = vld [vmem:[#allocation2 + $0x58] sm:$0x3]  ;;  %10649 = vmatprep.mubr.msk.f32.mxu1 %vm405_vm1, %v12164_v53 }
  0x34   : > { %v12175_v59 = vld [vmem:[#allocation2 + $0x60] sm:$0xff]  ;;  %10608 = vmatmul.mubr.msk.f32.gmra.mxu0 %vm405_vm1, %v12167_v54  ;;  %v12182_v60 = vsel %vm598_vm3, %v675_v42, %v677_v48  ;;  %v615_v62 = vrot.slane %v12170_v56, 1  ;;  %v12188_v63 = vld [vmem:[#allocation2 + $0x68] sm:$0xff]  ;;  %v617_v4 = vrot.slane %v12173_v58, 1  ;;  %v12210_v10 = vld [vmem:[#allocation2 + $0x70] sm:$0x3] }
  0x35   : > { %16502 = vst [vmem:[#allocation7_spill] sm:$0xff] %v12175_v59  ;;  %16503 = vst [vmem:[#allocation8_spill] sm:$0xff] %v12182_v60  ;;  %v12185_v61 = vsel %vm598_vm3, %v609_v49, %v610_v50  ;;  %10650 = vmatmul.mubr.msk.f32.vlgmr.msra.gmra.mxu1 %vm405_vm1, %v12182_v60  ;;  %v12198_v2 = vsel %vm598_vm3, %v610_v50, %v612_v55  ;;  %v619_v6 = vrot.slane %v12175_v59, 1  ;;  %v620_v9 = vrot.slane %v12188_v63, 1  ;;  %v12212_v11 = vld [vmem:[#allocation2 + $0x78] sm:$0xff]  ;;  %v12214_v13 = vld [vmem:[#allocation2 + $0x80] sm:$0xff] }
  0x36   : > { %10610 = vmatprep.mubr.msk.f32.mxu0 %vm405_vm1, %v12185_v61  ;;  %10653 = vmatpush3.msk.msra.mxu1 %vm745_vm0, %v12008_v3  ;;  %v12206_v5 = vsel %vm598_vm3, %v614_v57, %v615_v62  ;;  %16505 = vst [vmem:[#allocation10_spill] sm:$0xff] %v12212_v11  ;;  %v12224_v3 = vsel %vm598_vm3, %v615_v62, %v617_v4  ;;  %v622_v14 = vrot.slane %v12210_v10, 1  ;;  %v12227_v15 = vld [vmem:[#allocation2 + $0x88] sm:$0x3]  ;;  %v624_v17 = vrot.slane %v12212_v11, 1  ;;  %v12236_v20 = vld [vmem:[#allocation2 + $0x90] sm:$0xff] }
  0x37   : > { %10654 = vmatprep.mubr.msk.f32.mxu1 %vm405_vm1, %v12069_v7  ;;  %16504 = vst [vmem:[#allocation9_spill] sm:$0xff] %v12206_v5  ;;  %10752 = vmatprep.subr.msk.mxu1 %vm745_vm0, %v9154_v0  ;;  %16506 = vst [vmem:[#allocation11_spill] sm:$0xff] %v12224_v3  ;;  %v12232_v16 = vsel %vm598_vm3, %v619_v6, %v620_v9  ;;  %v625_v18 = vrot.slane %v12214_v13, 1  ;;  %v12238_v21 = vld [vmem:[#allocation2 + $0x98] sm:$0xff]  ;;  %v12248_v26 = vld [vmem:[#allocation2 + $0xa0] sm:$0x3] }
  0x38   : > { %10611 = vmatmul.mubr.msk.f32.gmra.mxu0 %vm405_vm1, %v12198_v2  ;;  %16507 = vst [vmem:[#allocation12_spill] sm:$0xff] %v12232_v16  ;;  %16508 = vst [vmem:[#allocation13_spill] sm:$0xff] %v12236_v20  ;;  %v396_v27 = vld [vmem:[%s12064_s25 + $0xb8] sm:$0xff]  ;;  %v397_v28 = vld [vmem:[%s12064_s25 + $0xc0] sm:$0xff]  ;;  %v12261_v30 = vsel %vm598_vm3, %v620_v9, %v622_v14  ;;  %v627_v31 = vrot.slane %v12227_v15, 1  ;;  %v629_v40 = vrot.slane %v12236_v20, 1 }
  0x39   : > { %10655 = vmatmul.mubr.msk.f32.vlgmr.msra.gmra.mxu1 %vm405_vm1, %v12071_v8  ;;  %10613 = vmatprep.mubr.msk.f32.mxu0 %vm405_vm1, %v12206_v5  ;;  %481 = vst.msk [vmem:[#allocation2 + $0xf9] sm:$0xff] %vm405_vm1, %v392_v22  ;;  %482 = vst.msk [vmem:[#allocation2 + $0x109] sm:$0xff] %vm405_vm1, %v393_v23  ;;  %v398_v29 = vld [vmem:[%s12064_s25 + $0xc8] sm:$0xff]  ;;  %v399_v32 = vld [vmem:[%s12064_s25 + $0xd0] sm:$0xff]  ;;  %v12273_v38 = vsel %vm598_vm3, %v624_v17, %v625_v18  ;;  %v630_v42 = vrot.slane %v12238_v21, 1  ;;  %v632_v57 = vrot.slane %v12248_v26, 1 }
  0x3a   : > { %10657 = vmatprep.mubr.msk.f32.mxu1 %vm405_vm1, %v12125_v34  ;;  %10753 = vmatpush3.msk.msra.mxu1 %vm745_vm0, %v9154_v0  ;;  %483 = vst.msk [vmem:[#allocation2 + $0x111] sm:$0xff] %vm405_vm1, %v394_v24  ;;  %484 = vst.msk [vmem:[#allocation2 + $0x121] sm:$0xff] %vm405_vm1, %v395_v25  ;;  %v400_v33 = vld [vmem:[%s12064_s25 + $0xd8] sm:$0xff]  ;;  %v403_v37 = vld [vmem:[%s12064_s25 + $0xf0] sm:$0xff]  ;;  %v12300_v55 = vsel %vm598_vm3, %v625_v18, %v627_v31 }
  0x3b   : > { %16509 = vst [vmem:[#allocation14_spill] sm:$0xff] %v12261_v30  ;;  %485 = vst.msk [vmem:[#allocation2 + $0x129] sm:$0xff] %vm405_vm1, %v396_v27  ;;  %v12282_v43 = vld [vmem:[%s16334_s1 + $0x14] sm:$0xf]  ;;  %v404_v48 = vld [vmem:[%s12064_s25 + $0xf8] sm:$0xff]  ;;  %v12306_v62 = vsel %vm598_vm3, %v629_v40, %v630_v42  ;;  %v12323_v17 = vsel %vm598_vm3, %v630_v42, %v632_v57 }
  0x3c   : > { %10614 = vmatmul.mubr.msk.f32.gmra.mxu0 %vm405_vm1, %v12224_v3  ;;  %486 = vst.msk [vmem:[#allocation2 + $0x139] sm:$0xff] %vm405_vm1, %v397_v28  ;;  %487 = vst.msk [vmem:[#allocation2 + $0x141] sm:$0xff] %vm405_vm1, %v398_v29  ;;  %v12286_v49 = vld [vmem:[#allocation2 + $0xa8] sm:$0xff]  ;;  %v12288_v50 = vld [vmem:[#allocation2 + $0xb0] sm:$0xff]  ;;  %10852 = vmatprep.subr.msk.mxu1 %vm745_vm0, %v12282_v43 }
  0x3d   : > { %10658 = vmatmul.mubr.msk.f32.gmra.mxu1 %vm405_vm1, %v12127_v35  ;;  %10616 = vmatprep.mubr.msk.f32.mxu0 %vm405_vm1, %v12232_v16  ;;  %16510 = vst [vmem:[#allocation15_spill] sm:$0xff] %v12273_v38  ;;  %488 = vst.msk [vmem:[#allocation2 + $0x151] sm:$0xff] %vm405_vm1, %v399_v32  ;;  %v634_v0 = vrot.slane %v12286_v49, 1  ;;  %v635_v4 = vrot.slane %v12288_v50, 1  ;;  %v12310_v6 = vld [vmem:[#allocation2 + $0xb8] sm:$0x3] }
  0x3e   : > { %10660 = vmatprep.mubr.msk.f32.mxu1 %vm405_vm1, %v12147_v45  ;;  %489 = vst.msk [vmem:[#allocation2 + $0x159] sm:$0xff] %vm405_vm1, %v400_v33  ;;  %492 = vst.msk [vmem:[#allocation2 + $0x181] sm:$0xff] %vm405_vm1, %v403_v37  ;;  %v12312_v9 = vld [vmem:[#allocation2 + $0xc0] sm:$0xff]  ;;  %v12314_v14 = vld [vmem:[#allocation2 + $0xc8] sm:$0xff]  ;;  %v637_v18 = vrot.slane %v12310_v6, 1 }
  0x3f   : > { %16511 = vst [vmem:[#allocation16_spill] sm:$0xff] %v12286_v49  ;;  %493 = vst.msk [vmem:[#allocation2 + $0x189] sm:$0xff] %vm405_vm1, %v404_v48  ;;  %v12329_v22 = vsel %vm598_vm3, %v634_v0, %v635_v4  ;;  %v639_v23 = vrot.slane %v12312_v9, 1  ;;  %v640_v24 = vrot.slane %v12314_v14, 1  ;;  %v12333_v25 = vld [vmem:[#allocation2 + $0xd0] sm:$0x3] }
  0x40   : > { %10617 = vmatmul.mubr.msk.f32.gmra.mxu0 %vm405_vm1, %v12261_v30  ;;  %16512 = vst [vmem:[#allocation17_spill] sm:$0xff] %v12300_v55  ;;  %16513 = vst [vmem:[#allocation18_spill] sm:$0xff] %v12306_v62  ;;  %v12335_v27 = vld [vmem:[#allocation2 + $0xd8] sm:$0xff]  ;;  %v12337_v28 = vld [vmem:[#allocation2 + $0xe0] sm:$0xff]  ;;  %v12346_v29 = vsel %vm598_vm3, %v635_v4, %v637_v18  ;;  %v642_v31 = vrot.slane %v12333_v25, 1 }
  0x41   : > { %10661 = vmatmul.mubr.msk.f32.gmra.mxu1 %vm405_vm1, %v12149_v46  ;;  %10619 = vmatprep.mubr.msk.f32.mxu0 %vm405_vm1, %v12273_v38  ;;  %16514 = vst [vmem:[#allocation19_spill] sm:$0xff] %v12312_v9  ;;  %16515 = vst [vmem:[#allocation20_spill] sm:$0xff] %v12323_v17  ;;  %v12352_v32 = vsel %vm598_vm3, %v639_v23, %v640_v24  ;;  %v644_v33 = vrot.slane %v12335_v27, 1  ;;  %v645_v37 = vrot.slane %v12337_v28, 1  ;;  %v12356_v40 = vld [vmem:[#allocation2 + $0xe8] sm:$0x3] }
  0x42   : > { %10663 = vmatprep.mubr.msk.f32.mxu1 %vm405_vm1, %v12159_v52  ;;  %16516 = vst [vmem:[#allocation21_spill] sm:$0xff] %v12329_v22  ;;  %16517 = vst [vmem:[#allocation22_spill] sm:$0xff] %v12335_v27  ;;  %v12358_v42 = vld [vmem:[#allocation2 + $0xf0] sm:$0xff]  ;;  %v12360_v48 = vld [vmem:[#allocation2 + $0xf8] sm:$0xff]  ;;  %v12369_v57 = vsel %vm598_vm3, %v640_v24, %v642_v31  ;;  %v647_v0 = vrot.slane %v12356_v40, 1 }
  0x43   : > { %16518 = vst [vmem:[#allocation23_spill] sm:$0xff] %v12346_v29  ;;  %16519 = vst [vmem:[#allocation24_spill] sm:$0xff] %v12352_v32  ;;  %v12375_v4 = vsel %vm598_vm3, %v644_v33, %v645_v37  ;;  %v649_v18 = vrot.slane %v12358_v42, 1  ;;  %v650_v23 = vrot.slane %v12360_v48, 1  ;;  %v12379_v1 = vld [vmem:[#allocation2 + $0x100] sm:$0x3] }
  0x44   : > { %10620 = vmatmul.mubr.msk.f32.gmra.mxu0 %vm405_vm1, %v12300_v55  ;;  %16520 = vst [vmem:[#allocation25_spill] sm:$0xff] %v12358_v42  ;;  %16521 = vst [vmem:[#allocation26_spill] sm:$0xff] %v12369_v57  ;;  %v12381_v60 = vld [vmem:[#allocation2 + $0x108] sm:$0xff]  ;;  %v12383_v53 = vld [vmem:[#allocation2 + $0x110] sm:$0xff]  ;;  %v12392_v24 = vsel %vm598_vm3, %v645_v37, %v647_v0  ;;  %v652_v31 = vrot.slane %v12379_v1, 1 }
  0x45   : > { %10664 = vmatmul.mubr.msk.f32.gmra.mxu1 %vm405_vm1, %v12170_v56  ;;  %10622 = vmatprep.mubr.msk.f32.mxu0 %vm405_vm1, %v12306_v62  ;;  %16522 = vst [vmem:[#allocation27_spill] sm:$0xff] %v12375_v4  ;;  %16523 = vst [vmem:[#allocation28_spill] sm:$0xff] %v12392_v24  ;;  %v12398_v33 = vsel %vm598_vm3, %v649_v18, %v650_v23  ;;  %v12425_v62 = vld [vmem:[#allocation2 + $0x130] sm:$0x3]  ;;  %v12427_v55 = vld [vmem:[#allocation2 + $0x138] sm:$0xff] }
  0x46   : > { %10666 = vmatprep.mubr.msk.f32.mxu1 %vm405_vm1, %v12175_v59  ;;  %16524 = vst [vmem:[#allocation29_spill] sm:$0xff] %v12398_v33  ;;  %v12415_v37 = vsel %vm598_vm3, %v650_v23, %v652_v31  ;;  %v662_v23 = vrot.slane %v12425_v62, 1  ;;  %v664_v38 = vrot.slane %v12427_v55, 1  ;;  %v12448_v30 = vld [vmem:[#allocation2 + $0x148] sm:$0x3]  ;;  %v12450_v16 = vld [vmem:[#allocation2 + $0x150] sm:$0xff] }
  0x47   : > { %16525 = vst [vmem:[#allocation30_spill] sm:$0xff] %v12415_v37  ;;  %v669_v3 = vrot.slane %v12450_v16, 1  ;;  %v12471_v5 = vld [vmem:[#allocation2 + $0x160] sm:$0x3] }
  0x48   : > { %10623 = vmatmul.mubr.msk.f32.gmra.mxu0 %vm405_vm1, %v12323_v17 }
  0x49   : > { %10667 = vmatmul.mubr.msk.f32.gmra.mxu1 %vm405_vm1, %v12188_v63  ;;  %10625 = vmatprep.mubr.msk.f32.mxu0 %vm405_vm1, %v12329_v22  ;;  %v12404_v22 = vld [vmem:[#allocation2 + $0x120] sm:$0xff] }
  0x4a   : > { %10669 = vmatprep.mubr.msk.f32.mxu1 %vm405_vm1, %v12212_v11  ;;  %v659_v17 = vrot.slane %v12404_v22, 1 }
  0x4c   : > { %10626 = vmatmul.mubr.msk.f32.gmra.mxu0 %vm405_vm1, %v12346_v29  ;;  %v12402_v29 = vld [vmem:[#allocation2 + $0x118] sm:$0x3] }
  0x4d   : > { %10670 = vmatmul.mubr.msk.f32.gmra.mxu1 %vm405_vm1, %v12214_v13  ;;  %10628 = vmatprep.mubr.msk.f32.mxu0 %vm405_vm1, %v12352_v32  ;;  %v654_v32 = vrot.slane %v12381_v60, 1  ;;  %v657_v0 = vrot.slane %v12402_v29, 1 }
  0x4e   : > { %10672 = vmatprep.mubr.msk.f32.mxu1 %vm405_vm1, %v12236_v20 }
  0x50   : > { %10629 = vmatmul.mubr.msk.f32.gmra.mxu0 %vm405_vm1, %v12369_v57  ;;  %v655_v57 = vrot.slane %v12383_v53, 1 }
  0x51   : > { %10673 = vmatmul.mubr.msk.f32.gmra.mxu1 %vm405_vm1, %v12238_v21  ;;  %10631 = vmatprep.mubr.msk.f32.mxu0 %vm405_vm1, %v12375_v4  ;;  %v12406_v4 = vld [vmem:[#allocation2 + $0x128] sm:$0xff] }
  0x52   : > { %10675 = vmatprep.mubr.msk.f32.mxu1 %vm405_vm1, %v12286_v49  ;;  %v12421_v18 = vsel %vm598_vm3, %v654_v32, %v655_v57  ;;  %v12438_v32 = vsel %vm598_vm3, %v655_v57, %v657_v0  ;;  %v667_v57 = vrot.slane %v12448_v30, 1 }
  0x53   : > { %16526 = vst [vmem:[#allocation31_spill] sm:$0xff] %v12421_v18  ;;  %16527 = vst [vmem:[#allocation32_spill] sm:$0xff] %v12438_v32 }
  0x54   : > { %10632 = vmatmul.mubr.msk.f32.gmra.mxu0 %vm405_vm1, %v12392_v24  ;;  %v660_v24 = vrot.slane %v12406_v4, 1 }
  0x55   : > { %10676 = vmatmul.mubr.msk.f32.gmra.mxu1 %vm405_vm1, %v12288_v50  ;;  %10634 = vmatprep.mubr.msk.f32.mxu0 %vm405_vm1, %v12398_v33  ;;  %v12429_v33 = vld [vmem:[#allocation2 + $0x140] sm:$0xff] }
  0x56   : > { %10678 = vmatprep.mubr.msk.f32.mxu1 %vm405_vm1, %v12312_v9  ;;  %v12444_v31 = vsel %vm598_vm3, %v659_v17, %v660_v24  ;;  %v12461_v17 = vsel %vm598_vm3, %v660_v24, %v662_v23 }
  0x57   : > { %16528 = vst [vmem:[#allocation33_spill] sm:$0xff] %v12444_v31  ;;  %16529 = vst [vmem:[#allocation34_spill] sm:$0xff] %v12461_v17 }
  0x58   : > { %10635 = vmatmul.mubr.msk.f32.gmra.mxu0 %vm405_vm1, %v12415_v37  ;;  %v665_v37 = vrot.slane %v12429_v33, 1 }
  0x59   : > { %10679 = vmatmul.mubr.msk.f32.gmra.mxu1 %vm405_vm1, %v12314_v14  ;;  %10637 = vmatprep.mubr.msk.f32.mxu0 %vm405_vm1, %v12421_v18  ;;  %v12452_v18 = vld [vmem:[#allocation2 + $0x158] sm:$0xff] }
  0x5a   : > { %10681 = vmatprep.mubr.msk.f32.mxu1 %vm405_vm1, %v12335_v27  ;;  %v12467_v0 = vsel %vm598_vm3, %v664_v38, %v665_v37  ;;  %v12480_v24 = vsel %vm598_vm3, %v665_v37, %v667_v57  ;;  %v672_v38 = vrot.slane %v12471_v5, 1  ;;  %v1278_v57 = vrot.slane %v12149_v46, 2 }
  0x5b   : > { %16530 = vst [vmem:[#allocation35_spill] sm:$0xff] %v12467_v0 }
  0x5c   : > { %10638 = vmatmul.mubr.msk.f32.gmra.mxu0 %vm405_vm1, %v12438_v32  ;;  %v670_v32 = vrot.slane %v12452_v18, 1 }
  0x5d   : > { %10682 = vmatmul.mubr.msk.f32.gmra.mxu1 %vm405_vm1, %v12337_v28  ;;  %10640 = vmatprep.mubr.msk.f32.mxu0 %vm405_vm1, %v12444_v31  ;;  %v1267_v31 = vrot.slane %v12069_v7, 2 }
  0x5e   : > { %10684 = vmatprep.mubr.msk.f32.mxu1 %vm405_vm1, %v12358_v42  ;;  %v12486_v23 = vsel %vm598_vm3, %v669_v3, %v670_v32  ;;  %v12498_v37 = vsel %vm598_vm3, %v670_v32, %v672_v38  ;;  %v1273_v3 = vrot.slane %v12127_v35, 2  ;;  %v1275_v32 = vrot.slane %v12141_v41, 2 }
  0x5f   : > { %16531 = vst [vmem:[#allocation36_spill] sm:$0xff] %v12486_v23  ;;  %16532 = vst [vmem:[#allocation37_spill] sm:$0xff] %v12498_v37 }
  0x60   : > { %10641 = vmatmul.mubr.msk.f32.gmra.mxu0 %vm405_vm1, %v12461_v17  ;;  %v1268_v17 = vrot.slane %v12071_v8, 2  ;;  %v1272_v8 = vrot.slane %v12125_v34, 2  ;;  %v12530_v41 = vsel %vm1266_vm4, %v1273_v3, %v1275_v32  ;;  %v1287_v32 = vrot.slane %v12175_v59, 2 }
  0x61   : > { %10685 = vmatmul.mubr.msk.f32.gmra.mxu1 %vm405_vm1, %v12360_v48  ;;  %10643 = vmatprep.mubr.msk.f32.mxu0 %vm405_vm1, %v12467_v0  ;;  %v1270_v0 = vrot.slane %v12079_v12, 2 }
  0x62   : > { %10687 = vmatprep.mubr.msk.f32.mxu1 %vm405_vm1, %v12381_v60  ;;  %v1269_v7 = vsel %vm1266_vm4, %v1267_v31, %v1268_v17  ;;  %v1277_v31 = vrot.slane %v12147_v45, 2  ;;  %v12517_v38 = vsel %vm1266_vm4, %v1272_v8, %v1273_v3  ;;  %v1282_v8 = vrot.slane %v12159_v52, 2 }
  0x63   : > { %v1271_v12 = vsel %vm1266_vm4, %v1268_v17, %v1270_v0  ;;  %v1280_v17 = vrot.slane %v12157_v51, 2  ;;  %v1285_v51 = vrot.slane %v12173_v58, 2 }
  0x64   : > { %10644 = vmatmul.mubr.msk.f32.gmra.mxu0 %vm405_vm1, %v12480_v24  ;;  %v12538_v0 = vsel %vm1266_vm4, %v1277_v31, %v1278_v57  ;;  %v1288_v31 = vrot.slane %v12188_v63, 2 }
  0x65   : > { %10688 = vmatmul.mubr.msk.f32.gmra.mxu1 %vm405_vm1, %v12383_v53  ;;  %10646 = vmatprep.mubr.msk.f32.mxu0 %vm405_vm1, %v12486_v23  ;;  %16533 = vst [vmem:[#allocation38_spill] sm:$0xff] %v12538_v0  ;;  %v1298_v23 = vrot.slane %v12238_v21, 2 }
  0x66   : > { %10690 = vmatprep.mubr.msk.f32.mxu1 %vm405_vm1, %v12404_v22 }
  0x68   : > { %10647 = vmatmul.mubr.msk.f32.gmra.mxu0 %vm405_vm1, %v12498_v37  ;;  %v1293_v37 = vrot.slane %v12214_v13, 2 }
  0x69   : > { %10691 = vmatmul.mubr.msk.f32.gmra.mxu1 %vm405_vm1, %v12406_v4  ;;  %10704 = vmatprep.mubr.msk.f32.mxu0 %vm405_vm1, %v1269_v7  ;;  %v12523_v7 = vld [vmem:[%s16334_s1 + $0x18] sm:$0xf] }
  0x6a   : > { %10693 = vmatprep.mubr.msk.f32.mxu1 %vm405_vm1, %v12427_v55 }
  0x6c   : > { %10705 = vmatmul.mubr.msk.f32.vlgmr.msra.gmra.mxu0 %vm405_vm1, %v1271_v12  ;;  %v1283_v12 = vrot.slane %v12170_v56, 2 }
  0x6d   : > { %10694 = vmatmul.mubr.msk.f32.gmra.mxu1 %vm405_vm1, %v12429_v33  ;;  %10803 = vmatpush3.msk.msra.mxu0 %vm745_vm0, %v12093_v19  ;;  %v12551_v19 = vsel %vm1266_vm4, %v1278_v57, %v1280_v17  ;;  %v1290_v57 = vrot.slane %v12210_v10, 2  ;;  %v12574_v17 = vsel %vm1266_vm4, %v1287_v32, %v1288_v31  ;;  %v1295_v10 = vrot.slane %v12227_v15, 2 }
  0x6e   : > { %10696 = vmatprep.mubr.msk.f32.mxu1 %vm405_vm1, %v12450_v16  ;;  %10707 = vmatprep.mubr.msk.f32.mxu0 %vm405_vm1, %v12517_v38  ;;  %16534 = vst [vmem:[#allocation39_spill] sm:$0xff] %v12551_v19  ;;  %v12557_v3 = vsel %vm1266_vm4, %v1282_v8, %v1283_v12  ;;  %v12568_v58 = vsel %vm1266_vm4, %v1283_v12, %v1285_v51  ;;  %16537 = vst [vmem:[#allocation42_spill] sm:$0xff] %v12574_v17  ;;  %v1292_v8 = vrot.slane %v12212_v11, 2  ;;  %v12583_v12 = vld [vmem:[%s16334_s1 + $0x1c] sm:$0xf] }
  0x6f   : > { %10902 = vmatprep.subr.msk.mxu0 %vm745_vm0, %v12523_v7  ;;  %16535 = vst [vmem:[#allocation40_spill] sm:$0xff] %v12557_v3  ;;  %16536 = vst [vmem:[#allocation41_spill] sm:$0xff] %v12568_v58  ;;  %v1297_v32 = vrot.slane %v12236_v20, 2  ;;  %v1300_v15 = vrot.slane %v12248_v26, 2 }
  0x70   : > { %10708 = vmatmul.mubr.msk.f32.gmra.mxu0 %vm405_vm1, %v12530_v41  ;;  %v12596_v51 = vsel %vm1266_vm4, %v1292_v8, %v1293_v37 }
  0x71   : > { %10697 = vmatmul.mubr.msk.f32.gmra.mxu1 %vm405_vm1, %v12452_v18  ;;  %10710 = vmatprep.mubr.msk.f32.mxu0 %vm405_vm1, %v12538_v0  ;;  %16539 = vst [vmem:[#allocation44_spill] sm:$0xff] %v12596_v51  ;;  %v12628_v26 = vsel %vm1266_vm4, %v1298_v23, %v1300_v15 }
  0x72   : > { %10699 = vmatprep.mubr.msk.f32.mxu1 %vm405_vm1, %v12129_v36  ;;  %16542 = vst [vmem:[#allocation47_spill] sm:$0xff] %v12628_v26 }
  0x74   : > { %10711 = vmatmul.mubr.msk.f32.gmra.mxu0 %vm405_vm1, %v12551_v19 }
  0x75   : > { %10700 = vmatmul.mubr.msk.f32.gmra.mxu1 %vm405_vm1, %v12138_v39  ;;  %10713 = vmatprep.mubr.msk.f32.mxu0 %vm405_vm1, %v12557_v3 }
  0x76   : > { %10754 = vmatprep.mubr.msk.f32.mxu1 %vm405_vm1, %v12125_v34  ;;  %v12590_v34 = vsel %vm1266_vm4, %v1288_v31, %v1290_v57  ;;  %v1302_v31 = vrot.slane %v12286_v49, 2  ;;  %v1303_v57 = vrot.slane %v12288_v50, 2 }
  0x77   : > { %16538 = vst [vmem:[#allocation43_spill] sm:$0xff] %v12590_v34 }
  0x78   : > { %10714 = vmatmul.mubr.msk.f32.gmra.mxu0 %vm405_vm1, %v12568_v58  ;;  %v12634_v8 = vsel %vm1266_vm4, %v1302_v31, %v1303_v57  ;;  %v1312_v31 = vrot.slane %v12335_v27, 2 }
  0x79   : > { %10755 = vmatmul.mubr.msk.f32.vlgmr.msra.gmra.mxu1 %vm405_vm1, %v12127_v35  ;;  %10716 = vmatprep.mubr.msk.f32.mxu0 %vm405_vm1, %v12574_v17  ;;  %v12611_v35 = vsel %vm1266_vm4, %v1293_v37, %v1295_v10  ;;  %v1305_v37 = vrot.slane %v12310_v6, 2  ;;  %16543 = vst [vmem:[#allocation48_spill] sm:$0xff] %v12634_v8  ;;  %v1307_v10 = vrot.slane %v12312_v9, 2 }
  0x7a   : > { %10757 = vmatprep.mubr.msk.f32.mxu1 %vm405_vm1, %v12147_v45  ;;  %10853 = vmatpush3.msk.msra.mxu1 %vm745_vm0, %v12282_v43  ;;  %16540 = vst [vmem:[#allocation45_spill] sm:$0xff] %v12611_v35  ;;  %v12617_v43 = vsel %vm1266_vm4, %v1297_v32, %v1298_v23  ;;  %v1308_v32 = vrot.slane %v12314_v14, 2  ;;  %v1310_v23 = vrot.slane %v12333_v25, 2 }
  0x7b   : > { %10952 = vmatprep.subr.msk.mxu1 %vm745_vm0, %v12583_v12  ;;  %16541 = vst [vmem:[#allocation46_spill] sm:$0xff] %v12617_v43  ;;  %v12645_v6 = vsel %vm1266_vm4, %v1303_v57, %v1305_v37  ;;  %v1315_v57 = vrot.slane %v12356_v40, 2 }
  0x7c   : > { %10717 = vmatmul.mubr.msk.f32.gmra.mxu0 %vm405_vm1, %v12590_v34  ;;  %16544 = vst [vmem:[#allocation49_spill] sm:$0xff] %v12645_v6  ;;  %v12651_v15 = vsel %vm1266_vm4, %v1307_v10, %v1308_v32  ;;  %v12662_v25 = vsel %vm1266_vm4, %v1308_v32, %v1310_v23  ;;  %v1317_v10 = vrot.slane %v12358_v42, 2  ;;  %v1320_v32 = vrot.slane %v12379_v1, 2 }
  0x7d   : > { %10758 = vmatmul.mubr.msk.f32.gmra.mxu1 %vm405_vm1, %v12149_v46  ;;  %10719 = vmatprep.mubr.msk.f32.mxu0 %vm405_vm1, %v12596_v51  ;;  %16545 = vst [vmem:[#allocation50_spill] sm:$0xff] %v12651_v15  ;;  %16546 = vst [vmem:[#allocation51_spill] sm:$0xff] %v12662_v25 }
  0x7e   : > { %10760 = vmatprep.mubr.msk.f32.mxu1 %vm405_vm1, %v12159_v52 }
  0x80   : > { %10720 = vmatmul.mubr.msk.f32.gmra.mxu0 %vm405_vm1, %v12611_v35 }
  0x81   : > { %10761 = vmatmul.mubr.msk.f32.gmra.mxu1 %vm405_vm1, %v12170_v56  ;;  %10722 = vmatprep.mubr.msk.f32.mxu0 %vm405_vm1, %v12617_v43 }
  0x82   : > { %10763 = vmatprep.mubr.msk.f32.mxu1 %vm405_vm1, %v12175_v59  ;;  %v1313_v59 = vrot.slane %v12337_v28, 2 }
  0x84   : > { %10723 = vmatmul.mubr.msk.f32.gmra.mxu0 %vm405_vm1, %v12628_v26  ;;  %v12668_v37 = vsel %vm1266_vm4, %v1312_v31, %v1313_v59  ;;  %v12679_v40 = vsel %vm1266_vm4, %v1313_v59, %v1315_v57  ;;  %v1322_v31 = vrot.slane %v12381_v60, 2  ;;  %v1325_v59 = vrot.slane %v12402_v29, 2 }
  0x85   : > { %10764 = vmatmul.mubr.msk.f32.gmra.mxu1 %vm405_vm1, %v12188_v63  ;;  %10725 = vmatprep.mubr.msk.f32.mxu0 %vm405_vm1, %v12634_v8  ;;  %16547 = vst [vmem:[#allocation52_spill] sm:$0xff] %v12668_v37  ;;  %16548 = vst [vmem:[#allocation53_spill] sm:$0xff] %v12679_v40  ;;  %v1330_v29 = vrot.slane %v12425_v62, 2  ;;  %v1335_v62 = vrot.slane %v12448_v30, 2 }
  0x86   : > { %10766 = vmatprep.mubr.msk.f32.mxu1 %vm405_vm1, %v12212_v11  ;;  %v1318_v11 = vrot.slane %v12360_v48, 2 }
  0x88   : > { %10726 = vmatmul.mubr.msk.f32.gmra.mxu0 %vm405_vm1, %v12645_v6  ;;  %v12685_v23 = vsel %vm1266_vm4, %v1317_v10, %v1318_v11  ;;  %v12696_v1 = vsel %vm1266_vm4, %v1318_v11, %v1320_v32  ;;  %v1327_v10 = vrot.slane %v12404_v22, 2 }
  0x89   : > { %10767 = vmatmul.mubr.msk.f32.gmra.mxu1 %vm405_vm1, %v12214_v13  ;;  %10728 = vmatprep.mubr.msk.f32.mxu0 %vm405_vm1, %v12651_v15  ;;  %16549 = vst [vmem:[#allocation54_spill] sm:$0xff] %v12685_v23  ;;  %16550 = vst [vmem:[#allocation55_spill] sm:$0xff] %v12696_v1 }
  0x8a   : > { %10769 = vmatprep.mubr.msk.f32.mxu1 %vm405_vm1, %v12236_v20  ;;  %v1323_v20 = vrot.slane %v12383_v53, 2 }
  0x8c   : > { %10729 = vmatmul.mubr.msk.f32.gmra.mxu0 %vm405_vm1, %v12662_v25  ;;  %v12702_v57 = vsel %vm1266_vm4, %v1322_v31, %v1323_v20  ;;  %v12713_v11 = vsel %vm1266_vm4, %v1323_v20, %v1325_v59  ;;  %v1332_v31 = vrot.slane %v12427_v55, 2 }
  0x8d   : > { %10770 = vmatmul.mubr.msk.f32.gmra.mxu1 %vm405_vm1, %v12238_v21  ;;  %10731 = vmatprep.mubr.msk.f32.mxu0 %vm405_vm1, %v12668_v37  ;;  %16551 = vst [vmem:[#allocation56_spill] sm:$0xff] %v12713_v11 }
  0x8e   : > { %10772 = vmatprep.mubr.msk.f32.mxu1 %vm405_vm1, %v12286_v49  ;;  %v1328_v49 = vrot.slane %v12406_v4, 2 }
  0x90   : > { %10732 = vmatmul.mubr.msk.f32.gmra.mxu0 %vm405_vm1, %v12679_v40  ;;  %v12719_v32 = vsel %vm1266_vm4, %v1327_v10, %v1328_v49  ;;  %v12730_v20 = vsel %vm1266_vm4, %v1328_v49, %v1330_v29  ;;  %v1337_v10 = vrot.slane %v12450_v16, 2  ;;  %v1340_v49 = vrot.slane %v12471_v5, 2 }
  0x91   : > { %10773 = vmatmul.mubr.msk.f32.gmra.mxu1 %vm405_vm1, %v12288_v50  ;;  %10734 = vmatprep.mubr.msk.f32.mxu0 %vm405_vm1, %v12685_v23 }
  0x92   : > { %10775 = vmatprep.mubr.msk.f32.mxu1 %vm405_vm1, %v12312_v9  ;;  %v1333_v9 = vrot.slane %v12429_v33, 2 }
  0x94   : > { %10735 = vmatmul.mubr.msk.f32.gmra.mxu0 %vm405_vm1, %v12696_v1  ;;  %v12736_v59 = vsel %vm1266_vm4, %v1332_v31, %v1333_v9  ;;  %v12747_v30 = vsel %vm1266_vm4, %v1333_v9, %v1335_v62  ;;  %v1342_v31 = vrot.slane %v12129_v36, 2  ;;  %v1345_v9 = vrot.slane %v12145_v44, 2  ;;  %v12796_v44 = vld [vmem:[%s16334_s1 + $0x20] sm:$0xf] }
  0x95   : > { %10776 = vmatmul.mubr.msk.f32.gmra.mxu1 %vm405_vm1, %v12314_v14  ;;  %10737 = vmatprep.mubr.msk.f32.mxu0 %vm405_vm1, %v12702_v57 }
  0x96   : > { %10778 = vmatprep.mubr.msk.f32.mxu1 %vm405_vm1, %v12335_v27  ;;  %v1338_v27 = vrot.slane %v12452_v18, 2 }
  0x98   : > { %10738 = vmatmul.mubr.msk.f32.gmra.mxu0 %vm405_vm1, %v12713_v11  ;;  %v12753_v29 = vsel %vm1266_vm4, %v1337_v10, %v1338_v27  ;;  %v12764_v5 = vsel %vm1266_vm4, %v1338_v27, %v1340_v49  ;;  %v16558_v10 = vld [vmem:[#allocation15_spill] sm:$0xff]  ;;  %v16559_v49 = vld [vmem:[#allocation17_spill] sm:$0xff] }
  0x99   : > { %10779 = vmatmul.mubr.msk.f32.gmra.mxu1 %vm405_vm1, %v12337_v28  ;;  %10740 = vmatprep.mubr.msk.f32.mxu0 %vm405_vm1, %v12719_v32  ;;  %16552 = vst [vmem:[#allocation57_spill] sm:$0xff] %v12753_v29 }
  0x9a   : > { %10781 = vmatprep.mubr.msk.f32.mxu1 %vm405_vm1, %v12358_v42  ;;  %v1343_v42 = vrot.slane %v12138_v39, 2 }
  0x9c   : > { %10741 = vmatmul.mubr.msk.f32.gmra.mxu0 %vm405_vm1, %v12730_v20  ;;  %v12770_v62 = vsel %vm1266_vm4, %v1342_v31, %v1343_v42  ;;  %v12779_v27 = vsel %vm1266_vm4, %v1343_v42, %v1345_v9  ;;  %v16555_v42 = vld [vmem:[#allocation11_spill] sm:$0xff]  ;;  %v16562_v31 = vld [vmem:[#allocation21_spill] sm:$0xff]  ;;  %v16564_v9 = vld [vmem:[#allocation24_spill] sm:$0xff] }
  0x9d   : > { %10782 = vmatmul.mubr.msk.f32.gmra.mxu1 %vm405_vm1, %v12360_v48  ;;  %10743 = vmatprep.mubr.msk.f32.mxu0 %vm405_vm1, %v12736_v59  ;;  %16553 = vst [vmem:[#allocation58_spill] sm:$0xff] %v12770_v62 }
  0x9e   : > { %10784 = vmatprep.mubr.msk.f32.mxu1 %vm405_vm1, %v12381_v60 }
  0xa0   : > { %10744 = vmatmul.mubr.msk.f32.gmra.mxu0 %vm405_vm1, %v12747_v30 }
  0xa1   : > { %10785 = vmatmul.mubr.msk.f32.gmra.mxu1 %vm405_vm1, %v12383_v53  ;;  %10746 = vmatprep.mubr.msk.f32.mxu0 %vm405_vm1, %v12753_v29 }
  0xa2   : > { %10787 = vmatprep.mubr.msk.f32.mxu1 %vm405_vm1, %v12404_v22 }
  0xa4   : > { %10747 = vmatmul.mubr.msk.f32.gmra.mxu0 %vm405_vm1, %v12764_v5 }
  0xa5   : > { %10788 = vmatmul.mubr.msk.f32.gmra.mxu1 %vm405_vm1, %v12406_v4  ;;  %10749 = vmatprep.mubr.msk.f32.mxu0 %vm405_vm1, %v12770_v62 }
  0xa6   : > { %10790 = vmatprep.mubr.msk.f32.mxu1 %vm405_vm1, %v12427_v55 }
  0xa8   : > { %10750 = vmatmul.mubr.msk.f32.gmra.mxu0 %vm405_vm1, %v12779_v27 }
  0xa9   : > { %10791 = vmatmul.mubr.msk.f32.gmra.mxu1 %vm405_vm1, %v12429_v33  ;;  %10804 = vmatprep.mubr.msk.f32.mxu0 %vm405_vm1, %v12152_v47  ;;  %v12806_v47 = vld [vmem:[#allocation2 + $0x180] sm:$0xff] }
  0xaa   : > { %10793 = vmatprep.mubr.msk.f32.mxu1 %vm405_vm1, %v12450_v16 }
  0xac   : > { %10805 = vmatmul.mubr.msk.f32.vlgmr.msra.gmra.mxu0 %vm405_vm1, %v12167_v54  ;;  %v16554_v54 = vld [vmem:[#allocation9_spill] sm:$0xff] }
  0xad   : > { %10794 = vmatmul.mubr.msk.f32.gmra.mxu1 %vm405_vm1, %v12452_v18  ;;  %10903 = vmatpush3.msk.msra.mxu0 %vm745_vm0, %v12523_v7  ;;  %v16556_v7 = vld [vmem:[#allocation12_spill] sm:$0xff] }
  0xae   : > { %10796 = vmatprep.mubr.msk.f32.mxu1 %vm405_vm1, %v12129_v36  ;;  %10807 = vmatprep.mubr.msk.f32.mxu0 %vm405_vm1, %v12185_v61  ;;  %v12818_v36 = vld [vmem:[#allocation2 + $0x188] sm:$0xff] }
  0xaf   : > { %11002 = vmatprep.subr.msk.mxu0 %vm745_vm0, %v12796_v44 }
  0xb0   : > { %10808 = vmatmul.mubr.msk.f32.gmra.mxu0 %vm405_vm1, %v12198_v2 }
  0xb1   : > { %10797 = vmatmul.mubr.msk.f32.gmra.mxu1 %vm405_vm1, %v12138_v39  ;;  %10810 = vmatprep.mubr.msk.f32.mxu0 %vm405_vm1, %v16554_v54  ;;  %v16557_v39 = vld [vmem:[#allocation14_spill] sm:$0xff] }
  0xb2   : > { %10799 = vmatprep.mubr.msk.f32.mxu1 %vm405_vm1, %v12806_v47 }
  0xb4   : > { %10811 = vmatmul.mubr.msk.f32.gmra.mxu0 %vm405_vm1, %v16555_v42 }
  0xb5   : > { %10800 = vmatmul.mubr.msk.f32.gmra.mxu1 %vm405_vm1, %v12818_v36  ;;  %10813 = vmatprep.mubr.msk.f32.mxu0 %vm405_vm1, %v16556_v7 }
  0xb6   : > { %10854 = vmatprep.mubr.msk.f32.mxu1 %vm405_vm1, %v12517_v38  ;;  %v16560_v38 = vld [vmem:[#allocation18_spill] sm:$0xff] }
  0xb8   : > { %10814 = vmatmul.mubr.msk.f32.gmra.mxu0 %vm405_vm1, %v16557_v39 }
  0xb9   : > { %10855 = vmatmul.mubr.msk.f32.vlgmr.msra.gmra.mxu1 %vm405_vm1, %v12530_v41  ;;  %10816 = vmatprep.mubr.msk.f32.mxu0 %vm405_vm1, %v16558_v10  ;;  %v16561_v41 = vld [vmem:[#allocation20_spill] sm:$0xff] }
  0xba   : > { %10857 = vmatprep.mubr.msk.f32.mxu1 %vm405_vm1, %v12538_v0  ;;  %10953 = vmatpush3.msk.msra.mxu1 %vm745_vm0, %v12583_v12  ;;  %v16563_v12 = vld [vmem:[#allocation23_spill] sm:$0xff] }
  0xbc   : > { %10817 = vmatmul.mubr.msk.f32.gmra.mxu0 %vm405_vm1, %v16559_v49 }
  0xbd   : > { %10858 = vmatmul.mubr.msk.f32.gmra.mxu1 %vm405_vm1, %v12551_v19  ;;  %10819 = vmatprep.mubr.msk.f32.mxu0 %vm405_vm1, %v16560_v38  ;;  %v16576_v19 = vld [vmem:[#allocation37_spill] sm:$0xff] }
  0xbe   : > { %10860 = vmatprep.mubr.msk.f32.mxu1 %vm405_vm1, %v12557_v3  ;;  %v16565_v3 = vld [vmem:[#allocation26_spill] sm:$0xff] }
  0xc0   : > { %10820 = vmatmul.mubr.msk.f32.gmra.mxu0 %vm405_vm1, %v16561_v41 }
  0xc1   : > { %10861 = vmatmul.mubr.msk.f32.gmra.mxu1 %vm405_vm1, %v12568_v58  ;;  %10822 = vmatprep.mubr.msk.f32.mxu0 %vm405_vm1, %v16562_v31  ;;  %v16566_v58 = vld [vmem:[#allocation27_spill] sm:$0xff] }
  0xc2   : > { %10863 = vmatprep.mubr.msk.f32.mxu1 %vm405_vm1, %v12574_v17  ;;  %v16567_v17 = vld [vmem:[#allocation28_spill] sm:$0xff] }
  0xc4   : > { %10823 = vmatmul.mubr.msk.f32.gmra.mxu0 %vm405_vm1, %v16563_v12 }
  0xc5   : > { %10864 = vmatmul.mubr.msk.f32.gmra.mxu1 %vm405_vm1, %v12590_v34  ;;  %10825 = vmatprep.mubr.msk.f32.mxu0 %vm405_vm1, %v16564_v9  ;;  %v16568_v34 = vld [vmem:[#allocation29_spill] sm:$0xff] }
  0xc6   : > { %10866 = vmatprep.mubr.msk.f32.mxu1 %vm405_vm1, %v12596_v51  ;;  %v16569_v51 = vld [vmem:[#allocation30_spill] sm:$0xff] }
  0xc8   : > { %10826 = vmatmul.mubr.msk.f32.gmra.mxu0 %vm405_vm1, %v16565_v3 }
  0xc9   : > { %10867 = vmatmul.mubr.msk.f32.gmra.mxu1 %vm405_vm1, %v12611_v35  ;;  %10828 = vmatprep.mubr.msk.f32.mxu0 %vm405_vm1, %v16566_v58  ;;  %v16570_v35 = vld [vmem:[#allocation31_spill] sm:$0xff] }
  0xca   : > { %10869 = vmatprep.mubr.msk.f32.mxu1 %vm405_vm1, %v12617_v43  ;;  %v16571_v43 = vld [vmem:[#allocation32_spill] sm:$0xff] }
  0xcc   : > { %10829 = vmatmul.mubr.msk.f32.gmra.mxu0 %vm405_vm1, %v16567_v17 }
  0xcd   : > { %10870 = vmatmul.mubr.msk.f32.gmra.mxu1 %vm405_vm1, %v12628_v26  ;;  %10831 = vmatprep.mubr.msk.f32.mxu0 %vm405_vm1, %v16568_v34  ;;  %v16572_v26 = vld [vmem:[#allocation33_spill] sm:$0xff] }
  0xce   : > { %10872 = vmatprep.mubr.msk.f32.mxu1 %vm405_vm1, %v12634_v8  ;;  %v16573_v8 = vld [vmem:[#allocation34_spill] sm:$0xff] }
  0xd0   : > { %10832 = vmatmul.mubr.msk.f32.gmra.mxu0 %vm405_vm1, %v16569_v51 }
  0xd1   : > { %10873 = vmatmul.mubr.msk.f32.gmra.mxu1 %vm405_vm1, %v12645_v6  ;;  %10834 = vmatprep.mubr.msk.f32.mxu0 %vm405_vm1, %v16570_v35  ;;  %v16574_v6 = vld [vmem:[#allocation35_spill] sm:$0xff] }
  0xd2   : > { %10875 = vmatprep.mubr.msk.f32.mxu1 %vm405_vm1, %v12651_v15  ;;  %v1943_v15 = vrot.slane %v12818_v36, 1 }
  0xd4   : > { %10835 = vmatmul.mubr.msk.f32.gmra.mxu0 %vm405_vm1, %v16571_v43 }
  0xd5   : > { %10876 = vmatmul.mubr.msk.f32.gmra.mxu1 %vm405_vm1, %v12662_v25  ;;  %10837 = vmatprep.mubr.msk.f32.mxu0 %vm405_vm1, %v16572_v26  ;;  %v16575_v25 = vld [vmem:[#allocation36_spill] sm:$0xff] }
  0xd6   : > { %10878 = vmatprep.mubr.msk.f32.mxu1 %vm405_vm1, %v12668_v37  ;;  %v1942_v37 = vrot.slane %v12806_v47, 1 }
  0xd8   : > { %10838 = vmatmul.mubr.msk.f32.gmra.mxu0 %vm405_vm1, %v16573_v8  ;;  %v12921_v0 = vsel %vm598_vm3, %v1942_v37, %v1943_v15  ;;  %v2213_v37 = vrot.slane %v12806_v47, 2 }
  0xd9   : > { %10879 = vmatmul.mubr.msk.f32.gmra.mxu1 %vm405_vm1, %v12679_v40  ;;  %10840 = vmatprep.mubr.msk.f32.mxu0 %vm405_vm1, %v16574_v6  ;;  %v545_v40 = vld [vmem:[#allocation2 + $0x190] sm:$0x3] }
  0xda   : > { %10881 = vmatprep.mubr.msk.f32.mxu1 %vm405_vm1, %v12685_v23  ;;  %v16577_v23 = vld [vmem:[#allocation6_spill] sm:$0xff] }
  0xdc   : > { %10841 = vmatmul.mubr.msk.f32.gmra.mxu0 %vm405_vm1, %v12480_v24 }
  0xdd   : > { %10882 = vmatmul.mubr.msk.f32.gmra.mxu1 %vm405_vm1, %v12696_v1  ;;  %10843 = vmatprep.mubr.msk.f32.mxu0 %vm405_vm1, %v16575_v25  ;;  %v1945_v1 = vrot.slane %v545_v40, 1  ;;  %v16578_v25 = vld [vmem:[#allocation8_spill] sm:$0xff] }
  0xde   : > { %10884 = vmatprep.mubr.msk.f32.mxu1 %vm405_vm1, %v12702_v57 }
  0xe0   : > { %10844 = vmatmul.mubr.msk.f32.gmra.mxu0 %vm405_vm1, %v16576_v19 }
  0xe1   : > { %10885 = vmatmul.mubr.msk.f32.gmra.mxu1 %vm405_vm1, %v12713_v11  ;;  %10846 = vmatprep.mubr.msk.f32.mxu0 %vm405_vm1, %v16577_v23  ;;  %v12930_v11 = vsel %vm598_vm3, %v1943_v15, %v1945_v1  ;;  %v2214_v15 = vrot.slane %v12818_v36, 2 }
  0xe2   : > { %10887 = vmatprep.mubr.msk.f32.mxu1 %vm405_vm1, %v12719_v32 }
  0xe4   : > { %10847 = vmatmul.mubr.msk.f32.gmra.mxu0 %vm405_vm1, %v16578_v25 }
  0xe5   : > { %10888 = vmatmul.mubr.msk.f32.gmra.mxu1 %vm405_vm1, %v12730_v20  ;;  %10849 = vmatprep.mubr.msk.f32.mxu0 %vm405_vm1, %v12921_v0 }
  0xe6   : > { %10890 = vmatprep.mubr.msk.f32.mxu1 %vm405_vm1, %v12736_v59 }
  0xe8   : > { %10850 = vmatmul.mubr.msk.f32.gmra.mxu0 %vm405_vm1, %v12930_v11 }
  0xe9   : > { %10891 = vmatmul.mubr.msk.f32.gmra.mxu1 %vm405_vm1, %v12747_v30  ;;  %10904 = vmatprep.mubr.msk.f32.mxu0 %vm405_vm1, %v12147_v45  ;;  %v10606_v1 = vpop.f32.mrf.mxu0  ;;  %v2216_v45 = vrot.slane %v545_v40, 2 }
  0xea   : > { %10893 = vmatprep.mubr.msk.f32.mxu1 %vm405_vm1, %v12753_v29  ;;  %v12955_v29 = vsel %vm1266_vm4, %v2213_v37, %v2214_v15 }
  0xeb   : > { %16579 = vst [vmem:[#allocation9_spill] sm:$0xff] %v12955_v29 }
  0xec   : > { %10905 = vmatmul.mubr.msk.f32.vlgmr.msra.gmra.mxu0 %vm405_vm1, %v12149_v46  ;;  %v16580_v46 = vld [vmem:[#allocation7_spill] sm:$0xff] }
  0xed   : > { %10894 = vmatmul.mubr.msk.f32.gmra.mxu1 %vm405_vm1, %v12764_v5  ;;  %11003 = vmatpush3.msk.msra.mxu0 %vm745_vm0, %v12796_v44  ;;  %v815_v44 = vpop.f32.mrf.mxu0  ;;  %vm7958_vm0 = vcmask 259072  }
  0xee   : > { %10896 = vmatprep.mubr.msk.f32.mxu1 %vm405_vm1, %v12770_v62  ;;  %10907 = vmatprep.mubr.msk.f32.mxu0 %vm405_vm1, %v12159_v52  ;;  %v12966_v62 = vsel %vm1266_vm4, %v2214_v15, %v2216_v45 }
  0xef   : > { %16581 = vst [vmem:[#allocation11_spill] sm:$0xff] %v12966_v62 }
  0xf0   : > { %10908 = vmatmul.mubr.msk.f32.gmra.mxu0 %vm405_vm1, %v12170_v56  ;;  %v16582_v56 = vld [vmem:[#allocation10_spill] sm:$0xff] }
  0xf1   : > { %10897 = vmatmul.mubr.msk.f32.gmra.mxu1 %vm405_vm1, %v12779_v27  ;;  %10910 = vmatprep.mubr.msk.f32.mxu0 %vm405_vm1, %v16580_v46 }
  0xf2   : > { %10899 = vmatprep.mubr.msk.f32.mxu1 %vm405_vm1, %v12955_v29 }
  0xf4   : > { %v10609_v52 = vpop.f32.mrf.mxu0  ;;  %10911 = vmatmul.mubr.msk.f32.gmra.mxu0 %vm405_vm1, %v12188_v63  ;;  %v16584_v63 = vld [vmem:[#allocation13_spill] sm:$0xff] }
  0xf5   : > { %v12970_v40 = vpop.f32.mrf.mxu1  ;;  %10900 = vmatmul.mubr.msk.f32.gmra.mxu1 %vm405_vm1, %v12966_v62  ;;  %10913 = vmatprep.mubr.msk.f32.mxu0 %vm405_vm1, %v16582_v56 }
  0xf6   : > { %v825_v37 = vpop.f32.mrf.mxu0  ;;  %10954 = vmatprep.mubr.msk.f32.mxu1 %vm405_vm1, %v12185_v61 }
  0xf7   : > { %v12978_v46 = vpop.f32.mrf.mxu1 }
  0xf8   : > { %16583 = vst [vmem:[#allocation12_spill] sm:$0xff] %v12978_v46  ;;  %v10612_v15 = vpop.f32.mrf.mxu0  ;;  %10914 = vmatmul.mubr.msk.f32.gmra.mxu0 %vm405_vm1, %v12214_v13 }
  0xf9   : > { %v10656_v45 = vpop.f32.mrf.mxu1  ;;  %10955 = vmatmul.mubr.msk.f32.vlgmr.msra.gmra.mxu1 %vm405_vm1, %v12198_v2  ;;  %10916 = vmatprep.mubr.msk.f32.mxu0 %vm405_vm1, %v16584_v63  ;;  %v16585_v2 = vld [vmem:[#allocation16_spill] sm:$0xff] }
  0xfa   : > { %v12986_v62 = vadd.f32 %v10656_v45, %v10606_v1  ;;  %v835_v56 = vpop.f32.mrf.mxu0  ;;  %10957 = vmatprep.mubr.msk.f32.mxu1 %vm405_vm1, %v16554_v54 }
  0xfb   : > { %v1107_v61 = vpop.f32.mrf.mxu1 }
  0xfc   : > { %v12990_v29 = vadd.f32 %v1107_v61, %v815_v44  ;;  %v10615_v46 = vpop.f32.mrf.mxu0  ;;  %10917 = vmatmul.mubr.msk.f32.gmra.mxu0 %vm405_vm1, %v12238_v21 }
  0xfd   : > { %v10659_v13 = vpop.f32.mrf.mxu1  ;;  %10958 = vmatmul.mubr.msk.f32.gmra.mxu1 %vm405_vm1, %v16555_v42  ;;  %10919 = vmatprep.mubr.msk.f32.mxu0 %vm405_vm1, %v16585_v2  ;;  %v16586_v42 = vld [vmem:[#allocation19_spill] sm:$0xff] }
  0xfe   : > { %v12998_v1 = vadd.f32 %v10659_v13, %v10609_v52  ;;  %v845_v45 = vpop.f32.mrf.mxu0  ;;  %10960 = vmatprep.mubr.msk.f32.mxu1 %vm405_vm1, %v16556_v7 }
  0xff   : > { %v1117_v54 = vpop.f32.mrf.mxu1 }
 0x100   : > { %v13002_v44 = vadd.f32 %v1117_v54, %v825_v37  ;;  %v10618_v63 = vpop.f32.mrf.mxu0  ;;  %10920 = vmatmul.mubr.msk.f32.gmra.mxu0 %vm405_vm1, %v12288_v50 }
 0x101   : > { %v10662_v21 = vpop.f32.mrf.mxu1  ;;  %10961 = vmatmul.mubr.msk.f32.gmra.mxu1 %vm405_vm1, %v16557_v39  ;;  %10922 = vmatprep.mubr.msk.f32.mxu0 %vm405_vm1, %v16586_v42  ;;  %v16587_v39 = vld [vmem:[#allocation22_spill] sm:$0xff] }
 0x102   : > { %v13010_v52 = vadd.f32 %v10662_v21, %v10612_v15  ;;  %v855_v61 = vpop.f32.mrf.mxu0  ;;  %10963 = vmatprep.mubr.msk.f32.mxu1 %vm405_vm1, %v16558_v10 }
 0x103   : > { %v1127_v7 = vpop.f32.mrf.mxu1 }
 0x104   : > { %v13014_v37 = vadd.f32 %v1127_v7, %v835_v56  ;;  %v10621_v13 = vpop.f32.mrf.mxu0  ;;  %10923 = vmatmul.mubr.msk.f32.gmra.mxu0 %vm405_vm1, %v12314_v14 }
 0x105   : > { %v10665_v50 = vpop.f32.mrf.mxu1  ;;  %10964 = vmatmul.mubr.msk.f32.gmra.mxu1 %vm405_vm1, %v16559_v49  ;;  %10925 = vmatprep.mubr.msk.f32.mxu0 %vm405_vm1, %v16587_v39  ;;  %v16588_v49 = vld [vmem:[#allocation25_spill] sm:$0xff] }
 0x106   : > { %v13022_v15 = vadd.f32 %v10665_v50, %v10615_v46  ;;  %v865_v2 = vpop.f32.mrf.mxu0  ;;  %10966 = vmatprep.mubr.msk.f32.mxu1 %vm405_vm1, %v16560_v38 }
 0x107   : > { %v1137_v10 = vpop.f32.mrf.mxu1 }
 0x108   : > { %v13026_v56 = vadd.f32 %v1137_v10, %v845_v45  ;;  %v10624_v54 = vpop.f32.mrf.mxu0  ;;  %10926 = vmatmul.mubr.msk.f32.gmra.mxu0 %vm405_vm1, %v12337_v28 }
 0x109   : > { %v10668_v14 = vpop.f32.mrf.mxu1  ;;  %10967 = vmatmul.mubr.msk.f32.gmra.mxu1 %vm405_vm1, %v16561_v41  ;;  %10928 = vmatprep.mubr.msk.f32.mxu0 %vm405_vm1, %v16588_v49  ;;  %v11824_v49 = vld [vmem:[#allocation2 + $0x170] sm:$0xff] }
 0x10a   : > { %v13034_v46 = vadd.f32 %v10668_v14, %v10618_v63  ;;  %v875_v21 = vpop.f32.mrf.mxu0  ;;  %10969 = vmatprep.mubr.msk.f32.mxu1 %vm405_vm1, %v16562_v31 }
 0x10b   : > { %v1147_v38 = vpop.f32.mrf.mxu1 }
 0x10c   : > { %v13038_v45 = vadd.f32 %v1147_v38, %v855_v61  ;;  %v10627_v42 = vpop.f32.mrf.mxu0  ;;  %10929 = vmatmul.mubr.msk.f32.gmra.mxu0 %vm405_vm1, %v12360_v48 }
 0x10d   : > { %v10671_v28 = vpop.f32.mrf.mxu1  ;;  %10970 = vmatmul.mubr.msk.f32.gmra.mxu1 %vm405_vm1, %v16563_v12  ;;  %10931 = vmatprep.mubr.msk.f32.mxu0 %vm405_vm1, %v12381_v60 }
 0x10e   : > { %v13046_v41 = vadd.f32 %v10671_v28, %v10621_v13  ;;  %v885_v63 = vpop.f32.mrf.mxu0  ;;  %10972 = vmatprep.mubr.msk.f32.mxu1 %vm405_vm1, %v16564_v9 }
 0x10f   : > { %v1157_v31 = vpop.f32.mrf.mxu1 }
 0x110   : > { %v13050_v61 = vadd.f32 %v1157_v31, %v865_v2  ;;  %v10630_v7 = vpop.f32.mrf.mxu0  ;;  %10932 = vmatmul.mubr.msk.f32.gmra.mxu0 %vm405_vm1, %v12383_v53 }
 0x111   : > { %v10674_v48 = vpop.f32.mrf.mxu1  ;;  %10973 = vmatmul.mubr.msk.f32.gmra.mxu1 %vm405_vm1, %v16565_v3  ;;  %10934 = vmatprep.mubr.msk.f32.mxu0 %vm405_vm1, %v12404_v22 }
 0x112   : > { %v13058_v60 = vadd.f32 %v10674_v48, %v10624_v54  ;;  %v13060_v12 = vpop.f32.mrf.mxu0  ;;  %10975 = vmatprep.mubr.msk.f32.mxu1 %vm405_vm1, %v16566_v58 }
 0x113   : > { %v1167_v9 = vpop.f32.mrf.mxu1 }
 0x114   : > { %v13064_v13 = vadd.f32 %v1167_v9, %v875_v21  ;;  %v10633_v50 = vpop.f32.mrf.mxu0  ;;  %10935 = vmatmul.mubr.msk.f32.gmra.mxu0 %vm405_vm1, %v12406_v4 }
 0x115   : > { %v10677_v53 = vpop.f32.mrf.mxu1  ;;  %10976 = vmatmul.mubr.msk.f32.gmra.mxu1 %vm405_vm1, %v16567_v17  ;;  %10937 = vmatprep.mubr.msk.f32.mxu0 %vm405_vm1, %v12427_v55 }
 0x116   : > { %v13072_v22 = vadd.f32 %v10677_v53, %v10627_v42  ;;  %v13074_v3 = vpop.f32.mrf.mxu0  ;;  %10978 = vmatprep.mubr.msk.f32.mxu1 %vm405_vm1, %v16568_v34 }
 0x117   : > { %v1177_v58 = vpop.f32.mrf.mxu1 }
 0x118   : > { %v13078_v39 = vadd.f32 %v1177_v58, %v885_v63  ;;  %v10636_v2 = vpop.f32.mrf.mxu0  ;;  %10938 = vmatmul.mubr.msk.f32.gmra.mxu0 %vm405_vm1, %v12429_v33  ;;  %v16589_v63 = vld [vmem:[#allocation36_spill] sm:$0xff] }
 0x119   : > { %v10680_v4 = vpop.f32.mrf.mxu1  ;;  %10979 = vmatmul.mubr.msk.f32.gmra.mxu1 %vm405_vm1, %v16569_v51  ;;  %10940 = vmatprep.mubr.msk.f32.mxu0 %vm405_vm1, %v12450_v16  ;;  %v11823_v51 = vld [vmem:[#allocation2 + $0x168] sm:$0xff] }
 0x11a   : > { %v13086_v55 = vadd.f32 %v10680_v4, %v10630_v7  ;;  %v13088_v17 = vpop.f32.mrf.mxu0  ;;  %10981 = vmatprep.mubr.msk.f32.mxu1 %vm405_vm1, %v16570_v35 }
 0x11b   : > { %v13092_v34 = vpop.f32.mrf.mxu1 }
 0x11c   : > { %v10639_v10 = vpop.f32.mrf.mxu0  ;;  %10941 = vmatmul.mubr.msk.f32.gmra.mxu0 %vm405_vm1, %v12452_v18 }
 0x11d   : > { %v10683_v33 = vpop.f32.mrf.mxu1  ;;  %10982 = vmatmul.mubr.msk.f32.gmra.mxu1 %vm405_vm1, %v16571_v43  ;;  %10943 = vmatprep.mubr.msk.f32.mxu0 %vm405_vm1, %v11823_v51  ;;  %v16592_v51 = vld [vmem:[#allocation40_spill] sm:$0xff] }
 0x11e   : > { %v13099_v16 = vadd.f32 %v10683_v33, %v10633_v50  ;;  %v13101_v54 = vpop.f32.mrf.mxu0  ;;  %10984 = vmatprep.mubr.msk.f32.mxu1 %vm405_vm1, %v16572_v26  ;;  %v13118_v26 = vld [vmem:[#allocation2 + $0x198] sm:$0xff] }
 0x11f   : > { %v13105_v35 = vpop.f32.mrf.mxu1  ;;  %v2753_v50 = vrot.slane %v13118_v26, 1 }
 0x120   : > { %v10642_v14 = vpop.f32.mrf.mxu0  ;;  %10944 = vmatmul.mubr.msk.f32.gmra.mxu0 %vm405_vm1, %v11824_v49 }
 0x121   : > { %v10686_v18 = vpop.f32.mrf.mxu1  ;;  %10985 = vmatmul.mubr.msk.f32.gmra.mxu1 %vm405_vm1, %v16573_v8  ;;  %10946 = vmatprep.mubr.msk.f32.mxu0 %vm405_vm1, %v12806_v47  ;;  %v13128_v8 = vld [vmem:[#allocation2 + $0x1a0] sm:$0xff] }
 0x122   : > { %v13112_v43 = vadd.f32 %v10686_v18, %v10636_v2  ;;  %v13114_v21 = vpop.f32.mrf.mxu0  ;;  %10987 = vmatprep.mubr.msk.f32.mxu1 %vm405_vm1, %v16574_v6  ;;  %v2754_v58 = vrot.slane %v13128_v8, 1  ;;  %v13154_v2 = vld [vmem:[#allocation2 + $0x1a8] sm:$0x3] }
 0x123   : > { %v13120_v38 = vpop.f32.mrf.mxu1  ;;  %v2756_v49 = vrot.slane %v13154_v2, 1 }
 0x124   : > { %v10645_v42 = vpop.f32.mrf.mxu0  ;;  %10947 = vmatmul.mubr.msk.f32.gmra.mxu0 %vm405_vm1, %v12818_v36 }
 0x125   : > { %v10689_v28 = vpop.f32.mrf.mxu1  ;;  %10988 = vmatmul.mubr.msk.f32.gmra.mxu1 %vm405_vm1, %v12480_v24  ;;  %10949 = vmatprep.mubr.msk.f32.mxu0 %vm405_vm1, %v13118_v26  ;;  %v16590_v24 = vld [vmem:[#allocation38_spill] sm:$0xff] }
 0x126   : > { %v13130_v47 = vadd.f32 %v10689_v28, %v10639_v10  ;;  %v13132_v6 = vpop.f32.mrf.mxu0  ;;  %10990 = vmatprep.mubr.msk.f32.mxu1 %vm405_vm1, %v16589_v63 }
 0x127   : > { %v13136_v31 = vpop.f32.mrf.mxu1 }
 0x128   : > { %v10648_v7 = vpop.f32.mrf.mxu0  ;;  %10950 = vmatmul.mubr.msk.f32.gmra.mxu0 %vm405_vm1, %v13128_v8 }
 0x129   : > { %v10692_v36 = vpop.f32.mrf.mxu1  ;;  %10991 = vmatmul.mubr.msk.f32.gmra.mxu1 %vm405_vm1, %v16576_v19  ;;  %11004 = vmatprep.mubr.msk.f32.mxu0 %vm405_vm1, %v16590_v24  ;;  %v16591_v19 = vld [vmem:[#allocation39_spill] sm:$0xff] }
 0x12a   : > { %v13144_v48 = vadd.f32 %v10692_v36, %v10642_v14  ;;  %v13146_v9 = vpop.f32.mrf.mxu0  ;;  %10993 = vmatprep.mubr.msk.f32.mxu1 %vm405_vm1, %v16577_v23 }
 0x12b   : > { %v13151_v53 = vpop.f32.mrf.mxu1 }
 0x12c   : > { %v10706_v4 = vpop.f32.mrf.mxu0  ;;  %11005 = vmatmul.mubr.msk.f32.vlgmr.msra.gmra.mxu0 %vm405_vm1, %v16591_v19 }
 0x12d   : > { %v10695_v10 = vpop.f32.mrf.mxu1  ;;  %v1642_v33 = vadd.f32 %v10706_v4, %v12986_v62  ;;  %10994 = vmatmul.mubr.msk.f32.gmra.mxu1 %vm405_vm1, %v16578_v25  ;;  %11007 = vmatprep.mubr.msk.f32.mxu0 %vm405_vm1, %v16592_v51  ;;  %v2755_v62 = vsel %vm598_vm3, %v2753_v50, %v2754_v58  ;;  %v16593_v25 = vld [vmem:[#allocation41_spill] sm:$0xff] }
 0x12e   : > { %v13163_v23 = vadd.f32 %v10695_v10, %v10645_v42  ;;  %v1482_v14 = vpop.f32.mrf.mxu0  ;;  %10996 = vmatprep.mubr.msk.f32.mxu1 %vm405_vm1, %v12921_v0  ;;  %v16594_v0 = vld [vmem:[#allocation42_spill] sm:$0xff] }
 0x12f   : > { %v13168_v18 = vpop.f32.mrf.mxu1  ;;  %v13171_v28 = vadd.f32 %v1482_v14, %v12990_v29  ;;  %v2757_v29 = vsel %vm598_vm3, %v2754_v58, %v2756_v49 }
 0x130   : > { %v10709_v63 = vpop.f32.mrf.mxu0  ;;  %11008 = vmatmul.mubr.msk.f32.gmra.mxu0 %vm405_vm1, %v16593_v25 }
 0x131   : > { %v10698_v36 = vpop.f32.mrf.mxu1  ;;  %v1644_v42 = vadd.f32 %v10709_v63, %v12998_v1  ;;  %10997 = vmatmul.mubr.msk.f32.gmra.mxu1 %vm405_vm1, %v12930_v11  ;;  %11010 = vmatprep.mubr.msk.f32.mxu0 %vm405_vm1, %v16594_v0  ;;  %v16595_v1 = vld [vmem:[#allocation43_spill] sm:$0xff]  ;;  %v16597_v63 = vld [vmem:[#allocation45_spill] sm:$0xff] }
 0x132   : > { %v13181_v24 = vadd.f32 %v10698_v36, %v10648_v7  ;;  %v1492_v4 = vpop.f32.mrf.mxu0  ;;  %10999 = vmatprep.mubr.msk.f32.mxu1 %vm405_vm1, %v2755_v62  ;;  %v16596_v7 = vld [vmem:[#allocation44_spill] sm:$0xff]  ;;  %v16598_v36 = vld [vmem:[#allocation46_spill] sm:$0xff] }
 0x133   : > { %v13185_v50 = vpop.f32.mrf.mxu1  ;;  %v13188_v19 = vadd.f32 %v1492_v4, %v13002_v44 }
 0x134   : > { %v10712_v10 = vpop.f32.mrf.mxu0  ;;  %11011 = vmatmul.mubr.msk.f32.gmra.mxu0 %vm405_vm1, %v16595_v1 }
 0x135   : > { %v10701_v11 = vpop.f32.mrf.mxu1  ;;  %v1646_v51 = vadd.f32 %v10712_v10, %v13010_v52  ;;  %11000 = vmatmul.mubr.msk.f32.gmra.mxu1 %vm405_vm1, %v2757_v29  ;;  %11013 = vmatprep.mubr.msk.f32.mxu0 %vm405_vm1, %v16596_v7  ;;  %v16599_v10 = vld [vmem:[#allocation47_spill] sm:$0xff] }
 0x136   : > { %v13197_v14 = vadd.f32 %v10701_v11, %v12970_v40  ;;  %v1502_v58 = vpop.f32.mrf.mxu0 }
 0x137   : > { %v13199_v49 = vpop.f32.mrf.mxu1  ;;  %v13202_v44 = vadd.f32 %v1502_v58, %v13014_v37 }
 0x138   : > { %v10715_v62 = vpop.f32.mrf.mxu0  ;;  %11014 = vmatmul.mubr.msk.f32.gmra.mxu0 %vm405_vm1, %v16597_v63 }
 0x139   : > { %v1648_v52 = vadd.f32 %v10715_v62, %v13022_v15  ;;  %v10756_v25 = vpop.f32.mrf.mxu1  ;;  %11016 = vmatprep.mubr.msk.f32.mxu0 %vm405_vm1, %v16598_v36  ;;  %v16600_v15 = vld [vmem:[#allocation48_spill] sm:$0xff]  ;;  %v16602_v36 = vld [vmem:[#allocation50_spill] sm:$0xff] }
 0x13a   : > { %v13209_v0 = vadd.f32 %v10756_v25, %v1642_v33  ;;  %v1512_v40 = vpop.f32.mrf.mxu0  ;;  %v16601_v25 = vld [vmem:[#allocation49_spill] sm:$0xff] }
 0x13b   : > { %v13212_v4 = vadd.f32 %v1512_v40, %v13026_v56  ;;  %v13214_v29 = vpop.f32.mrf.mxu1  ;;  %v9360_v56 = vld [vmem:[%s16336_s3 + $0x18] sm:$0xff] }
 0x13c   : > { %v10718_v37 = vpop.f32.mrf.mxu0  ;;  %11017 = vmatmul.mubr.msk.f32.gmra.mxu0 %vm405_vm1, %v16599_v10  ;;  %11052 = vmatprep.subr.mxu1 %v9360_v56 }
 0x13d   : > { %v1650_v1 = vadd.f32 %v10718_v37, %v13034_v46  ;;  %v10759_v11 = vpop.f32.mrf.mxu1  ;;  %11019 = vmatprep.mubr.msk.f32.mxu0 %vm405_vm1, %v16600_v15  ;;  %11053 = vmatpush3.msra.mxu1 %v9360_v56  ;;  %v16603_v15 = vld [vmem:[#allocation51_spill] sm:$0xff] }
 0x13e   : > { %v13221_v7 = vadd.f32 %v10759_v11, %v1644_v42  ;;  %v1522_v33 = vpop.f32.mrf.mxu0 }
 0x13f   : > { %v13227_v58 = vadd.f32 %v1522_v33, %v13038_v45  ;;  %v13229_v62 = vpop.f32.mrf.mxu1 }
 0x140   : > { %v10721_v63 = vpop.f32.mrf.mxu0  ;;  %11020 = vmatmul.mubr.msk.f32.gmra.mxu0 %vm405_vm1, %v16601_v25 }
 0x141   : > { %v1652_v46 = vadd.f32 %v10721_v63, %v13046_v41  ;;  %v10762_v42 = vpop.f32.mrf.mxu1  ;;  %11022 = vmatprep.mubr.msk.f32.mxu0 %vm405_vm1, %v16602_v36  ;;  %v16604_v41 = vld [vmem:[#allocation52_spill] sm:$0xff]  ;;  %v16605_v36 = vld [vmem:[#allocation53_spill] sm:$0xff] }
 0x142   : > { %v13236_v40 = vadd.f32 %v10762_v42, %v1646_v51  ;;  %v1532_v37 = vpop.f32.mrf.mxu0 }
 0x143   : > { %v13239_v45 = vadd.f32 %v1532_v37, %v13050_v61  ;;  %v13241_v10 = vpop.f32.mrf.mxu1 }
 0x144   : > { %v10724_v11 = vpop.f32.mrf.mxu0  ;;  %11023 = vmatmul.mubr.msk.f32.gmra.mxu0 %vm405_vm1, %v16603_v15 }
 0x145   : > { %v1654_v33 = vadd.f32 %v10724_v11, %v13058_v60  ;;  %v10765_v56 = vpop.f32.mrf.mxu1  ;;  %11025 = vmatprep.mubr.msk.f32.mxu0 %vm405_vm1, %v16604_v41  ;;  %v16606_v60 = vld [vmem:[#allocation54_spill] sm:$0xff] }
 0x146   : > { %v13248_v63 = vadd.f32 %v10765_v56, %v1648_v52  ;;  %v1542_v51 = vpop.f32.mrf.mxu0 }
 0x147   : > { %v13251_v25 = vadd.f32 %v1542_v51, %v13064_v13  ;;  %v13253_v61 = vpop.f32.mrf.mxu1  ;;  %v16608_v51 = vld [vmem:[#allocation55_spill] sm:$0xff] }
 0x148   : > { %v10727_v42 = vpop.f32.mrf.mxu0  ;;  %11026 = vmatmul.mubr.msk.f32.gmra.mxu0 %vm405_vm1, %v16605_v36  ;;  %v1188_v36 = vadd.f32 %v13092_v34, %v13060_v12 }
 0x149   : > { %v1656_v37 = vadd.f32 %v10727_v42, %v13072_v22  ;;  %v10768_v15 = vpop.f32.mrf.mxu1  ;;  %11028 = vmatprep.mubr.msk.f32.mxu0 %vm405_vm1, %v16606_v60 }
 0x14a   : > { %v13260_v11 = vadd.f32 %v10768_v15, %v1650_v1  ;;  %v1552_v52 = vpop.f32.mrf.mxu0 }
 0x14b   : > { %v13263_v56 = vadd.f32 %v1552_v52, %v13078_v39  ;;  %v13265_v13 = vpop.f32.mrf.mxu1 }
 0x14c   : > { %v10730_v41 = vpop.f32.mrf.mxu0  ;;  %11029 = vmatmul.mubr.msk.f32.gmra.mxu0 %vm405_vm1, %v16608_v51 }
 0x14d   : > { %16607 = vst [vmem:[#allocation14_spill] sm:$0xff] %v13263_v56  ;;  %v1658_v22 = vadd.f32 %v10730_v41, %v13086_v55  ;;  %v10771_v42 = vpop.f32.mrf.mxu1  ;;  %11031 = vmatprep.mubr.msk.f32.mxu0 %vm405_vm1, %v12702_v57  ;;  %v16609_v56 = vld [vmem:[#allocation56_spill] sm:$0xff] }
 0x14e   : > { %v13274_v1 = vadd.f32 %v10771_v42, %v1652_v46  ;;  %v1562_v15 = vpop.f32.mrf.mxu0 }
 0x14f   : > { %v13276_v39 = vadd.f32 %v1562_v15, %v1188_v36  ;;  %v13278_v60 = vpop.f32.mrf.mxu1 }
 0x150   : > { %v10733_v52 = vpop.f32.mrf.mxu0  ;;  %11032 = vmatmul.mubr.msk.f32.gmra.mxu0 %vm405_vm1, %v16609_v56 }
 0x151   : > { %v1660_v51 = vadd.f32 %v10733_v52, %v13099_v16  ;;  %v10774_v12 = vpop.f32.mrf.mxu1  ;;  %11034 = vmatprep.mubr.msk.f32.mxu0 %vm405_vm1, %v12719_v32 }
 0x152   : > { %v13285_v55 = vadd.f32 %v10774_v12, %v1654_v33  ;;  %v13287_v57 = vpop.f32.mrf.mxu0 }
 0x153   : > { %v13289_v34 = vpop.f32.mrf.mxu1 }
 0x154   : > { %v10736_v46 = vpop.f32.mrf.mxu0  ;;  %11035 = vmatmul.mubr.msk.f32.gmra.mxu0 %vm405_vm1, %v12730_v20  ;;  %v16610_v20 = vld [vmem:[#allocation57_spill] sm:$0xff] }
 0x155   : > { %v1662_v41 = vadd.f32 %v10736_v46, %v13112_v43  ;;  %v10777_v36 = vpop.f32.mrf.mxu1  ;;  %11037 = vmatprep.mubr.msk.f32.mxu0 %vm405_vm1, %v12736_v59 }
 0x156   : > { %v13296_v16 = vadd.f32 %v10777_v36, %v1656_v37  ;;  %v13298_v56 = vpop.f32.mrf.mxu0 }
 0x157   : > { %v13300_v32 = vpop.f32.mrf.mxu1 }
 0x158   : > { %v10739_v33 = vpop.f32.mrf.mxu0  ;;  %11038 = vmatmul.mubr.msk.f32.gmra.mxu0 %vm405_vm1, %v12747_v30  ;;  %v16612_v30 = vld [vmem:[#allocation58_spill] sm:$0xff] }
 0x159   : > { %v1664_v42 = vadd.f32 %v10739_v33, %v13130_v47  ;;  %v10780_v15 = vpop.f32.mrf.mxu1  ;;  %11040 = vmatprep.mubr.msk.f32.mxu0 %vm405_vm1, %v16610_v20  ;;  %v3024_v47 = vrot.slane %v13118_v26, 2  ;;  %v3025_v33 = vrot.slane %v13128_v8, 2  ;;  %v3027_v8 = vrot.slane %v13154_v2, 2 }
 0x15a   : > { %v13307_v43 = vadd.f32 %v10780_v15, %v1658_v22  ;;  %v13309_v52 = vpop.f32.mrf.mxu0  ;;  %v9359_v15 = vld [vmem:[%s16336_s3 + $0x10] sm:$0xff] }
 0x15b   : > { %v13311_v59 = vpop.f32.mrf.mxu1  ;;  %11054 = vmatprep.subr.mxu1 %v9359_v15  ;;  %v3028_v2 = vsel %vm1266_vm4, %v3025_v33, %v3027_v8 }
 0x15c   : > { %16611 = vst [vmem:[#allocation15_spill] sm:$0xff] %v13311_v59  ;;  %v10742_v37 = vpop.f32.mrf.mxu0  ;;  %11041 = vmatmul.mubr.msk.f32.gmra.mxu0 %vm405_vm1, %v12764_v5  ;;  %11055 = vmatpush3.msra.mxu1 %v9359_v15  ;;  %v16616_v59 = vld [vmem:[#allocation11_spill] sm:$0xff] }
 0x15d   : > { %v1666_v12 = vadd.f32 %v10742_v37, %v13144_v48  ;;  %v10783_v46 = vpop.f32.mrf.mxu1  ;;  %11043 = vmatprep.mubr.msk.f32.mxu0 %vm405_vm1, %v16612_v30  ;;  %v3026_v30 = vsel %vm1266_vm4, %v3024_v47, %v3025_v33 }
 0x15e   : > { %v13319_v36 = vadd.f32 %v10783_v46, %v1660_v51  ;;  %v13321_v22 = vpop.f32.mrf.mxu0  ;;  %v16615_v51 = vld [vmem:[#allocation9_spill] sm:$0xff] }
 0x15f   : > { %16613 = vst [vmem:[#allocation17_spill] sm:$0xff] %v13321_v22  ;;  %v13327_v20 = vpop.f32.mrf.mxu1 }
 0x160   : > { %16614 = vst [vmem:[#allocation18_spill] sm:$0xff] %v13327_v20  ;;  %v10745_v5 = vpop.f32.mrf.mxu0  ;;  %11044 = vmatmul.mubr.msk.f32.gmra.mxu0 %vm405_vm1, %v12779_v27 }
 0x161   : > { %v1668_v26 = vadd.f32 %v10745_v5, %v13163_v23  ;;  %v10786_v48 = vpop.f32.mrf.mxu1  ;;  %11046 = vmatprep.mubr.msk.f32.mxu0 %vm405_vm1, %v16615_v51 }
 0x162   : > { %v13335_v37 = vadd.f32 %v10786_v48, %v1662_v41  ;;  %v13337_v46 = vpop.f32.mrf.mxu0 }
 0x163   : > { %v13340_v20 = vpop.f32.mrf.mxu1 }
 0x164   : > { %v10748_v22 = vpop.f32.mrf.mxu0  ;;  %11047 = vmatmul.mubr.msk.f32.gmra.mxu0 %vm405_vm1, %v16616_v59 }
 0x165   : > { %v13345_v27 = vadd.f32 %v10748_v22, %v13181_v24  ;;  %v10789_v23 = vpop.f32.mrf.mxu1  ;;  %11049 = vmatprep.mubr.msk.f32.mxu0 %vm405_vm1, %v3026_v30 }
 0x166   : > { %v13349_v41 = vadd.f32 %v10789_v23, %v1664_v42  ;;  %v13351_v15 = vpop.f32.mrf.mxu0 }
 0x167   : > { %v13353_v5 = vpop.f32.mrf.mxu1 }
 0x168   : > { %16617 = vst [vmem:[#allocation20_spill] sm:$0xff] %v13353_v5  ;;  %v10751_v47 = vpop.f32.mrf.mxu0  ;;  %11050 = vmatmul.mubr.msk.f32.gmra.mxu0 %vm405_vm1, %v3028_v2  ;;  %vm8046_vm1 = vcmask 257024  }
 0x169   : > { %v13357_v48 = vadd.f32 %v10751_v47, %v13197_v14  ;;  %v10792_v59 = vpop.f32.mrf.mxu1 }
 0x16a   : > { %v13359_v24 = vadd.f32 %v10792_v59, %v1666_v12  ;;  %v13361_v22 = vpop.f32.mrf.mxu0  ;;  %v16621_v12 = vmov 0.0  }
 0x16b   : > { %16618 = vst [vmem:[#allocation21_spill] sm:$0xff] %v13361_v22  ;;  %v13363_v51 = vpop.f32.mrf.mxu1  ;;  %3371 = vst.msk [vmem:[#allocation3 + $0x20] sm:$0xff] %vm3365_vm5, %v16621_v12 }
 0x16c   : > { %16619 = vst [vmem:[#allocation23_spill] sm:$0xff] %v13363_v51  ;;  %v10806_v33 = vpop.f32.mrf.mxu0  ;;  %3366 = vst.msk [vmem:[#allocation3] sm:$0xff] %vm3365_vm5, %v16621_v12 }
 0x16d   : > { %v10795_v42 = vpop.f32.mrf.mxu1  ;;  %v13366_v8 = vadd.f32 %v10806_v33, %v13209_v0  ;;  %3367 = vst.msk [vmem:[#allocation3 + $0x8] sm:$0xff] %vm3365_vm5, %v16621_v12  ;;  %3370 = vst.msk [vmem:[#allocation3 + $0x18] sm:$0xff] %vm3365_vm5, %v16621_v12 }
 0x16e   : > { %v13368_v30 = vadd.f32 %v10795_v42, %v1668_v26  ;;  %v13370_v23 = vpop.f32.mrf.mxu0  ;;  %3373 = vst.msk [vmem:[#allocation3 + $0x30] sm:$0xff] %vm3365_vm5, %v16621_v12  ;;  %3374 = vst.msk [vmem:[#allocation3 + $0x38] sm:$0xff] %vm3365_vm5, %v16621_v12 }
 0x16f   : > { %v13372_v2 = vpop.f32.mrf.mxu1  ;;  %3376 = vst.msk [vmem:[#allocation3 + $0x48] sm:$0xff] %vm3365_vm5, %v16621_v12  ;;  %3377 = vst.msk [vmem:[#allocation3 + $0x50] sm:$0xff] %vm3365_vm5, %v16621_v12 }
 0x170   : > { %16620 = vst [vmem:[#allocation24_spill] sm:$0xff] %v13372_v2  ;;  %v10809_v14 = vpop.f32.mrf.mxu0  ;;  %3379 = vst.msk [vmem:[#allocation3 + $0x60] sm:$0xff] %vm3365_vm5, %v16621_v12 }
 0x171   : > { %3380 = vst.msk [vmem:[#allocation3 + $0x68] sm:$0xff] %vm3365_vm5, %v16621_v12  ;;  %3382 = vst.msk [vmem:[#allocation3 + $0x78] sm:$0xff] %vm3365_vm5, %v16621_v12  ;;  %v10798_v0 = vpop.f32.mrf.mxu1  ;;  %v13447_v26 = vadd.f32 %v10809_v14, %v13221_v7 }
 0x172   : > { %3383 = vst.msk [vmem:[#allocation3 + $0x80] sm:$0xff] %vm3365_vm5, %v16621_v12  ;;  %3385 = vst.msk [vmem:[#allocation3 + $0x90] sm:$0xff] %vm3365_vm5, %v16621_v12  ;;  %v13486_v7 = vadd.f32 %v10798_v0, %v13345_v27  ;;  %v13488_v47 = vpop.f32.mrf.mxu0 }
 0x173   : > { %3386 = vst.msk [vmem:[#allocation3 + $0x98] sm:$0xff] %vm3365_vm5, %v16621_v12  ;;  %3388 = vst.msk [vmem:[#allocation3 + $0xa8] sm:$0xff] %vm3365_vm5, %v16621_v12  ;;  %v13490_v59 = vpop.f32.mrf.mxu1  ;;  %v3455_v0 = vld [vmem:[#allocation3] sm:$0xff] }
 0x174   : > { %3389 = vst.msk [vmem:[#allocation3 + $0xb0] sm:$0xff] %vm3365_vm5, %v16621_v12  ;;  %3391 = vst.msk [vmem:[#allocation3 + $0xc0] sm:$0xff] %vm3365_vm5, %v16621_v12  ;;  %v10812_v33 = vpop.f32.mrf.mxu0  ;;  %11108 = vmatprep.mubr.msk.f32.mxu0 %vm3365_vm5, %v3455_v0 }
 0x175   : > { %3392 = vst.msk [vmem:[#allocation3 + $0xc8] sm:$0xff] %vm3365_vm5, %v16621_v12  ;;  %3394 = vst.msk [vmem:[#allocation3 + $0xd8] sm:$0xff] %vm3365_vm5, %v16621_v12  ;;  %v10801_v42 = vpop.f32.mrf.mxu1  ;;  %v13493_v14 = vadd.f32 %v10812_v33, %v13236_v40  ;;  %v3509_v40 = vld [vmem:[%s16336_s3] sm:$0xff]  ;;  %v3559_v33 = vrot.slane %v3455_v0, 1 }
 0x176   : > { %3395 = vst.msk [vmem:[#allocation3 + $0xe0] sm:$0xff] %vm3365_vm5, %v16621_v12  ;;  %3397 = vst.msk [vmem:[#allocation3 + $0xf0] sm:$0xff] %vm3365_vm5, %v16621_v12  ;;  %v13498_v2 = vpop.f32.mrf.mxu0 }
 0x177   : > { %3398 = vst.msk [vmem:[#allocation3 + $0xf8] sm:$0xff] %vm3365_vm5, %v16621_v12  ;;  %3400 = vst.msk [vmem:[#allocation3 + $0x108] sm:$0xff] %vm3365_vm5, %v16621_v12  ;;  %v13503_v27 = vpop.f32.mrf.mxu1 }
 0x178   : > { %3401 = vst.msk [vmem:[#allocation3 + $0x110] sm:$0xff] %vm3365_vm5, %v16621_v12  ;;  %3403 = vst.msk [vmem:[#allocation3 + $0x120] sm:$0xff] %vm3365_vm5, %v16621_v12 }
 0x179   : > { %3404 = vst.msk [vmem:[#allocation3 + $0x128] sm:$0xff] %vm3365_vm5, %v16621_v12  ;;  %3406 = vst.msk [vmem:[#allocation3 + $0x138] sm:$0xff] %vm3365_vm5, %v16621_v12 }
 0x17a   : > { %3407 = vst.msk [vmem:[#allocation3 + $0x140] sm:$0xff] %vm3365_vm5, %v16621_v12  ;;  %3409 = vst.msk [vmem:[#allocation3 + $0x150] sm:$0xff] %vm3365_vm5, %v16621_v12 }
 0x17b   : > { %3410 = vst.msk [vmem:[#allocation3 + $0x158] sm:$0xff] %vm3365_vm5, %v16621_v12  ;;  %3412 = vst.msk [vmem:[#allocation3 + $0x168] sm:$0xff] %vm3365_vm5, %v16621_v12 }
 0x17c   : > { %3413 = vst.msk [vmem:[#allocation3 + $0x170] sm:$0xff] %vm3365_vm5, %v16621_v12  ;;  %3415 = vst.msk [vmem:[#allocation3 + $0x180] sm:$0xff] %vm3365_vm5, %v16621_v12 }
 0x17d   : > { %3416 = vst.msk [vmem:[#allocation3 + $0x188] sm:$0xff] %vm3365_vm5, %v16621_v12  ;;  %3418 = vst.msk [vmem:[#allocation3 + $0x198] sm:$0xff] %vm3365_vm5, %v16621_v12 }
 0x17e   : > { %3419 = vst.msk [vmem:[#allocation3 + $0x1a0] sm:$0xff] %vm3365_vm5, %v16621_v12  ;;  %16622 = vst [vmem:[#allocation26_spill] sm:$0xff] %v13447_v26  ;;  %v13496_v26 = vadd.f32 %v10801_v42, %v13357_v48 }
 0x17f   : > { %3372 = vst.msk [vmem:[#allocation3 + $0x28] sm:$0x3] %vm3368_vm6, %v16621_v12  ;;  %3369 = vst.msk [vmem:[#allocation3 + $0x10] sm:$0x3] %vm3368_vm6, %v16621_v12 }
 0x180   : > { %3375 = vst.msk [vmem:[#allocation3 + $0x40] sm:$0x3] %vm3368_vm6, %v16621_v12  ;;  %3378 = vst.msk [vmem:[#allocation3 + $0x58] sm:$0x3] %vm3368_vm6, %v16621_v12 }
 0x181   : > { %3381 = vst.msk [vmem:[#allocation3 + $0x70] sm:$0x3] %vm3368_vm6, %v16621_v12  ;;  %3384 = vst.msk [vmem:[#allocation3 + $0x88] sm:$0x3] %vm3368_vm6, %v16621_v12 }
 0x182   : > { %3387 = vst.msk [vmem:[#allocation3 + $0xa0] sm:$0x3] %vm3368_vm6, %v16621_v12  ;;  %3390 = vst.msk [vmem:[#allocation3 + $0xb8] sm:$0x3] %vm3368_vm6, %v16621_v12 }
 0x183   : > { %3393 = vst.msk [vmem:[#allocation3 + $0xd0] sm:$0x3] %vm3368_vm6, %v16621_v12  ;;  %3396 = vst.msk [vmem:[#allocation3 + $0xe8] sm:$0x3] %vm3368_vm6, %v16621_v12 }
 0x184   : > { %3399 = vst.msk [vmem:[#allocation3 + $0x100] sm:$0x3] %vm3368_vm6, %v16621_v12  ;;  %3402 = vst.msk [vmem:[#allocation3 + $0x118] sm:$0x3] %vm3368_vm6, %v16621_v12 }
 0x185   : > { %3405 = vst.msk [vmem:[#allocation3 + $0x130] sm:$0x3] %vm3368_vm6, %v16621_v12  ;;  %3408 = vst.msk [vmem:[#allocation3 + $0x148] sm:$0x3] %vm3368_vm6, %v16621_v12 }
 0x186   : > { %3411 = vst.msk [vmem:[#allocation3 + $0x160] sm:$0x3] %vm3368_vm6, %v16621_v12  ;;  %3414 = vst.msk [vmem:[#allocation3 + $0x178] sm:$0x3] %vm3368_vm6, %v16621_v12  ;;  %v3457_v42 = vld [vmem:[#allocation3 + $0x10] sm:$0x3] }
 0x187   : > { %3417 = vst.msk [vmem:[#allocation3 + $0x190] sm:$0x3] %vm3368_vm6, %v16621_v12  ;;  %3420 = vst.msk [vmem:[#allocation3 + $0x1a8] sm:$0x3] %vm3368_vm6, %v16621_v12  ;;  %v3510_v12 = vld [vmem:[%s16336_s3 + $0x8] sm:$0xff] }
 0x188   : > { %16623 = vst [vmem:[#allocation27_spill] sm:$0xff] %v13488_v47  ;;  %16624 = vst [vmem:[#allocation28_spill] sm:$0xff] %v13490_v59  ;;  %11104 = vmatprep.subr.mxu0 %v3510_v12  ;;  %v3456_v47 = vld [vmem:[#allocation3 + $0x8] sm:$0xff]  ;;  %v10815_v59 = vpop.f32.mrf.mxu0 }
 0x189   : > { %16625 = vst [vmem:[#allocation29_spill] sm:$0xff] %v13493_v14  ;;  %16626 = vst [vmem:[#allocation30_spill] sm:$0xff] %v13498_v2  ;;  %11105 = vmatpush3.msra.mxu0 %v3510_v12  ;;  %v3560_v48 = vrot.slane %v3456_v47, 1  ;;  %v13510_v14 = vadd.f32 %v10815_v59, %v13248_v63  ;;  %v13512_v2 = vpop.f32.mrf.mxu1 }
 0x18a   : > { %16627 = vst [vmem:[#allocation31_spill] sm:$0xff] %v13503_v27  ;;  %11106 = vmatprep.subr.mxu0 %v3509_v40  ;;  %v3562_v27 = vrot.slane %v3457_v42, 1  ;;  %v13514_v51 = vpop.f32.mrf.mxu0 }
 0x18b   : > { %16628 = vst [vmem:[#allocation32_spill] sm:$0xff] %v13510_v14  ;;  %11107 = vmatpush3.msra.mxu0 %v3509_v40  ;;  %v3561_v12 = vsel %vm598_vm3, %v3559_v33, %v3560_v48  ;;  %v13517_v22 = vpop.f32.mrf.mxu1 }
 0x18c   : > { %11056 = vmatprep.mubr.msk.f32.mxu1 %vm3365_vm5, %v3561_v12  ;;  %11109 = vmatmul.mubr.msk.f32.vlgmr.msra.gmra.mxu0 %vm3365_vm5, %v3456_v47  ;;  %v3563_v0 = vsel %vm598_vm3, %v3560_v48, %v3562_v27  ;;  %v10818_v5 = vpop.f32.mrf.mxu0 }
 0x18d   : > { %11057 = vmatmul.mubr.msk.f32.vlgmr.msra.gmra.mxu1 %vm3365_vm5, %v3563_v0  ;;  %v13524_v63 = vadd.f32 %v10818_v5, %v13260_v11  ;;  %v13526_v59 = vpop.f32.mrf.mxu1  ;;  %v9426_v11 = vld [vmem:[%s16336_s3 + $0x28] sm:$0xff] }
 0x18e   : > { %v13528_v42 = vpop.f32.mrf.mxu0  ;;  %11156 = vmatprep.subr.mxu1 %v9426_v11 }
 0x18f   : > { %16629 = vst [vmem:[#allocation33_spill] sm:$0xff] %v13524_v63  ;;  %v13530_v40 = vpop.f32.mrf.mxu1  ;;  %11157 = vmatpush3.msra.mxu1 %v9426_v11 }
 0x190   : > { %16630 = vst [vmem:[#allocation34_spill] sm:$0xff] %v13530_v40  ;;  %v10821_v33 = vpop.f32.mrf.mxu0 }
 0x191   : > { %v13533_v14 = vadd.f32 %v10821_v33, %v13274_v1  ;;  %v13535_v12 = vpop.f32.mrf.mxu1 }
 0x192   : > { %16632 = vst [vmem:[#allocation37_spill] sm:$0xff] %v13535_v12  ;;  %v13537_v47 = vpop.f32.mrf.mxu0 }
 0x193   : > { %16631 = vst [vmem:[#allocation35_spill] sm:$0xff] %v13533_v14  ;;  %16633 = vst [vmem:[#allocation6_spill] sm:$0xff] %v13537_v47  ;;  %v13539_v27 = vpop.f32.mrf.mxu1 }
 0x194   : > { %16634 = vst [vmem:[#allocation8_spill] sm:$0xff] %v13539_v27  ;;  %v10824_v5 = vpop.f32.mrf.mxu0 }
 0x195   : > { %v13545_v48 = vadd.f32 %v10824_v5, %v13285_v55  ;;  %v13547_v0 = vpop.f32.mrf.mxu1 }
 0x196   : > { %v13549_v1 = vpop.f32.mrf.mxu0 }
 0x197   : > { %16635 = vst [vmem:[#allocation7_spill] sm:$0xff] %v13545_v48  ;;  %v13551_v33 = vpop.f32.mrf.mxu1 }
 0x198   : > { %16636 = vst [vmem:[#allocation10_spill] sm:$0xff] %v13551_v33  ;;  %v10827_v14 = vpop.f32.mrf.mxu0 }
 0x199   : > { %v13554_v63 = vadd.f32 %v10827_v14, %v13296_v16  ;;  %v13556_v27 = vpop.f32.mrf.mxu1 }
 0x19a   : > { %v13558_v47 = vpop.f32.mrf.mxu0 }
 0x19b   : > { %16637 = vst [vmem:[#allocation13_spill] sm:$0xff] %v13554_v63  ;;  %16638 = vst [vmem:[#allocation16_spill] sm:$0xff] %v13558_v47  ;;  %v13560_v12 = vpop.f32.mrf.mxu1 }
 0x19c   : > { %16639 = vst [vmem:[#allocation19_spill] sm:$0xff] %v13560_v12  ;;  %v10830_v40 = vpop.f32.mrf.mxu0 }
 0x19d   : > { %v13563_v55 = vadd.f32 %v10830_v40, %v13307_v43  ;;  %v13565_v5 = vpop.f32.mrf.mxu1 }
 0x19e   : > { %v13567_v11 = vpop.f32.mrf.mxu0 }
 0x19f   : > { %16640 = vst [vmem:[#allocation22_spill] sm:$0xff] %v13563_v55  ;;  %16641 = vst [vmem:[#allocation25_spill] sm:$0xff] %v13567_v11  ;;  %v13569_v48 = vpop.f32.mrf.mxu1 }
 0x1a0   : > { %16642 = vst [vmem:[#allocation36_spill] sm:$0xff] %v13569_v48  ;;  %v10833_v33 = vpop.f32.mrf.mxu0 }
 0x1a1   : > { %v13572_v16 = vadd.f32 %v10833_v33, %v13319_v36  ;;  %v13574_v14 = vpop.f32.mrf.mxu1 }
 0x1a2   : > { %16644 = vst [vmem:[#allocation39_spill] sm:$0xff] %v13574_v14  ;;  %v13576_v63 = vpop.f32.mrf.mxu0 }
 0x1a3   : > { %16643 = vst [vmem:[#allocation38_spill] sm:$0xff] %v13572_v16  ;;  %16645 = vst [vmem:[#allocation40_spill] sm:$0xff] %v13576_v63  ;;  %v13578_v47 = vpop.f32.mrf.mxu1 }
 0x1a4   : > { %16646 = vst [vmem:[#allocation41_spill] sm:$0xff] %v13578_v47  ;;  %v10836_v12 = vpop.f32.mrf.mxu0 }
 0x1a5   : > { %v13581_v43 = vadd.f32 %v10836_v12, %v13335_v37  ;;  %v13583_v40 = vpop.f32.mrf.mxu1 }
 0x1a6   : > { %16648 = vst [vmem:[#allocation43_spill] sm:$0xff] %v13583_v40  ;;  %v13585_v55 = vpop.f32.mrf.mxu0 }
 0x1a7   : > { %16647 = vst [vmem:[#allocation42_spill] sm:$0xff] %v13581_v43  ;;  %16649 = vst [vmem:[#allocation44_spill] sm:$0xff] %v13585_v55  ;;  %v13587_v11 = vpop.f32.mrf.mxu1 }
 0x1a8   : > { %16650 = vst [vmem:[#allocation45_spill] sm:$0xff] %v13587_v11  ;;  %v10839_v48 = vpop.f32.mrf.mxu0 }
 0x1a9   : > { %v13590_v36 = vadd.f32 %v10839_v48, %v13349_v41  ;;  %v13592_v33 = vpop.f32.mrf.mxu1 }
 0x1aa   : > { %16652 = vst [vmem:[#allocation47_spill] sm:$0xff] %v13592_v33  ;;  %v13594_v16 = vpop.f32.mrf.mxu0 }
 0x1ab   : > { %16651 = vst [vmem:[#allocation46_spill] sm:$0xff] %v13590_v36  ;;  %16653 = vst [vmem:[#allocation48_spill] sm:$0xff] %v13594_v16  ;;  %v13596_v63 = vpop.f32.mrf.mxu1 }
 0x1ac   : > { %16654 = vst [vmem:[#allocation49_spill] sm:$0xff] %v13596_v63  ;;  %v10842_v47 = vpop.f32.mrf.mxu0 }
 0x1ad   : > { %v13599_v37 = vadd.f32 %v10842_v47, %v13359_v24  ;;  %v13601_v12 = vpop.f32.mrf.mxu1  ;;  %v9425_v24 = vld [vmem:[%s16336_s3 + $0x20] sm:$0xff] }
 0x1ae   : > { %16656 = vst [vmem:[#allocation51_spill] sm:$0xff] %v13601_v12  ;;  %v13603_v43 = vpop.f32.mrf.mxu0  ;;  %11158 = vmatprep.subr.mxu1 %v9425_v24 }
 0x1af   : > { %16655 = vst [vmem:[#allocation50_spill] sm:$0xff] %v13599_v37  ;;  %16657 = vst [vmem:[#allocation52_spill] sm:$0xff] %v13603_v43  ;;  %v13605_v55 = vpop.f32.mrf.mxu1  ;;  %11159 = vmatpush3.msra.mxu1 %v9425_v24 }
 0x1b0   : > { %16658 = vst [vmem:[#allocation53_spill] sm:$0xff] %v13605_v55  ;;  %v10845_v11 = vpop.f32.mrf.mxu0 }
 0x1b1   : > { %v13608_v41 = vadd.f32 %v10845_v11, %v13368_v30  ;;  %v13610_v48 = vpop.f32.mrf.mxu1 }
 0x1b2   : > { %16660 = vst [vmem:[#allocation55_spill] sm:$0xff] %v13610_v48  ;;  %v13612_v36 = vpop.f32.mrf.mxu0 }
 0x1b3   : > { %16659 = vst [vmem:[#allocation54_spill] sm:$0xff] %v13608_v41  ;;  %16661 = vst [vmem:[#allocation56_spill] sm:$0xff] %v13612_v36  ;;  %v13614_v16 = vpop.f32.mrf.mxu1 }
 0x1b4   : > { %16662 = vst [vmem:[#allocation57_spill] sm:$0xff] %v13614_v16  ;;  %v10848_v47 = vpop.f32.mrf.mxu0 }
 0x1b5   : > { %v13620_v37 = vadd.f32 %v10848_v47, %v13486_v7  ;;  %v13622_v55 = vpop.f32.mrf.mxu1 }
 0x1b6   : > { %16664 = vst [vmem:[#allocation9_spill] sm:$0xff] %v13622_v55  ;;  %v13624_v30 = vpop.f32.mrf.mxu0 }
 0x1b7   : > { %16663 = vst [vmem:[#allocation58_spill] sm:$0xff] %v13620_v37  ;;  %16665 = vst [vmem:[#allocation11_spill] sm:$0xff] %v13624_v30  ;;  %v13626_v11 = vpop.f32.mrf.mxu1 }
 0x1b8   : > { %16666 = vst [vmem:[#allocation59_spill] sm:$0xff] %v13626_v11  ;;  %v10851_v41 = vpop.f32.mrf.mxu0 }
 0x1b9   : > { %v13629_v36 = vadd.f32 %v10851_v41, %v13496_v26  ;;  %v13631_v16 = vpop.f32.mrf.mxu1 }
 0x1ba   : > { %16668 = vst [vmem:[#allocation61_spill] sm:$0xff] %v13631_v16  ;;  %v13633_v48 = vpop.f32.mrf.mxu0 }
 0x1bb   : > { %16667 = vst [vmem:[#allocation60_spill] sm:$0xff] %v13629_v36  ;;  %16669 = vst [vmem:[#allocation62_spill] sm:$0xff] %v13633_v48  ;;  %v13635_v43 = vpop.f32.mrf.mxu1 }
 0x1bc   : > { %16670 = vst [vmem:[#allocation63_spill] sm:$0xff] %v13635_v43  ;;  %v13637_v12 = vpop.f32.mrf.mxu0 }
 0x1bd   : > { %v13639_v7 = vpop.f32.mrf.mxu1 }
 0x1be   : > { %16671 = vst [vmem:[#allocation64_spill] sm:$0xff] %v13639_v7  ;;  %v13641_v47 = vpop.f32.mrf.mxu0  ;;  %v9460_v7 = vld [vmem:[%s16336_s3 + $0x38] sm:$0xff] }
 0x1bf   : > { %v13643_v24 = vpop.f32.mrf.mxu1  ;;  %11208 = vmatprep.subr.mxu0 %v9460_v7 }
 0x1c0   : > { %16672 = vst [vmem:[#allocation65_spill] sm:$0xff] %v13643_v24  ;;  %v13645_v37 = vpop.f32.mrf.mxu0  ;;  %11209 = vmatpush3.msra.mxu0 %v9460_v7 }
 0x1c1   : > { %v13647_v11 = vpop.f32.mrf.mxu1 }
 0x1c2   : > { %16673 = vst [vmem:[#allocation66_spill] sm:$0xff] %v13647_v11  ;;  %v13649_v26 = vpop.f32.mrf.mxu0 }
 0x1c3   : > { %v13651_v41 = vpop.f32.mrf.mxu1 }
 0x1c4   : > { %16674 = vst [vmem:[#allocation67_spill] sm:$0xff] %v13651_v41  ;;  %v13653_v36 = vpop.f32.mrf.mxu0  ;;  %v9459_v41 = vld [vmem:[%s16336_s3 + $0x30] sm:$0xff] }
 0x1c5   : > { %16675 = vst [vmem:[#allocation68_spill] sm:$0xff] %v13653_v36  ;;  %v13655_v48 = vpop.f32.mrf.mxu1  ;;  %11210 = vmatprep.subr.mxu0 %v9459_v41 }
 0x1c6   : > { %16676 = vst [vmem:[#allocation69_spill] sm:$0xff] %v13655_v48  ;;  %v13657_v43 = vpop.f32.mrf.mxu0  ;;  %11211 = vmatpush3.msra.mxu0 %v9459_v41 }
 0x1c7   : > { %16677 = vst [vmem:[#allocation70_spill] sm:$0xff] %v13657_v43  ;;  %v13662_v16 = vpop.f32.mrf.mxu1 }
 0x1c8   : > { %16678 = vst [vmem:[#allocation71_spill] sm:$0xff] %v13662_v16  ;;  %v13664_v24 = vpop.f32.mrf.mxu0  ;;  %v9494_v16 = vld [vmem:[%s16336_s3 + $0x48] sm:$0xff] }
 0x1c9   : > { %16679 = vst [vmem:[#allocation72_spill] sm:$0xff] %v13664_v24  ;;  %v13669_v11 = vpop.f32.mrf.mxu1  ;;  %11260 = vmatprep.subr.mxu1 %v9494_v16 }
 0x1ca   : > { %v13671_v48 = vpop.f32.mrf.mxu0 }
 0x1cb   : > { %16680 = vst [vmem:[#allocation73_spill] sm:$0xff] %v13671_v48  ;;  %v13673_v30 = vpop.f32.mrf.mxu1 }
 0x1cc   : > { %v13678_v55 = vpop.f32.mrf.mxu0 }
 0x1cd   : > { %16681 = vst [vmem:[#allocation74_spill] sm:$0xff] %v13678_v55  ;;  %v13680_v7 = vpop.f32.mrf.mxu1 }
 0x1ce   : > { %v13682_v63 = vpop.f32.mrf.mxu0 }
 0x1cf   : > { %16682 = vst [vmem:[#allocation75_spill] sm:$0xff] %v13682_v63  ;;  %v13684_v33 = vpop.f32.mrf.mxu1 }
 0x1d0   : > { %16683 = vst [vmem:[#allocation76_spill] sm:$0xff] %v13684_v33  ;;  %v13686_v24 = vpop.f32.mrf.mxu0 }
 0x1d1   : > { %16684 = vst [vmem:[#allocation77_spill] sm:$0xff] %v13686_v24  ;;  %v13688_v40 = vpop.f32.mrf.mxu1 }
 0x1d2   : > { %16685 = vst [vmem:[#allocation78_spill] sm:$0xff] %v13688_v40  ;;  %v13690_v41 = vpop.f32.mrf.mxu0 }
 0x1d3   : > { %16686 = vst [vmem:[#allocation79_spill] sm:$0xff] %v13690_v41  ;;  %v13692_v48 = vpop.f32.mrf.mxu1 }
 0x1d4   : > { %16687 = vst [vmem:[#allocation80_spill] sm:$0xff] %v13692_v48  ;;  %v13694_v43 = vpop.f32.mrf.mxu0 }
 0x1d5   : > { %16688 = vst [vmem:[#allocation81_spill] sm:$0xff] %v13694_v43  ;;  %v13696_v14 = vpop.f32.mrf.mxu1 }
 0x1d6   : > { %16689 = vst [vmem:[#allocation82_spill] sm:$0xff] %v13696_v14  ;;  %v13698_v55 = vpop.f32.mrf.mxu0 }
 0x1d7   : > { %16690 = vst [vmem:[#allocation83_spill] sm:$0xff] %v13698_v55  ;;  %v13700_v16 = vpop.f32.mrf.mxu1 }
 0x1d8   : > { %16691 = vst [vmem:[#allocation84_spill] sm:$0xff] %v13700_v16  ;;  %v13702_v36 = vpop.f32.mrf.mxu0 }
 0x1d9   : > { %16692 = vst [vmem:[#allocation85_spill] sm:$0xff] %v13702_v36  ;;  %v13704_v63 = vpop.f32.mrf.mxu1 }
 0x1da   : > { %16693 = vst [vmem:[#allocation86_spill] sm:$0xff] %v13704_v63  ;;  %v13706_v33 = vpop.f32.mrf.mxu0 }
 0x1db   : > { %16694 = vst [vmem:[#allocation87_spill] sm:$0xff] %v13706_v33  ;;  %v13710_v40 = vpop.f32.mrf.mxu1 }
 0x1dc   : > { %v13708_v24 = vpop.f32.mrf.mxu0  ;;  %16696 = vst [vmem:[#allocation89_spill] sm:$0xff] %v13710_v40 }
 0x1dd   : > { %16695 = vst [vmem:[#allocation88_spill] sm:$0xff] %v13708_v24  ;;  %v13716_v43 = vpop.f32.mrf.mxu1 }
 0x1de   : > { %v13712_v41 = vpop.f32.mrf.mxu0  ;;  %16699 = vst [vmem:[#allocation92_spill] sm:$0xff] %v13716_v43 }
 0x1df   : > { %16697 = vst [vmem:[#allocation90_spill] sm:$0xff] %v13712_v41  ;;  %v13722_v16 = vpop.f32.mrf.mxu1 }
 0x1e0   : > { %v13714_v48 = vpop.f32.mrf.mxu0 }
 0x1e1   : > { %16698 = vst [vmem:[#allocation91_spill] sm:$0xff] %v13714_v48  ;;  %v13728_v33 = vpop.f32.mrf.mxu1 }
 0x1e2   : > { %v13718_v14 = vpop.f32.mrf.mxu0 }
 0x1e3   : > { %16700 = vst [vmem:[#allocation93_spill] sm:$0xff] %v13718_v14  ;;  %v13734_v41 = vpop.f32.mrf.mxu1 }
 0x1e4   : > { %v13720_v55 = vpop.f32.mrf.mxu0 }
 0x1e5   : > { %16701 = vst [vmem:[#allocation94_spill] sm:$0xff] %v13720_v55  ;;  %v1198_v55 = vadd.f32 %v13105_v35, %v13074_v3  ;;  %v13744_v14 = vpop.f32.mrf.mxu1  ;;  %v16708_v3 = vld [vmem:[#allocation12_spill] sm:$0xff] }
 0x1e6   : > { %v13724_v36 = vpop.f32.mrf.mxu0  ;;  %v1258_v35 = vadd.f32 %v13199_v49, %v16708_v3  ;;  %v16719_v3 = vld [vmem:[#allocation31_spill] sm:$0xff] }
 0x1e7   : > { %16702 = vst [vmem:[#allocation95_spill] sm:$0xff] %v13724_v36  ;;  %v1208_v36 = vadd.f32 %v13120_v38, %v13088_v17  ;;  %v1909_v17 = vadd.f32 %v13214_v29, %v13171_v28  ;;  %v1915_v38 = vadd.f32 %v13253_v61, %v13212_v4  ;;  %v16710_v4 = vld [vmem:[#allocation15_spill] sm:$0xff] }
 0x1e8   : > { %v13726_v63 = vpop.f32.mrf.mxu0  ;;  %v1925_v29 = vadd.f32 %v16710_v4, %v13276_v39 }
 0x1e9   : > { %16703 = vst [vmem:[#allocation96_spill] sm:$0xff] %v13726_v63  ;;  %v1218_v63 = vadd.f32 %v13136_v31, %v13101_v54  ;;  %v1911_v54 = vadd.f32 %v13229_v62, %v13188_v19  ;;  %v1919_v31 = vadd.f32 %v13278_v60, %v13239_v45  ;;  %v1661_v28 = vadd.f32 %v13298_v56, %v1208_v36  ;;  %v16712_v45 = vld [vmem:[#allocation18_spill] sm:$0xff]  ;;  %v16713_v56 = vld [vmem:[#allocation20_spill] sm:$0xff] }
 0x1ea   : > { %v13730_v24 = vpop.f32.mrf.mxu0  ;;  %v16717_v36 = vld [vmem:[#allocation28_spill] sm:$0xff] }
 0x1eb   : > { %16704 = vst [vmem:[#allocation97_spill] sm:$0xff] %v13730_v24  ;;  %v1238_v24 = vadd.f32 %v13168_v18, %v13132_v6  ;;  %v1917_v6 = vadd.f32 %v13265_v13, %v13227_v58  ;;  %v1921_v18 = vadd.f32 %v13289_v34, %v13251_v25  ;;  %v1663_v49 = vadd.f32 %v13309_v52, %v1218_v63  ;;  %v16711_v58 = vld [vmem:[#allocation17_spill] sm:$0xff]  ;;  %v16715_v63 = vld [vmem:[#allocation23_spill] sm:$0xff] }
 0x1ec   : > { %v13732_v40 = vpop.f32.mrf.mxu0  ;;  %v13789_v25 = vadd.f32 %v13340_v20, %v1661_v28  ;;  %v2453_v34 = vadd.f32 %v13512_v2, %v13366_v8  ;;  %v2187_v28 = vadd.f32 %v13514_v51, %v1915_v38  ;;  %v16727_v38 = vld [vmem:[#allocation32_spill] sm:$0xff] }
 0x1ed   : > { %16705 = vst [vmem:[#allocation98_spill] sm:$0xff] %v13732_v40  ;;  %v1228_v40 = vadd.f32 %v13151_v53, %v13114_v21  ;;  %v1913_v21 = vadd.f32 %v13241_v10, %v13202_v44  ;;  %v13779_v44 = vpop.f32.mrf.mxu1  ;;  %v1667_v61 = vadd.f32 %v13337_v46, %v1238_v24  ;;  %v13796_v39 = vadd.f32 %v16713_v56, %v1663_v49  ;;  %v16716_v46 = vld [vmem:[#allocation24_spill] sm:$0xff] }
 0x1ee   : > { %v13736_v48 = vpop.f32.mrf.mxu0  ;;  %v2721_v2 = vadd.f32 %v13637_v12, %v2453_v34  ;;  %v16726_v34 = vld [vmem:[#allocation8_spill] sm:$0xff] }
 0x1ef   : > { %16706 = vst [vmem:[#allocation99_spill] sm:$0xff] %v13736_v48  ;;  %v1665_v62 = vadd.f32 %v16711_v58, %v1228_v40  ;;  %v13803_v40 = vadd.f32 %v16716_v46, %v1667_v61  ;;  %v13813_v24 = vpop.f32.mrf.mxu1  ;;  %v16722_v58 = vld [vmem:[#allocation34_spill] sm:$0xff]  ;;  %v16724_v61 = vld [vmem:[#allocation37_spill] sm:$0xff] }
 0x1f0   : > { %v13738_v43 = vpop.f32.mrf.mxu0  ;;  %v16729_v46 = vld [vmem:[#allocation33_spill] sm:$0xff] }
 0x1f1   : > { %16707 = vst [vmem:[#allocation100_spill] sm:$0xff] %v13738_v43  ;;  %v1248_v43 = vadd.f32 %v13185_v50, %v13146_v9  ;;  %v1659_v9 = vadd.f32 %v13287_v57, %v1198_v55  ;;  %v16709_v50 = vld [vmem:[#allocation14_spill] sm:$0xff]  ;;  %v2181_v57 = vadd.f32 %v13370_v23, %v1909_v17  ;;  %v13800_v55 = vadd.f32 %v16715_v63, %v1665_v62  ;;  %v16718_v23 = vld [vmem:[#allocation27_spill] sm:$0xff] }
 0x1f2   : > { %v13754_v48 = vpop.f32.mrf.mxu0  ;;  %v1923_v19 = vadd.f32 %v13300_v32, %v16709_v50  ;;  %v16714_v32 = vld [vmem:[#allocation21_spill] sm:$0xff]  ;;  %v16720_v17 = vld [vmem:[#allocation30_spill] sm:$0xff]  ;;  %v2993_v62 = vadd.f32 %v13669_v11, %v2721_v2 }
 0x1f3   : > { %v1927_v10 = vadd.f32 %v16712_v45, %v1659_v9  ;;  %v1669_v60 = vadd.f32 %v13351_v15, %v1248_v43  ;;  %v1671_v52 = vadd.f32 %v16714_v32, %v1258_v35  ;;  %v2183_v43 = vadd.f32 %v16718_v23, %v1911_v54  ;;  %v16721_v50 = vld [vmem:[#allocation26_spill] sm:$0xff]  ;;  %v16723_v45 = vld [vmem:[#allocation29_spill] sm:$0xff]  ;;  %v13842_v32 = vpop.f32.mrf.mxu1 }
 0x1f4   : > { %v13771_v53 = vpop.f32.mrf.mxu0  ;;  %v2452_v8 = vadd.f32 %v13517_v22, %v2181_v57  ;;  %v2185_v9 = vadd.f32 %v16720_v17, %v1913_v21  ;;  %v2455_v49 = vadd.f32 %v13526_v59, %v16721_v50  ;;  %v2189_v54 = vadd.f32 %v13528_v42, %v1917_v6  ;;  %v16725_v57 = vld [vmem:[#allocation6_spill] sm:$0xff]  ;;  %v13837_v42 = vld [vmem:[%s16335_s2] ss:$0 sm:$0xff] }
 0x1f5   : > { %v13808_v15 = vadd.f32 %v16717_v36, %v1669_v60  ;;  %v13816_v35 = vadd.f32 %v16719_v3, %v1671_v52  ;;  %v2454_v22 = vadd.f32 %v16722_v58, %v2183_v43  ;;  %v2457_v60 = vadd.f32 %v16724_v61, %v16723_v45  ;;  %v16728_v52 = vld [vmem:[#allocation10_spill] sm:$0xff]  ;;  %v16730_v36 = vld [vmem:[#allocation16_spill] sm:$0xff]  ;;  %v16731_v43 = vld [vmem:[#allocation19_spill] sm:$0xff] }
 0x1f6   : > { %v13786_v13 = vpop.f32.mrf.mxu0  ;;  %v2720_v12 = vadd.f32 %v13641_v47, %v2452_v8  ;;  %v2191_v21 = vadd.f32 %v16725_v57, %v1919_v31  ;;  %v2456_v51 = vadd.f32 %v16726_v34, %v2185_v9  ;;  %v2459_v59 = vadd.f32 %v13547_v0, %v16727_v38  ;;  %v16732_v3 = vld [vmem:[#allocation35_spill] sm:$0xff]  ;;  %v16733_v9 = vld [vmem:[#allocation25_spill] sm:$0xff]  ;;  %v16736_v58 = vld [vmem:[#allocation76_spill] sm:$0xff] }
 0x1f7   : > { %v2193_v47 = vadd.f32 %v13549_v1, %v1921_v18  ;;  %v2723_v11 = vadd.f32 %v13645_v37, %v2455_v49  ;;  %v2458_v63 = vadd.f32 %v16728_v52, %v2187_v28  ;;  %v2461_v0 = vadd.f32 %v13556_v27, %v16729_v46  ;;  %v16734_v27 = vld [vmem:[#allocation36_spill] sm:$0xff]  ;;  %v16737_v45 = vld [vmem:[#allocation7_spill] sm:$0xff]  ;;  %v16740_v34 = vld [vmem:[#allocation41_spill] sm:$0xff] }
 0x1f8   : > { %v13805_v20 = vpop.f32.mrf.mxu0  ;;  %v2992_v56 = vadd.f32 %v13673_v30, %v2720_v12  ;;  %v2195_v23 = vadd.f32 %v16730_v36, %v1923_v19  ;;  %v13849_v8 = vadd.f32 %v16731_v43, %v2189_v54  ;;  %v2722_v1 = vadd.f32 %v13649_v26, %v2454_v22  ;;  %v16735_v19 = vld [vmem:[#allocation68_spill] sm:$0xff]  ;;  %v13864_v26 = vpop.f32.mrf.mxu1  ;;  %v16738_v61 = vld [vmem:[#allocation39_spill] sm:$0xff]  ;;  %v16741_v38 = vld [vmem:[#allocation70_spill] sm:$0xff] }
 0x1f9   : > { %v2995_v37 = vadd.f32 %v13680_v7, %v2723_v11  ;;  %v13856_v17 = vadd.f32 %v13565_v5, %v16732_v3  ;;  %v2197_v28 = vadd.f32 %v16733_v9, %v1925_v29  ;;  %v13860_v50 = vadd.f32 %v16734_v27, %v2191_v21  ;;  %v16739_v57 = vld [vmem:[#allocation40_spill] sm:$0xff]  ;;  %v16742_v11 = vld [vmem:[#allocation78_spill] sm:$0xff]  ;;  %v16743_v36 = vld [vmem:[#allocation13_spill] sm:$0xff] }
 0x1fa   : > { %v13822_v4 = vpop.f32.mrf.mxu0  ;;  %v2725_v49 = vadd.f32 %v16735_v19, %v2457_v60  ;;  %v2994_v12 = vadd.f32 %v16736_v58, %v2722_v1  ;;  %v13869_v5 = vadd.f32 %v16738_v61, %v16737_v45  ;;  %v2199_v29 = vadd.f32 %v16739_v57, %v1927_v10  ;;  %v16744_v43 = vld [vmem:[#allocation43_spill] sm:$0xff]  ;;  %v16745_v10 = vld [vmem:[#allocation44_spill] sm:$0xff]  ;;  %v13890_v27 = vpop.f32.mrf.mxu1  ;;  %v16749_v58 = vld [vmem:[#allocation22_spill] sm:$0xff] }
 0x1fb   : > { %v13873_v21 = vadd.f32 %v16740_v34, %v2193_v47  ;;  %v2724_v60 = vadd.f32 %v16741_v38, %v2456_v51  ;;  %v2201_v1 = vadd.f32 %v16745_v10, %v13789_v25  ;;  %v16746_v47 = vld [vmem:[#allocation45_spill] sm:$0xff]  ;;  %v16747_v51 = vld [vmem:[#allocation72_spill] sm:$0xff]  ;;  %v16754_v57 = vld [vmem:[#allocation82_spill] sm:$0xff] }
 0x1fc   : > { %v11006_v6 = vpop.f32.mrf.mxu0  ;;  %v16748_v3 = vld [vmem:[#allocation80_spill] sm:$0xff] }
 0x1fd   : > { %v3264_v31 = vadd.f32 %v11006_v6, %v2993_v62  ;;  %v2996_v9 = vadd.f32 %v16748_v3, %v2724_v60  ;;  %v16751_v25 = vld [vmem:[#allocation48_spill] sm:$0xff] }
 0x1fe   : > { %v3104_v2 = vpop.f32.mrf.mxu0 }
 0x1ff   : > { %v3302_v30 = vadd.f32 %v13837_v42, %v3264_v31  ;;  %v3263_v18 = vadd.f32 %v3104_v2, %v2992_v56  ;;  %v2997_v56 = vadd.f32 %v16742_v11, %v2725_v49  ;;  %v13881_v2 = vadd.f32 %v16744_v43, %v16743_v36  ;;  %v13910_v11 = vld [vmem:[%s16336_s3 + $0x58] sm:$0xff]  ;;  %v16759_v36 = vld [vmem:[#allocation74_spill] sm:$0xff] }
 0x200   : > { %v11009_v54 = vpop.f32.mrf.mxu0  ;;  %v2729_v43 = vadd.f32 %v16759_v36, %v2461_v0  ;;  %11312 = vmatprep.subr.mxu0 %v13910_v11 }
 0x201   : > { %v3334_v7 = vmax.f32 %v3302_v30, 0.0  ;;  %v3301_v22 = vadd.f32 %v13837_v42, %v3263_v18  ;;  %v3266_v62 = vadd.f32 %v11009_v54, %v2995_v37  ;;  %v13886_v37 = vadd.f32 %v16746_v47, %v2195_v23  ;;  %v16760_v47 = vld [vmem:[#allocation84_spill] sm:$0xff] }
 0x202   : > { %v3114_v6 = vpop.f32.mrf.mxu0  ;;  %v2727_v30 = vadd.f32 %v16747_v51, %v2459_v59  ;;  %v2203_v23 = vadd.f32 %v16751_v25, %v13796_v39  ;;  %v16755_v39 = vld [vmem:[#allocation38_spill] sm:$0xff] }
 0x203   : > { %3423 = vst.msk [vmem:[#allocation3 + $0x21] sm:$0xff] %vm3365_vm5, %v3334_v7  ;;  %v3333_v31 = vmax.f32 %v3301_v22, 0.0  ;;  %v3304_v52 = vadd.f32 %v13837_v42, %v3266_v62  ;;  %v3265_v46 = vadd.f32 %v3114_v6, %v2994_v12  ;;  %v16750_v12 = vld [vmem:[#allocation47_spill] sm:$0xff]  ;;  %v16752_v22 = vld [vmem:[#allocation49_spill] sm:$0xff] }
 0x204   : > { %v11012_v18 = vpop.f32.mrf.mxu0  ;;  %v13896_v7 = vadd.f32 %v16750_v12, %v16749_v58  ;;  %v13901_v59 = vadd.f32 %v16752_v22, %v2197_v28  ;;  %v16753_v62 = vld [vmem:[#allocation73_spill] sm:$0xff]  ;;  %v2999_v34 = vadd.f32 %v16754_v57, %v2727_v30  ;;  %v13926_v30 = vpop.f32.mrf.mxu1  ;;  %v16765_v12 = vld [vmem:[#allocation75_spill] sm:$0xff] }
 0x205   : > { %3422 = vst.msk [vmem:[#allocation3 + $0x19] sm:$0xff] %vm3365_vm5, %v3333_v31  ;;  %v3336_v19 = vmax.f32 %v3304_v52, 0.0  ;;  %v3303_v49 = vadd.f32 %v13837_v42, %v3265_v46  ;;  %v3268_v54 = vadd.f32 %v11012_v18, %v2997_v56  ;;  %v2726_v45 = vadd.f32 %v16753_v62, %v2458_v63  ;;  %v16756_v56 = vld [vmem:[#allocation51_spill] sm:$0xff]  ;;  %v16757_v63 = vld [vmem:[#allocation52_spill] sm:$0xff]  ;;  %v16758_v52 = vld [vmem:[#allocation53_spill] sm:$0xff] }
 0x206   : > { %v3124_v61 = vpop.f32.mrf.mxu0  ;;  %v13914_v28 = vadd.f32 %v16756_v56, %v16755_v39  ;;  %v13918_v31 = vadd.f32 %v16757_v63, %v13800_v55  ;;  %v13921_v46 = vadd.f32 %v16758_v52, %v2199_v29  ;;  %v16761_v55 = vld [vmem:[#allocation42_spill] sm:$0xff]  ;;  %v16763_v29 = vld [vmem:[#allocation56_spill] sm:$0xff]  ;;  %v2728_v25 = vadd.f32 %v16765_v12, %v13849_v8  ;;  %v16770_v8 = vld [vmem:[#allocation77_spill] sm:$0xff] }
 0x207   : > { %3425 = vst.msk [vmem:[#allocation3 + $0x39] sm:$0xff] %vm3365_vm5, %v3336_v19  ;;  %v3335_v38 = vmax.f32 %v3303_v49, 0.0  ;;  %v3306_v60 = vadd.f32 %v13837_v42, %v3268_v54  ;;  %v3267_v6 = vadd.f32 %v3124_v61, %v2996_v9  ;;  %v2998_v51 = vadd.f32 %v16760_v47, %v2726_v45  ;;  %v16762_v19 = vld [vmem:[#allocation55_spill] sm:$0xff]  ;;  %v16764_v54 = vld [vmem:[#allocation57_spill] sm:$0xff]  ;;  %v16766_v62 = vld [vmem:[#allocation86_spill] sm:$0xff]  ;;  %v13963_v47 = vpop.f32.mrf.mxu1 }
 0x208   : > { %v11015_v10 = vpop.f32.mrf.mxu0  ;;  %v13932_v49 = vadd.f32 %v16762_v19, %v16761_v55  ;;  %v13936_v0 = vadd.f32 %v16763_v29, %v13803_v40  ;;  %v13939_v58 = vadd.f32 %v16764_v54, %v2201_v1  ;;  %v3001_v45 = vadd.f32 %v16766_v62, %v2729_v43  ;;  %v16768_v40 = vld [vmem:[#allocation9_spill] sm:$0xff]  ;;  %v16769_v1 = vld [vmem:[#allocation11_spill] sm:$0xff] }
 0x209   : > { %3424 = vst.msk [vmem:[#allocation3 + $0x31] sm:$0xff] %vm3365_vm5, %v3335_v38  ;;  %v3338_v18 = vmax.f32 %v3306_v60, 0.0  ;;  %v3305_v3 = vadd.f32 %v13837_v42, %v3267_v6  ;;  %v3270_v9 = vadd.f32 %v11015_v10, %v2999_v34  ;;  %v16767_v60 = vld [vmem:[#allocation46_spill] sm:$0xff]  ;;  %v13954_v39 = vadd.f32 %v16769_v1, %v13808_v15  ;;  %v16771_v63 = vld [vmem:[#allocation89_spill] sm:$0xff]  ;;  %v16773_v55 = vld [vmem:[#allocation79_spill] sm:$0xff] }
 0x20a   : > { %v3134_v22 = vpop.f32.mrf.mxu0  ;;  %v13946_v38 = vld [vmem:[#allocation3 + $0x28] sm:$0x3]  ;;  %v13950_v6 = vadd.f32 %v16768_v40, %v16767_v60  ;;  %v2731_v56 = vadd.f32 %v16770_v8, %v13856_v17  ;;  %v3000_v52 = vadd.f32 %v16771_v63, %v2728_v25  ;;  %v2730_v19 = vadd.f32 %v16773_v55, %v13860_v50  ;;  %v16774_v25 = vld [vmem:[#allocation92_spill] sm:$0xff]  ;;  %v16775_v50 = vld [vmem:[#allocation81_spill] sm:$0xff]  ;;  %v13997_v63 = vpop.f32.mrf.mxu1 }
 0x20b   : > { %3427 = vst.msk [vmem:[#allocation3 + $0x51] sm:$0xff] %vm3365_vm5, %v3338_v18  ;;  %v3337_v61 = vmax.f32 %v3305_v3, 0.0  ;;  %v3308_v57 = vadd.f32 %v13837_v42, %v3270_v9  ;;  %v3269_v34 = vadd.f32 %v3134_v22, %v2998_v51  ;;  %v16772_v17 = vld [vmem:[#allocation59_spill] sm:$0xff]  ;;  %v3567_v12 = vrot.slane %v13946_v38, 1 }
 0x20c   : > { %v11018_v36 = vpop.f32.mrf.mxu0  ;;  %v13959_v43 = vld [vmem:[#allocation3 + $0x18] sm:$0xff]  ;;  %v13961_v10 = vld [vmem:[#allocation3 + $0x20] sm:$0xff]  ;;  %v13971_v9 = vadd.f32 %v16772_v17, %v2203_v23  ;;  %v3003_v22 = vadd.f32 %v16774_v25, %v2731_v56 }
 0x20d   : > { %3426 = vst.msk [vmem:[#allocation3 + $0x49] sm:$0xff] %vm3365_vm5, %v3337_v61  ;;  %v3340_v51 = vmax.f32 %v3308_v57, 0.0  ;;  %v3307_v18 = vadd.f32 %v13837_v42, %v3269_v34  ;;  %v3272_v3 = vadd.f32 %v11018_v36, %v3001_v45  ;;  %v3564_v15 = vrot.slane %v13959_v43, 1  ;;  %11111 = vmatprep.mubr.msk.f32.mxu0 %vm3365_vm5, %v13959_v43 }
 0x20e   : > { %v3144_v29 = vpop.f32.mrf.mxu0  ;;  %11112 = vmatmul.mubr.msk.f32.gmra.mxu0 %vm3365_vm5, %v13961_v10  ;;  %v3565_v54 = vrot.slane %v13961_v10, 1  ;;  %v13982_v61 = vld [vmem:[#allocation3 + $0x40] sm:$0x3]  ;;  %v2733_v57 = vadd.f32 %v16775_v50, %v13869_v5  ;;  %v3002_v34 = vadd.f32 %v13722_v16, %v2730_v19 }
 0x20f   : > { %3429 = vst.msk [vmem:[#allocation3 + $0x69] sm:$0xff] %vm3365_vm5, %v3340_v51  ;;  %v3339_v62 = vmax.f32 %v3307_v18, 0.0  ;;  %v3310_v45 = vadd.f32 %v13837_v42, %v3272_v3  ;;  %v3271_v23 = vadd.f32 %v3144_v29, %v3000_v52  ;;  %v16776_v51 = vld [vmem:[#allocation50_spill] sm:$0xff]  ;;  %v16777_v18 = vld [vmem:[#allocation61_spill] sm:$0xff]  ;;  %v3572_v29 = vrot.slane %v13982_v61, 1 }
 0x210   : > { %v11021_v60 = vpop.f32.mrf.mxu0  ;;  %v13988_v40 = vsel %vm598_vm3, %v3564_v15, %v3565_v54  ;;  %v13991_v1 = vsel %vm598_vm3, %v3565_v54, %v3567_v12  ;;  %v13993_v8 = vld [vmem:[#allocation3 + $0x30] sm:$0xff]  ;;  %v13995_v56 = vld [vmem:[#allocation3 + $0x38] sm:$0xff]  ;;  %v14008_v3 = vadd.f32 %v16777_v18, %v16776_v51  ;;  %v16778_v15 = vld [vmem:[#allocation83_spill] sm:$0xff]  ;;  %v3005_v54 = vadd.f32 %v13728_v33, %v2733_v57 }
 0x211   : > { %3428 = vst.msk [vmem:[#allocation3 + $0x61] sm:$0xff] %vm3365_vm5, %v3339_v62  ;;  %v3342_v52 = vmax.f32 %v3310_v45, 0.0  ;;  %v3309_v5 = vadd.f32 %v13837_v42, %v3271_v23  ;;  %v3274_v36 = vadd.f32 %v11021_v60, %v3003_v22  ;;  %11059 = vmatprep.mubr.msk.f32.mxu1 %vm3365_vm5, %v13988_v40  ;;  %11114 = vmatprep.mubr.msk.f32.mxu0 %vm3365_vm5, %v13993_v8  ;;  %v3569_v16 = vrot.slane %v13993_v8, 1  ;;  %v16779_v62 = vld [vmem:[#allocation85_spill] sm:$0xff]  ;;  %v16783_v18 = vld [vmem:[#allocation87_spill] sm:$0xff] }
 0x212   : > { %v2732_v17 = vadd.f32 %v16778_v15, %v13873_v21  ;;  %11060 = vmatmul.mubr.msk.f32.gmra.mxu1 %vm3365_vm5, %v13991_v1  ;;  %v3154_v55 = vpop.f32.mrf.mxu0  ;;  %11115 = vmatmul.mubr.msk.f32.gmra.mxu0 %vm3365_vm5, %v13995_v56  ;;  %v3570_v19 = vrot.slane %v13995_v56, 1  ;;  %v14021_v21 = vld [vmem:[#allocation3 + $0x58] sm:$0x3]  ;;  %v2735_v45 = vadd.f32 %v16779_v62, %v13881_v2  ;;  %v2734_v15 = vadd.f32 %v16783_v18, %v13886_v37 }
 0x213   : > { %3431 = vst.msk [vmem:[#allocation3 + $0x81] sm:$0xff] %vm3365_vm5, %v3342_v52  ;;  %v3341_v12 = vmax.f32 %v3309_v5, 0.0  ;;  %v3312_v25 = vadd.f32 %v13837_v42, %v3274_v36  ;;  %v3273_v22 = vadd.f32 %v3154_v55, %v3002_v34  ;;  %v14036_v52 = vpop.f32.mrf.mxu1  ;;  %v16782_v36 = vld [vmem:[#allocation62_spill] sm:$0xff] }
 0x214   : > { %v3004_v23 = vadd.f32 %v13734_v41, %v2732_v17  ;;  %v11024_v50 = vpop.f32.mrf.mxu0  ;;  %v14027_v60 = vsel %vm598_vm3, %v3569_v16, %v3570_v19  ;;  %v14030_v51 = vsel %vm598_vm3, %v3570_v19, %v3572_v29  ;;  %v14032_v33 = vld [vmem:[#allocation3 + $0x48] sm:$0xff]  ;;  %v14034_v57 = vld [vmem:[#allocation3 + $0x50] sm:$0xff]  ;;  %v14047_v16 = vadd.f32 %v16782_v36, %v13816_v35 }
 0x215   : > { %16780 = vst [vmem:[#allocation12_spill] sm:$0xff] %v14027_v60  ;;  %16781 = vst [vmem:[#allocation14_spill] sm:$0xff] %v14030_v51  ;;  %v3344_v34 = vmax.f32 %v3312_v25, 0.0  ;;  %v3311_v2 = vadd.f32 %v13837_v42, %v3273_v22  ;;  %v3276_v5 = vadd.f32 %v11024_v50, %v3005_v54  ;;  %11062 = vmatprep.mubr.msk.f32.mxu1 %vm3365_vm5, %v14027_v60  ;;  %11117 = vmatprep.mubr.msk.f32.mxu0 %vm3365_vm5, %v14032_v33  ;;  %v16784_v25 = vld [vmem:[#allocation88_spill] sm:$0xff] }
 0x216   : > { %3430 = vst.msk [vmem:[#allocation3 + $0x79] sm:$0xff] %vm3365_vm5, %v3341_v12  ;;  %v3574_v41 = vrot.slane %v14032_v33, 1  ;;  %11063 = vmatmul.mubr.msk.f32.gmra.mxu1 %vm3365_vm5, %v14030_v51  ;;  %v3164_v17 = vpop.f32.mrf.mxu0  ;;  %11118 = vmatmul.mubr.msk.f32.gmra.mxu0 %vm3365_vm5, %v14034_v57  ;;  %v3575_v55 = vrot.slane %v14034_v57, 1  ;;  %v3577_v19 = vrot.slane %v14021_v21, 1  ;;  %v3007_v29 = vadd.f32 %v13744_v14, %v2735_v45  ;;  %v14060_v37 = vld [vmem:[#allocation3 + $0x70] sm:$0x3] }
 0x217   : > { %3433 = vst.msk [vmem:[#allocation3 + $0x99] sm:$0xff] %vm3365_vm5, %v3344_v34  ;;  %v3343_v35 = vmax.f32 %v3311_v2, 0.0  ;;  %v3314_v54 = vadd.f32 %v13837_v42, %v3276_v5  ;;  %v3275_v12 = vadd.f32 %v3164_v17, %v3004_v23  ;;  %v2737_v22 = vadd.f32 %v16784_v25, %v13896_v7  ;;  %v14075_v34 = vpop.f32.mrf.mxu1  ;;  %v16787_v5 = vld [vmem:[#allocation63_spill] sm:$0xff] }
 0x218   : > { %v3006_v62 = vadd.f32 %v13779_v44, %v2734_v15  ;;  %v11027_v50 = vpop.f32.mrf.mxu0  ;;  %v14066_v36 = vsel %vm598_vm3, %v3574_v41, %v3575_v55  ;;  %v14069_v18 = vsel %vm598_vm3, %v3575_v55, %v3577_v19  ;;  %v14071_v14 = vld [vmem:[#allocation3 + $0x60] sm:$0xff]  ;;  %v14073_v45 = vld [vmem:[#allocation3 + $0x68] sm:$0xff]  ;;  %v14086_v41 = vadd.f32 %v16787_v5, %v13918_v31 }
 0x219   : > { %16785 = vst [vmem:[#allocation15_spill] sm:$0xff] %v14066_v36  ;;  %16786 = vst [vmem:[#allocation17_spill] sm:$0xff] %v14069_v18  ;;  %v3346_v23 = vmax.f32 %v3314_v54, 0.0  ;;  %v3313_v7 = vadd.f32 %v13837_v42, %v3275_v12  ;;  %v3278_v2 = vadd.f32 %v11027_v50, %v3007_v29  ;;  %11065 = vmatprep.mubr.msk.f32.mxu1 %vm3365_vm5, %v14066_v36  ;;  %11120 = vmatprep.mubr.msk.f32.mxu0 %vm3365_vm5, %v14071_v14  ;;  %v16788_v15 = vld [vmem:[#allocation90_spill] sm:$0xff]  ;;  %v16789_v25 = vld [vmem:[#allocation91_spill] sm:$0xff] }
 0x21a   : > { %3432 = vst.msk [vmem:[#allocation3 + $0x91] sm:$0xff] %vm3365_vm5, %v3343_v35  ;;  %v3579_v44 = vrot.slane %v14071_v14, 1  ;;  %v2736_v17 = vadd.f32 %v16788_v15, %v13901_v59  ;;  %11066 = vmatmul.mubr.msk.f32.gmra.mxu1 %vm3365_vm5, %v14069_v18  ;;  %v3174_v55 = vpop.f32.mrf.mxu0  ;;  %11121 = vmatmul.mubr.msk.f32.gmra.mxu0 %vm3365_vm5, %v14073_v45  ;;  %v3580_v19 = vrot.slane %v14073_v45, 1  ;;  %v3582_v29 = vrot.slane %v14060_v37, 1  ;;  %v14099_v59 = vld [vmem:[#allocation3 + $0x88] sm:$0x3] }
 0x21b   : > { %v3009_v35 = vadd.f32 %v13813_v24, %v2737_v22  ;;  %3435 = vst.msk [vmem:[#allocation3 + $0xb1] sm:$0xff] %vm3365_vm5, %v3346_v23  ;;  %v3345_v31 = vmax.f32 %v3313_v7, 0.0  ;;  %v3316_v54 = vadd.f32 %v13837_v42, %v3278_v2  ;;  %v3277_v12 = vadd.f32 %v3174_v55, %v3006_v62  ;;  %v14114_v23 = vpop.f32.mrf.mxu1  ;;  %v16792_v2 = vld [vmem:[#allocation54_spill] sm:$0xff]  ;;  %v16794_v55 = vld [vmem:[#allocation93_spill] sm:$0xff] }
 0x21c   : > { %v2739_v50 = vadd.f32 %v16789_v25, %v13914_v28  ;;  %v3008_v5 = vadd.f32 %v13842_v32, %v2736_v17  ;;  %v11030_v15 = vpop.f32.mrf.mxu0  ;;  %v14105_v18 = vsel %vm598_vm3, %v3579_v44, %v3580_v19  ;;  %v14108_v36 = vsel %vm598_vm3, %v3580_v19, %v3582_v29  ;;  %v16793_v44 = vld [vmem:[#allocation64_spill] sm:$0xff] }
 0x21d   : > { %16790 = vst [vmem:[#allocation18_spill] sm:$0xff] %v14105_v18  ;;  %16791 = vst [vmem:[#allocation20_spill] sm:$0xff] %v14108_v36  ;;  %v14110_v24 = vld [vmem:[#allocation3 + $0x78] sm:$0xff]  ;;  %v14112_v22 = vld [vmem:[#allocation3 + $0x80] sm:$0xff]  ;;  %v3348_v62 = vmax.f32 %v3316_v54, 0.0  ;;  %v3315_v28 = vadd.f32 %v13837_v42, %v3277_v12  ;;  %v3280_v7 = vadd.f32 %v11030_v15, %v3009_v35  ;;  %11068 = vmatprep.mubr.msk.f32.mxu1 %vm3365_vm5, %v14105_v18 }
 0x21e   : > { %3434 = vst.msk [vmem:[#allocation3 + $0xa9] sm:$0xff] %vm3365_vm5, %v3345_v31  ;;  %11123 = vmatprep.mubr.msk.f32.mxu0 %vm3365_vm5, %v14110_v24  ;;  %v3584_v32 = vrot.slane %v14110_v24, 1  ;;  %v14125_v17 = vadd.f32 %v16793_v44, %v16792_v2  ;;  %v2738_v19 = vadd.f32 %v16794_v55, %v13921_v46  ;;  %11069 = vmatmul.mubr.msk.f32.gmra.mxu1 %vm3365_vm5, %v14108_v36  ;;  %v3184_v29 = vpop.f32.mrf.mxu0  ;;  %v3585_v35 = vrot.slane %v14112_v22, 1  ;;  %v14138_v46 = vld [vmem:[#allocation3 + $0xa0] sm:$0x3] }
 0x21f   : > { %11124 = vmatmul.mubr.msk.f32.gmra.mxu0 %vm3365_vm5, %v14112_v22  ;;  %v3587_v31 = vrot.slane %v14099_v59, 1  ;;  %v3011_v54 = vadd.f32 %v13864_v26, %v2739_v50  ;;  %3437 = vst.msk [vmem:[#allocation3 + $0xc9] sm:$0xff] %vm3365_vm5, %v3348_v62  ;;  %v3347_v12 = vmax.f32 %v3315_v28, 0.0  ;;  %v3318_v25 = vadd.f32 %v13837_v42, %v3280_v7  ;;  %v16795_v2 = vld [vmem:[#allocation94_spill] sm:$0xff]  ;;  %v14153_v62 = vpop.f32.mrf.mxu1  ;;  %v16798_v7 = vld [vmem:[#allocation65_spill] sm:$0xff] }
 0x220   : > { %v3279_v15 = vadd.f32 %v3184_v29, %v3008_v5  ;;  %v2741_v44 = vadd.f32 %v16795_v2, %v13932_v49  ;;  %v3010_v55 = vadd.f32 %v13890_v27, %v2738_v19  ;;  %v11033_v36 = vpop.f32.mrf.mxu0  ;;  %v14144_v18 = vsel %vm598_vm3, %v3584_v32, %v3585_v35  ;;  %v16799_v19 = vld [vmem:[#allocation95_spill] sm:$0xff] }
 0x221   : > { %16796 = vst [vmem:[#allocation21_spill] sm:$0xff] %v14144_v18  ;;  %v14147_v51 = vsel %vm598_vm3, %v3585_v35, %v3587_v31  ;;  %v14149_v26 = vld [vmem:[#allocation3 + $0x90] sm:$0xff]  ;;  %v14151_v50 = vld [vmem:[#allocation3 + $0x98] sm:$0xff]  ;;  %3436 = vst.msk [vmem:[#allocation3 + $0xc1] sm:$0xff] %vm3365_vm5, %v3347_v12  ;;  %v3350_v5 = vmax.f32 %v3318_v25, 0.0  ;;  %v3282_v28 = vadd.f32 %v11033_v36, %v3011_v54  ;;  %11071 = vmatprep.mubr.msk.f32.mxu1 %vm3365_vm5, %v14144_v18  ;;  %v3592_v31 = vrot.slane %v14138_v46, 1 }
 0x222   : > { %16797 = vst [vmem:[#allocation23_spill] sm:$0xff] %v14147_v51  ;;  %v3317_v49 = vadd.f32 %v13837_v42, %v3279_v15  ;;  %11126 = vmatprep.mubr.msk.f32.mxu0 %vm3365_vm5, %v14149_v26  ;;  %v3589_v27 = vrot.slane %v14149_v26, 1  ;;  %v14164_v32 = vadd.f32 %v16798_v7, %v13936_v0  ;;  %v2740_v29 = vadd.f32 %v16799_v19, %v13939_v58  ;;  %v3194_v35 = vpop.f32.mrf.mxu0  ;;  %v14177_v58 = vld [vmem:[#allocation3 + $0xb8] sm:$0x3]  ;;  %v16800_v15 = vld [vmem:[#allocation96_spill] sm:$0xff] }
 0x223   : > { %11072 = vmatmul.mubr.msk.f32.gmra.mxu1 %vm3365_vm5, %v14147_v51  ;;  %11127 = vmatmul.mubr.msk.f32.gmra.mxu0 %vm3365_vm5, %v14151_v50  ;;  %v3590_v36 = vrot.slane %v14151_v50, 1  ;;  %v3013_v54 = vadd.f32 %v13926_v30, %v2741_v44  ;;  %3439 = vst.msk [vmem:[#allocation3 + $0xe1] sm:$0xff] %vm3365_vm5, %v3350_v5  ;;  %v3320_v12 = vadd.f32 %v13837_v42, %v3282_v28  ;;  %v14192_v5 = vpop.f32.mrf.mxu1  ;;  %v16803_v28 = vld [vmem:[#allocation58_spill] sm:$0xff] }
 0x224   : > { %v3349_v0 = vmax.f32 %v3317_v49, 0.0  ;;  %v3281_v25 = vadd.f32 %v3194_v35, %v3010_v55  ;;  %v2743_v2 = vadd.f32 %v16800_v15, %v13950_v6  ;;  %v3012_v7 = vadd.f32 %v13963_v47, %v2740_v29  ;;  %v11036_v19 = vpop.f32.mrf.mxu0  ;;  %v16805_v35 = vld [vmem:[#allocation97_spill] sm:$0xff] }
 0x225   : > { %v14183_v51 = vsel %vm598_vm3, %v3589_v27, %v3590_v36  ;;  %v14186_v18 = vsel %vm598_vm3, %v3590_v36, %v3592_v31  ;;  %v14188_v30 = vld [vmem:[#allocation3 + $0xa8] sm:$0xff]  ;;  %v14190_v44 = vld [vmem:[#allocation3 + $0xb0] sm:$0xff]  ;;  %v3352_v55 = vmax.f32 %v3320_v12, 0.0  ;;  %v3284_v49 = vadd.f32 %v11036_v19, %v3013_v54  ;;  %v16804_v27 = vld [vmem:[#allocation66_spill] sm:$0xff] }
 0x226   : > { %16801 = vst [vmem:[#allocation24_spill] sm:$0xff] %v14183_v51  ;;  %16802 = vst [vmem:[#allocation28_spill] sm:$0xff] %v14186_v18  ;;  %v3319_v6 = vadd.f32 %v13837_v42, %v3281_v25  ;;  %11074 = vmatprep.mubr.msk.f32.mxu1 %vm3365_vm5, %v14183_v51  ;;  %11129 = vmatprep.mubr.msk.f32.mxu0 %vm3365_vm5, %v14188_v30  ;;  %v3594_v47 = vrot.slane %v14188_v30, 1  ;;  %v14203_v29 = vadd.f32 %v16804_v27, %v16803_v28  ;;  %v3204_v31 = vpop.f32.mrf.mxu0  ;;  %v16806_v28 = vld [vmem:[#allocation98_spill] sm:$0xff] }
 0x227   : > { %3438 = vst.msk [vmem:[#allocation3 + $0xd9] sm:$0xff] %vm3365_vm5, %v3349_v0  ;;  %v2742_v36 = vadd.f32 %v16805_v35, %v13971_v9  ;;  %11075 = vmatmul.mubr.msk.f32.gmra.mxu1 %vm3365_vm5, %v14186_v18  ;;  %11130 = vmatmul.mubr.msk.f32.gmra.mxu0 %vm3365_vm5, %v14190_v44  ;;  %v3595_v54 = vrot.slane %v14190_v44, 1  ;;  %v3597_v0 = vrot.slane %v14177_v58, 1  ;;  %v3015_v12 = vadd.f32 %v13997_v63, %v2743_v2  ;;  %v14216_v9 = vld [vmem:[#allocation3 + $0xd0] sm:$0x3] }
 0x228   : > { %3441 = vst.msk [vmem:[#allocation3 + $0xf9] sm:$0xff] %vm3365_vm5, %v3352_v55  ;;  %v3351_v25 = vmax.f32 %v3319_v6, 0.0  ;;  %v3322_v15 = vadd.f32 %v13837_v42, %v3284_v49  ;;  %v3283_v19 = vadd.f32 %v3204_v31, %v3012_v7  ;;  %v2745_v27 = vadd.f32 %v16806_v28, %v14008_v3  ;;  %v11039_v18 = vpop.f32.mrf.mxu0  ;;  %v14227_v63 = vld [vmem:[#allocation3 + $0xc0] sm:$0xff]  ;;  %v14229_v2 = vld [vmem:[#allocation3 + $0xc8] sm:$0xff]  ;;  %v14231_v55 = vpop.f32.mrf.mxu1 }
 0x229   : > { %v3014_v35 = vadd.f32 %v14036_v52, %v2742_v36  ;;  %v14222_v51 = vsel %vm598_vm3, %v3594_v47, %v3595_v54  ;;  %v14225_v60 = vsel %vm598_vm3, %v3595_v54, %v3597_v0  ;;  %v3286_v6 = vadd.f32 %v11039_v18, %v3015_v12  ;;  %11132 = vmatprep.mubr.msk.f32.mxu0 %vm3365_vm5, %v14227_v63  ;;  %v16809_v49 = vld [vmem:[#allocation67_spill] sm:$0xff] }
 0x22a   : > { %16807 = vst [vmem:[#allocation27_spill] sm:$0xff] %v14222_v51  ;;  %16808 = vst [vmem:[#allocation31_spill] sm:$0xff] %v14225_v60  ;;  %v3354_v7 = vmax.f32 %v3322_v15, 0.0  ;;  %v3321_v3 = vadd.f32 %v13837_v42, %v3283_v19  ;;  %11077 = vmatprep.mubr.msk.f32.mxu1 %vm3365_vm5, %v14222_v51  ;;  %v3599_v52 = vrot.slane %v14227_v63, 1  ;;  %v2480_v47 = vadd.f32 %v16809_v49, %v13954_v39  ;;  %v16810_v36 = vld [vmem:[#allocation99_spill] sm:$0xff]  ;;  %v3214_v54 = vpop.f32.mrf.mxu0  ;;  %v16811_v19 = vld [vmem:[#allocation100_spill] sm:$0xff] }
 0x22b   : > { %3440 = vst.msk [vmem:[#allocation3 + $0xf1] sm:$0xff] %vm3365_vm5, %v3351_v25  ;;  %v2744_v31 = vadd.f32 %v16810_v36, %v14086_v41  ;;  %11078 = vmatmul.mubr.msk.f32.gmra.mxu1 %vm3365_vm5, %v14225_v60  ;;  %11133 = vmatmul.mubr.msk.f32.gmra.mxu0 %vm3365_vm5, %v14229_v2  ;;  %v3600_v18 = vrot.slane %v14229_v2, 1  ;;  %v3602_v0 = vrot.slane %v14216_v9, 1  ;;  %v3017_v12 = vadd.f32 %v14075_v34, %v2745_v27  ;;  %v14253_v41 = vld [vmem:[#allocation3 + $0xe8] sm:$0x3] }
 0x22c   : > { %3443 = vst.msk [vmem:[#allocation3 + $0x111] sm:$0xff] %vm3365_vm5, %v3354_v7  ;;  %v3353_v25 = vmax.f32 %v3321_v3, 0.0  ;;  %v3324_v39 = vadd.f32 %v13837_v42, %v3286_v6  ;;  %v3285_v15 = vadd.f32 %v3214_v54, %v3014_v35  ;;  %v2747_v28 = vadd.f32 %v16811_v19, %v14125_v17  ;;  %v11042_v36 = vpop.f32.mrf.mxu0  ;;  %v2973_v7 = vpop.f32.mrf.mxu1  ;;  %v16813_v6 = vld [vmem:[#allocation60_spill] sm:$0xff] }
 0x22d   : > { %v3016_v49 = vadd.f32 %v14114_v23, %v2744_v31  ;;  %v14259_v60 = vsel %vm598_vm3, %v3599_v52, %v3600_v18  ;;  %v14262_v51 = vsel %vm598_vm3, %v3600_v18, %v3602_v0  ;;  %v3288_v17 = vadd.f32 %v11042_v36, %v3017_v12  ;;  %v16814_v52 = vld [vmem:[#allocation69_spill] sm:$0xff] }
 0x22e   : > { %16812 = vst [vmem:[#allocation30_spill] sm:$0xff] %v14262_v51  ;;  %v14264_v34 = vld [vmem:[#allocation3 + $0xd8] sm:$0xff]  ;;  %v14266_v27 = vld [vmem:[#allocation3 + $0xe0] sm:$0xff]  ;;  %3442 = vst.msk [vmem:[#allocation3 + $0x109] sm:$0xff] %vm3365_vm5, %v3353_v25  ;;  %v3356_v35 = vmax.f32 %v3324_v39, 0.0  ;;  %v3323_v3 = vadd.f32 %v13837_v42, %v3285_v15  ;;  %11080 = vmatprep.mubr.msk.f32.mxu1 %vm3365_vm5, %v14259_v60  ;;  %v2483_v31 = vadd.f32 %v16814_v52, %v16813_v6  ;;  %v3224_v18 = vpop.f32.mrf.mxu0  ;;  %v3607_v12 = vrot.slane %v14253_v41, 1 }
 0x22f   : > { %11135 = vmatprep.mubr.msk.f32.mxu0 %vm3365_vm5, %v14264_v34  ;;  %v3604_v23 = vrot.slane %v14264_v34, 1  ;;  %v2746_v54 = vadd.f32 %v13754_v48, %v14164_v32  ;;  %11081 = vmatmul.mubr.msk.f32.gmra.mxu1 %vm3365_vm5, %v14262_v51  ;;  %v3605_v0 = vrot.slane %v14266_v27, 1  ;;  %v3019_v25 = vadd.f32 %v14153_v62, %v2747_v28  ;;  %v14288_v48 = vld [vmem:[#allocation3 + $0x100] sm:$0x3] }
 0x230   : > { %11136 = vmatmul.mubr.msk.f32.gmra.mxu0 %vm3365_vm5, %v14266_v27  ;;  %3445 = vst.msk [vmem:[#allocation3 + $0x129] sm:$0xff] %vm3365_vm5, %v3356_v35  ;;  %v3355_v39 = vmax.f32 %v3323_v3, 0.0  ;;  %v3326_v15 = vadd.f32 %v13837_v42, %v3288_v17  ;;  %v3287_v19 = vadd.f32 %v3224_v18, %v3016_v49  ;;  %v2749_v32 = vadd.f32 %v13771_v53, %v14203_v29  ;;  %v11045_v6 = vpop.f32.mrf.mxu0  ;;  %v11001_v35 = vpop.f32.mrf.mxu1  ;;  %v16816_v29 = vld [vmem:[#allocation71_spill] sm:$0xff] }
 0x231   : > { %v3018_v36 = vadd.f32 %v14192_v5, %v2746_v54  ;;  %v14294_v52 = vsel %vm598_vm3, %v3604_v23, %v3605_v0  ;;  %v14297_v51 = vsel %vm598_vm3, %v3605_v0, %v3607_v12  ;;  %v3290_v53 = vadd.f32 %v11045_v6, %v3019_v25 }
 0x232   : > { %16815 = vst [vmem:[#allocation26_spill] sm:$0xff] %v14297_v51  ;;  %v14299_v62 = vld [vmem:[#allocation3 + $0xf0] sm:$0xff]  ;;  %v14301_v28 = vld [vmem:[#allocation3 + $0xf8] sm:$0xff]  ;;  %3444 = vst.msk [vmem:[#allocation3 + $0x121] sm:$0xff] %vm3365_vm5, %v3355_v39  ;;  %v3358_v49 = vmax.f32 %v3326_v15, 0.0  ;;  %v3325_v3 = vadd.f32 %v13837_v42, %v3287_v19  ;;  %11083 = vmatprep.mubr.msk.f32.mxu1 %vm3365_vm5, %v14294_v52  ;;  %v2482_v17 = vadd.f32 %v16816_v29, %v14047_v16  ;;  %v3234_v54 = vpop.f32.mrf.mxu0  ;;  %v3612_v0 = vrot.slane %v14288_v48, 1 }
 0x233   : > { %11138 = vmatprep.mubr.msk.f32.mxu0 %vm3365_vm5, %v14299_v62  ;;  %v3609_v5 = vrot.slane %v14299_v62, 1  ;;  %v2748_v23 = vadd.f32 %v13786_v13, %v2480_v47  ;;  %11084 = vmatmul.mubr.msk.f32.gmra.mxu1 %vm3365_vm5, %v14297_v51  ;;  %v3610_v18 = vrot.slane %v14301_v28, 1  ;;  %v3021_v12 = vadd.f32 %v14231_v55, %v2749_v32  ;;  %v14322_v13 = vld [vmem:[#allocation3 + $0x118] sm:$0x3]  ;;  %v2983_v32 = vpop.f32.mrf.mxu1 }
 0x234   : > { %11139 = vmatmul.mubr.msk.f32.gmra.mxu0 %vm3365_vm5, %v14301_v28  ;;  %3447 = vst.msk [vmem:[#allocation3 + $0x141] sm:$0xff] %vm3365_vm5, %v3358_v49  ;;  %v3357_v25 = vmax.f32 %v3325_v3, 0.0  ;;  %v3328_v16 = vadd.f32 %v13837_v42, %v3290_v53  ;;  %v3289_v39 = vadd.f32 %v3234_v54, %v3018_v36  ;;  %v2751_v47 = vadd.f32 %v13805_v20, %v2483_v31  ;;  %v11048_v19 = vpop.f32.mrf.mxu0 }
 0x235   : > { %v3020_v15 = vadd.f32 %v2973_v7, %v2748_v23  ;;  %v14326_v6 = vsel %vm598_vm3, %v3609_v5, %v3610_v18  ;;  %v14329_v29 = vsel %vm598_vm3, %v3610_v18, %v3612_v0  ;;  %v14331_v51 = vld [vmem:[#allocation3 + $0x108] sm:$0xff]  ;;  %v14333_v55 = vld [vmem:[#allocation3 + $0x110] sm:$0xff]  ;;  %v3292_v3 = vadd.f32 %v11048_v19, %v3021_v12 }
 0x236   : > { %3446 = vst.msk [vmem:[#allocation3 + $0x139] sm:$0xff] %vm3365_vm5, %v3357_v25  ;;  %v3360_v36 = vmax.f32 %v3328_v16, 0.0  ;;  %v3327_v49 = vadd.f32 %v13837_v42, %v3289_v39  ;;  %11086 = vmatprep.mubr.msk.f32.mxu1 %vm3365_vm5, %v14326_v6  ;;  %11141 = vmatprep.mubr.msk.f32.mxu0 %vm3365_vm5, %v14331_v51  ;;  %v3614_v20 = vrot.slane %v14331_v51, 1  ;;  %v2750_v7 = vadd.f32 %v13822_v4, %v2482_v17  ;;  %v3244_v31 = vpop.f32.mrf.mxu0 }
 0x237   : > { %11087 = vmatmul.mubr.msk.f32.gmra.mxu1 %vm3365_vm5, %v14329_v29  ;;  %v3615_v53 = vrot.slane %v14333_v55, 1  ;;  %v3617_v5 = vrot.slane %v14322_v13, 1  ;;  %v3023_v23 = vadd.f32 %v11001_v35, %v2751_v47  ;;  %v3330_v18 = vadd.f32 %v13837_v42, %v3292_v3  ;;  %v14351_v12 = vld [vmem:[#allocation3 + $0x130] sm:$0x3] }
 0x238   : > { %11142 = vmatmul.mubr.msk.f32.gmra.mxu0 %vm3365_vm5, %v14333_v55  ;;  %3449 = vst.msk [vmem:[#allocation3 + $0x159] sm:$0xff] %vm3365_vm5, %v3360_v36  ;;  %v3359_v54 = vmax.f32 %v3327_v49, 0.0  ;;  %v3291_v0 = vadd.f32 %v3244_v31, %v3020_v15  ;;  %v3022_v4 = vadd.f32 %v2983_v32, %v2750_v7  ;;  %v11051_v17 = vpop.f32.mrf.mxu0  ;;  %v3622_v3 = vrot.slane %v14351_v12, 1 }
 0x239   : > { %v14354_v25 = vsel %vm598_vm3, %v3614_v20, %v3615_v53  ;;  %v14357_v16 = vsel %vm598_vm3, %v3615_v53, %v3617_v5  ;;  %v14359_v39 = vld [vmem:[#allocation3 + $0x120] sm:$0xff]  ;;  %v14361_v19 = vld [vmem:[#allocation3 + $0x128] sm:$0xff]  ;;  %v3362_v35 = vmax.f32 %v3330_v18, 0.0  ;;  %v3294_v15 = vadd.f32 %v11051_v17, %v3023_v23 }
 0x23a   : > { %16817 = vst [vmem:[#allocation34_spill] sm:$0xff] %v14357_v16  ;;  %3448 = vst.msk [vmem:[#allocation3 + $0x151] sm:$0xff] %vm3365_vm5, %v3359_v54  ;;  %v3329_v47 = vadd.f32 %v13837_v42, %v3291_v0  ;;  %11089 = vmatprep.mubr.msk.f32.mxu1 %vm3365_vm5, %v14354_v25  ;;  %11144 = vmatprep.mubr.msk.f32.mxu0 %vm3365_vm5, %v14359_v39  ;;  %v3619_v32 = vrot.slane %v14359_v39, 1  ;;  %v3254_v36 = vpop.f32.mrf.mxu0  ;;  %v3620_v49 = vrot.slane %v14361_v19, 1 }
 0x23b   : > { %11090 = vmatmul.mubr.msk.f32.gmra.mxu1 %vm3365_vm5, %v14357_v16  ;;  %v14376_v20 = vld [vmem:[#allocation3 + $0x148] sm:$0x3]  ;;  %3451 = vst.msk [vmem:[#allocation3 + $0x171] sm:$0xff] %vm3365_vm5, %v3362_v35  ;;  %v3332_v31 = vadd.f32 %v13837_v42, %v3294_v15  ;;  %v3293_v53 = vadd.f32 %v3254_v36, %v3022_v4 }
 0x23c   : > { %11145 = vmatmul.mubr.msk.f32.gmra.mxu0 %vm3365_vm5, %v14361_v19  ;;  %v3361_v7 = vmax.f32 %v3329_v47, 0.0  ;;  %v14381_v5 = vsel %vm598_vm3, %v3619_v32, %v3620_v49  ;;  %v14384_v23 = vsel %vm598_vm3, %v3620_v49, %v3622_v3  ;;  %v3627_v0 = vrot.slane %v14376_v20, 1 }
 0x23d   : > { %16818 = vst [vmem:[#allocation29_spill] sm:$0xff] %v14381_v5  ;;  %16819 = vst [vmem:[#allocation37_spill] sm:$0xff] %v14384_v23  ;;  %v14386_v54 = vld [vmem:[#allocation3 + $0x138] sm:$0xff]  ;;  %v14388_v18 = vld [vmem:[#allocation3 + $0x140] sm:$0xff]  ;;  %v3364_v17 = vmax.f32 %v3332_v31, 0.0  ;;  %v3331_v35 = vadd.f32 %v13837_v42, %v3293_v53  ;;  %11092 = vmatprep.mubr.msk.f32.mxu1 %vm3365_vm5, %v14381_v5 }
 0x23e   : > { %3450 = vst.msk [vmem:[#allocation3 + $0x169] sm:$0xff] %vm3365_vm5, %v3361_v7  ;;  %11147 = vmatprep.mubr.msk.f32.mxu0 %vm3365_vm5, %v14386_v54  ;;  %v3624_v4 = vrot.slane %v14386_v54, 1  ;;  %v3625_v47 = vrot.slane %v14388_v18, 1 }
 0x23f   : > { %11093 = vmatmul.mubr.msk.f32.gmra.mxu1 %vm3365_vm5, %v14384_v23  ;;  %v14403_v15 = vld [vmem:[#allocation3 + $0x160] sm:$0x3]  ;;  %3453 = vst.msk [vmem:[#allocation3 + $0x189] sm:$0xff] %vm3365_vm5, %v3364_v17  ;;  %v3363_v42 = vmax.f32 %v3331_v35, 0.0 }
 0x240   : > { %11148 = vmatmul.mubr.msk.f32.gmra.mxu0 %vm3365_vm5, %v14388_v18  ;;  %v14407_v32 = vsel %vm598_vm3, %v3624_v4, %v3625_v47  ;;  %v14410_v36 = vsel %vm598_vm3, %v3625_v47, %v3627_v0  ;;  %v3632_v53 = vrot.slane %v14403_v15, 1  ;;  %v11825_v4 = vld [vmem:[#allocation3] sm:$0xff] }
 0x241   : > { %16820 = vst [vmem:[#allocation6_spill] sm:$0xff] %v14407_v32  ;;  %16821 = vst [vmem:[#allocation8_spill] sm:$0xff] %v14410_v36  ;;  %11095 = vmatprep.mubr.msk.f32.mxu1 %vm3365_vm5, %v14407_v32  ;;  %v14414_v49 = vld [vmem:[#allocation3 + $0x150] sm:$0xff]  ;;  %v14416_v3 = vld [vmem:[#allocation3 + $0x158] sm:$0xff]  ;;  %v4188_v47 = vrot.slane %v11825_v4, 2 }
 0x242   : > { %16822 = vst [vmem:[#allocation32_spill] sm:$0xff] %v14416_v3  ;;  %3452 = vst.msk [vmem:[#allocation3 + $0x181] sm:$0xff] %vm3365_vm5, %v3363_v42  ;;  %11150 = vmatprep.mubr.msk.f32.mxu0 %vm3365_vm5, %v14414_v49  ;;  %v3629_v7 = vrot.slane %v14414_v49, 1  ;;  %v3630_v31 = vrot.slane %v14416_v3, 1  ;;  %v14428_v0 = vld [vmem:[#allocation3 + $0x178] sm:$0x3] }
 0x243   : > { %11096 = vmatmul.mubr.msk.f32.gmra.mxu1 %vm3365_vm5, %v14410_v36  ;;  %v11826_v36 = vld [vmem:[#allocation3 + $0x8] sm:$0xff]  ;;  %v11827_v4 = vld [vmem:[#allocation3 + $0x10] sm:$0x3] }
 0x244   : > { %11151 = vmatmul.mubr.msk.f32.gmra.mxu0 %vm3365_vm5, %v14416_v3  ;;  %v14431_v17 = vsel %vm598_vm3, %v3629_v7, %v3630_v31  ;;  %v14434_v35 = vsel %vm598_vm3, %v3630_v31, %v3632_v53  ;;  %v4189_v23 = vrot.slane %v11826_v36, 2  ;;  %v3637_v31 = vrot.slane %v14428_v0, 1 }
 0x245   : > { %16823 = vst [vmem:[#allocation10_spill] sm:$0xff] %v14431_v17  ;;  %16824 = vst [vmem:[#allocation33_spill] sm:$0xff] %v14434_v35  ;;  %11098 = vmatprep.mubr.msk.f32.mxu1 %vm3365_vm5, %v14431_v17  ;;  %v14438_v42 = vld [vmem:[#allocation3 + $0x168] sm:$0xff]  ;;  %v14440_v32 = vld [vmem:[#allocation3 + $0x170] sm:$0xff]  ;;  %v4191_v17 = vrot.slane %v11827_v4, 2 }
 0x246   : > { %11153 = vmatprep.mubr.msk.f32.mxu0 %vm3365_vm5, %v14438_v42  ;;  %v3634_v7 = vrot.slane %v14438_v42, 1  ;;  %v3635_v5 = vrot.slane %v14440_v32, 1  ;;  %v4190_v16 = vsel %vm1266_vm4, %v4188_v47, %v4189_v23  ;;  %v9493_v4 = vld [vmem:[%s16336_s3 + $0x40] sm:$0xff] }
 0x247   : > { %11099 = vmatmul.mubr.msk.f32.gmra.mxu1 %vm3365_vm5, %v14434_v35  ;;  %v4193_v35 = vrot.slane %v13959_v43, 2  ;;  %v4192_v47 = vsel %vm1266_vm4, %v4189_v23, %v4191_v17  ;;  %v11828_v23 = vld [vmem:[%s16336_s3 + $0x48] sm:$0xff]  ;;  %v4196_v17 = vrot.slane %v13946_v38, 2 }
 0x248   : > { %11154 = vmatmul.mubr.msk.f32.gmra.mxu0 %vm3365_vm5, %v14440_v32  ;;  %v14454_v36 = vsel %vm598_vm3, %v3634_v7, %v3635_v5  ;;  %v14457_v53 = vsel %vm598_vm3, %v3635_v5, %v3637_v31  ;;  %v4194_v7 = vrot.slane %v13961_v10, 2  ;;  %v9527_v5 = vld [vmem:[%s16336_s3 + $0x50] sm:$0xff] }
 0x249   : > { %11212 = vmatprep.mubr.msk.f32.mxu0 %vm3365_vm5, %v13959_v43  ;;  %16825 = vst [vmem:[#allocation16_spill] sm:$0xff] %v14457_v53  ;;  %11101 = vmatprep.mubr.msk.f32.mxu1 %vm3365_vm5, %v14454_v36 }
 0x24b   : > { %11102 = vmatmul.mubr.msk.f32.gmra.mxu1 %vm3365_vm5, %v14457_v53  ;;  %v14483_v53 = vsel %vm1266_vm4, %v4193_v35, %v4194_v7  ;;  %v14498_v35 = vsel %vm1266_vm4, %v4194_v7, %v4196_v17  ;;  %v4203_v7 = vrot.slane %v14032_v33, 2 }
 0x24c   : > { %11213 = vmatmul.mubr.msk.f32.vlgmr.msra.gmra.mxu0 %vm3365_vm5, %v13961_v10  ;;  %11160 = vmatprep.mubr.msk.f32.mxu1 %vm3365_vm5, %v4190_v16  ;;  %v11110_v43 = vpop.f32.mrf.mxu0  ;;  %v4198_v16 = vrot.slane %v13993_v8, 2 }
 0x24d   : > { %11215 = vmatprep.mubr.msk.f32.mxu0 %vm3365_vm5, %v13993_v8  ;;  %11313 = vmatpush3.msra.mxu0 %v13910_v11  ;;  %v11058_v31 = vpop.f32.mrf.mxu1  ;;  %v4199_v11 = vrot.slane %v13995_v56, 2  ;;  %v14503_v8 = vld [vmem:[%s16336_s3 + $0x68] sm:$0xff] }
 0x24e   : > { %11314 = vmatprep.subr.mxu0 %v9527_v5  ;;  %v14479_v10 = vadd.f32 %v11110_v43, %v11058_v31  ;;  %v4206_v31 = vrot.slane %v14021_v21, 2  ;;  %v4211_v21 = vrot.slane %v14060_v37, 2  ;;  %v4216_v37 = vrot.slane %v14099_v59, 2 }
 0x24f   : > { %11161 = vmatmul.mubr.msk.f32.vlgmr.msra.gmra.mxu1 %vm3365_vm5, %v4192_v47  ;;  %11315 = vmatpush3.msra.mxu0 %v9527_v5  ;;  %v14513_v38 = vsel %vm1266_vm4, %v4198_v16, %v4199_v11  ;;  %v4204_v5 = vrot.slane %v14034_v57, 2  ;;  %v4201_v47 = vrot.slane %v13982_v61, 2  ;;  %v4209_v61 = vrot.slane %v14073_v45, 2 }
 0x250   : > { %16826 = vst [vmem:[#allocation19_spill] sm:$0xff] %v14479_v10  ;;  %11216 = vmatmul.mubr.msk.f32.gmra.mxu0 %vm3365_vm5, %v13995_v56  ;;  %11261 = vmatpush3.msra.mxu1 %v11828_v23  ;;  %v14508_v56 = vld [vmem:[%s16336_s3 + $0x78] sm:$0xff]  ;;  %v4221_v59 = vrot.slane %v14138_v46, 2  ;;  %v4226_v46 = vrot.slane %v14177_v58, 2  ;;  %v4231_v58 = vrot.slane %v14216_v9, 2  ;;  %v4236_v9 = vrot.slane %v14253_v41, 2 }
 0x251   : > { %11163 = vmatprep.mubr.msk.f32.mxu1 %vm3365_vm5, %v14483_v53  ;;  %11218 = vmatprep.mubr.msk.f32.mxu0 %vm3365_vm5, %v14032_v33  ;;  %v14527_v43 = vsel %vm1266_vm4, %v4199_v11, %v4201_v47  ;;  %v14532_v33 = vsel %vm1266_vm4, %v4203_v7, %v4204_v5  ;;  %v14561_v11 = vsel %vm1266_vm4, %v4209_v61, %v4211_v21  ;;  %v4234_v21 = vrot.slane %v14266_v27, 2 }
 0x252   : > { %11262 = vmatprep.subr.mxu1 %v9493_v4  ;;  %11416 = vmatprep.subr.mxu0 %v14508_v56  ;;  %v4241_v41 = vrot.slane %v14288_v48, 2  ;;  %v4246_v48 = vrot.slane %v14322_v13, 2  ;;  %v4251_v13 = vrot.slane %v14351_v12, 2  ;;  %v4256_v12 = vrot.slane %v14376_v20, 2 }
 0x253   : > { %11263 = vmatpush3.msra.mxu1 %v9493_v4  ;;  %v14544_v4 = vsel %vm1266_vm4, %v4204_v5, %v4206_v31  ;;  %v4263_v10 = vrot.slane %v14438_v42, 2  ;;  %v4261_v20 = vrot.slane %v14403_v15, 2  ;;  %v4266_v15 = vrot.slane %v14428_v0, 2  ;;  %v16848_v0 = vld [vmem:[#allocation12_spill] sm:$0xff] }
 0x254   : > { %11164 = vmatmul.mubr.msk.f32.gmra.mxu1 %vm3365_vm5, %v14498_v35  ;;  %11219 = vmatmul.mubr.msk.f32.gmra.mxu0 %vm3365_vm5, %v14034_v57  ;;  %v4208_v57 = vrot.slane %v14071_v14, 2 }
 0x255   : > { %11166 = vmatprep.mubr.msk.f32.mxu1 %vm3365_vm5, %v14513_v38  ;;  %11221 = vmatprep.mubr.msk.f32.mxu0 %vm3365_vm5, %v14071_v14  ;;  %v4213_v14 = vrot.slane %v14110_v24, 2 }
 0x256   : > { %11364 = vmatprep.subr.mxu1 %v14503_v8  ;;  %v14549_v16 = vsel %vm1266_vm4, %v4208_v57, %v4209_v61  ;;  %v4228_v57 = vrot.slane %v14227_v63, 2  ;;  %v4229_v61 = vrot.slane %v14229_v2, 2 }
 0x258   : > { %11167 = vmatmul.mubr.msk.f32.gmra.mxu1 %vm3365_vm5, %v14527_v43  ;;  %11222 = vmatmul.mubr.msk.f32.gmra.mxu0 %vm3365_vm5, %v14073_v45  ;;  %v4214_v45 = vrot.slane %v14112_v22, 2 }
 0x259   : > { %11169 = vmatprep.mubr.msk.f32.mxu1 %vm3365_vm5, %v14532_v33  ;;  %11224 = vmatprep.mubr.msk.f32.mxu0 %vm3365_vm5, %v14110_v24  ;;  %v4218_v24 = vrot.slane %v14149_v26, 2 }
 0x25a   : > { %v14566_v23 = vsel %vm1266_vm4, %v4213_v14, %v4214_v45  ;;  %v14578_v17 = vsel %vm1266_vm4, %v4214_v45, %v4216_v37  ;;  %v14617_v14 = vsel %vm1266_vm4, %v4228_v57, %v4229_v61  ;;  %v4233_v45 = vrot.slane %v14264_v34, 2 }
 0x25b   : > { %16827 = vst [vmem:[#allocation35_spill] sm:$0xff] %v14578_v17  ;;  %16832 = vst [vmem:[#allocation7_spill] sm:$0xff] %v14617_v14  ;;  %v4238_v37 = vrot.slane %v14299_v62, 2  ;;  %v4243_v57 = vrot.slane %v14331_v51, 2 }
 0x25c   : > { %11170 = vmatmul.mubr.msk.f32.gmra.mxu1 %vm3365_vm5, %v14544_v4  ;;  %11225 = vmatmul.mubr.msk.f32.gmra.mxu0 %vm3365_vm5, %v14112_v22  ;;  %v4219_v22 = vrot.slane %v14151_v50, 2 }
 0x25d   : > { %11172 = vmatprep.mubr.msk.f32.mxu1 %vm3365_vm5, %v14549_v16  ;;  %11227 = vmatprep.mubr.msk.f32.mxu0 %vm3365_vm5, %v14149_v26  ;;  %v4223_v26 = vrot.slane %v14188_v30, 2 }
 0x25e   : > { %v14583_v7 = vsel %vm1266_vm4, %v4218_v24, %v4219_v22  ;;  %v14595_v5 = vsel %vm1266_vm4, %v4219_v22, %v4221_v59  ;;  %v14629_v24 = vsel %vm1266_vm4, %v4229_v61, %v4231_v58  ;;  %v14634_v22 = vsel %vm1266_vm4, %v4233_v45, %v4234_v21 }
 0x25f   : > { %16828 = vst [vmem:[#allocation25_spill] sm:$0xff] %v14583_v7  ;;  %16829 = vst [vmem:[#allocation36_spill] sm:$0xff] %v14595_v5  ;;  %v4244_v61 = vrot.slane %v14333_v55, 2  ;;  %v4249_v58 = vrot.slane %v14361_v19, 2 }
 0x260   : > { %11173 = vmatmul.mubr.msk.f32.gmra.mxu1 %vm3365_vm5, %v14561_v11  ;;  %11228 = vmatmul.mubr.msk.f32.gmra.mxu0 %vm3365_vm5, %v14151_v50  ;;  %v4224_v50 = vrot.slane %v14190_v44, 2  ;;  %16833 = vst [vmem:[#allocation39_spill] sm:$0xff] %v14629_v24  ;;  %16834 = vst [vmem:[#allocation40_spill] sm:$0xff] %v14634_v22 }
 0x261   : > { %11175 = vmatprep.mubr.msk.f32.mxu1 %vm3365_vm5, %v14566_v23  ;;  %11230 = vmatprep.mubr.msk.f32.mxu0 %vm3365_vm5, %v14188_v30  ;;  %v14668_v45 = vsel %vm1266_vm4, %v4243_v57, %v4244_v61  ;;  %v4254_v57 = vrot.slane %v14388_v18, 2 }
 0x262   : > { %v14600_v47 = vsel %vm1266_vm4, %v4223_v26, %v4224_v50  ;;  %v14612_v31 = vsel %vm1266_vm4, %v4224_v50, %v4226_v46  ;;  %v4239_v26 = vrot.slane %v14301_v28, 2  ;;  %v14646_v50 = vsel %vm1266_vm4, %v4234_v21, %v4236_v9  ;;  %16838 = vst [vmem:[#allocation13_spill] sm:$0xff] %v14668_v45 }
 0x263   : > { %16830 = vst [vmem:[#allocation68_spill] sm:$0xff] %v14600_v47  ;;  %16831 = vst [vmem:[#allocation76_spill] sm:$0xff] %v14612_v31  ;;  %v4248_v21 = vrot.slane %v14359_v39, 2  ;;  %v4253_v9 = vrot.slane %v14386_v54, 2 }
 0x264   : > { %11176 = vmatmul.mubr.msk.f32.gmra.mxu1 %vm3365_vm5, %v14578_v17  ;;  %11231 = vmatmul.mubr.msk.f32.gmra.mxu0 %vm3365_vm5, %v14190_v44  ;;  %16835 = vst [vmem:[#allocation41_spill] sm:$0xff] %v14646_v50  ;;  %v14651_v59 = vsel %vm1266_vm4, %v4238_v37, %v4239_v26  ;;  %v14663_v46 = vsel %vm1266_vm4, %v4239_v26, %v4241_v41 }
 0x265   : > { %11178 = vmatprep.mubr.msk.f32.mxu1 %vm3365_vm5, %v14583_v7  ;;  %11233 = vmatprep.mubr.msk.f32.mxu0 %vm3365_vm5, %v14227_v63  ;;  %16836 = vst [vmem:[#allocation70_spill] sm:$0xff] %v14651_v59  ;;  %16837 = vst [vmem:[#allocation78_spill] sm:$0xff] %v14663_v46  ;;  %v14680_v37 = vsel %vm1266_vm4, %v4244_v61, %v4246_v48  ;;  %v14685_v26 = vsel %vm1266_vm4, %v4248_v21, %v4249_v58  ;;  %v4258_v21 = vrot.slane %v14414_v49, 2 }
 0x266   : > { %16839 = vst [vmem:[#allocation43_spill] sm:$0xff] %v14680_v37  ;;  %16840 = vst [vmem:[#allocation44_spill] sm:$0xff] %v14685_v26  ;;  %v14697_v61 = vsel %vm1266_vm4, %v4249_v58, %v4251_v13  ;;  %v14702_v41 = vsel %vm1266_vm4, %v4253_v9, %v4254_v57  ;;  %v4259_v48 = vrot.slane %v14416_v3, 2  ;;  %v14714_v58 = vsel %vm1266_vm4, %v4254_v57, %v4256_v12  ;;  %v14723_v13 = vld [vmem:[#allocation3 + $0x180] sm:$0xff] }
 0x267   : > { %16841 = vst [vmem:[#allocation45_spill] sm:$0xff] %v14697_v61  ;;  %16842 = vst [vmem:[#allocation72_spill] sm:$0xff] %v14702_v41 }
 0x268   : > { %11179 = vmatmul.mubr.msk.f32.gmra.mxu1 %vm3365_vm5, %v14595_v5  ;;  %11234 = vmatmul.mubr.msk.f32.gmra.mxu0 %vm3365_vm5, %v14229_v2  ;;  %16843 = vst [vmem:[#allocation80_spill] sm:$0xff] %v14714_v58  ;;  %v14719_v9 = vsel %vm1266_vm4, %v4258_v21, %v4259_v48  ;;  %v14733_v57 = vsel %vm1266_vm4, %v4259_v48, %v4261_v20  ;;  %v14735_v21 = vld [vmem:[#allocation3 + $0x188] sm:$0xff]  ;;  %v16854_v20 = vld [vmem:[#allocation21_spill] sm:$0xff] }
 0x269   : > { %11181 = vmatprep.mubr.msk.f32.mxu1 %vm3365_vm5, %v14600_v47  ;;  %11236 = vmatprep.mubr.msk.f32.mxu0 %vm3365_vm5, %v14264_v34  ;;  %16844 = vst [vmem:[#allocation22_spill] sm:$0xff] %v14719_v9  ;;  %16845 = vst [vmem:[#allocation47_spill] sm:$0xff] %v14733_v57 }
 0x26c   : > { %11182 = vmatmul.mubr.msk.f32.gmra.mxu1 %vm3365_vm5, %v14612_v31  ;;  %11237 = vmatmul.mubr.msk.f32.gmra.mxu0 %vm3365_vm5, %v14266_v27 }
 0x26d   : > { %11184 = vmatprep.mubr.msk.f32.mxu1 %vm3365_vm5, %v14617_v14  ;;  %11239 = vmatprep.mubr.msk.f32.mxu0 %vm3365_vm5, %v14299_v62 }
 0x270   : > { %11185 = vmatmul.mubr.msk.f32.gmra.mxu1 %vm3365_vm5, %v14629_v24  ;;  %11240 = vmatmul.mubr.msk.f32.gmra.mxu0 %vm3365_vm5, %v14301_v28 }
 0x271   : > { %11187 = vmatprep.mubr.msk.f32.mxu1 %vm3365_vm5, %v14634_v22  ;;  %11242 = vmatprep.mubr.msk.f32.mxu0 %vm3365_vm5, %v14331_v51 }
 0x274   : > { %11188 = vmatmul.mubr.msk.f32.gmra.mxu1 %vm3365_vm5, %v14646_v50  ;;  %11243 = vmatmul.mubr.msk.f32.gmra.mxu0 %vm3365_vm5, %v14333_v55 }
 0x275   : > { %11190 = vmatprep.mubr.msk.f32.mxu1 %vm3365_vm5, %v14651_v59  ;;  %11245 = vmatprep.mubr.msk.f32.mxu0 %vm3365_vm5, %v14359_v39 }
 0x278   : > { %11191 = vmatmul.mubr.msk.f32.gmra.mxu1 %vm3365_vm5, %v14663_v46  ;;  %11246 = vmatmul.mubr.msk.f32.gmra.mxu0 %vm3365_vm5, %v14361_v19 }
 0x279   : > { %11193 = vmatprep.mubr.msk.f32.mxu1 %vm3365_vm5, %v14668_v45  ;;  %11248 = vmatprep.mubr.msk.f32.mxu0 %vm3365_vm5, %v14386_v54 }
 0x27c   : > { %11194 = vmatmul.mubr.msk.f32.gmra.mxu1 %vm3365_vm5, %v14680_v37  ;;  %11249 = vmatmul.mubr.msk.f32.gmra.mxu0 %vm3365_vm5, %v14388_v18 }
 0x27d   : > { %11196 = vmatprep.mubr.msk.f32.mxu1 %vm3365_vm5, %v14685_v26  ;;  %11251 = vmatprep.mubr.msk.f32.mxu0 %vm3365_vm5, %v14414_v49 }
 0x280   : > { %11197 = vmatmul.mubr.msk.f32.gmra.mxu1 %vm3365_vm5, %v14697_v61  ;;  %11252 = vmatmul.mubr.msk.f32.gmra.mxu0 %vm3365_vm5, %v14416_v3  ;;  %v4264_v3 = vrot.slane %v14440_v32, 2 }
 0x281   : > { %11199 = vmatprep.mubr.msk.f32.mxu1 %vm3365_vm5, %v14702_v41  ;;  %11254 = vmatprep.mubr.msk.f32.mxu0 %vm3365_vm5, %v14438_v42 }
 0x282   : > { %v14740_v12 = vsel %vm1266_vm4, %v4263_v10, %v4264_v3  ;;  %v14750_v48 = vsel %vm1266_vm4, %v4264_v3, %v4266_v15  ;;  %v9595_v10 = vld [vmem:[%s16336_s3 + $0x70] sm:$0xff]  ;;  %v9561_v3 = vld [vmem:[%s16336_s3 + $0x60] sm:$0xff]  ;;  %v16855_v15 = vld [vmem:[#allocation23_spill] sm:$0xff] }
 0x283   : > { %16846 = vst [vmem:[#allocation48_spill] sm:$0xff] %v14740_v12  ;;  %16847 = vst [vmem:[#allocation49_spill] sm:$0xff] %v14750_v48 }
 0x284   : > { %11200 = vmatmul.mubr.msk.f32.gmra.mxu1 %vm3365_vm5, %v14714_v58  ;;  %11255 = vmatmul.mubr.msk.f32.gmra.mxu0 %vm3365_vm5, %v14440_v32 }
 0x285   : > { %11202 = vmatprep.mubr.msk.f32.mxu1 %vm3365_vm5, %v14719_v9  ;;  %11257 = vmatprep.mubr.msk.f32.mxu0 %vm3365_vm5, %v14723_v13 }
 0x288   : > { %11203 = vmatmul.mubr.msk.f32.gmra.mxu1 %vm3365_vm5, %v14733_v57  ;;  %11258 = vmatmul.mubr.msk.f32.gmra.mxu0 %vm3365_vm5, %v14735_v21 }
 0x289   : > { %11205 = vmatprep.mubr.msk.f32.mxu1 %vm3365_vm5, %v14740_v12  ;;  %11316 = vmatprep.mubr.msk.f32.mxu0 %vm3365_vm5, %v14483_v53  ;;  %v16850_v53 = vld [vmem:[#allocation15_spill] sm:$0xff] }
 0x28c   : > { %11206 = vmatmul.mubr.msk.f32.gmra.mxu1 %vm3365_vm5, %v14750_v48  ;;  %11317 = vmatmul.mubr.msk.f32.vlgmr.msra.gmra.mxu0 %vm3365_vm5, %v14498_v35  ;;  %v16851_v35 = vld [vmem:[#allocation17_spill] sm:$0xff] }
 0x28d   : > { %11264 = vmatprep.mubr.msk.f32.mxu1 %vm3365_vm5, %v13988_v40  ;;  %11319 = vmatprep.mubr.msk.f32.mxu0 %vm3365_vm5, %v14513_v38  ;;  %v14779_v40 = vld [vmem:[%s16336_s3 + $0x88] sm:$0xff] }
 0x28e   : > { %11417 = vmatpush3.msra.mxu0 %v14508_v56  ;;  %v16853_v56 = vld [vmem:[#allocation20_spill] sm:$0xff] }
 0x28f   : > { %11418 = vmatprep.subr.mxu0 %v9595_v10 }
 0x290   : > { %11265 = vmatmul.mubr.msk.f32.vlgmr.msra.gmra.mxu1 %vm3365_vm5, %v13991_v1  ;;  %11320 = vmatmul.mubr.msk.f32.gmra.mxu0 %vm3365_vm5, %v14527_v43  ;;  %v16849_v1 = vld [vmem:[#allocation14_spill] sm:$0xff] }
 0x291   : > { %11365 = vmatpush3.msra.mxu1 %v14503_v8  ;;  %11267 = vmatprep.mubr.msk.f32.mxu1 %vm3365_vm5, %v16848_v0  ;;  %v16852_v8 = vld [vmem:[#allocation18_spill] sm:$0xff] }
 0x292   : > { %11322 = vmatprep.mubr.msk.f32.mxu0 %vm3365_vm5, %v14532_v33  ;;  %11366 = vmatprep.subr.mxu1 %v9561_v3 }
 0x293   : > { %11367 = vmatpush3.msra.mxu1 %v9561_v3  ;;  %11419 = vmatpush3.msra.mxu0 %v9595_v10  ;;  %v16856_v10 = vld [vmem:[#allocation24_spill] sm:$0xff] }
 0x294   : > { %11268 = vmatmul.mubr.msk.f32.gmra.mxu1 %vm3365_vm5, %v16849_v1  ;;  %11323 = vmatmul.mubr.msk.f32.gmra.mxu0 %vm3365_vm5, %v14544_v4  ;;  %v16857_v3 = vld [vmem:[#allocation28_spill] sm:$0xff] }
 0x295   : > { %11270 = vmatprep.mubr.msk.f32.mxu1 %vm3365_vm5, %v16850_v53  ;;  %11325 = vmatprep.mubr.msk.f32.mxu0 %vm3365_vm5, %v14549_v16 }
 0x296   : > { %11468 = vmatprep.subr.mxu1 %v14779_v40 }
 0x298   : > { %11271 = vmatmul.mubr.msk.f32.gmra.mxu1 %vm3365_vm5, %v16851_v35  ;;  %11326 = vmatmul.mubr.msk.f32.gmra.mxu0 %vm3365_vm5, %v14561_v11 }
 0x299   : > { %11273 = vmatprep.mubr.msk.f32.mxu1 %vm3365_vm5, %v16852_v8  ;;  %11328 = vmatprep.mubr.msk.f32.mxu0 %vm3365_vm5, %v14566_v23 }
 0x29c   : > { %11274 = vmatmul.mubr.msk.f32.gmra.mxu1 %vm3365_vm5, %v16853_v56  ;;  %11329 = vmatmul.mubr.msk.f32.gmra.mxu0 %vm3365_vm5, %v14578_v17  ;;  %v16858_v17 = vld [vmem:[#allocation27_spill] sm:$0xff] }
 0x29d   : > { %11276 = vmatprep.mubr.msk.f32.mxu1 %vm3365_vm5, %v16854_v20  ;;  %11331 = vmatprep.mubr.msk.f32.mxu0 %vm3365_vm5, %v14583_v7  ;;  %v16859_v7 = vld [vmem:[#allocation31_spill] sm:$0xff] }
 0x2a0   : > { %11277 = vmatmul.mubr.msk.f32.gmra.mxu1 %vm3365_vm5, %v16855_v15  ;;  %11332 = vmatmul.mubr.msk.f32.gmra.mxu0 %vm3365_vm5, %v14595_v5  ;;  %v16870_v5 = vld [vmem:[#allocation16_spill] sm:$0xff] }
 0x2a1   : > { %11279 = vmatprep.mubr.msk.f32.mxu1 %vm3365_vm5, %v16856_v10  ;;  %11334 = vmatprep.mubr.msk.f32.mxu0 %vm3365_vm5, %v14600_v47  ;;  %v16860_v47 = vld [vmem:[#allocation30_spill] sm:$0xff] }
 0x2a4   : > { %11280 = vmatmul.mubr.msk.f32.gmra.mxu1 %vm3365_vm5, %v16857_v3  ;;  %11335 = vmatmul.mubr.msk.f32.gmra.mxu0 %vm3365_vm5, %v14612_v31 }
 0x2a5   : > { %11282 = vmatprep.mubr.msk.f32.mxu1 %vm3365_vm5, %v16858_v17  ;;  %11337 = vmatprep.mubr.msk.f32.mxu0 %vm3365_vm5, %v14617_v14  ;;  %v16861_v14 = vld [vmem:[#allocation26_spill] sm:$0xff] }
 0x2a8   : > { %11283 = vmatmul.mubr.msk.f32.gmra.mxu1 %vm3365_vm5, %v16859_v7  ;;  %11338 = vmatmul.mubr.msk.f32.gmra.mxu0 %vm3365_vm5, %v14629_v24 }
 0x2a9   : > { %11285 = vmatprep.mubr.msk.f32.mxu1 %vm3365_vm5, %v14259_v60  ;;  %11340 = vmatprep.mubr.msk.f32.mxu0 %vm3365_vm5, %v14634_v22  ;;  %v4795_v22 = vrot.slane %v14723_v13, 1 }
 0x2ac   : > { %11286 = vmatmul.mubr.msk.f32.gmra.mxu1 %vm3365_vm5, %v16860_v47  ;;  %11341 = vmatmul.mubr.msk.f32.gmra.mxu0 %vm3365_vm5, %v14646_v50  ;;  %v16867_v50 = vld [vmem:[#allocation10_spill] sm:$0xff] }
 0x2ad   : > { %11288 = vmatprep.mubr.msk.f32.mxu1 %vm3365_vm5, %v14294_v52  ;;  %11343 = vmatprep.mubr.msk.f32.mxu0 %vm3365_vm5, %v14651_v59  ;;  %v16862_v59 = vld [vmem:[#allocation34_spill] sm:$0xff] }
 0x2b0   : > { %11289 = vmatmul.mubr.msk.f32.gmra.mxu1 %vm3365_vm5, %v16861_v14  ;;  %11344 = vmatmul.mubr.msk.f32.gmra.mxu0 %vm3365_vm5, %v14663_v46  ;;  %v16863_v46 = vld [vmem:[#allocation29_spill] sm:$0xff] }
 0x2b1   : > { %11291 = vmatprep.mubr.msk.f32.mxu1 %vm3365_vm5, %v14326_v6  ;;  %11346 = vmatprep.mubr.msk.f32.mxu0 %vm3365_vm5, %v14668_v45  ;;  %v16864_v45 = vld [vmem:[#allocation37_spill] sm:$0xff] }
 0x2b4   : > { %11292 = vmatmul.mubr.msk.f32.gmra.mxu1 %vm3365_vm5, %v14329_v29  ;;  %11347 = vmatmul.mubr.msk.f32.gmra.mxu0 %vm3365_vm5, %v14680_v37  ;;  %v16865_v37 = vld [vmem:[#allocation6_spill] sm:$0xff] }
 0x2b5   : > { %11294 = vmatprep.mubr.msk.f32.mxu1 %vm3365_vm5, %v14354_v25  ;;  %11349 = vmatprep.mubr.msk.f32.mxu0 %vm3365_vm5, %v14685_v26  ;;  %v16866_v26 = vld [vmem:[#allocation8_spill] sm:$0xff] }
 0x2b8   : > { %11295 = vmatmul.mubr.msk.f32.gmra.mxu1 %vm3365_vm5, %v16862_v59  ;;  %11350 = vmatmul.mubr.msk.f32.gmra.mxu0 %vm3365_vm5, %v14697_v61  ;;  %v5032_v61 = vrot.slane %v14723_v13, 2 }
 0x2b9   : > { %11297 = vmatprep.mubr.msk.f32.mxu1 %vm3365_vm5, %v16863_v46  ;;  %11352 = vmatprep.mubr.msk.f32.mxu0 %vm3365_vm5, %v14702_v41  ;;  %v5033_v41 = vrot.slane %v14735_v21, 2 }
 0x2bb   : > { %v14886_v24 = vsel %vm1266_vm4, %v5032_v61, %v5033_v41 }
 0x2bc   : > { %11298 = vmatmul.mubr.msk.f32.gmra.mxu1 %vm3365_vm5, %v16864_v45  ;;  %11353 = vmatmul.mubr.msk.f32.gmra.mxu0 %vm3365_vm5, %v14714_v58  ;;  %v3505_v58 = vld [vmem:[#allocation3 + $0x190] sm:$0x3]  ;;  %16869 = vst [vmem:[#allocation73_spill] sm:$0xff] %v14886_v24 }
 0x2bd   : > { %11300 = vmatprep.mubr.msk.f32.mxu1 %vm3365_vm5, %v16865_v37  ;;  %11355 = vmatprep.mubr.msk.f32.mxu0 %vm3365_vm5, %v14719_v9  ;;  %v16868_v9 = vld [vmem:[#allocation33_spill] sm:$0xff]  ;;  %v4798_v61 = vrot.slane %v3505_v58, 1 }
 0x2c0   : > { %11301 = vmatmul.mubr.msk.f32.gmra.mxu1 %vm3365_vm5, %v16866_v26  ;;  %11356 = vmatmul.mubr.msk.f32.gmra.mxu0 %vm3365_vm5, %v14733_v57  ;;  %v4796_v57 = vrot.slane %v14735_v21, 1 }
 0x2c1   : > { %11303 = vmatprep.mubr.msk.f32.mxu1 %vm3365_vm5, %v16867_v50  ;;  %11358 = vmatprep.mubr.msk.f32.mxu0 %vm3365_vm5, %v14740_v12  ;;  %v5035_v12 = vrot.slane %v3505_v58, 2  ;;  %v9629_v58 = vld [vmem:[%s16336_s3 + $0x80] sm:$0xff] }
 0x2c3   : > { %v14894_v31 = vsel %vm1266_vm4, %v5033_v41, %v5035_v12  ;;  %v11829_v41 = vld [vmem:[#allocation3 + $0x30] sm:$0xff] }
 0x2c4   : > { %11304 = vmatmul.mubr.msk.f32.gmra.mxu1 %vm3365_vm5, %v16868_v9  ;;  %11359 = vmatmul.mubr.msk.f32.gmra.mxu0 %vm3365_vm5, %v14750_v48  ;;  %v14899_v48 = vsel %vm598_vm3, %v4795_v22, %v4796_v57  ;;  %v14914_v22 = vpop.f32.mrf.mxu0 }
 0x2c5   : > { %11306 = vmatprep.mubr.msk.f32.mxu1 %vm3365_vm5, %v14454_v36  ;;  %11361 = vmatprep.mubr.msk.f32.mxu0 %vm3365_vm5, %v14886_v24  ;;  %v14908_v24 = vsel %vm598_vm3, %v4796_v57, %v4798_v61  ;;  %v11830_v57 = vld [vmem:[#allocation3 + $0x38] sm:$0xff] }
 0x2c8   : > { %11307 = vmatmul.mubr.msk.f32.gmra.mxu1 %vm3365_vm5, %v16870_v5  ;;  %11362 = vmatmul.mubr.msk.f32.gmra.mxu0 %vm3365_vm5, %v14894_v31 }
 0x2c9   : > { %11309 = vmatprep.mubr.msk.f32.mxu1 %vm3365_vm5, %v14899_v48  ;;  %11420 = vmatprep.mubr.msk.f32.mxu0 %vm3365_vm5, %v16848_v0  ;;  %v11831_v0 = vld [vmem:[#allocation3 + $0x48] sm:$0xff] }
 0x2cc   : > { %11310 = vmatmul.mubr.msk.f32.gmra.mxu1 %vm3365_vm5, %v14908_v24  ;;  %11421 = vmatmul.mubr.msk.f32.vlgmr.msra.gmra.mxu0 %vm3365_vm5, %v16849_v1  ;;  %v14927_v1 = vpop.f32.mrf.mxu1 }
 0x2cd   : > { %11368 = vmatprep.mubr.msk.f32.mxu1 %vm3365_vm5, %v11829_v41  ;;  %11423 = vmatprep.mubr.msk.f32.mxu0 %vm3365_vm5, %v16850_v53  ;;  %v11832_v41 = vld [vmem:[#allocation3 + $0x50] sm:$0xff] }
 0x2ce   : > { %v11113_v12 = vpop.f32.mrf.mxu0 }
 0x2d0   : > { %11369 = vmatmul.mubr.msk.f32.vlgmr.msra.gmra.mxu1 %vm3365_vm5, %v11830_v57  ;;  %11424 = vmatmul.mubr.msk.f32.gmra.mxu0 %vm3365_vm5, %v16851_v35  ;;  %v4055_v53 = vpop.f32.mrf.mxu0 }
 0x2d1   : > { %11469 = vmatpush3.msra.mxu1 %v14779_v40  ;;  %11371 = vmatprep.mubr.msk.f32.mxu1 %vm3365_vm5, %v11831_v0  ;;  %v11833_v40 = vld [vmem:[#allocation3 + $0x60] sm:$0xff]  ;;  %v11834_v0 = vld [vmem:[#allocation3 + $0x68] sm:$0xff] }
 0x2d2   : > { %11426 = vmatprep.mubr.msk.f32.mxu0 %vm3365_vm5, %v16852_v8  ;;  %11470 = vmatprep.subr.mxu1 %v9629_v58  ;;  %v11061_v61 = vpop.f32.mrf.mxu1  ;;  %v11116_v57 = vpop.f32.mrf.mxu0 }
 0x2d3   : > { %11471 = vmatpush3.msra.mxu1 %v9629_v58  ;;  %v11835_v61 = vld [vmem:[#allocation3 + $0x78] sm:$0xff] }
 0x2d4   : > { %11372 = vmatmul.mubr.msk.f32.gmra.mxu1 %vm3365_vm5, %v11832_v41  ;;  %11427 = vmatmul.mubr.msk.f32.gmra.mxu0 %vm3365_vm5, %v16853_v56  ;;  %v3782_v35 = vpop.f32.mrf.mxu1  ;;  %v4063_v12 = vpop.f32.mrf.mxu0 }
 0x2d5   : > { %11374 = vmatprep.mubr.msk.f32.mxu1 %vm3365_vm5, %v11833_v40  ;;  %11429 = vmatprep.mubr.msk.f32.mxu0 %vm3365_vm5, %v16854_v20  ;;  %v11836_v35 = vld [vmem:[#allocation3 + $0x80] sm:$0xff] }
 0x2d6   : > { %v11064_v8 = vpop.f32.mrf.mxu1  ;;  %v11119_v58 = vpop.f32.mrf.mxu0 }
 0x2d7   : > { %v14940_v53 = vadd.f32 %v11116_v57, %v11064_v8  ;;  %v11838_v58 = vld [vmem:[#allocation3 + $0x98] sm:$0xff] }
 0x2d8   : > { %11375 = vmatmul.mubr.msk.f32.gmra.mxu1 %vm3365_vm5, %v11834_v0  ;;  %11430 = vmatmul.mubr.msk.f32.gmra.mxu0 %vm3365_vm5, %v16855_v15  ;;  %v3790_v56 = vpop.f32.mrf.mxu1  ;;  %v4073_v20 = vpop.f32.mrf.mxu0  ;;  %v11837_v15 = vld [vmem:[#allocation3 + $0x90] sm:$0xff] }
 0x2d9   : > { %11377 = vmatprep.mubr.msk.f32.mxu1 %vm3365_vm5, %v11835_v61  ;;  %11432 = vmatprep.mubr.msk.f32.mxu0 %vm3365_vm5, %v16856_v10  ;;  %v14945_v41 = vadd.f32 %v4063_v12, %v3790_v56 }
 0x2da   : > { %v11067_v40 = vpop.f32.mrf.mxu1  ;;  %v11122_v0 = vpop.f32.mrf.mxu0 }
 0x2dc   : > { %11378 = vmatmul.mubr.msk.f32.gmra.mxu1 %vm3365_vm5, %v11836_v35  ;;  %11433 = vmatmul.mubr.msk.f32.gmra.mxu0 %vm3365_vm5, %v16857_v3  ;;  %v3800_v57 = vpop.f32.mrf.mxu1  ;;  %v4081_v10 = vpop.f32.mrf.mxu0 }
 0x2dd   : > { %11380 = vmatprep.mubr.msk.f32.mxu1 %vm3365_vm5, %v11837_v15  ;;  %11435 = vmatprep.mubr.msk.f32.mxu0 %vm3365_vm5, %v16858_v17 }
 0x2de   : > { %v11070_v8 = vpop.f32.mrf.mxu1 }
 0x2df   : > { %v11125_v12 = vpop.f32.mrf.mxu0  ;;  %v14956_v61 = vadd.f32 %v11122_v0, %v11070_v8 }
 0x2e0   : > { %11381 = vmatmul.mubr.msk.f32.gmra.mxu1 %vm3365_vm5, %v11838_v58  ;;  %11436 = vmatmul.mubr.msk.f32.gmra.mxu0 %vm3365_vm5, %v16859_v7  ;;  %v3808_v3 = vpop.f32.mrf.mxu1 }
 0x2e1   : > { %11383 = vmatprep.mubr.msk.f32.mxu1 %vm3365_vm5, %v14188_v30  ;;  %11438 = vmatprep.mubr.msk.f32.mxu0 %vm3365_vm5, %v14259_v60  ;;  %v4091_v17 = vpop.f32.mrf.mxu0  ;;  %v14962_v56 = vadd.f32 %v4081_v10, %v3808_v3  ;;  %v16871_v10 = vld [vmem:[#allocation32_spill] sm:$0xff] }
 0x2e3   : > { %v11073_v20 = vpop.f32.mrf.mxu1  ;;  %v11128_v40 = vpop.f32.mrf.mxu0 }
 0x2e4   : > { %11384 = vmatmul.mubr.msk.f32.gmra.mxu1 %vm3365_vm5, %v14190_v44  ;;  %11439 = vmatmul.mubr.msk.f32.gmra.mxu0 %vm3365_vm5, %v16860_v47 }
 0x2e5   : > { %11386 = vmatprep.mubr.msk.f32.mxu1 %vm3365_vm5, %v14227_v63  ;;  %11441 = vmatprep.mubr.msk.f32.mxu0 %vm3365_vm5, %v14294_v52  ;;  %v3818_v30 = vpop.f32.mrf.mxu1  ;;  %v4099_v60 = vpop.f32.mrf.mxu0 }
 0x2e7   : > { %v11076_v7 = vpop.f32.mrf.mxu1  ;;  %v11131_v35 = vpop.f32.mrf.mxu0 }
 0x2e8   : > { %11387 = vmatmul.mubr.msk.f32.gmra.mxu1 %vm3365_vm5, %v14229_v2  ;;  %11442 = vmatmul.mubr.msk.f32.gmra.mxu0 %vm3365_vm5, %v16861_v14  ;;  %v14976_v44 = vadd.f32 %v11128_v40, %v11076_v7  ;;  %v16872_v35 = vld [vmem:[#allocation19_spill] sm:$0xff] }
 0x2e9   : > { %11389 = vmatprep.mubr.msk.f32.mxu1 %vm3365_vm5, %v14264_v34  ;;  %11444 = vmatprep.mubr.msk.f32.mxu0 %vm3365_vm5, %v14326_v6  ;;  %v3826_v63 = vpop.f32.mrf.mxu1  ;;  %v4109_v52 = vpop.f32.mrf.mxu0 }
 0x2ea   : > { %v14982_v47 = vadd.f32 %v4099_v60, %v3826_v63 }
 0x2eb   : > { %v11079_v0 = vpop.f32.mrf.mxu1  ;;  %v11134_v2 = vpop.f32.mrf.mxu0 }
 0x2ec   : > { %11390 = vmatmul.mubr.msk.f32.gmra.mxu1 %vm3365_vm5, %v14266_v27  ;;  %11445 = vmatmul.mubr.msk.f32.gmra.mxu0 %vm3365_vm5, %v14329_v29 }
 0x2ed   : > { %11392 = vmatprep.mubr.msk.f32.mxu1 %vm3365_vm5, %v14299_v62  ;;  %11447 = vmatprep.mubr.msk.f32.mxu0 %vm3365_vm5, %v14354_v25  ;;  %v3836_v34 = vpop.f32.mrf.mxu1  ;;  %v14992_v6 = vpop.f32.mrf.mxu0 }
 0x2ef   : > { %v11082_v14 = vpop.f32.mrf.mxu1 }
 0x2f0   : > { %11393 = vmatmul.mubr.msk.f32.gmra.mxu1 %vm3365_vm5, %v14301_v28  ;;  %v11137_v15 = vpop.f32.mrf.mxu0  ;;  %11448 = vmatmul.mubr.msk.f32.gmra.mxu0 %vm3365_vm5, %v16862_v59  ;;  %v14998_v27 = vadd.f32 %v11134_v2, %v11082_v14 }
 0x2f1   : > { %11395 = vmatprep.mubr.msk.f32.mxu1 %vm3365_vm5, %v14331_v51  ;;  %11450 = vmatprep.mubr.msk.f32.mxu0 %vm3365_vm5, %v16863_v46  ;;  %v15004_v62 = vpop.f32.mrf.mxu1 }
 0x2f2   : > { %v4127_v29 = vpop.f32.mrf.mxu0 }
 0x2f3   : > { %v11085_v25 = vpop.f32.mrf.mxu1 }
 0x2f4   : > { %11396 = vmatmul.mubr.msk.f32.gmra.mxu1 %vm3365_vm5, %v14333_v55  ;;  %v11140_v28 = vpop.f32.mrf.mxu0  ;;  %11451 = vmatmul.mubr.msk.f32.gmra.mxu0 %vm3365_vm5, %v16864_v45 }
 0x2f5   : > { %11398 = vmatprep.mubr.msk.f32.mxu1 %vm3365_vm5, %v14359_v39  ;;  %11453 = vmatprep.mubr.msk.f32.mxu0 %vm3365_vm5, %v16865_v37  ;;  %v3854_v51 = vpop.f32.mrf.mxu1 }
 0x2f6   : > { %v15014_v59 = vpop.f32.mrf.mxu0 }
 0x2f7   : > { %v11088_v46 = vpop.f32.mrf.mxu1 }
 0x2f8   : > { %11399 = vmatmul.mubr.msk.f32.gmra.mxu1 %vm3365_vm5, %v14361_v19  ;;  %v11143_v57 = vpop.f32.mrf.mxu0  ;;  %11454 = vmatmul.mubr.msk.f32.gmra.mxu0 %vm3365_vm5, %v16866_v26  ;;  %v15020_v55 = vadd.f32 %v11140_v28, %v11088_v46  ;;  %v16873_v46 = vld [vmem:[#allocation35_spill] sm:$0xff] }
 0x2f9   : > { %11401 = vmatprep.mubr.msk.f32.mxu1 %vm3365_vm5, %v14386_v54  ;;  %11456 = vmatprep.mubr.msk.f32.mxu0 %vm3365_vm5, %v16867_v50  ;;  %v15026_v39 = vpop.f32.mrf.mxu1 }
 0x2fa   : > { %v4145_v45 = vpop.f32.mrf.mxu0 }
 0x2fb   : > { %v11091_v37 = vpop.f32.mrf.mxu1  ;;  %v16874_v45 = vld [vmem:[#allocation25_spill] sm:$0xff] }
 0x2fc   : > { %11402 = vmatmul.mubr.msk.f32.gmra.mxu1 %vm3365_vm5, %v14388_v18  ;;  %v11146_v19 = vpop.f32.mrf.mxu0  ;;  %11457 = vmatmul.mubr.msk.f32.gmra.mxu0 %vm3365_vm5, %v16868_v9 }
 0x2fd   : > { %11404 = vmatprep.mubr.msk.f32.mxu1 %vm3365_vm5, %v14414_v49  ;;  %11459 = vmatprep.mubr.msk.f32.mxu0 %vm3365_vm5, %v14454_v36  ;;  %v3872_v54 = vpop.f32.mrf.mxu1 }
 0x2fe   : > { %v15036_v26 = vpop.f32.mrf.mxu0  ;;  %v16876_v54 = vld [vmem:[#allocation68_spill] sm:$0xff] }
 0x2ff   : > { %v11094_v50 = vpop.f32.mrf.mxu1 }
 0x300   : > { %11405 = vmatmul.mubr.msk.f32.gmra.mxu1 %vm3365_vm5, %v16871_v10  ;;  %v11149_v8 = vpop.f32.mrf.mxu0  ;;  %11460 = vmatmul.mubr.msk.f32.gmra.mxu0 %vm3365_vm5, %v16870_v5  ;;  %v15042_v18 = vadd.f32 %v11146_v19, %v11094_v50 }
 0x301   : > { %11407 = vmatprep.mubr.msk.f32.mxu1 %vm3365_vm5, %v14438_v42  ;;  %11462 = vmatprep.mubr.msk.f32.mxu0 %vm3365_vm5, %v14899_v48  ;;  %v15048_v49 = vpop.f32.mrf.mxu1  ;;  %v15058_v42 = vld [vmem:[#allocation3 + $0x198] sm:$0xff] }
 0x302   : > { %v4163_v36 = vpop.f32.mrf.mxu0 }
 0x303   : > { %v11097_v9 = vpop.f32.mrf.mxu1 }
 0x304   : > { %11408 = vmatmul.mubr.msk.f32.gmra.mxu1 %vm3365_vm5, %v14440_v32  ;;  %v11152_v58 = vpop.f32.mrf.mxu0  ;;  %11463 = vmatmul.mubr.msk.f32.gmra.mxu0 %vm3365_vm5, %v14908_v24  ;;  %v15066_v32 = vld [vmem:[#allocation3 + $0x1a0] sm:$0xff] }
 0x305   : > { %11410 = vmatprep.mubr.msk.f32.mxu1 %vm3365_vm5, %v14723_v13  ;;  %v3890_v5 = vpop.f32.mrf.mxu1 }
 0x306   : > { %v15056_v12 = vpop.f32.mrf.mxu0 }
 0x307   : > { %v11100_v48 = vpop.f32.mrf.mxu1 }
 0x308   : > { %11411 = vmatmul.mubr.msk.f32.gmra.mxu1 %vm3365_vm5, %v14735_v21  ;;  %v11155_v3 = vpop.f32.mrf.mxu0  ;;  %v15062_v17 = vadd.f32 %v11152_v58, %v11100_v48  ;;  %v16877_v58 = vld [vmem:[#allocation76_spill] sm:$0xff]  ;;  %v16878_v48 = vld [vmem:[#allocation7_spill] sm:$0xff] }
 0x309   : > { %11413 = vmatprep.mubr.msk.f32.mxu1 %vm3365_vm5, %v15058_v42  ;;  %v15068_v24 = vpop.f32.mrf.mxu1 }
 0x30a   : > { %v4181_v13 = vpop.f32.mrf.mxu0 }
 0x30b   : > { %v11103_v20 = vpop.f32.mrf.mxu1 }
 0x30c   : > { %11414 = vmatmul.mubr.msk.f32.gmra.mxu1 %vm3365_vm5, %v15066_v32  ;;  %v11214_v40 = vpop.f32.mrf.mxu0  ;;  %v16879_v20 = vld [vmem:[#allocation39_spill] sm:$0xff] }
 0x30d   : > { %11472 = vmatprep.mubr.msk.f32.mxu1 %vm3365_vm5, %v14513_v38  ;;  %v3908_v21 = vpop.f32.mrf.mxu1 }
 0x30e   : > { %v15074_v30 = vpop.f32.mrf.mxu0  ;;  %v16880_v21 = vld [vmem:[#allocation40_spill] sm:$0xff] }
 0x30f   : > { %v11162_v60 = vpop.f32.mrf.mxu1 }
 0x310   : > { %11473 = vmatmul.mubr.msk.f32.vlgmr.msra.gmra.mxu1 %vm3365_vm5, %v14527_v43  ;;  %v11217_v7 = vpop.f32.mrf.mxu0  ;;  %v4545_v63 = vadd.f32 %v11162_v60, %v16872_v35 }
 0x311   : > { %11475 = vmatprep.mubr.msk.f32.mxu1 %vm3365_vm5, %v14532_v33  ;;  %v15081_v52 = vpop.f32.mrf.mxu1 }
 0x312   : > { %v4645_v0 = vpop.f32.mrf.mxu0  ;;  %v15083_v2 = vadd.f32 %v11214_v40, %v4545_v63 }
 0x314   : > { %v11165_v34 = vpop.f32.mrf.mxu1  ;;  %11476 = vmatmul.mubr.msk.f32.gmra.mxu1 %vm3365_vm5, %v14544_v4  ;;  %v11220_v38 = vpop.f32.mrf.mxu0 }
 0x315   : > { %11478 = vmatprep.mubr.msk.f32.mxu1 %vm3365_vm5, %v14549_v16  ;;  %v16881_v34 = vld [vmem:[#allocation41_spill] sm:$0xff] }
 0x316   : > { %v4411_v43 = vpop.f32.mrf.mxu1  ;;  %v15089_v14 = vpop.f32.mrf.mxu0 }
 0x317   : > { %v16882_v43 = vld [vmem:[#allocation70_spill] sm:$0xff] }
 0x318   : > { %v11168_v15 = vpop.f32.mrf.mxu1  ;;  %11479 = vmatmul.mubr.msk.f32.gmra.mxu1 %vm3365_vm5, %v14561_v11  ;;  %v11223_v33 = vpop.f32.mrf.mxu0 }
 0x319   : > { %v4547_v29 = vadd.f32 %v11168_v15, %v14940_v53  ;;  %11481 = vmatprep.mubr.msk.f32.mxu1 %vm3365_vm5, %v14566_v23  ;;  %v16875_v23 = vld [vmem:[#allocation36_spill] sm:$0xff] }
 0x31a   : > { %v4419_v25 = vpop.f32.mrf.mxu1  ;;  %v4663_v28 = vpop.f32.mrf.mxu0 }
 0x31b   : > { %v15097_v4 = vadd.f32 %v4419_v25, %v14945_v41  ;;  %v15099_v51 = vadd.f32 %v11220_v38, %v4547_v29  ;;  %v16883_v29 = vld [vmem:[#allocation78_spill] sm:$0xff]  ;;  %v16884_v28 = vld [vmem:[#allocation13_spill] sm:$0xff] }
 0x31c   : > { %v11171_v16 = vpop.f32.mrf.mxu1  ;;  %11482 = vmatmul.mubr.msk.f32.gmra.mxu1 %vm3365_vm5, %v16873_v46  ;;  %v11226_v57 = vpop.f32.mrf.mxu0 }
 0x31d   : > { %11484 = vmatprep.mubr.msk.f32.mxu1 %vm3365_vm5, %v16874_v45 }
 0x31e   : > { %v4429_v11 = vpop.f32.mrf.mxu1  ;;  %v15105_v53 = vpop.f32.mrf.mxu0 }
 0x31f   : > { %v16885_v11 = vld [vmem:[#allocation43_spill] sm:$0xff] }
 0x320   : > { %v11174_v37 = vpop.f32.mrf.mxu1  ;;  %11485 = vmatmul.mubr.msk.f32.gmra.mxu1 %vm3365_vm5, %v16875_v23  ;;  %v11229_v19 = vpop.f32.mrf.mxu0  ;;  %v16886_v23 = vld [vmem:[#allocation44_spill] sm:$0xff] }
 0x321   : > { %v4549_v41 = vadd.f32 %v11174_v37, %v14956_v61  ;;  %11487 = vmatprep.mubr.msk.f32.mxu1 %vm3365_vm5, %v16876_v54  ;;  %v16887_v54 = vld [vmem:[#allocation45_spill] sm:$0xff] }
 0x322   : > { %v4437_v50 = vpop.f32.mrf.mxu1  ;;  %v4681_v10 = vpop.f32.mrf.mxu0 }
 0x323   : > { %v15113_v8 = vadd.f32 %v4437_v50, %v14962_v56  ;;  %v15115_v36 = vadd.f32 %v11226_v57, %v4549_v41 }
 0x324   : > { %v11177_v9 = vpop.f32.mrf.mxu1  ;;  %11488 = vmatmul.mubr.msk.f32.gmra.mxu1 %vm3365_vm5, %v16877_v58  ;;  %v11232_v5 = vpop.f32.mrf.mxu0 }
 0x325   : > { %11490 = vmatprep.mubr.msk.f32.mxu1 %vm3365_vm5, %v16878_v48  ;;  %v16888_v9 = vld [vmem:[#allocation72_spill] sm:$0xff] }
 0x326   : > { %v4447_v3 = vpop.f32.mrf.mxu1  ;;  %v15121_v61 = vpop.f32.mrf.mxu0 }
 0x328   : > { %v11180_v13 = vpop.f32.mrf.mxu1  ;;  %11491 = vmatmul.mubr.msk.f32.gmra.mxu1 %vm3365_vm5, %v16879_v20  ;;  %v11235_v40 = vpop.f32.mrf.mxu0 }
 0x329   : > { %v4551_v56 = vadd.f32 %v11180_v13, %v14976_v44  ;;  %11493 = vmatprep.mubr.msk.f32.mxu1 %vm3365_vm5, %v16880_v21  ;;  %v16889_v13 = vld [vmem:[#allocation80_spill] sm:$0xff]  ;;  %v16890_v40 = vld [vmem:[#allocation22_spill] sm:$0xff] }
 0x32a   : > { %v4455_v60 = vpop.f32.mrf.mxu1  ;;  %v4699_v7 = vpop.f32.mrf.mxu0 }
 0x32b   : > { %v15129_v35 = vadd.f32 %v4455_v60, %v14982_v47  ;;  %v15131_v63 = vadd.f32 %v11232_v5, %v4551_v56  ;;  %v16891_v60 = vld [vmem:[#allocation47_spill] sm:$0xff] }
 0x32c   : > { %v11183_v0 = vpop.f32.mrf.mxu1  ;;  %11494 = vmatmul.mubr.msk.f32.gmra.mxu1 %vm3365_vm5, %v16881_v34  ;;  %v11238_v38 = vpop.f32.mrf.mxu0  ;;  %v16892_v34 = vld [vmem:[#allocation48_spill] sm:$0xff] }
 0x32d   : > { %11496 = vmatprep.mubr.msk.f32.mxu1 %vm3365_vm5, %v16882_v43 }
 0x32e   : > { %v4465_v15 = vpop.f32.mrf.mxu1  ;;  %v15137_v44 = vpop.f32.mrf.mxu0 }
 0x330   : > { %v11186_v33 = vpop.f32.mrf.mxu1  ;;  %11497 = vmatmul.mubr.msk.f32.gmra.mxu1 %vm3365_vm5, %v16883_v29  ;;  %v11241_v25 = vpop.f32.mrf.mxu0  ;;  %v16893_v29 = vld [vmem:[#allocation49_spill] sm:$0xff] }
 0x331   : > { %v4553_v47 = vadd.f32 %v11186_v33, %v14998_v27  ;;  %11499 = vmatprep.mubr.msk.f32.mxu1 %vm3365_vm5, %v16884_v28 }
 0x332   : > { %v15144_v16 = vpop.f32.mrf.mxu1  ;;  %v4717_v46 = vpop.f32.mrf.mxu0 }
 0x333   : > { %v15146_v57 = vadd.f32 %v11238_v38, %v4553_v47  ;;  %v16894_v47 = vld [vmem:[#allocation73_spill] sm:$0xff] }
 0x334   : > { %v11189_v45 = vpop.f32.mrf.mxu1  ;;  %11500 = vmatmul.mubr.msk.f32.gmra.mxu1 %vm3365_vm5, %v16885_v11  ;;  %v11244_v37 = vpop.f32.mrf.mxu0 }
 0x335   : > { %11502 = vmatprep.mubr.msk.f32.mxu1 %vm3365_vm5, %v16886_v23 }
 0x336   : > { %v4483_v19 = vpop.f32.mrf.mxu1  ;;  %v15152_v41 = vpop.f32.mrf.mxu0 }
 0x337   : > { %v4046_v19 = vadd.f32 %v14914_v22, %v14927_v1 }
 0x338   : > { %v11192_v27 = vpop.f32.mrf.mxu1  ;;  %11503 = vmatmul.mubr.msk.f32.gmra.mxu1 %vm3365_vm5, %v16887_v54  ;;  %v11247_v50 = vpop.f32.mrf.mxu0 }
 0x339   : > { %v4555_v10 = vadd.f32 %v11192_v27, %v15020_v55  ;;  %11505 = vmatprep.mubr.msk.f32.mxu1 %vm3365_vm5, %v16888_v9 }
 0x33a   : > { %v15159_v58 = vpop.f32.mrf.mxu1  ;;  %v4735_v5 = vpop.f32.mrf.mxu0 }
 0x33b   : > { %v15161_v48 = vadd.f32 %v11244_v37, %v4555_v10  ;;  %v4544_v10 = vadd.f32 %v15081_v52, %v4046_v19  ;;  %v4782_v19 = vadd.f32 %v15105_v53, %v15113_v8  ;;  %v4784_v8 = vadd.f32 %v15121_v61, %v15129_v35  ;;  %v6685_v61 = vld [vmem:[%s16338_s5 + $0x10] sm:$0xff] }
 0x33c   : > { %v11195_v3 = vpop.f32.mrf.mxu1  ;;  %11506 = vmatmul.mubr.msk.f32.gmra.mxu1 %vm3365_vm5, %v16889_v13  ;;  %v11250_v20 = vpop.f32.mrf.mxu0 }
 0x33d   : > { %11508 = vmatprep.mubr.msk.f32.mxu1 %vm3365_vm5, %v16890_v40 }
 0x33e   : > { %v4501_v56 = vpop.f32.mrf.mxu1  ;;  %v15167_v21 = vpop.f32.mrf.mxu0 }
 0x340   : > { %v11198_v55 = vpop.f32.mrf.mxu1  ;;  %11509 = vmatmul.mubr.msk.f32.gmra.mxu1 %vm3365_vm5, %v16891_v60  ;;  %v11253_v7 = vpop.f32.mrf.mxu0 }
 0x341   : > { %v4557_v0 = vadd.f32 %v11198_v55, %v15042_v18  ;;  %11511 = vmatprep.mubr.msk.f32.mxu1 %vm3365_vm5, %v16892_v34 }
 0x342   : > { %v15174_v38 = vpop.f32.mrf.mxu1  ;;  %v4753_v43 = vpop.f32.mrf.mxu0 }
 0x343   : > { %v15176_v15 = vadd.f32 %v11250_v20, %v4557_v0 }
 0x344   : > { %v11201_v33 = vpop.f32.mrf.mxu1  ;;  %11512 = vmatmul.mubr.msk.f32.gmra.mxu1 %vm3365_vm5, %v16893_v29  ;;  %v11256_v25 = vpop.f32.mrf.mxu0 }
 0x345   : > { %11514 = vmatprep.mubr.msk.f32.mxu1 %vm3365_vm5, %v16894_v47 }
 0x346   : > { %v4519_v28 = vpop.f32.mrf.mxu1  ;;  %v15182_v46 = vpop.f32.mrf.mxu0 }
 0x348   : > { %v11204_v18 = vpop.f32.mrf.mxu1  ;;  %11515 = vmatmul.mubr.msk.f32.gmra.mxu1 %vm3365_vm5, %v14894_v31  ;;  %v11259_v45 = vpop.f32.mrf.mxu0 }
 0x349   : > { %v4559_v11 = vadd.f32 %v11204_v18, %v15062_v17  ;;  %v4778_v17 = vadd.f32 %v15074_v30, %v4544_v10 }
 0x34a   : > { %v15187_v37 = vpop.f32.mrf.mxu1  ;;  %v4771_v23 = vpop.f32.mrf.mxu0 }
 0x34b   : > { %v15191_v27 = vadd.f32 %v11256_v25, %v4559_v11  ;;  %v16895_v23 = vmov 0.0  }
 0x34c   : > { %v11207_v54 = vpop.f32.mrf.mxu1  ;;  %v11318_v50 = vpop.f32.mrf.mxu0  ;;  %6308 = vst.msk [vmem:[#allocation4 + $0x10] sm:$0xff] %vm6304_vm7, %v16895_v23  ;;  %6305 = vst.msk [vmem:[#allocation4] sm:$0xff] %vm6304_vm7, %v16895_v23 }
 0x34d   : > { %6309 = vst.msk [vmem:[#allocation4 + $0x18] sm:$0x3] %vm6306_vm8, %v16895_v23  ;;  %6307 = vst.msk [vmem:[#allocation4 + $0x8] sm:$0x3] %vm6306_vm8, %v16895_v23 }
 0x34e   : > { %v4537_v9 = vpop.f32.mrf.mxu1  ;;  %v5110_v5 = vpop.f32.mrf.mxu0  ;;  %6310 = vst.msk [vmem:[#allocation4 + $0x20] sm:$0xff] %vm6304_vm7, %v16895_v23  ;;  %6312 = vst.msk [vmem:[#allocation4 + $0x30] sm:$0xff] %vm6304_vm7, %v16895_v23 }
 0x34f   : > { %6311 = vst.msk [vmem:[#allocation4 + $0x28] sm:$0x3] %vm6306_vm8, %v16895_v23  ;;  %6313 = vst.msk [vmem:[#allocation4 + $0x38] sm:$0x3] %vm6306_vm8, %v16895_v23 }
 0x350   : > { %v11266_v3 = vpop.f32.mrf.mxu1  ;;  %v11321_v13 = vpop.f32.mrf.mxu0  ;;  %6314 = vst.msk [vmem:[#allocation4 + $0x40] sm:$0xff] %vm6304_vm7, %v16895_v23  ;;  %6316 = vst.msk [vmem:[#allocation4 + $0x50] sm:$0xff] %vm6304_vm7, %v16895_v23 }
 0x351   : > { %v5017_v31 = vadd.f32 %v11266_v3, %v15083_v2  ;;  %v4780_v2 = vadd.f32 %v15089_v14, %v15097_v4  ;;  %6315 = vst.msk [vmem:[#allocation4 + $0x48] sm:$0x3] %vm6306_vm8, %v16895_v23  ;;  %6317 = vst.msk [vmem:[#allocation4 + $0x58] sm:$0x3] %vm6306_vm8, %v16895_v23 }
 0x352   : > { %v4873_v20 = vpop.f32.mrf.mxu1  ;;  %v5120_v40 = vpop.f32.mrf.mxu0  ;;  %6318 = vst.msk [vmem:[#allocation4 + $0x60] sm:$0xff] %vm6304_vm7, %v16895_v23  ;;  %6320 = vst.msk [vmem:[#allocation4 + $0x70] sm:$0xff] %vm6304_vm7, %v16895_v23 }
 0x353   : > { %v5016_v56 = vadd.f32 %v4873_v20, %v4778_v17  ;;  %v15196_v55 = vadd.f32 %v11318_v50, %v5017_v31  ;;  %6319 = vst.msk [vmem:[#allocation4 + $0x68] sm:$0x3] %vm6306_vm8, %v16895_v23  ;;  %6321 = vst.msk [vmem:[#allocation4 + $0x78] sm:$0x3] %vm6306_vm8, %v16895_v23  ;;  %v9667_v20 = vld [vmem:[%s16338_s5 + $0x38] sm:$0xff] }
 0x354   : > { %v11269_v22 = vpop.f32.mrf.mxu1  ;;  %v11324_v1 = vpop.f32.mrf.mxu0  ;;  %6322 = vst.msk [vmem:[#allocation4 + $0x80] sm:$0xff] %vm6304_vm7, %v16895_v23  ;;  %6324 = vst.msk [vmem:[#allocation4 + $0x90] sm:$0xff] %vm6304_vm7, %v16895_v23  ;;  %11520 = vmatprep.subr.mxu0 %v9667_v20 }
 0x355   : > { %v15198_v60 = vadd.f32 %v5110_v5, %v5016_v56  ;;  %6323 = vst.msk [vmem:[#allocation4 + $0x88] sm:$0x3] %vm6306_vm8, %v16895_v23  ;;  %6325 = vst.msk [vmem:[#allocation4 + $0x98] sm:$0x3] %vm6306_vm8, %v16895_v23  ;;  %11521 = vmatpush3.msra.mxu0 %v9667_v20  ;;  %v6686_v22 = vld [vmem:[%s16338_s5 + $0x18] sm:$0xff] }
 0x356   : > { %v4883_v7 = vpop.f32.mrf.mxu1  ;;  %v5128_v0 = vpop.f32.mrf.mxu0  ;;  %11540 = vmatprep.subr.mxu1 %v6686_v22  ;;  %7959 = vst.msk [vmem:[#allocation5] sm:$0x3f] %vm7958_vm0, %v16895_v23  ;;  %7960 = vst.msk [vmem:[#allocation5 + $0x8] sm:$0x3f] %vm7958_vm0, %v16895_v23 }
 0x357   : > { %11541 = vmatpush3.msra.mxu1 %v6686_v22  ;;  %7964 = vst.msk [vmem:[#allocation5 + $0x28] sm:$0x3f] %vm7958_vm0, %v16895_v23  ;;  %7961 = vst.msk [vmem:[#allocation5 + $0x10] sm:$0x3f] %vm7958_vm0, %v16895_v23 }
 0x358   : > { %v11272_v52 = vpop.f32.mrf.mxu1  ;;  %v11327_v34 = vpop.f32.mrf.mxu0  ;;  %11542 = vmatprep.subr.mxu1 %v6685_v61  ;;  %7962 = vst.msk [vmem:[#allocation5 + $0x18] sm:$0x3f] %vm7958_vm0, %v16895_v23  ;;  %7963 = vst.msk [vmem:[#allocation5 + $0x20] sm:$0x3f] %vm7958_vm0, %v16895_v23  ;;  %v9787_v23 = vld [vmem:[%s16340_s7 + $0x50] sm:$0xff] }
 0x359   : > { %v5019_v43 = vadd.f32 %v11272_v52, %v15099_v51  ;;  %v5742_v52 = vrot.slane %v15066_v32, 2  ;;  %v3508_v34 = vld [vmem:[#allocation3 + $0x1a8] sm:$0x3]  ;;  %11543 = vmatpush3.msra.mxu1 %v6685_v61 }
 0x35a   : > { %v4891_v33 = vpop.f32.mrf.mxu1  ;;  %v5138_v30 = vpop.f32.mrf.mxu0  ;;  %v5744_v35 = vrot.slane %v3508_v34, 2 }
 0x35b   : > { %v5018_v29 = vadd.f32 %v4891_v33, %v4780_v2  ;;  %v15203_v25 = vadd.f32 %v11324_v1, %v5019_v43  ;;  %v5504_v1 = vrot.slane %v15058_v42, 1  ;;  %v4118_v43 = vadd.f32 %v14992_v6, %v15004_v62  ;;  %v6684_v62 = vld [vmem:[%s16338_s5 + $0x8] sm:$0xff] }
 0x35c   : > { %v11275_v47 = vpop.f32.mrf.mxu1  ;;  %v11330_v28 = vpop.f32.mrf.mxu0  ;;  %v5745_v6 = vsel %vm1266_vm4, %v5742_v52, %v5744_v35  ;;  %11544 = vmatprep.subr.mxu1 %v6684_v62 }
 0x35d   : > { %v15205_v18 = vadd.f32 %v5128_v0, %v5018_v29  ;;  %v4552_v29 = vadd.f32 %v15144_v16, %v4118_v43  ;;  %v5507_v16 = vrot.slane %v3508_v34, 1  ;;  %11545 = vmatpush3.msra.mxu1 %v6684_v62 }
 0x35e   : > { %v4901_v45 = vpop.f32.mrf.mxu1  ;;  %v5146_v11 = vpop.f32.mrf.mxu0 }
 0x360   : > { %v11278_v14 = vpop.f32.mrf.mxu1  ;;  %v11333_v4 = vpop.f32.mrf.mxu0 }
 0x361   : > { %v5021_v51 = vadd.f32 %v11278_v14, %v15115_v36  ;;  %v5741_v36 = vrot.slane %v15058_v42, 2  ;;  %v9666_v14 = vld [vmem:[%s16338_s5 + $0x30] sm:$0xff] }
 0x362   : > { %v4909_v54 = vpop.f32.mrf.mxu1  ;;  %v5156_v50 = vpop.f32.mrf.mxu0  ;;  %11522 = vmatprep.subr.mxu0 %v9666_v14 }
 0x363   : > { %v5020_v10 = vadd.f32 %v4909_v54, %v4782_v19  ;;  %v15250_v9 = vadd.f32 %v11330_v28, %v5021_v51  ;;  %v5743_v30 = vsel %vm1266_vm4, %v5741_v36, %v5742_v52  ;;  %v5505_v28 = vrot.slane %v15066_v32, 1  ;;  %v6683_v51 = vld [vmem:[%s16338_s5] sm:$0xff]  ;;  %11523 = vmatpush3.msra.mxu0 %v9666_v14  ;;  %v9665_v50 = vld [vmem:[%s16338_s5 + $0x28] sm:$0xff] }
 0x364   : > { %v11281_v5 = vpop.f32.mrf.mxu1  ;;  %v11336_v3 = vpop.f32.mrf.mxu0  ;;  %11517 = vmatprep.mubr.msk.f32.mxu1 %vm3365_vm5, %v5743_v30  ;;  %11546 = vmatprep.subr.mxu1 %v6683_v51  ;;  %v4136_v36 = vadd.f32 %v15014_v59, %v15026_v39 }
 0x365   : > { %v15252_v13 = vadd.f32 %v5146_v11, %v5020_v10  ;;  %11518 = vmatmul.mubr.msk.f32.gmra.mxu1 %vm3365_vm5, %v5745_v6  ;;  %v5506_v4 = vsel %vm598_vm3, %v5504_v1, %v5505_v28  ;;  %v5508_v54 = vsel %vm598_vm3, %v5505_v28, %v5507_v16  ;;  %v15296_v10 = vld [vmem:[#allocation4] sm:$0xff]  ;;  %v15298_v5 = vld [vmem:[#allocation4 + $0x8] sm:$0x3]  ;;  %11524 = vmatprep.subr.mxu0 %v9665_v50 }
 0x366   : > { %v4919_v31 = vpop.f32.mrf.mxu1  ;;  %v5164_v17 = vpop.f32.mrf.mxu0  ;;  %11465 = vmatprep.mubr.msk.f32.mxu0 %vm3365_vm5, %v5506_v4  ;;  %v6704_v20 = vrot.slane %v15298_v5, 1  ;;  %11547 = vmatpush3.msra.mxu1 %v6683_v51  ;;  %v4554_v59 = vadd.f32 %v15159_v58, %v4136_v36 }
 0x367   : > { %v4786_v31 = vadd.f32 %v15137_v44, %v4552_v29  ;;  %11466 = vmatmul.mubr.msk.f32.gmra.mxu0 %vm3365_vm5, %v5508_v54  ;;  %11548 = vmatprep.mubr.msk.f32.mxu1 %vm6304_vm7, %v15296_v10  ;;  %vm8257_vm5 = vcmask 1045508  }
 0x368   : > { %v11284_v40 = vpop.f32.mrf.mxu1  ;;  %v11339_v56 = vpop.f32.mrf.mxu0  ;;  %11525 = vmatpush3.msra.mxu0 %v9665_v50 }
 0x369   : > { %v5023_v53 = vadd.f32 %v11284_v40, %v15131_v63 }
 0x36a   : > { %v4927_v7 = vpop.f32.mrf.mxu1  ;;  %v5174_v0 = vpop.f32.mrf.mxu0 }
 0x36b   : > { %v5022_v63 = vadd.f32 %v4927_v7, %v4784_v8  ;;  %v15268_v2 = vadd.f32 %v11336_v3, %v5023_v53 }
 0x36c   : > { %v11287_v33 = vpop.f32.mrf.mxu1  ;;  %v11342_v42 = vpop.f32.mrf.mxu0 }
 0x36d   : > { %v15275_v47 = vadd.f32 %v5164_v17, %v5022_v63  ;;  %v6703_v17 = vrot.slane %v15296_v10, 1  ;;  %v4788_v63 = vadd.f32 %v15152_v41, %v4554_v59  ;;  %v4154_v33 = vadd.f32 %v15036_v26, %v15048_v49 }
 0x36e   : > { %v4937_v45 = vpop.f32.mrf.mxu1  ;;  %v5182_v11 = vpop.f32.mrf.mxu0  ;;  %v4172_v26 = vadd.f32 %v15056_v12, %v15068_v24 }
 0x36f   : > { %v6705_v8 = vsel %vm598_vm3, %v6703_v17, %v6704_v20  ;;  %v4556_v6 = vadd.f32 %v15174_v38, %v4154_v33 }
 0x370   : > { %v11290_v19 = vpop.f32.mrf.mxu1  ;;  %v11345_v32 = vpop.f32.mrf.mxu0  ;;  %11528 = vmatprep.mubr.msk.f32.mxu0 %vm6304_vm7, %v6705_v8 }
 0x371   : > { %v5025_v3 = vadd.f32 %v11290_v19, %v15146_v57  ;;  %v9664_v57 = vld [vmem:[%s16338_s5 + $0x20] sm:$0xff]  ;;  %v4790_v14 = vadd.f32 %v15167_v21, %v4556_v6  ;;  %v4558_v32 = vadd.f32 %v15187_v37, %v4172_v26 }
 0x372   : > { %v4945_v40 = vpop.f32.mrf.mxu1  ;;  %v5192_v56 = vpop.f32.mrf.mxu0  ;;  %11526 = vmatprep.subr.mxu0 %v9664_v57 }
 0x373   : > { %v5024_v53 = vadd.f32 %v4945_v40, %v4786_v31  ;;  %v15310_v44 = vadd.f32 %v11342_v42, %v5025_v3  ;;  %11527 = vmatpush3.msra.mxu0 %v9664_v57  ;;  %v4792_v17 = vadd.f32 %v15182_v46, %v4558_v32 }
 0x374   : > { %v11293_v22 = vpop.f32.mrf.mxu1  ;;  %v11348_v1 = vpop.f32.mrf.mxu0 }
 0x375   : > { %v15317_v39 = vadd.f32 %v5182_v11, %v5024_v53 }
 0x376   : > { %v4955_v7 = vpop.f32.mrf.mxu1  ;;  %v5200_v0 = vpop.f32.mrf.mxu0 }
 0x378   : > { %v11296_v52 = vpop.f32.mrf.mxu1  ;;  %v11351_v34 = vpop.f32.mrf.mxu0 }
 0x379   : > { %v5027_v43 = vadd.f32 %v11296_v52, %v15161_v48 }
 0x37a   : > { %v4963_v61 = vpop.f32.mrf.mxu1  ;;  %v5210_v35 = vpop.f32.mrf.mxu0 }
 0x37b   : > { %v5026_v42 = vadd.f32 %v4963_v61, %v4788_v63  ;;  %v15323_v30 = vadd.f32 %v11348_v1, %v5027_v43 }
 0x37c   : > { %v11299_v58 = vpop.f32.mrf.mxu1  ;;  %v11354_v29 = vpop.f32.mrf.mxu0 }
 0x37d   : > { %v15326_v62 = vadd.f32 %v5200_v0, %v5026_v42 }
 0x37e   : > { %v4973_v28 = vpop.f32.mrf.mxu1  ;;  %v5218_v45 = vpop.f32.mrf.mxu0 }
 0x380   : > { %v11302_v11 = vpop.f32.mrf.mxu1  ;;  %v11357_v48 = vpop.f32.mrf.mxu0 }
 0x381   : > { %v5029_v41 = vadd.f32 %v11302_v11, %v15176_v15 }
 0x382   : > { %v4981_v16 = vpop.f32.mrf.mxu1  ;;  %v5228_v4 = vpop.f32.mrf.mxu0 }
 0x383   : > { %v5028_v49 = vadd.f32 %v4981_v16, %v4790_v14  ;;  %v15332_v51 = vadd.f32 %v11354_v29, %v5029_v41 }
 0x384   : > { %v11305_v19 = vpop.f32.mrf.mxu1  ;;  %v11360_v38 = vpop.f32.mrf.mxu0 }
 0x385   : > { %v15335_v54 = vadd.f32 %v5218_v45, %v5028_v49  ;;  %v15367_v49 = vld [vmem:[%s16338_s5 + $0x58] sm:$0xff] }
 0x386   : > { %v4991_v50 = vpop.f32.mrf.mxu1  ;;  %v5236_v3 = vpop.f32.mrf.mxu0  ;;  %11560 = vmatprep.subr.mxu0 %v15367_v49 }
 0x388   : > { %v11308_v31 = vpop.f32.mrf.mxu1  ;;  %v11363_v15 = vpop.f32.mrf.mxu0 }
 0x389   : > { %v5031_v21 = vadd.f32 %v11308_v31, %v15191_v27 }
 0x38a   : > { %v4999_v20 = vpop.f32.mrf.mxu1  ;;  %v5246_v36 = vpop.f32.mrf.mxu0 }
 0x38b   : > { %v5030_v12 = vadd.f32 %v4999_v20, %v4792_v17  ;;  %v15339_v24 = vadd.f32 %v11360_v38, %v5031_v21  ;;  %v6975_v20 = vrot.slane %v15298_v5, 2 }
 0x38c   : > { %v11311_v40 = vpop.f32.mrf.mxu1  ;;  %v11422_v56 = vpop.f32.mrf.mxu0 }
 0x38d   : > { %v15341_v57 = vadd.f32 %v5236_v3, %v5030_v12 }
 0x38e   : > { %v5009_v37 = vpop.f32.mrf.mxu1  ;;  %v5582_v53 = vpop.f32.mrf.mxu0 }
 0x390   : > { %v11370_v8 = vpop.f32.mrf.mxu1  ;;  %v11425_v22 = vpop.f32.mrf.mxu0 }
 0x391   : > { %v5488_v1 = vadd.f32 %v11370_v8, %v15196_v55 }
 0x392   : > { %v5344_v59 = vpop.f32.mrf.mxu1  ;;  %v5592_v7 = vpop.f32.mrf.mxu0 }
 0x393   : > { %v5487_v27 = vadd.f32 %v5344_v59, %v15198_v60  ;;  %v15345_v46 = vadd.f32 %v11422_v56, %v5488_v1 }
 0x394   : > { %v11373_v0 = vpop.f32.mrf.mxu1  ;;  %v11428_v52 = vpop.f32.mrf.mxu0 }
 0x395   : > { %v15347_v34 = vadd.f32 %v5582_v53, %v5487_v27 }
 0x396   : > { %v5354_v43 = vpop.f32.mrf.mxu1  ;;  %v5600_v63 = vpop.f32.mrf.mxu0 }
 0x398   : > { %v11376_v61 = vpop.f32.mrf.mxu1  ;;  %v11431_v35 = vpop.f32.mrf.mxu0 }
 0x399   : > { %v5490_v33 = vadd.f32 %v11376_v61, %v15203_v25  ;;  %v15359_v25 = vld [vmem:[%s16338_s5 + $0x78] sm:$0xff] }
 0x39a   : > { %v5362_v42 = vpop.f32.mrf.mxu1  ;;  %v5610_v58 = vpop.f32.mrf.mxu0  ;;  %11580 = vmatprep.subr.mxu1 %v15359_v25 }
 0x39b   : > { %v5489_v55 = vadd.f32 %v5362_v42, %v15205_v18  ;;  %v15351_v29 = vadd.f32 %v11428_v52, %v5490_v33 }
 0x39c   : > { %v11379_v6 = vpop.f32.mrf.mxu1  ;;  %v11434_v60 = vpop.f32.mrf.mxu0 }
 0x39d   : > { %v15353_v28 = vadd.f32 %v5600_v63, %v5489_v55 }
 0x39e   : > { %v5372_v45 = vpop.f32.mrf.mxu1  ;;  %v5618_v11 = vpop.f32.mrf.mxu0 }
 0x3a0   : > { %v11382_v48 = vpop.f32.mrf.mxu1  ;;  %v11437_v41 = vpop.f32.mrf.mxu0 }
 0x3a1   : > { %v5492_v14 = vadd.f32 %v11382_v48, %v15250_v9 }
 0x3a2   : > { %v5380_v16 = vpop.f32.mrf.mxu1  ;;  %v5628_v4 = vpop.f32.mrf.mxu0 }
 0x3a3   : > { %v5491_v18 = vadd.f32 %v5380_v16, %v15252_v13  ;;  %v15362_v26 = vadd.f32 %v11434_v60, %v5492_v14  ;;  %v6974_v13 = vrot.slane %v15296_v10, 2 }
 0x3a4   : > { %v11385_v19 = vpop.f32.mrf.mxu1  ;;  %v11440_v9 = vpop.f32.mrf.mxu0 }
 0x3a5   : > { %v15371_v38 = vadd.f32 %v5618_v11, %v5491_v18  ;;  %v15380_v37 = vsel %vm1266_vm4, %v6974_v13, %v6975_v20 }
 0x3a6   : > { %v5390_v32 = vpop.f32.mrf.mxu1  ;;  %v5636_v50 = vpop.f32.mrf.mxu0 }
 0x3a8   : > { %v11388_v3 = vpop.f32.mrf.mxu1  ;;  %v11443_v31 = vpop.f32.mrf.mxu0 }
 0x3a9   : > { %v5494_v15 = vadd.f32 %v11388_v3, %v15268_v2 }
 0x3aa   : > { %v5398_v21 = vpop.f32.mrf.mxu1  ;;  %v5646_v17 = vpop.f32.mrf.mxu0 }
 0x3ab   : > { %v5493_v36 = vadd.f32 %v5398_v21, %v15275_v47  ;;  %v15377_v12 = vadd.f32 %v11440_v9, %v5494_v15  ;;  %v6036_v21 = vlaneseq }
 0x3ac   : > { %v11391_v40 = vpop.f32.mrf.mxu1  ;;  %v11446_v56 = vpop.f32.mrf.mxu0 }
 0x3ad   : > { %v15382_v53 = vadd.f32 %v5636_v50, %v5493_v36 }
 0x3ae   : > { %v5408_v8 = vpop.f32.mrf.mxu1  ;;  %v5654_v22 = vpop.f32.mrf.mxu0 }
 0x3b0   : > { %v11394_v10 = vpop.f32.mrf.mxu1  ;;  %v11449_v1 = vpop.f32.mrf.mxu0 }
 0x3b1   : > { %v5496_v2 = vadd.f32 %v11394_v10, %v15310_v44 }
 0x3b2   : > { %v5416_v59 = vpop.f32.mrf.mxu1  ;;  %v5664_v7 = vpop.f32.mrf.mxu0 }
 0x3b3   : > { %v5495_v5 = vadd.f32 %v5416_v59, %v15317_v39  ;;  %v15386_v47 = vadd.f32 %v11446_v56, %v5496_v2 }
 0x3b4   : > { %v11397_v27 = vpop.f32.mrf.mxu1  ;;  %v11452_v0 = vpop.f32.mrf.mxu0 }
 0x3b5   : > { %v15388_v52 = vadd.f32 %v5654_v22, %v5495_v5 }
 0x3b6   : > { %v5426_v43 = vpop.f32.mrf.mxu1  ;;  %v5672_v63 = vpop.f32.mrf.mxu0 }
 0x3b8   : > { %v11400_v61 = vpop.f32.mrf.mxu1  ;;  %v11455_v35 = vpop.f32.mrf.mxu0 }
 0x3b9   : > { %v5498_v33 = vadd.f32 %v11400_v61, %v15323_v30 }
 0x3ba   : > { %v5434_v42 = vpop.f32.mrf.mxu1  ;;  %v5682_v58 = vpop.f32.mrf.mxu0 }
 0x3bb   : > { %v5497_v44 = vadd.f32 %v5434_v42, %v15326_v62  ;;  %v15392_v55 = vadd.f32 %v11452_v0, %v5498_v33 }
 0x3bc   : > { %v11403_v6 = vpop.f32.mrf.mxu1  ;;  %v11458_v39 = vpop.f32.mrf.mxu0 }
 0x3bd   : > { %v15394_v60 = vadd.f32 %v5672_v63, %v5497_v44 }
 0x3be   : > { %v5444_v45 = vpop.f32.mrf.mxu1  ;;  %v5690_v11 = vpop.f32.mrf.mxu0 }
 0x3c0   : > { %v11406_v48 = vpop.f32.mrf.mxu1  ;;  %v11461_v41 = vpop.f32.mrf.mxu0 }
 0x3c1   : > { %v5500_v14 = vadd.f32 %v11406_v48, %v15332_v51  ;;  %v11848_v51 = vmov 1983009808  }
 0x3c2   : > { %v5452_v16 = vpop.f32.mrf.mxu1  ;;  %v5700_v4 = vpop.f32.mrf.mxu0  ;;  %v6034_v15 = vunpack.c.l.s4 %v11848_v51 }
 0x3c3   : > { %v5499_v30 = vadd.f32 %v5452_v16, %v15335_v54  ;;  %v15398_v18 = vadd.f32 %v11458_v39, %v5500_v14  ;;  %v15411_v54 = vld [vmem:[%s16337_s4] ss:$0 sm:$0xff] }
 0x3c4   : > { %v11409_v19 = vpop.f32.mrf.mxu1  ;;  %v6035_v40 = vunpack.c.0.s8 %v6034_v15 }
 0x3c5   : > { %v15400_v62 = vadd.f32 %v5690_v11, %v5499_v30 }
 0x3c6   : > { %v5462_v9 = vpop.f32.mrf.mxu1 }
 0x3c8   : > { %v11412_v32 = vpop.f32.mrf.mxu1 }
 0x3c9   : > { %v15403_v50 = vadd.f32 %v11412_v32, %v15339_v24  ;;  %v6037_v24 = vshrl.u32 %v6036_v21, 7 }
 0x3ca   : > { %v5470_v3 = vpop.f32.mrf.mxu1 }
 0x3cb   : > { %v15406_v31 = vadd.f32 %v5470_v3, %v15341_v57  ;;  %v15416_v1 = vsub.s32 %v6035_v40, %v6037_v24  ;;  %v15422_v35 = vsub.s32 0, %v6037_v24 }
 0x3cc   : > { %v11415_v13 = vpop.f32.mrf.mxu1 }
 0x3cd   : > { %16896 = vst [vmem:[#allocation82_spill] sm:$0xff] %v15416_v1  ;;  %16897 = vst [vmem:[#allocation38_spill] sm:$0xff] %v15422_v35 }
 0x3ce   : > { %v5480_v17 = vpop.f32.mrf.mxu1 }
 0x3d0   : > { %v11474_v20 = vpop.f32.mrf.mxu1 }
 0x3d1   : > { %v5963_v36 = vadd.f32 %v11474_v20, %v15345_v46 }
 0x3d2   : > { %v5819_v56 = vpop.f32.mrf.mxu1 }
 0x3d3   : > { %v5985_v8 = vadd.f32 %v15411_v54, %v5963_v36  ;;  %v5962_v57 = vadd.f32 %v5819_v56, %v15347_v34 }
 0x3d4   : > { %v11477_v22 = vpop.f32.mrf.mxu1 }
 0x3d5   : > { %v6001_v10 = vmax.f32 %v5985_v8, 0.0  ;;  %v5984_v2 = vadd.f32 %v15411_v54, %v5962_v57 }
 0x3d6   : > { %v5829_v59 = vpop.f32.mrf.mxu1 }
 0x3d7   : > { %v6000_v7 = vmax.f32 %v5984_v2, 0.0  ;;  %v6049_v5 = vcombine.high %v6001_v10, %v6001_v10  ;;  %v6056_v0 = vrot.slane %v6001_v10, %v15416_v1 }
 0x3d8   : > { %v11480_v27 = vpop.f32.mrf.mxu1 }
 0x3d9   : > { %v6032_v46 = vcombine.high %v6000_v7, %v6000_v7  ;;  %v6039_v43 = vrot.slane %v6000_v7, %v15416_v1  ;;  %v5965_v63 = vadd.f32 %v11480_v27, %v15351_v29  ;;  %v6063_v33 = vrot.slane %v6049_v5, %v15416_v1 }
 0x3da   : > { %v5837_v61 = vpop.f32.mrf.mxu1  ;;  %v6064_v39 = vcombine.high %v6056_v0, %v6056_v0  ;;  %v6345_v3 = vrot.slane %v6056_v0, %v15422_v35 }
 0x3db   : > { %v6046_v34 = vrot.slane %v6032_v46, %v15416_v1  ;;  %v6047_v42 = vcombine.high %v6039_v43, %v6039_v43  ;;  %v5987_v58 = vadd.f32 %v15411_v54, %v5965_v63  ;;  %v5964_v44 = vadd.f32 %v5837_v61, %v15353_v28 }
 0x3dc   : > { %v11483_v6 = vpop.f32.mrf.mxu1  ;;  %v6329_v29 = vrot.slane %v6039_v43, %v15422_v35  ;;  %v6065_v28 = vcombine.high %v6063_v33, %v6063_v33  ;;  %v6349_v15 = vrot.slane %v6064_v39, %v15422_v35  ;;  %v6353_v21 = vrot.slane %v6063_v33, %v15422_v35 }
 0x3dd   : > { %v6048_v45 = vcombine.high %v6046_v34, %v6046_v34  ;;  %v6337_v11 = vrot.slane %v6046_v34, %v15422_v35  ;;  %v6333_v48 = vrot.slane %v6047_v42, %v15422_v35  ;;  %v6003_v41 = vmax.f32 %v5987_v58, 0.0 }
 0x3de   : > { %v5986_v14 = vadd.f32 %v15411_v54, %v5964_v44  ;;  %v5847_v16 = vpop.f32.mrf.mxu1  ;;  %v6357_v57 = vrot.slane %v6065_v28, %v15422_v35 }
 0x3df   : > { %v6341_v4 = vrot.slane %v6048_v45, %v15422_v35  ;;  %v6583_v30 = vsel %vm6582_vm9, %v6333_v48, %v6329_v29  ;;  %v6083_v19 = vcombine.high %v6003_v41, %v6003_v41  ;;  %v6090_v20 = vrot.slane %v6003_v41, %v15416_v1 }
 0x3e0   : > { %v6002_v9 = vmax.f32 %v5986_v14, 0.0  ;;  %v11486_v32 = vpop.f32.mrf.mxu1  ;;  %v6585_v13 = vsel %vm6584_vm10, %v6337_v11, %v6583_v30 }
 0x3e1   : > { %v5967_v51 = vadd.f32 %v11486_v32, %v15362_v26  ;;  %v6587_v17 = vsel %vm6586_vm11, %v6341_v4, %v6585_v13  ;;  %v6097_v22 = vrot.slane %v6083_v19, %v15416_v1  ;;  %v6098_v27 = vcombine.high %v6090_v20, %v6090_v20 }
 0x3e2   : > { %v5855_v36 = vpop.f32.mrf.mxu1  ;;  %v6589_v40 = vsel %vm6588_vm12, %v6345_v3, %v6587_v17  ;;  %v6066_v24 = vcombine.high %v6002_v9, %v6002_v9  ;;  %v6073_v56 = vrot.slane %v6002_v9, %v15416_v1  ;;  %v6377_v29 = vrot.slane %v6090_v20, %v15422_v35 }
 0x3e3   : > { %v5989_v8 = vadd.f32 %v15411_v54, %v5967_v51  ;;  %v6591_v26 = vsel %vm6590_vm13, %v6349_v15, %v6589_v40  ;;  %v5966_v46 = vadd.f32 %v5855_v36, %v15371_v38  ;;  %v6099_v42 = vcombine.high %v6097_v22, %v6097_v22 }
 0x3e4   : > { %v11489_v10 = vpop.f32.mrf.mxu1  ;;  %v6593_v2 = vsel %vm6592_vm14, %v6353_v21, %v6591_v26  ;;  %v6080_v59 = vrot.slane %v6066_v24, %v15416_v1  ;;  %v6081_v7 = vcombine.high %v6073_v56, %v6073_v56  ;;  %v6361_v61 = vrot.slane %v6073_v56, %v15422_v35  ;;  %v9698_v56 = vld [vmem:[%s16338_s5 + $0x70] sm:$0xff] }
 0x3e5   : > { %v6595_v5 = vsel %vm6594_vm15, %v6357_v57, %v6593_v2  ;;  %v6005_v0 = vmax.f32 %v5989_v8, 0.0  ;;  %v5988_v6 = vadd.f32 %v15411_v54, %v5966_v46  ;;  %v6381_v48 = vrot.slane %v6098_v27, %v15422_v35  ;;  %v9697_v27 = vld [vmem:[%s16338_s5 + $0x68] sm:$0xff] }
 0x3e6   : > { %v5865_v43 = vpop.f32.mrf.mxu1  ;;  %6654 = vst.msk [vmem:[#allocation4 + $0x11] sm:$0xff] %vm6304_vm7, %v6595_v5  ;;  %v6082_v63 = vcombine.high %v6080_v59, %v6080_v59  ;;  %v6365_v34 = vrot.slane %v6081_v7, %v15422_v35  ;;  %v6369_v33 = vrot.slane %v6080_v59, %v15422_v35  ;;  %v6385_v9 = vrot.slane %v6097_v22, %v15422_v35 }
 0x3e7   : > { %v6117_v58 = vcombine.high %v6005_v0, %v6005_v0  ;;  %v15456_v44 = vrot.slane %v6005_v0, %v15416_v1  ;;  %v6004_v28 = vmax.f32 %v5988_v6, 0.0 }
 0x3e8   : > { %v11492_v39 = vpop.f32.mrf.mxu1  ;;  %v6373_v38 = vrot.slane %v6082_v63, %v15422_v35  ;;  %v6596_v45 = vsel %vm6582_vm9, %v6365_v34, %v6361_v61 }
 0x3e9   : > { %v5969_v11 = vadd.f32 %v11492_v39, %v15377_v12  ;;  %v6597_v41 = vsel %vm6584_vm10, %v6369_v33, %v6596_v45  ;;  %v15466_v14 = vrot.slane %v6117_v58, %v15416_v1  ;;  %v6389_v12 = vrot.slane %v6099_v42, %v15422_v35  ;;  %v9696_v58 = vld [vmem:[%s16338_s5 + $0x60] sm:$0xff] }
 0x3ea   : > { %v5873_v16 = vpop.f32.mrf.mxu1  ;;  %v6598_v4 = vsel %vm6586_vm11, %v6373_v38, %v6597_v41  ;;  %v6132_v3 = vcombine.high %v15456_v44, %v15456_v44  ;;  %v6100_v15 = vcombine.high %v6004_v28, %v6004_v28  ;;  %v6107_v21 = vrot.slane %v6004_v28, %v15416_v1 }
 0x3eb   : > { %v5991_v30 = vadd.f32 %v15411_v54, %v5969_v11  ;;  %v5968_v19 = vadd.f32 %v5873_v16, %v15382_v53  ;;  %v6599_v32 = vsel %vm6588_vm12, %v6377_v29, %v6598_v4  ;;  %v6133_v53 = vcombine.high %v15466_v14, %v15466_v14  ;;  %v15529_v16 = vld [vmem:[%s16338_s5 + $0xb8] sm:$0xff] }
 0x3ec   : > { %v11495_v13 = vpop.f32.mrf.mxu1  ;;  %v6600_v51 = vsel %vm6590_vm13, %v6381_v48, %v6599_v32  ;;  %v6409_v57 = vrot.slane %v15456_v44, %v15422_v35  ;;  %v6114_v26 = vrot.slane %v6100_v15, %v15416_v1  ;;  %v6115_v22 = vcombine.high %v6107_v21, %v6107_v21 }
 0x3ed   : > { %v6007_v17 = vmax.f32 %v5991_v30, 0.0  ;;  %v6601_v20 = vsel %vm6592_vm14, %v6385_v9, %v6600_v51  ;;  %v5990_v36 = vadd.f32 %v15411_v54, %v5968_v19  ;;  %v15482_v24 = vld [vmem:[#allocation4 + $0x10] sm:$0xff]  ;;  %v6413_v10 = vrot.slane %v6132_v3, %v15422_v35  ;;  %v15518_v45 = vld [vmem:[#allocation4 + $0x18] sm:$0x3] }
 0x3ee   : > { %v5883_v40 = vpop.f32.mrf.mxu1  ;;  %v6602_v8 = vsel %vm6594_vm15, %v6389_v12, %v6601_v20  ;;  %11549 = vmatmul.mubr.msk.f32.vlgmr.msra.gmra.mxu1 %vm6304_vm7, %v15482_v24  ;;  %v6116_v0 = vcombine.high %v6114_v26, %v6114_v26  ;;  %v6393_v46 = vrot.slane %v6107_v21, %v15422_v35  ;;  %v6397_v43 = vrot.slane %v6115_v22, %v15422_v35 }
 0x3ef   : > { %6655 = vst.msk [vmem:[#allocation4 + $0x21] sm:$0xff] %vm6304_vm7, %v6602_v8  ;;  %v6151_v2 = vcombine.high %v6007_v17, %v6007_v17  ;;  %v15496_v59 = vrot.slane %v6007_v17, %v15416_v1  ;;  %v6006_v7 = vmax.f32 %v5990_v36, 0.0  ;;  %11581 = vmatpush3.msra.mxu1 %v15359_v25  ;;  %v6401_v63 = vrot.slane %v6114_v26, %v15422_v35 }
 0x3f0   : > { %v11498_v5 = vpop.f32.mrf.mxu1  ;;  %11582 = vmatprep.subr.mxu1 %v9698_v56  ;;  %v6417_v61 = vrot.slane %v15466_v14, %v15422_v35  ;;  %v6421_v34 = vrot.slane %v6133_v53, %v15422_v35  ;;  %v6405_v44 = vrot.slane %v6116_v0, %v15422_v35  ;;  %v6603_v6 = vsel %vm6582_vm9, %v6397_v43, %v6393_v46  ;;  %v9685_v0 = vld [vmem:[%s16338_s5 + $0x48] sm:$0xff]  ;;  %v11464_v46 = vpop.f32.mrf.mxu0 }
 0x3f1   : > { %v15509_v33 = vrot.slane %v6151_v2, %v15416_v1  ;;  %v6134_v25 = vcombine.high %v6006_v7, %v6006_v7  ;;  %11583 = vmatpush3.msra.mxu1 %v9698_v56  ;;  %v6141_v39 = vrot.slane %v6006_v7, %v15416_v1  ;;  %v5971_v38 = vadd.f32 %v11498_v5, %v15386_v47 }
 0x3f2   : > { %v5891_v42 = vpop.f32.mrf.mxu1  ;;  %11584 = vmatprep.subr.mxu1 %v9697_v27  ;;  %v6604_v11 = vsel %vm6584_vm10, %v6401_v63, %v6603_v6  ;;  %v6166_v29 = vcombine.high %v15496_v59, %v15496_v59  ;;  %v6441_v48 = vrot.slane %v15496_v59, %v15422_v35  ;;  %v6706_v41 = vrot.slane %v15482_v24, 1 }
 0x3f3   : > { %11585 = vmatpush3.msra.mxu1 %v9697_v27  ;;  %v6605_v47 = vsel %vm6586_vm11, %v6405_v44, %v6604_v11  ;;  %v6167_v4 = vcombine.high %v15509_v33, %v15509_v33  ;;  %v6148_v28 = vrot.slane %v6134_v25, %v15416_v1  ;;  %v6149_v30 = vcombine.high %v6141_v39, %v6141_v39 }
 0x3f4   : > { %v11501_v14 = vpop.f32.mrf.mxu1  ;;  %11586 = vmatprep.subr.mxu1 %v9696_v58  ;;  %v6606_v19 = vsel %vm6588_vm12, %v6409_v57, %v6605_v47  ;;  %v6425_v9 = vrot.slane %v6141_v39, %v15422_v35  ;;  %v5993_v12 = vadd.f32 %v15411_v54, %v5971_v38  ;;  %v6707_v32 = vrot.slane %v15518_v45, 1  ;;  %v9686_v57 = vld [vmem:[%s16338_s5 + $0x50] sm:$0xff] }
 0x3f5   : > { %11587 = vmatpush3.msra.mxu1 %v9696_v58  ;;  %v6607_v13 = vsel %vm6590_vm13, %v6413_v10, %v6606_v19  ;;  %v6150_v51 = vcombine.high %v6148_v28, %v6148_v28  ;;  %v6429_v15 = vrot.slane %v6149_v30, %v15422_v35  ;;  %v6433_v21 = vrot.slane %v6148_v28, %v15422_v35 }
 0x3f6   : > { %v5901_v3 = vpop.f32.mrf.mxu1  ;;  %v15542_v17 = vld [vmem:[#allocation4 + $0x20] sm:$0xff]  ;;  %11620 = vmatprep.subr.mxu1 %v15529_v16  ;;  %v6608_v20 = vsel %vm6592_vm14, %v6417_v61, %v6607_v13  ;;  %v6009_v53 = vmax.f32 %v5993_v12, 0.0  ;;  %v15547_v36 = vsel %vm598_vm3, %v6706_v41, %v6707_v32  ;;  %v5970_v40 = vadd.f32 %v5891_v42, %v15388_v52  ;;  %v15552_v8 = vld [vmem:[#allocation4 + $0x28] sm:$0x3]  ;;  %v5708_v41 = vpop.f32.mrf.mxu0  ;;  %v15610_v32 = vld [vmem:[%s16338_s5 + $0x98] sm:$0xff] }
 0x3f7   : > { %11551 = vmatprep.mubr.msk.f32.mxu1 %vm6304_vm7, %v15542_v17  ;;  %v6609_v26 = vsel %vm6594_vm15, %v6421_v34, %v6608_v20  ;;  %v6437_v22 = vrot.slane %v6150_v51, %v15422_v35  ;;  %v6610_v10 = vsel %vm6582_vm9, %v6429_v15, %v6425_v9  ;;  %11529 = vmatmul.mubr.msk.f32.vlgmr.msra.gmra.mxu0 %vm6304_vm7, %v15547_v36  ;;  %v6709_v63 = vrot.slane %v15542_v17, 1 }
 0x3f8   : > { %v11504_v56 = vpop.f32.mrf.mxu1  ;;  %6656 = vst.msk [vmem:[#allocation4 + $0x31] sm:$0xff] %vm6304_vm7, %v6609_v26  ;;  %v6445_v2 = vrot.slane %v6166_v29, %v15422_v35  ;;  %v6611_v59 = vsel %vm6584_vm10, %v6433_v21, %v6610_v10  ;;  %v6185_v7 = vcombine.high %v6009_v53, %v6009_v53  ;;  %v5992_v5 = vadd.f32 %v15411_v54, %v5970_v40 }
 0x3f9   : > { %v5973_v52 = vadd.f32 %v11504_v56, %v15392_v55  ;;  %11561 = vmatpush3.msra.mxu0 %v15367_v49  ;;  %v6612_v43 = vsel %vm6586_vm11, %v6437_v22, %v6611_v59  ;;  %v6710_v61 = vrot.slane %v15552_v8, 1  ;;  %v6449_v34 = vrot.slane %v15509_v33, %v15422_v35  ;;  %v9684_v33 = vld [vmem:[%s16338_s5 + $0x40] sm:$0xff] }
 0x3fa   : > { %v5909_v27 = vpop.f32.mrf.mxu1  ;;  %11562 = vmatprep.subr.mxu0 %v9686_v57  ;;  %v6453_v25 = vrot.slane %v6167_v4, %v15422_v35  ;;  %v6613_v49 = vsel %vm6588_vm12, %v6441_v48, %v6612_v43  ;;  %v15580_v42 = vrot.slane %v6009_v53, %v15416_v1  ;;  %v6008_v6 = vmax.f32 %v5992_v5, 0.0 }
 0x3fb   : > { %v5995_v55 = vadd.f32 %v15411_v54, %v5973_v52  ;;  %11563 = vmatpush3.msra.mxu0 %v9686_v57  ;;  %v6614_v44 = vsel %vm6590_vm13, %v6445_v2, %v6613_v49  ;;  %v15584_v38 = vsel %vm598_vm3, %v6709_v63, %v6710_v61  ;;  %v15591_v29 = vrot.slane %v6185_v7, %v15416_v1 }
 0x3fc   : > { %v11507_v58 = vpop.f32.mrf.mxu1  ;;  %11564 = vmatprep.subr.mxu0 %v9685_v0  ;;  %v6615_v11 = vsel %vm6592_vm14, %v6449_v34, %v6614_v44  ;;  %11531 = vmatprep.mubr.msk.f32.mxu0 %vm6304_vm7, %v15584_v38  ;;  %v6168_v47 = vcombine.high %v6008_v6, %v6008_v6  ;;  %v6175_v4 = vrot.slane %v6008_v6, %v15416_v1 }
 0x3fd   : > { %v6011_v39 = vmax.f32 %v5995_v55, 0.0  ;;  %v6616_v14 = vsel %vm6594_vm15, %v6453_v25, %v6615_v11  ;;  %11565 = vmatpush3.msra.mxu0 %v9685_v0  ;;  %v6200_v28 = vcombine.high %v15580_v42, %v15580_v42  ;;  %v5972_v30 = vadd.f32 %v5909_v27, %v15394_v60 }
 0x3fe   : > { %v5919_v48 = vpop.f32.mrf.mxu1  ;;  %6657 = vst.msk [vmem:[#allocation4 + $0x41] sm:$0xff] %vm6304_vm7, %v6616_v14  ;;  %v15602_v9 = vadd.f32 %v11464_v46, %v15403_v50  ;;  %v15605_v12 = vadd.f32 %v5708_v41, %v15406_v31  ;;  %11566 = vmatprep.subr.mxu0 %v9684_v33  ;;  %v6473_v3 = vrot.slane %v15580_v42, %v15422_v35 }
 0x3ff   : > { %v6182_v13 = vrot.slane %v6168_v47, %v15416_v1  ;;  %v6183_v51 = vcombine.high %v6175_v4, %v6175_v4  ;;  %v6219_v60 = vcombine.high %v6011_v39, %v6011_v39  ;;  %v15615_v15 = vld [vmem:[#allocation4 + $0x30] sm:$0xff]  ;;  %11567 = vmatpush3.msra.mxu0 %v9684_v33  ;;  %v6201_v50 = vcombine.high %v15591_v29, %v15591_v29  ;;  %v15634_v59 = vld [vmem:[#allocation4 + $0x38] sm:$0x3] }
 0x400   : > { %v11510_v19 = vpop.f32.mrf.mxu1  ;;  %v15620_v31 = vrot.slane %v6011_v39, %v15416_v1  ;;  %v5994_v21 = vadd.f32 %v15411_v54, %v5972_v30  ;;  %11552 = vmatmul.mubr.msk.f32.gmra.mxu1 %vm6304_vm7, %v15615_v15  ;;  %v6457_v56 = vrot.slane %v6175_v4, %v15422_v35  ;;  %11600 = vmatprep.subr.mxu0 %v15610_v32  ;;  %v6712_v0 = vrot.slane %v15615_v15, 1 }
 0x401   : > { %v5975_v20 = vadd.f32 %v11510_v19, %v15398_v18  ;;  %v6184_v40 = vcombine.high %v6182_v13, %v6182_v13  ;;  %v6461_v57 = vrot.slane %v6183_v51, %v15422_v35  ;;  %v6465_v26 = vrot.slane %v6182_v13, %v15422_v35 }
 0x402   : > { %v5927_v53 = vpop.f32.mrf.mxu1  ;;  %v6477_v22 = vrot.slane %v6200_v28, %v15422_v35  ;;  %v6481_v10 = vrot.slane %v15591_v29, %v15422_v35  ;;  %v6010_v52 = vmax.f32 %v5994_v21, 0.0  ;;  %v6233_v27 = vrot.slane %v6219_v60, %v15416_v1 }
 0x403   : > { %v5997_v2 = vadd.f32 %v15411_v54, %v5975_v20  ;;  %v6469_v7 = vrot.slane %v6184_v40, %v15422_v35  ;;  %v6617_v5 = vsel %vm6582_vm9, %v6461_v57, %v6457_v56  ;;  %v6485_v46 = vrot.slane %v6201_v50, %v15422_v35 }
 0x404   : > { %v11513_v18 = vpop.f32.mrf.mxu1  ;;  %v6618_v43 = vsel %vm6584_vm10, %v6465_v26, %v6617_v5  ;;  %v6202_v55 = vcombine.high %v6010_v52, %v6010_v52  ;;  %v6209_v63 = vrot.slane %v6010_v52, %v15416_v1  ;;  %v6234_v25 = vcombine.high %v15620_v31, %v15620_v31 }
 0x405   : > { %v6619_v34 = vsel %vm6586_vm11, %v6469_v7, %v6618_v43  ;;  %v6013_v49 = vmax.f32 %v5997_v2, 0.0  ;;  %v6713_v42 = vrot.slane %v15634_v59, 1  ;;  %v15647_v58 = vld [vmem:[#allocation4 + $0x40] sm:$0xff]  ;;  %v5974_v33 = vadd.f32 %v5927_v53, %v15400_v62  ;;  %v15673_v20 = vld [vmem:[#allocation4 + $0x48] sm:$0x3] }
 0x406   : > { %v5937_v61 = vpop.f32.mrf.mxu1  ;;  %v6620_v44 = vsel %vm6588_vm12, %v6473_v3, %v6619_v34  ;;  %v6216_v6 = vrot.slane %v6202_v55, %v15416_v1  ;;  %v6217_v39 = vcombine.high %v6209_v63, %v6209_v63  ;;  %11554 = vmatprep.mubr.msk.f32.mxu1 %vm6304_vm7, %v15647_v58  ;;  %v6235_v48 = vcombine.high %v6233_v27, %v6233_v27 }
 0x407   : > { %v6621_v29 = vsel %vm6590_vm13, %v6477_v22, %v6620_v44  ;;  %v6489_v41 = vrot.slane %v6209_v63, %v15422_v35  ;;  %v15657_v14 = vsel %vm598_vm3, %v6712_v0, %v6713_v42  ;;  %v6505_v19 = vrot.slane %v15620_v31, %v15422_v35 }
 0x408   : > { %v11516_v11 = vpop.f32.mrf.mxu1  ;;  %v6622_v47 = vsel %vm6592_vm14, %v6481_v10, %v6621_v29  ;;  %v6218_v4 = vcombine.high %v6216_v6, %v6216_v6  ;;  %v6493_v28 = vrot.slane %v6217_v39, %v15422_v35  ;;  %v6497_v30 = vrot.slane %v6216_v6, %v15422_v35  ;;  %11532 = vmatmul.mubr.msk.f32.gmra.mxu0 %vm6304_vm7, %v15657_v14 }
 0x409   : > { %v6623_v62 = vsel %vm6594_vm15, %v6485_v46, %v6622_v47  ;;  %v6509_v3 = vrot.slane %v6234_v25, %v15422_v35  ;;  %v6253_v13 = vcombine.high %v6013_v49, %v6013_v49  ;;  %v5996_v50 = vadd.f32 %v15411_v54, %v5974_v33 }
 0x40a   : > { %6658 = vst.msk [vmem:[#allocation4 + $0x51] sm:$0xff] %vm6304_vm7, %v6623_v62  ;;  %v6501_v51 = vrot.slane %v6218_v4, %v15422_v35  ;;  %v6624_v60 = vsel %vm6582_vm9, %v6493_v28, %v6489_v41  ;;  %v5977_v21 = vadd.f32 %v11516_v11, %v15602_v9  ;;  %v5945_v53 = vpop.f32.mrf.mxu1  ;;  %v6513_v40 = vrot.slane %v6233_v27, %v15422_v35 }
 0x40b   : > { %v6517_v31 = vrot.slane %v6235_v48, %v15422_v35  ;;  %v6625_v56 = vsel %vm6584_vm10, %v6497_v30, %v6624_v60  ;;  %v6260_v57 = vrot.slane %v6013_v49, %v15416_v1  ;;  %v6012_v22 = vmax.f32 %v5996_v50, 0.0 }
 0x40c   : > { %v6626_v26 = vsel %vm6586_vm11, %v6501_v51, %v6625_v56  ;;  %v5999_v10 = vadd.f32 %v15411_v54, %v5977_v21  ;;  %v6715_v52 = vrot.slane %v15647_v58, 1  ;;  %v6267_v2 = vrot.slane %v6253_v13, %v15416_v1 }
 0x40d   : > { %v6627_v9 = vsel %vm6588_vm12, %v6505_v19, %v6626_v26  ;;  %v6716_v18 = vrot.slane %v15673_v20, 1  ;;  %v5976_v7 = vadd.f32 %v5945_v53, %v15605_v12  ;;  %v6236_v27 = vcombine.high %v6012_v22, %v6012_v22 }
 0x40e   : > { %v6628_v5 = vsel %vm6590_vm13, %v6509_v3, %v6627_v9  ;;  %v6243_v0 = vrot.slane %v6012_v22, %v15416_v1  ;;  %v6015_v46 = vmax.f32 %v5999_v10, 0.0  ;;  %v6268_v12 = vcombine.high %v6260_v57, %v6260_v57 }
 0x40f   : > { %v6629_v43 = vsel %vm6592_vm14, %v6513_v40, %v6628_v5  ;;  %v15690_v55 = vsel %vm598_vm3, %v6715_v52, %v6716_v18  ;;  %v5998_v63 = vadd.f32 %v15411_v54, %v5976_v7  ;;  %v6250_v34 = vrot.slane %v6236_v27, %v15416_v1 }
 0x410   : > { %v6630_v61 = vsel %vm6594_vm15, %v6517_v31, %v6629_v43  ;;  %v6251_v25 = vcombine.high %v6243_v0, %v6243_v0  ;;  %11534 = vmatprep.mubr.msk.f32.mxu0 %vm6304_vm7, %v15690_v55  ;;  %v6269_v49 = vcombine.high %v6267_v2, %v6267_v2  ;;  %v6521_v42 = vrot.slane %v6243_v0, %v15422_v35 }
 0x411   : > { %6659 = vst.msk [vmem:[#allocation4 + $0x61] sm:$0xff] %vm6304_vm7, %v6630_v61  ;;  %v6014_v44 = vmax.f32 %v5998_v63, 0.0  ;;  %v15699_v6 = vld [vmem:[#allocation4 + $0x50] sm:$0xff]  ;;  %v15701_v39 = vld [vmem:[#allocation4 + $0x58] sm:$0x3]  ;;  %v6252_v54 = vcombine.high %v6250_v34, %v6250_v34  ;;  %v6529_v11 = vrot.slane %v6250_v34, %v15422_v35  ;;  %v6287_v29 = vcombine.high %v6015_v46, %v6015_v46 }
 0x412   : > { %v6525_v33 = vrot.slane %v6251_v25, %v15422_v35  ;;  %11555 = vmatmul.mubr.msk.f32.gmra.mxu1 %vm6304_vm7, %v15699_v6  ;;  %v6537_v48 = vrot.slane %v6260_v57, %v15422_v35  ;;  %v6294_v41 = vrot.slane %v6015_v46, %v15416_v1  ;;  %v6718_v4 = vrot.slane %v15699_v6, 1 }
 0x413   : > { %v6270_v47 = vcombine.high %v6014_v44, %v6014_v44  ;;  %v6533_v28 = vrot.slane %v6252_v54, %v15422_v35  ;;  %v6277_v62 = vrot.slane %v6014_v44, %v15416_v1  ;;  %v6719_v19 = vrot.slane %v15701_v39, 1 }
 0x414   : > { %v6631_v30 = vsel %vm6582_vm9, %v6525_v33, %v6521_v42  ;;  %v6541_v3 = vrot.slane %v6268_v12, %v15422_v35  ;;  %v6545_v13 = vrot.slane %v6267_v2, %v15422_v35  ;;  %v6549_v51 = vrot.slane %v6269_v49, %v15422_v35 }
 0x415   : > { %v6632_v60 = vsel %vm6584_vm10, %v6529_v11, %v6631_v30  ;;  %v6301_v21 = vrot.slane %v6287_v29, %v15416_v1  ;;  %v6284_v53 = vrot.slane %v6270_v47, %v15416_v1  ;;  %v6285_v40 = vcombine.high %v6277_v62, %v6277_v62 }
 0x416   : > { %v6633_v50 = vsel %vm6586_vm11, %v6533_v28, %v6632_v60  ;;  %v6302_v56 = vcombine.high %v6294_v41, %v6294_v41  ;;  %v6553_v57 = vrot.slane %v6277_v62, %v15422_v35  ;;  %v15724_v26 = vsel %vm598_vm3, %v6718_v4, %v6719_v19 }
 0x417   : > { %v6634_v31 = vsel %vm6588_vm12, %v6537_v48, %v6633_v50  ;;  %v6286_v10 = vcombine.high %v6284_v53, %v6284_v53  ;;  %v6557_v52 = vrot.slane %v6285_v40, %v15422_v35  ;;  %v6561_v9 = vrot.slane %v6284_v53, %v15422_v35  ;;  %11535 = vmatmul.mubr.msk.f32.gmra.mxu0 %vm6304_vm7, %v15724_v26  ;;  %v9721_v53 = vld [vmem:[%s16338_s5 + $0xa8] sm:$0xff] }
 0x418   : > { %v6635_v22 = vsel %vm6590_vm13, %v6541_v3, %v6634_v31  ;;  %v15731_v2 = vld [vmem:[#allocation4 + $0x60] sm:$0xff]  ;;  %v15733_v18 = vld [vmem:[#allocation4 + $0x68] sm:$0x3]  ;;  %v6303_v46 = vcombine.high %v6301_v21, %v6301_v21  ;;  %v6569_v61 = vrot.slane %v6294_v41, %v15422_v35  ;;  %v6573_v12 = vrot.slane %v6302_v56, %v15422_v35 }
 0x419   : > { %v6636_v7 = vsel %vm6592_vm14, %v6545_v13, %v6635_v22  ;;  %11557 = vmatprep.mubr.msk.f32.mxu1 %vm6304_vm7, %v15731_v2  ;;  %v6721_v5 = vrot.slane %v15731_v2, 1  ;;  %v6722_v27 = vrot.slane %v15733_v18, 1  ;;  %v6565_v43 = vrot.slane %v6286_v10, %v15422_v35  ;;  %v9722_v13 = vld [vmem:[%s16338_s5 + $0xb0] sm:$0xff]  ;;  %v9720_v10 = vld [vmem:[%s16338_s5 + $0xa0] sm:$0xff] }
 0x41a   : > { %v6637_v0 = vsel %vm6594_vm15, %v6549_v51, %v6636_v7  ;;  %v6638_v63 = vsel %vm6582_vm9, %v6557_v52, %v6553_v57  ;;  %v6577_v42 = vrot.slane %v6301_v21, %v15422_v35  ;;  %v6581_v54 = vrot.slane %v6303_v46, %v15422_v35  ;;  %v9747_v46 = vld [vmem:[%s16338_s5 + $0xf8] sm:$0xff] }
 0x41b   : > { %6660 = vst.msk [vmem:[#allocation4 + $0x71] sm:$0xff] %vm6304_vm7, %v6637_v0  ;;  %v6639_v34 = vsel %vm6584_vm10, %v6561_v9, %v6638_v63  ;;  %v15747_v25 = vsel %vm598_vm3, %v6721_v5, %v6722_v27  ;;  %v6977_v28 = vrot.slane %v15482_v24, 2  ;;  %v6978_v62 = vrot.slane %v15518_v45, 2  ;;  %v9710_v45 = vld [vmem:[%s16338_s5 + $0x90] sm:$0xff]  ;;  %v9735_v0 = vld [vmem:[%s16338_s5 + $0xd8] sm:$0xff] }
 0x41c   : > { %v6640_v49 = vsel %vm6586_vm11, %v6565_v43, %v6639_v34  ;;  %11537 = vmatprep.mubr.msk.f32.mxu0 %vm6304_vm7, %v15747_v25  ;;  %v6980_v19 = vrot.slane %v15542_v17, 2  ;;  %v6981_v3 = vrot.slane %v15552_v8, 2  ;;  %v6983_v8 = vrot.slane %v15615_v15, 2  ;;  %v9746_v63 = vld [vmem:[%s16338_s5 + $0xf0] sm:$0xff] }
 0x41d   : > { %v6641_v44 = vsel %vm6588_vm12, %v6569_v61, %v6640_v49  ;;  %v6984_v51 = vrot.slane %v15634_v59, 2  ;;  %v6986_v60 = vrot.slane %v15647_v58, 2  ;;  %v9709_v59 = vld [vmem:[%s16338_s5 + $0x88] sm:$0xff]  ;;  %v6990_v21 = vrot.slane %v15701_v39, 2  ;;  %v9708_v39 = vld [vmem:[%s16338_s5 + $0x80] sm:$0xff]  ;;  %v9734_v61 = vld [vmem:[%s16338_s5 + $0xd0] sm:$0xff] }
 0x41e   : > { %v6642_v33 = vsel %vm6590_vm13, %v6573_v12, %v6641_v44  ;;  %v6992_v31 = vrot.slane %v15731_v2, 2  ;;  %v6993_v56 = vrot.slane %v15733_v18, 2  ;;  %v9732_v12 = vld [vmem:[%s16338_s5 + $0xc0] sm:$0xff]  ;;  %v9745_v44 = vld [vmem:[%s16338_s5 + $0xe8] sm:$0xff] }
 0x41f   : > { %v6643_v11 = vsel %vm6592_vm14, %v6577_v42, %v6642_v33  ;;  %v9744_v33 = vld [vmem:[%s16338_s5 + $0xe0] sm:$0xff] }
 0x420   : > { %v6644_v29 = vsel %vm6594_vm15, %v6581_v54, %v6643_v11  ;;  %v15846_v5 = vsel %vm1266_vm4, %v6992_v31, %v6993_v56 }
 0x421   : > { %6661 = vst.msk [vmem:[#allocation4 + $0x81] sm:$0xff] %vm6304_vm7, %v6644_v29 }
 0x422   : > { %v15760_v48 = vld [vmem:[#allocation4 + $0x70] sm:$0xff]  ;;  %v15762_v41 = vld [vmem:[#allocation4 + $0x78] sm:$0x3] }
 0x423   : > { %11558 = vmatmul.mubr.msk.f32.gmra.mxu1 %vm6304_vm7, %v15760_v48  ;;  %v6724_v47 = vrot.slane %v15760_v48, 1  ;;  %v6725_v4 = vrot.slane %v15762_v41, 1  ;;  %v6995_v9 = vrot.slane %v15760_v48, 2  ;;  %v6996_v18 = vrot.slane %v15762_v41, 2  ;;  %v9759_v41 = vld [vmem:[%s16338_s5 + $0x118] sm:$0xff] }
 0x424   : > { %11588 = vmatprep.mubr.msk.f32.mxu1 %vm6304_vm7, %v15482_v24  ;;  %v6979_v24 = vsel %vm1266_vm4, %v6977_v28, %v6978_v62  ;;  %v6682_v28 = vld [vmem:[#allocation4 + $0x98] sm:$0x3]  ;;  %v9774_v62 = vld [vmem:[%s16340_s7 + $0x28] sm:$0xff] }
 0x425   : > { %v15772_v30 = vsel %vm598_vm3, %v6724_v47, %v6725_v4  ;;  %v11519_v50 = vpop.f32.mrf.mxu1  ;;  %v15862_v43 = vsel %vm1266_vm4, %v6995_v9, %v6996_v18  ;;  %v6681_v4 = vld [vmem:[#allocation4 + $0x90] sm:$0xff] }
 0x426   : > { %11538 = vmatmul.mubr.msk.f32.gmra.mxu0 %vm6304_vm7, %v15772_v30 }
 0x427   : > { %11589 = vmatmul.mubr.msk.f32.vlgmr.msra.gmra.mxu1 %vm6304_vm7, %v15542_v17  ;;  %11568 = vmatprep.mubr.msk.f32.mxu0 %vm6304_vm7, %v15380_v37  ;;  %v15797_v37 = vsel %vm1266_vm4, %v6980_v19, %v6981_v3  ;;  %v5955_v57 = vpop.f32.mrf.mxu1  ;;  %v11467_v22 = vpop.f32.mrf.mxu0  ;;  %v9786_v19 = vld [vmem:[%s16340_s7 + $0x48] sm:$0xff]  ;;  %v9773_v3 = vld [vmem:[%s16340_s7 + $0x20] sm:$0xff] }
 0x428   : > { %11591 = vmatprep.mubr.msk.f32.mxu1 %vm6304_vm7, %v15615_v15  ;;  %11621 = vmatpush3.msra.mxu1 %v15529_v16  ;;  %v6987_v16 = vrot.slane %v15673_v20, 2  ;;  %v15812_v20 = vsel %vm1266_vm4, %v6983_v8, %v6984_v51  ;;  %v15850_v27 = vld [vmem:[#allocation4 + $0x80] sm:$0xff]  ;;  %v6680_v34 = vld [vmem:[#allocation4 + $0x88] sm:$0x3] }
 0x429   : > { %11622 = vmatprep.subr.mxu1 %v9722_v13  ;;  %v5718_v7 = vpop.f32.mrf.mxu0  ;;  %v7377_v49 = vrot.slane %v15850_v27, 2  ;;  %v7378_v42 = vrot.slane %v6680_v34, 2  ;;  %v7254_v54 = vrot.slane %v15850_v27, 1  ;;  %v7255_v11 = vrot.slane %v6680_v34, 1 }
 0x42a   : > { %11569 = vmatmul.mubr.msk.f32.vlgmr.msra.gmra.mxu0 %vm6304_vm7, %v6979_v24  ;;  %11623 = vmatpush3.msra.mxu1 %v9722_v13  ;;  %v15822_v40 = vsel %vm1266_vm4, %v6986_v60, %v6987_v16  ;;  %v9785_v13 = vld [vmem:[%s16340_s7 + $0x40] sm:$0xff] }
 0x42b   : > { %11601 = vmatpush3.msra.mxu0 %v15610_v32  ;;  %11571 = vmatprep.mubr.msk.f32.mxu0 %vm6304_vm7, %v15797_v37  ;;  %v6989_v32 = vrot.slane %v15699_v6, 2  ;;  %v7379_v29 = vsel %vm1266_vm4, %v7377_v49, %v7378_v42  ;;  %v7256_v47 = vsel %vm598_vm3, %v7254_v54, %v7255_v11 }
 0x42c   : > { %11592 = vmatmul.mubr.msk.f32.gmra.mxu1 %vm6304_vm7, %v15647_v58  ;;  %11602 = vmatprep.subr.mxu0 %v9710_v45 }
 0x42d   : > { %11594 = vmatprep.mubr.msk.f32.mxu1 %vm6304_vm7, %v15699_v6  ;;  %11603 = vmatpush3.msra.mxu0 %v9710_v45  ;;  %v15839_v52 = vsel %vm1266_vm4, %v6989_v32, %v6990_v21  ;;  %v16011_v45 = vld [vmem:[%s16340_s7 + $0x98] sm:$0xff] }
 0x42e   : > { %11572 = vmatmul.mubr.msk.f32.gmra.mxu0 %vm6304_vm7, %v15812_v20  ;;  %11604 = vmatprep.subr.mxu0 %v9709_v59  ;;  %16899 = vst [vmem:[#allocation52_spill] sm:$0xff] %v16011_v45 }
 0x42f   : > { %11574 = vmatprep.mubr.msk.f32.mxu0 %vm6304_vm7, %v15822_v40  ;;  %11605 = vmatpush3.msra.mxu0 %v9709_v59 }
 0x430   : > { %11595 = vmatmul.mubr.msk.f32.gmra.mxu1 %vm6304_vm7, %v15731_v2  ;;  %11624 = vmatprep.subr.mxu1 %v9721_v53 }
 0x431   : > { %11597 = vmatprep.mubr.msk.f32.mxu1 %vm6304_vm7, %v15760_v48  ;;  %11625 = vmatpush3.msra.mxu1 %v9721_v53 }
 0x432   : > { %11575 = vmatmul.mubr.msk.f32.gmra.mxu0 %vm6304_vm7, %v15839_v52  ;;  %11606 = vmatprep.subr.mxu0 %v9708_v39 }
 0x433   : > { %11577 = vmatprep.mubr.msk.f32.mxu0 %vm6304_vm7, %v15846_v5  ;;  %11626 = vmatprep.subr.mxu1 %v9720_v10 }
 0x434   : > { %11598 = vmatmul.mubr.msk.f32.gmra.mxu1 %vm6304_vm7, %v15850_v27  ;;  %11607 = vmatpush3.msra.mxu0 %v9708_v39 }
 0x435   : > { %11628 = vmatprep.mubr.msk.f32.mxu1 %vm6304_vm7, %v6979_v24  ;;  %11627 = vmatpush3.msra.mxu1 %v9720_v10  ;;  %v16006_v24 = vld [vmem:[%s16340_s7 + $0x18] sm:$0xff] }
 0x436   : > { %11578 = vmatmul.mubr.msk.f32.gmra.mxu0 %vm6304_vm7, %v15862_v43  ;;  %11640 = vmatprep.subr.mxu0 %v9735_v0  ;;  %16898 = vst [vmem:[#allocation51_spill] sm:$0xff] %v16006_v24 }
 0x437   : > { %11608 = vmatprep.mubr.msk.f32.mxu0 %vm6304_vm7, %v15547_v36  ;;  %11660 = vmatprep.subr.mxu1 %v9747_v46  ;;  %v9733_v36 = vld [vmem:[%s16338_s5 + $0xc8] sm:$0xff] }
 0x438   : > { %11629 = vmatmul.mubr.msk.f32.vlgmr.msra.gmra.mxu1 %vm6304_vm7, %v15797_v37 }
 0x439   : > { %11631 = vmatprep.mubr.msk.f32.mxu1 %vm6304_vm7, %v15812_v20  ;;  %11661 = vmatpush3.msra.mxu1 %v9747_v46 }
 0x43a   : > { %11609 = vmatmul.mubr.msk.f32.vlgmr.msra.gmra.mxu0 %vm6304_vm7, %v15584_v38  ;;  %11662 = vmatprep.subr.mxu1 %v9746_v63 }
 0x43b   : > { %11641 = vmatpush3.msra.mxu0 %v9735_v0  ;;  %11611 = vmatprep.mubr.msk.f32.mxu0 %vm6304_vm7, %v15657_v14 }
 0x43c   : > { %11632 = vmatmul.mubr.msk.f32.gmra.mxu1 %vm6304_vm7, %v15822_v40  ;;  %11642 = vmatprep.subr.mxu0 %v9734_v61 }
 0x43d   : > { %11634 = vmatprep.mubr.msk.f32.mxu1 %vm6304_vm7, %v15839_v52  ;;  %11643 = vmatpush3.msra.mxu0 %v9734_v61 }
 0x43e   : > { %11612 = vmatmul.mubr.msk.f32.gmra.mxu0 %vm6304_vm7, %v15690_v55  ;;  %11644 = vmatprep.subr.mxu0 %v9733_v36 }
 0x43f   : > { %11614 = vmatprep.mubr.msk.f32.mxu0 %vm6304_vm7, %v15724_v26  ;;  %11645 = vmatpush3.msra.mxu0 %v9733_v36 }
 0x440   : > { %11635 = vmatmul.mubr.msk.f32.gmra.mxu1 %vm6304_vm7, %v15846_v5  ;;  %11646 = vmatprep.subr.mxu0 %v9732_v12 }
 0x441   : > { %11637 = vmatprep.mubr.msk.f32.mxu1 %vm6304_vm7, %v15862_v43  ;;  %11663 = vmatpush3.msra.mxu1 %v9746_v63 }
 0x442   : > { %11615 = vmatmul.mubr.msk.f32.gmra.mxu0 %vm6304_vm7, %v15747_v25  ;;  %11664 = vmatprep.subr.mxu1 %v9745_v44 }
 0x443   : > { %11617 = vmatprep.mubr.msk.f32.mxu0 %vm6304_vm7, %v15772_v30  ;;  %11665 = vmatpush3.msra.mxu1 %v9745_v44 }
 0x444   : > { %11638 = vmatmul.mubr.msk.f32.gmra.mxu1 %vm6304_vm7, %v7379_v29  ;;  %11666 = vmatprep.subr.mxu1 %v9744_v33 }
 0x445   : > { %11668 = vmatprep.mubr.msk.f32.mxu1 %vm6304_vm7, %v15584_v38  ;;  %11647 = vmatpush3.msra.mxu0 %v9732_v12  ;;  %v9758_v38 = vld [vmem:[%s16338_s5 + $0x110] sm:$0xff] }
 0x446   : > { %11618 = vmatmul.mubr.msk.f32.gmra.mxu0 %vm6304_vm7, %v7256_v47  ;;  %11667 = vmatpush3.msra.mxu1 %v9744_v33 }
 0x447   : > { %11648 = vmatprep.mubr.msk.f32.mxu0 %vm6304_vm7, %v15542_v17  ;;  %11680 = vmatprep.subr.mxu0 %v9759_v41  ;;  %v9757_v17 = vld [vmem:[%s16338_s5 + $0x108] sm:$0xff] }
 0x448   : > { %11669 = vmatmul.mubr.msk.f32.vlgmr.msra.gmra.mxu1 %vm6304_vm7, %v15657_v14  ;;  %v7622_v14 = vrot.slane %v6681_v4, 1 }
 0x449   : > { %11671 = vmatprep.mubr.msk.f32.mxu1 %vm6304_vm7, %v15690_v55  ;;  %v7623_v55 = vrot.slane %v6682_v28, 1 }
 0x44a   : > { %11649 = vmatmul.mubr.msk.f32.vlgmr.msra.gmra.mxu0 %vm6304_vm7, %v15615_v15  ;;  %v9756_v15 = vld [vmem:[%s16338_s5 + $0x100] sm:$0xff] }
 0x44b   : > { %11681 = vmatpush3.msra.mxu0 %v9759_v41  ;;  %11651 = vmatprep.mubr.msk.f32.mxu0 %vm6304_vm7, %v15647_v58  ;;  %v7624_v58 = vsel %vm598_vm3, %v7622_v14, %v7623_v55  ;;  %vm8071_vm3 = vcmask 1046532  }
 0x44c   : > { %11672 = vmatmul.mubr.msk.f32.gmra.mxu1 %vm6304_vm7, %v15724_v26  ;;  %11682 = vmatprep.subr.mxu0 %v9758_v38  ;;  %v7746_v26 = vrot.slane %v6682_v28, 2  ;;  %vm16095_vm6 = vmor %vm8070_vm2, %vm8071_vm3 }
 0x44d   : > { %11674 = vmatprep.mubr.msk.f32.mxu1 %vm6304_vm7, %v15747_v25  ;;  %11683 = vmatpush3.msra.mxu0 %v9758_v38  ;;  %v9776_v25 = vld [vmem:[%s16340_s7 + $0x38] sm:$0xff] }
 0x44e   : > { %11652 = vmatmul.mubr.msk.f32.gmra.mxu0 %vm6304_vm7, %v15699_v6  ;;  %11684 = vmatprep.subr.mxu0 %v9757_v17  ;;  %v7745_v6 = vrot.slane %v6681_v4, 2 }
 0x44f   : > { %11654 = vmatprep.mubr.msk.f32.mxu0 %vm6304_vm7, %v15731_v2  ;;  %11685 = vmatpush3.msra.mxu0 %v9757_v17 }
 0x450   : > { %11675 = vmatmul.mubr.msk.f32.gmra.mxu1 %vm6304_vm7, %v15772_v30  ;;  %11686 = vmatprep.subr.mxu0 %v9756_v15  ;;  %v7747_v2 = vsel %vm1266_vm4, %v7745_v6, %v7746_v26  ;;  %v9788_v30 = vld [vmem:[%s16340_s7 + $0x58] sm:$0xff]  ;;  %vm8256_vm4 = vcmask 1041408  }
 0x451   : > { %11677 = vmatprep.mubr.msk.f32.mxu1 %vm6304_vm7, %v7256_v47  ;;  %11687 = vmatpush3.msra.mxu0 %v9756_v15  ;;  %vm16103_vm8 = vmor %vm8256_vm4, %vm8257_vm5 }
 0x452   : > { %11655 = vmatmul.mubr.msk.f32.gmra.mxu0 %vm6304_vm7, %v15760_v48  ;;  %v9775_v48 = vld [vmem:[%s16340_s7 + $0x30] sm:$0xff]  ;;  %11700 = vmatprep.subr.mxu1 %v9776_v25 }
 0x453   : > { %11657 = vmatprep.mubr.msk.f32.mxu0 %vm6304_vm7, %v15850_v27  ;;  %11701 = vmatpush3.msra.mxu1 %v9776_v25 }
 0x454   : > { %11678 = vmatmul.mubr.msk.f32.gmra.mxu1 %vm6304_vm7, %v7624_v58  ;;  %11722 = vmatprep.subr.mxu0 %v9788_v30 }
 0x455   : > { %11702 = vmatprep.subr.mxu1 %v9775_v48 }
 0x456   : > { %11658 = vmatmul.mubr.msk.f32.gmra.mxu0 %vm6304_vm7, %v6681_v4  ;;  %11703 = vmatpush3.msra.mxu1 %v9775_v48 }
 0x457   : > { %11688 = vmatprep.mubr.msk.f32.mxu0 %vm6304_vm7, %v15797_v37  ;;  %11704 = vmatprep.subr.mxu1 %v9774_v62 }
 0x458   : > { %11705 = vmatpush3.msra.mxu1 %v9774_v62 }
 0x459   : > { %11706 = vmatprep.subr.mxu1 %v9773_v3 }
 0x45a   : > { %11689 = vmatmul.mubr.msk.f32.vlgmr.msra.gmra.mxu0 %vm6304_vm7, %v15812_v20  ;;  %11707 = vmatpush3.msra.mxu1 %v9773_v3 }
 0x45b   : > { %11691 = vmatprep.mubr.msk.f32.mxu0 %vm6304_vm7, %v15822_v40  ;;  %11723 = vmatpush3.msra.mxu0 %v9788_v30 }
 0x45c   : > { %11724 = vmatprep.subr.mxu0 %v9787_v23  ;;  %11711 = vmatprep.subr.mxu1 %v16006_v24 }
 0x45d   : > { %11725 = vmatpush3.msra.mxu0 %v9787_v23 }
 0x45e   : > { %11692 = vmatmul.mubr.msk.f32.gmra.mxu0 %vm6304_vm7, %v15839_v52  ;;  %11726 = vmatprep.subr.mxu0 %v9786_v19 }
 0x45f   : > { %11694 = vmatprep.mubr.msk.f32.mxu0 %vm6304_vm7, %v15846_v5  ;;  %11727 = vmatpush3.msra.mxu0 %v9786_v19 }
 0x460   : > { %11728 = vmatprep.subr.mxu0 %v9785_v13 }
 0x461   : > { %11729 = vmatpush3.msra.mxu0 %v9785_v13 }
 0x462   : > { %11695 = vmatmul.mubr.msk.f32.gmra.mxu0 %vm6304_vm7, %v15862_v43  ;;  %11744 = vmatprep.subr.mxu0 %v16011_v45 }
 0x463   : > { %11697 = vmatprep.mubr.msk.f32.mxu0 %vm6304_vm7, %v7379_v29 }
 0x466   : > { %11698 = vmatmul.mubr.msk.f32.gmra.mxu0 %vm6304_vm7, %v7747_v2 }
 0x4ae   : > { %v11550_v8 = vpop.f32.mrf.mxu1 }
 0x4b0   : > { %v6935_v37 = vpop.f32.mrf.mxu1 }
 0x4b7   : > { %v11530_v51 = vpop.f32.mrf.mxu0 }
 0x4b8   : > { %v6941_v55 = vadd.f32 %v11550_v8, %v11530_v51 }
 0x4b9   : > { %v6814_v16 = vpop.f32.mrf.mxu0 }
 0x4ba   : > { %v6936_v6 = vadd.f32 %v6935_v37, %v6814_v16 }
 0x4c0   : > { %v11553_v60 = vpop.f32.mrf.mxu1 }
 0x4c2   : > { %v6945_v50 = vpop.f32.mrf.mxu1 }
 0x4c8   : > { %v11533_v59 = vpop.f32.mrf.mxu0 }
 0x4c9   : > { %v6951_v48 = vadd.f32 %v11553_v60, %v11533_v59 }
 0x4ca   : > { %v6824_v32 = vpop.f32.mrf.mxu0 }
 0x4cb   : > { %v6946_v23 = vadd.f32 %v6945_v50, %v6824_v32 }
 0x4d2   : > { %v11556_v20 = vpop.f32.mrf.mxu1 }
 0x4d4   : > { %v6955_v53 = vpop.f32.mrf.mxu1 }
 0x4d7   : > { %v11536_v21 = vpop.f32.mrf.mxu0 }
 0x4d9   : > { %v6834_v31 = vpop.f32.mrf.mxu0 }
 0x4da   : > { %v6956_v37 = vadd.f32 %v6955_v53, %v6834_v31 }
 0x4e3   : > { %v16015_v40 = vpop.f32.mrf.mxu1 }
 0x4e5   : > { %v16017_v56 = vpop.f32.mrf.mxu1 }
 0x4e6   : > { %v11539_v57 = vpop.f32.mrf.mxu0 }
 0x4e7   : > { %v11590_v39 = vpop.f32.mrf.mxu1  ;;  %v6971_v50 = vadd.f32 %v16015_v40, %v11539_v57 }
 0x4e8   : > { %v6844_v22 = vpop.f32.mrf.mxu0 }
 0x4e9   : > { %v7206_v10 = vpop.f32.mrf.mxu1  ;;  %v6966_v32 = vadd.f32 %v16017_v56, %v6844_v22 }
 0x4ea   : > { %v11570_v52 = vpop.f32.mrf.mxu0 }
 0x4eb   : > { %v7125_v26 = vadd.f32 %v11570_v52, %v6941_v55 }
 0x4ec   : > { %v11593_v9 = vpop.f32.mrf.mxu1  ;;  %v7085_v18 = vpop.f32.mrf.mxu0 }
 0x4ed   : > { %v7124_v30 = vadd.f32 %v7085_v18, %v6936_v6  ;;  %v7246_v3 = vadd.f32 %v11590_v39, %v7125_v26 }
 0x4ee   : > { %v7216_v7 = vpop.f32.mrf.mxu1  ;;  %v11573_v5 = vpop.f32.mrf.mxu0 }
 0x4ef   : > { %v7127_v19 = vadd.f32 %v11573_v5, %v6951_v48  ;;  %v7245_v1 = vadd.f32 %v7206_v10, %v7124_v30 }
 0x4f0   : > { %v11596_v27 = vpop.f32.mrf.mxu1  ;;  %v7095_v0 = vpop.f32.mrf.mxu0 }
 0x4f1   : > { %v7126_v24 = vadd.f32 %v7095_v0, %v6946_v23  ;;  %v7248_v8 = vadd.f32 %v11593_v9, %v7127_v19 }
 0x4f2   : > { %v16019_v46 = vpop.f32.mrf.mxu1  ;;  %v11576_v43 = vpop.f32.mrf.mxu0 }
 0x4f3   : > { %v7247_v60 = vadd.f32 %v7216_v7, %v7126_v24 }
 0x4f4   : > { %v16021_v63 = vpop.f32.mrf.mxu1  ;;  %v7105_v61 = vpop.f32.mrf.mxu0 }
 0x4f5   : > { %v7128_v39 = vadd.f32 %v7105_v61, %v6956_v37 }
 0x4f6   : > { %v16023_v36 = vpop.f32.mrf.mxu1  ;;  %v11579_v34 = vpop.f32.mrf.mxu0 }
 0x4f7   : > { %v7249_v24 = vadd.f32 %v16019_v46, %v7128_v39 }
 0x4f8   : > { %v11630_v12 = vpop.f32.mrf.mxu1  ;;  %v7115_v49 = vpop.f32.mrf.mxu0 }
 0x4fa   : > { %v7453_v42 = vpop.f32.mrf.mxu1  ;;  %v11610_v44 = vpop.f32.mrf.mxu0 }
 0x4fb   : > { %v7370_v35 = vadd.f32 %v11610_v44, %v7246_v3 }
 0x4fc   : > { %v11633_v54 = vpop.f32.mrf.mxu1  ;;  %v7330_v33 = vpop.f32.mrf.mxu0 }
 0x4fd   : > { %v7493_v59 = vadd.f32 %v11630_v12, %v7370_v35 }
 0x4fe   : > { %v7463_v11 = vpop.f32.mrf.mxu1  ;;  %v11613_v29 = vpop.f32.mrf.mxu0 }
 0x4ff   : > { %v7372_v55 = vadd.f32 %v11613_v29, %v7248_v8 }
 0x500   : > { %v16025_v41 = vpop.f32.mrf.mxu1  ;;  %v7340_v47 = vpop.f32.mrf.mxu0 }
 0x501   : > { %v7371_v5 = vadd.f32 %v7340_v47, %v7247_v60  ;;  %v7495_v31 = vadd.f32 %v11633_v54, %v7372_v55 }
 0x502   : > { %v16027_v38 = vpop.f32.mrf.mxu1  ;;  %v11616_v4 = vpop.f32.mrf.mxu0 }
 0x503   : > { %16900 = vst [vmem:[#allocation53_spill] sm:$0xff] %v16027_v38  ;;  %v7369_v38 = vadd.f32 %v7330_v33, %v7245_v1  ;;  %v7130_v1 = vadd.f32 %v7115_v49, %v6966_v32  ;;  %v7494_v57 = vadd.f32 %v7463_v11, %v7371_v5 }
 0x504   : > { %v16029_v28 = vpop.f32.mrf.mxu1  ;;  %v7350_v17 = vpop.f32.mrf.mxu0 }
 0x505   : > { %16901 = vst [vmem:[#allocation74_spill] sm:$0xff] %v16029_v28  ;;  %v6961_v28 = vadd.f32 %v11556_v20, %v11536_v21  ;;  %v7492_v10 = vadd.f32 %v7453_v42, %v7369_v38  ;;  %v7131_v21 = vadd.f32 %v11579_v34, %v6971_v50  ;;  %v7373_v22 = vadd.f32 %v7350_v17, %v7249_v24  ;;  %v16060_v24 = vld [vmem:[#allocation5] sm:$0x3f] }
 0x506   : > { %v16031_v15 = vpop.f32.mrf.mxu1  ;;  %v11619_v14 = vpop.f32.mrf.mxu0  ;;  %v7251_v12 = vadd.f32 %v16023_v36, %v7130_v1 }
 0x507   : > { %16902 = vst [vmem:[#allocation84_spill] sm:$0xff] %v16031_v15  ;;  %v7129_v16 = vadd.f32 %v11576_v43, %v6961_v28  ;;  %v7252_v61 = vadd.f32 %v16021_v63, %v7131_v21 }
 0x508   : > { %v7360_v58 = vpop.f32.mrf.mxu0  ;;  %v11670_v2 = vpop.f32.mrf.mxu1 }
 0x509   : > { %v7250_v9 = vadd.f32 %v11596_v27, %v7129_v16  ;;  %v16041_v27 = vld [vmem:[%s16339_s6] ss:$0 sm:$0xff]  ;;  %v7376_v46 = vadd.f32 %v11619_v14, %v7252_v61  ;;  %v7375_v33 = vadd.f32 %v7360_v58, %v7251_v12 }
 0x50a   : > { %v11650_v25 = vpop.f32.mrf.mxu0  ;;  %v7698_v13 = vpop.f32.mrf.mxu1 }
 0x50b   : > { %v7614_v0 = vadd.f32 %v11650_v25, %v7493_v59  ;;  %v7374_v43 = vadd.f32 %v11616_v4, %v7250_v9  ;;  %v16903_v4 = vld [vmem:[#allocation53_spill] sm:$0xff] }
 0x50c   : > { %v7574_v62 = vpop.f32.mrf.mxu0  ;;  %v11673_v51 = vpop.f32.mrf.mxu1  ;;  %v7496_v28 = vadd.f32 %v16903_v4, %v7373_v22 }
 0x50d   : > { %v7613_v53 = vadd.f32 %v7574_v62, %v7492_v10  ;;  %v7738_v56 = vadd.f32 %v11670_v2, %v7614_v0 }
 0x50e   : > { %v11653_v45 = vpop.f32.mrf.mxu0  ;;  %v7708_v20 = vpop.f32.mrf.mxu1  ;;  %v16905_v25 = vld [vmem:[#allocation84_spill] sm:$0xff] }
 0x50f   : > { %v7616_v7 = vadd.f32 %v11653_v45, %v7495_v31  ;;  %v7737_v54 = vadd.f32 %v7698_v13, %v7613_v53  ;;  %v7497_v45 = vadd.f32 %v16025_v41, %v7374_v43  ;;  %v16904_v41 = vld [vmem:[#allocation74_spill] sm:$0xff]  ;;  %v7498_v48 = vadd.f32 %v16905_v25, %v7375_v33 }
 0x510   : > { %v7584_v15 = vpop.f32.mrf.mxu0  ;;  %v11676_v40 = vpop.f32.mrf.mxu1  ;;  %v7499_v2 = vadd.f32 %v16904_v41, %v7376_v46  ;;  %v8066_v46 = vcombine.high %v16060_v24, %v16060_v24 }
 0x511   : > { %v7615_v34 = vadd.f32 %v7584_v15, %v7494_v57  ;;  %v7740_v38 = vadd.f32 %v11673_v51, %v7616_v7 }
 0x512   : > { %v11656_v52 = vpop.f32.mrf.mxu0  ;;  %v7718_v29 = vpop.f32.mrf.mxu1 }
 0x513   : > { %v7618_v36 = vadd.f32 %v11656_v52, %v7497_v45  ;;  %v7739_v14 = vadd.f32 %v7708_v20, %v7615_v34  ;;  %v16906_v52 = vld [vmem:[#allocation82_spill] sm:$0xff] }
 0x514   : > { %v7594_v18 = vpop.f32.mrf.mxu0  ;;  %v11679_v6 = vpop.f32.mrf.mxu1  ;;  %v16907_v20 = vld [vmem:[#allocation38_spill] sm:$0xff] }
 0x515   : > { %v7617_v58 = vadd.f32 %v7594_v18, %v7496_v28  ;;  %v7742_v8 = vadd.f32 %v11676_v40, %v7618_v36 }
 0x516   : > { %v11659_v44 = vpop.f32.mrf.mxu0  ;;  %v7728_v37 = vpop.f32.mrf.mxu1 }
 0x517   : > { %v7620_v3 = vadd.f32 %v11659_v44, %v7499_v2  ;;  %v7741_v50 = vadd.f32 %v7718_v29, %v7617_v58  ;;  %v8075_v58 = vrot.slane %v8066_v46, 5 }
 0x518   : > { %v7604_v35 = vpop.f32.mrf.mxu0 }
 0x519   : > { %v7619_v13 = vadd.f32 %v7604_v35, %v7498_v48  ;;  %v7744_v0 = vadd.f32 %v11679_v6, %v7620_v3  ;;  %v9781_v6 = vrot.slane %v16060_v24, 10 }
 0x51a   : > { %v11690_v42 = vpop.f32.mrf.mxu0 }
 0x51b   : > { %v7861_v49 = vadd.f32 %v11690_v42, %v7738_v56  ;;  %v7743_v10 = vadd.f32 %v7728_v37, %v7619_v13 }
 0x51c   : > { %v7821_v11 = vpop.f32.mrf.mxu0 }
 0x51d   : > { %v7860_v47 = vadd.f32 %v7821_v11, %v7737_v54  ;;  %v7875_v63 = vadd.f32 %v16041_v27, %v7861_v49 }
 0x51e   : > { %v11693_v17 = vpop.f32.mrf.mxu0 }
 0x51f   : > { %v7874_v26 = vadd.f32 %v16041_v27, %v7860_v47  ;;  %v7863_v15 = vadd.f32 %v11693_v17, %v7740_v38  ;;  %8920 = vrot.lane.b32.xlu0 %v7875_v63, %s11849_s30  ;;  %v9769_v17 = vrot.slane %v16060_v24, 9 }
 0x520   : > { %v7831_v30 = vpop.f32.mrf.mxu0 }
 0x521   : > { %v7882_v62 = vmax.f32 %v7874_v26, 0.0  ;;  %v7862_v23 = vadd.f32 %v7831_v30, %v7739_v14  ;;  %v7877_v19 = vadd.f32 %v16041_v27, %v7863_v15 }
 0x522   : > { %v11696_v51 = vpop.f32.mrf.mxu0 }
 0x523   : > { %v7890_v16 = vcombine.high %v7882_v62, %v7882_v62  ;;  %v7897_v55 = vrot.slane %v7882_v62, %v16906_v52  ;;  %v7876_v60 = vadd.f32 %v16041_v27, %v7862_v23  ;;  %8924 = vrot.lane.b32.xlu1 %v7877_v19, %s11849_s30  ;;  %v7865_v59 = vadd.f32 %v11696_v51, %v7742_v8 }
 0x524   : > { %8918 = vrot.lane.b32.xlu0 %v7874_v26, %s11849_s30  ;;  %v7841_v32 = vpop.f32.mrf.mxu0 }
 0x525   : > { %v7904_v39 = vrot.slane %v7890_v16, %v16906_v52  ;;  %v7905_v18 = vcombine.high %v7897_v55, %v7897_v55  ;;  %v7883_v5 = vmax.f32 %v7876_v60, 0.0  ;;  %v7968_v21 = vrot.slane %v7897_v55, %v16907_v20 }
 0x526   : > { %v7864_v1 = vadd.f32 %v7841_v32, %v7741_v50  ;;  %v11699_v9 = vpop.f32.mrf.mxu0  ;;  %v7879_v7 = vadd.f32 %v16041_v27, %v7865_v59 }
 0x527   : > { %v7906_v44 = vcombine.high %v7904_v39, %v7904_v39  ;;  %v7972_v53 = vrot.slane %v7905_v18, %v16907_v20  ;;  %v7976_v31 = vrot.slane %v7904_v39, %v16907_v20  ;;  %v7907_v43 = vcombine.high %v7883_v5, %v7883_v5  ;;  %8922 = vrot.lane.b32.xlu1 %v7876_v60, %s11849_s30 }
 0x528   : > { %v7914_v35 = vrot.slane %v7883_v5, %v16906_v52  ;;  %v7878_v40 = vadd.f32 %v16041_v27, %v7864_v1  ;;  %v7867_v57 = vadd.f32 %v11699_v9, %v7744_v0  ;;  %v7851_v56 = vpop.f32.mrf.mxu0  ;;  %v8076_v39 = vsel %vm16095_vm6, %v9769_v17, %v8075_v58  ;;  %v16913_v58 = vld [vmem:[#allocation52_spill] sm:$0xff] }
 0x529   : > { %v7980_v22 = vrot.slane %v7906_v44, %v16907_v20  ;;  %v8029_v61 = vsel %vm6582_vm9, %v7972_v53, %v7968_v21  ;;  %v7921_v12 = vrot.slane %v7907_v43, %v16906_v52  ;;  %v7866_v42 = vadd.f32 %v7851_v56, %v7743_v10 }
 0x52a   : > { %v8030_v34 = vsel %vm6584_vm10, %v7976_v31, %v8029_v61  ;;  %v7922_v49 = vcombine.high %v7914_v35, %v7914_v35  ;;  %v7884_v54 = vmax.f32 %v7878_v40, 0.0  ;;  %8926 = vrot.lane.b32.xlu0 %v7878_v40, %s11849_s30  ;;  %v7984_v11 = vrot.slane %v7914_v35, %v16907_v20 }
 0x52b   : > { %v8031_v33 = vsel %vm6586_vm11, %v7980_v22, %v8030_v34  ;;  %v7923_v45 = vcombine.high %v7921_v12, %v7921_v12  ;;  %v7992_v29 = vrot.slane %v7921_v12, %v16907_v20  ;;  %8928 = vrot.lane.b32.xlu1 %v7879_v7, %s11849_s30  ;;  %v7880_v36 = vadd.f32 %v16041_v27, %v7866_v42 }
 0x52c   : > { %8047 = vst.msk [vmem:[#allocation5 + $0x9] sm:$0xf] %vm8046_vm1, %v8031_v33  ;;  %v7988_v47 = vrot.slane %v7922_v49, %v16907_v20  ;;  %v7924_v38 = vcombine.high %v7884_v54, %v7884_v54  ;;  %v7931_v63 = vrot.slane %v7884_v54, %v16906_v52  ;;  %v7881_v28 = vadd.f32 %v16041_v27, %v7867_v57 }
 0x52d   : > { %v7996_v4 = vrot.slane %v7923_v45, %v16907_v20  ;;  %v7885_v25 = vmax.f32 %v7880_v36, 0.0  ;;  %v8261_v27 = vrot.slane %v8066_v46, 6 }
 0x52e   : > { %v8032_v26 = vsel %vm6582_vm9, %v7988_v47, %v7984_v11  ;;  %v7938_v15 = vrot.slane %v7924_v38, %v16906_v52  ;;  %v7939_v14 = vcombine.high %v7931_v63, %v7931_v63  ;;  %8930 = vrot.lane.b32.xlu0 %v7880_v36, %s11849_s30  ;;  %v8000_v2 = vrot.slane %v7931_v63, %v16907_v20 }
 0x52f   : > { %v8033_v41 = vsel %vm6584_vm10, %v7992_v29, %v8032_v26  ;;  %8932 = vrot.lane.b32.xlu1 %v7881_v28, %s11849_s30  ;;  %v7941_v3 = vcombine.high %v7885_v25, %v7885_v25  ;;  %v7948_v13 = vrot.slane %v7885_v25, %v16906_v52  ;;  %v8262_v18 = vsel %vm16103_vm8, %v9781_v6, %v8261_v27  ;;  %v8060_v6 = vld [vmem:[%s16340_s7 + $0x10] sm:$0xff]  ;;  %v8059_v25 = vld [vmem:[%s16340_s7 + $0x8] sm:$0xff] }
 0x530   : > { %v8034_v48 = vsel %vm6586_vm11, %v7996_v4, %v8033_v41  ;;  %v7940_v30 = vcombine.high %v7938_v15, %v7938_v15  ;;  %v8004_v62 = vrot.slane %v7939_v14, %v16907_v20  ;;  %v8008_v23 = vrot.slane %v7938_v15, %v16907_v20  ;;  %v9800_v15 = vld [vmem:[%s16340_s7 + $0x90] sm:$0xff]  ;;  %v16912_v14 = vld [vmem:[#allocation51_spill] sm:$0xff] }
 0x531   : > { %8048 = vst.msk [vmem:[#allocation5 + $0x11] sm:$0xf] %vm8046_vm1, %v8034_v48  ;;  %v7955_v55 = vrot.slane %v7941_v3, %v16906_v52  ;;  %v7956_v60 = vcombine.high %v7948_v13, %v7948_v13  ;;  %v8016_v0 = vrot.slane %v7948_v13, %v16907_v20  ;;  %v8058_v48 = vld [vmem:[%s16340_s7] sm:$0xff]  ;;  %v9814_v13 = vld [vmem:[%s16340_s7 + $0xd8] sm:$0xff] }
 0x532   : > { %v8012_v51 = vrot.slane %v7940_v30, %v16907_v20  ;;  %v8035_v37 = vsel %vm6582_vm9, %v8004_v62, %v8000_v2  ;;  %v9798_v30 = vld [vmem:[%s16340_s7 + $0x80] sm:$0xff] }
 0x533   : > { %v8036_v16 = vsel %vm6584_vm10, %v8008_v23, %v8035_v37  ;;  %v16111_v59 = vld [vmem:[#allocation5 + $0x8] sm:$0x3f]  ;;  %v7957_v5 = vcombine.high %v7955_v55, %v7955_v55  ;;  %v8020_v52 = vrot.slane %v7956_v60, %v16907_v20  ;;  %v8024_v10 = vrot.slane %v7955_v55, %v16907_v20  ;;  %v9794_v23 = vld [vmem:[%s16340_s7 + $0x78] sm:$0xff]  ;;  %v9813_v55 = vld [vmem:[%s16340_s7 + $0xd0] sm:$0xff] }
 0x534   : > { %v8037_v50 = vsel %vm6586_vm11, %v8012_v51, %v8036_v16  ;;  %v8067_v32 = vcombine.high %v16111_v59, %v16111_v59  ;;  %v9770_v21 = vrot.slane %v16111_v59, 9  ;;  %v9782_v9 = vrot.slane %v16111_v59, 10  ;;  %v9793_v16 = vld [vmem:[%s16340_s7 + $0x70] sm:$0xff]  ;;  %v9792_v60 = vld [vmem:[%s16340_s7 + $0x68] sm:$0xff] }
 0x535   : > { %8049 = vst.msk [vmem:[#allocation5 + $0x19] sm:$0xf] %vm8046_vm1, %v8037_v50  ;;  %v8028_v53 = vrot.slane %v7957_v5, %v16907_v20  ;;  %v8038_v31 = vsel %vm6582_vm9, %v8020_v52, %v8016_v0  ;;  %v8175_v26 = vcombine.low %v16060_v24, %v16111_v59  ;;  %v9799_v24 = vld [vmem:[%s16340_s7 + $0x88] sm:$0xff]  ;;  %v9791_v50 = vld [vmem:[%s16340_s7 + $0x60] sm:$0xff]  ;;  %v9828_v0 = vld [vmem:[%s16340_s7 + $0x118] sm:$0xff]  ;;  %vm8942_vm9 = vcmask 293888  }
 0x536   : > { %v8079_v1 = vrot.slane %v8067_v32, 5  ;;  %v8265_v44 = vrot.slane %v8067_v32, 6  ;;  %v8039_v43 = vsel %vm6584_vm10, %v8024_v10, %v8038_v31  ;;  %v9811_v32 = vld [vmem:[%s16340_s7 + $0xc0] sm:$0xff] }
 0x537   : > { %v8040_v57 = vsel %vm6586_vm11, %v8028_v53, %v8039_v43  ;;  %v9806_v43 = vld [vmem:[%s16340_s7 + $0xa8] sm:$0xff] }
 0x538   : > { %v8080_v35 = vsel %vm16095_vm6, %v9770_v21, %v8079_v1  ;;  %v16133_v7 = vsel %vm16103_vm8, %v9782_v9, %v8265_v44  ;;  %v16135_v40 = vld [vmem:[#allocation5 + $0x10] sm:$0x3f]  ;;  %8050 = vst.msk [vmem:[#allocation5 + $0x21] sm:$0xf] %vm8046_vm1, %v8040_v57  ;;  %v9825_v57 = vld [vmem:[%s16340_s7 + $0x100] sm:$0xff] }
 0x539   : > { %v8094_v56 = vcombine.low %v8076_v39, %v8080_v35  ;;  %v8280_v22 = vcombine.low %v8262_v18, %v16133_v7  ;;  %v8068_v20 = vcombine.high %v16135_v40, %v16135_v40  ;;  %v9771_v49 = vrot.slane %v16135_v40, 9  ;;  %v16243_v39 = vld [vmem:[#allocation5 + $0x28] sm:$0x3f]  ;;  %v9808_v18 = vld [vmem:[%s16340_s7 + $0xb8] sm:$0xff]  ;;  %v9807_v1 = vld [vmem:[%s16340_s7 + $0xb0] sm:$0xff] }
 0x53a   : > { %v9783_v54 = vrot.slane %v16135_v40, 10  ;;  %v8369_v37 = vcombine.low %v16111_v59, %v16135_v40  ;;  %v9812_v59 = vld [vmem:[%s16340_s7 + $0xc8] sm:$0xff]  ;;  %v8723_v52 = vcombine.high %v16243_v39, %v16243_v39  ;;  %v9827_v9 = vld [vmem:[%s16340_s7 + $0x110] sm:$0xff]  ;;  %v9824_v53 = vrot.slane %v16243_v39, 10 }
 0x53b   : > { %11708 = vmatprep.mubr.msk.f32.mxu1 %vm6304_vm7, %v8094_v56  ;;  %11730 = vmatprep.mubr.msk.f32.mxu0 %vm6304_vm7, %v8280_v22  ;;  %v8083_v42 = vrot.slane %v8068_v20, 5  ;;  %v8269_v34 = vrot.slane %v8068_v20, 6  ;;  %v9821_v20 = vld [vmem:[%s16340_s7 + $0xf8] sm:$0xff]  ;;  %v9817_v8 = vrot.slane %v16243_v39, 9 }
 0x53c   : > { %v16144_v61 = vld [vmem:[#allocation5 + $0x18] sm:$0x3f]  ;;  %v8815_v31 = vrot.slane %v8723_v52, 6 }
 0x53d   : > { %v8069_v12 = vcombine.high %v16144_v61, %v16144_v61  ;;  %v9772_v46 = vrot.slane %v16144_v61, 9  ;;  %v9784_v45 = vrot.slane %v16144_v61, 10  ;;  %v8084_v29 = vsel %vm16095_vm6, %v9771_v49, %v8083_v42  ;;  %v9820_v42 = vld [vmem:[%s16340_s7 + $0xf0] sm:$0xff]  ;;  %v9819_v49 = vld [vmem:[%s16340_s7 + $0xe8] sm:$0xff] }
 0x53e   : > { %v16158_v38 = vsel %vm16103_vm8, %v9783_v54, %v8269_v34  ;;  %v8462_v41 = vcombine.low %v8080_v35, %v8084_v29  ;;  %v8176_v3 = vcombine.low %v16135_v40, %v16144_v61  ;;  %v9826_v35 = vld [vmem:[%s16340_s7 + $0x108] sm:$0xff]  ;;  %v9805_v40 = vld [vmem:[%s16340_s7 + $0xa0] sm:$0xff]  ;;  %v8816_v22 = vsel %vm16103_vm8, %v9824_v53, %v8815_v31 }
 0x53f   : > { %v8087_v33 = vrot.slane %v8069_v12, 5  ;;  %v8273_v11 = vrot.slane %v8069_v12, 6  ;;  %v16164_v36 = vld [vmem:[#allocation5 + $0x20] sm:$0x3f]  ;;  %v8554_v21 = vcombine.low %v16133_v7, %v16158_v38  ;;  %v8726_v34 = vrot.slane %v8723_v52, 5 }
 0x540   : > { %v16174_v17 = vcombine.high %v16164_v36, %v16164_v36  ;;  %v9797_v27 = vrot.slane %v16164_v36, 9  ;;  %v8370_v5 = vcombine.low %v16144_v61, %v16164_v36  ;;  %v8643_v10 = vcombine.low %v16164_v36, %v16243_v39  ;;  %v9818_v54 = vld [vmem:[%s16340_s7 + $0xe0] sm:$0xff] }
 0x541   : > { %v8088_v47 = vsel %vm16095_vm6, %v9772_v46, %v8087_v33  ;;  %v16162_v63 = vsel %vm16103_vm8, %v9784_v45, %v8273_v11  ;;  %v9804_v7 = vrot.slane %v16164_v36, 10  ;;  %v8727_v46 = vsel %vm16095_vm6, %v9817_v8, %v8726_v34 }
 0x542   : > { %v16166_v4 = vcombine.low %v8084_v29, %v8088_v47  ;;  %v16170_v28 = vcombine.low %v16158_v38, %v16162_v63  ;;  %v8455_v2 = vrot.slane %v16174_v17, 5  ;;  %v8547_v44 = vrot.slane %v16174_v17, 6 }
 0x544   : > { %11709 = vmatmul.mubr.msk.f32.vlgmr.msra.gmra.mxu1 %vm6304_vm7, %v16166_v4  ;;  %11731 = vmatmul.mubr.msk.f32.vlgmr.msra.gmra.mxu0 %vm6304_vm7, %v16170_v28  ;;  %v16208_v62 = vsel %vm16095_vm6, %v9797_v27, %v8455_v2  ;;  %v8548_v56 = vsel %vm16103_vm8, %v9804_v7, %v8547_v44 }
 0x545   : > { %11712 = vmatpush3.msra.mxu1 %v16912_v14  ;;  %11745 = vmatpush3.msra.mxu0 %v16913_v58  ;;  %v8463_v51 = vcombine.low %v8088_v47, %v16208_v62  ;;  %v8555_v61 = vcombine.low %v16162_v63, %v8548_v56  ;;  %v8822_v12 = vcombine.low %v8548_v56, %v8816_v22 }
 0x546   : > { %11713 = vmatprep.subr.mxu1 %v8060_v6  ;;  %11719 = vmatprep.mubr.msk.f32.mxu1 %vm6304_vm7, %v8175_v26  ;;  %v8733_v33 = vcombine.low %v16208_v62, %v8727_v46 }
 0x547   : > { %11746 = vmatprep.subr.mxu0 %v9800_v15  ;;  %11752 = vmatprep.mubr.msk.f32.mxu0 %vm6304_vm7, %v8462_v41 }
 0x548   : > { %11714 = vmatpush3.msra.mxu1 %v8060_v6  ;;  %11747 = vmatpush3.msra.mxu0 %v9800_v15 }
 0x549   : > { %11715 = vmatprep.subr.mxu1 %v8059_v25  ;;  %11748 = vmatprep.subr.mxu0 %v9799_v24 }
 0x54a   : > { %11716 = vmatpush3.msra.mxu1 %v8059_v25  ;;  %11749 = vmatpush3.msra.mxu0 %v9799_v24 }
 0x54b   : > { %11717 = vmatprep.subr.mxu1 %v8058_v48  ;;  %11750 = vmatprep.subr.mxu0 %v9798_v30 }
 0x54c   : > { %11718 = vmatpush3.msra.mxu1 %v8058_v48  ;;  %11751 = vmatpush3.msra.mxu0 %v9798_v30 }
 0x54d   : > { %11720 = vmatmul.mubr.msk.f32.vlgmr.msra.gmra.mxu1 %vm6304_vm7, %v8176_v3  ;;  %11733 = vmatprep.subr.mxu1 %v9794_v23 }
 0x54e   : > { %11753 = vmatmul.mubr.msk.f32.vlgmr.msra.gmra.mxu0 %vm6304_vm7, %v8463_v51  ;;  %11766 = vmatprep.subr.mxu0 %v9814_v13 }
 0x54f   : > { %11734 = vmatpush3.msra.mxu1 %v9794_v23  ;;  %11741 = vmatprep.mubr.msk.f32.mxu1 %vm6304_vm7, %v8369_v37 }
 0x550   : > { %11767 = vmatpush3.msra.mxu0 %v9814_v13  ;;  %11774 = vmatprep.mubr.msk.f32.mxu0 %vm6304_vm7, %v8176_v3 }
 0x551   : > { %11735 = vmatprep.subr.mxu1 %v9793_v16  ;;  %11768 = vmatprep.subr.mxu0 %v9813_v55 }
 0x552   : > { %11736 = vmatpush3.msra.mxu1 %v9793_v16  ;;  %11769 = vmatpush3.msra.mxu0 %v9813_v55 }
 0x553   : > { %11737 = vmatprep.subr.mxu1 %v9792_v60  ;;  %11770 = vmatprep.subr.mxu0 %v9812_v59 }
 0x554   : > { %11738 = vmatpush3.msra.mxu1 %v9792_v60  ;;  %11771 = vmatpush3.msra.mxu0 %v9812_v59 }
 0x555   : > { %11739 = vmatprep.subr.mxu1 %v9791_v50  ;;  %11772 = vmatprep.subr.mxu0 %v9811_v32 }
 0x556   : > { %11740 = vmatpush3.msra.mxu1 %v9791_v50  ;;  %11773 = vmatpush3.msra.mxu0 %v9811_v32 }
 0x557   : > { %11742 = vmatmul.mubr.msk.f32.vlgmr.msra.gmra.mxu1 %vm6304_vm7, %v8370_v5  ;;  %11755 = vmatprep.subr.mxu1 %v9808_v18  ;;  %v9831_v5 = vld [vmem:[%s16341_s8] ss:$0 sm:$0xff] }
 0x558   : > { %11775 = vmatmul.mubr.msk.f32.vlgmr.msra.gmra.mxu0 %vm6304_vm7, %v8643_v10  ;;  %11788 = vmatprep.subr.mxu0 %v9828_v0 }
 0x559   : > { %11756 = vmatpush3.msra.mxu1 %v9808_v18  ;;  %11763 = vmatprep.mubr.msk.f32.mxu1 %vm6304_vm7, %v8554_v21 }
 0x55a   : > { %11789 = vmatpush3.msra.mxu0 %v9828_v0  ;;  %11796 = vmatprep.mubr.msk.f32.mxu0 %vm6304_vm7, %v16170_v28 }
 0x55b   : > { %11757 = vmatprep.subr.mxu1 %v9807_v1  ;;  %11790 = vmatprep.subr.mxu0 %v9827_v9 }
 0x55c   : > { %11758 = vmatpush3.msra.mxu1 %v9807_v1  ;;  %11791 = vmatpush3.msra.mxu0 %v9827_v9 }
 0x55d   : > { %11759 = vmatprep.subr.mxu1 %v9806_v43  ;;  %11792 = vmatprep.subr.mxu0 %v9826_v35 }
 0x55e   : > { %11760 = vmatpush3.msra.mxu1 %v9806_v43  ;;  %11793 = vmatpush3.msra.mxu0 %v9826_v35 }
 0x55f   : > { %11761 = vmatprep.subr.mxu1 %v9805_v40  ;;  %11794 = vmatprep.subr.mxu0 %v9825_v57 }
 0x560   : > { %11762 = vmatpush3.msra.mxu1 %v9805_v40  ;;  %11795 = vmatpush3.msra.mxu0 %v9825_v57 }
 0x561   : > { %11764 = vmatmul.mubr.msk.f32.vlgmr.msra.gmra.mxu1 %vm6304_vm7, %v8555_v61  ;;  %11777 = vmatprep.subr.mxu1 %v9821_v20 }
 0x562   : > { %11797 = vmatmul.mubr.msk.f32.vlgmr.msra.gmra.mxu0 %vm6304_vm7, %v8822_v12  ;;  %11778 = vmatpush3.msra.mxu1 %v9821_v20 }
 0x563   : > { %11785 = vmatprep.mubr.msk.f32.mxu1 %vm6304_vm7, %v16166_v4  ;;  %11779 = vmatprep.subr.mxu1 %v9820_v42 }
 0x564   : > { %11780 = vmatpush3.msra.mxu1 %v9820_v42 }
 0x565   : > { %11781 = vmatprep.subr.mxu1 %v9819_v49 }
 0x566   : > { %11782 = vmatpush3.msra.mxu1 %v9819_v49 }
 0x567   : > { %11783 = vmatprep.subr.mxu1 %v9818_v54 }
 0x568   : > { %11784 = vmatpush3.msra.mxu1 %v9818_v54 }
 0x569   : > { %11786 = vmatmul.mubr.msk.f32.vlgmr.msra.gmra.mxu1 %vm6304_vm7, %v8733_v33  ;;  %vm8951_vm7 = vcmask 441344  }
 0x591   : > { %v8921_v45 = vpop.permute.xlu0 %8920 }
 0x592   : > { %8944 = vst.msk [vmem:[%s367_s12 + $0x8] sm:$0xff] %vm8942_vm9, %v8921_v45 }
 0x595   : > { %v8925_v11 = vpop.permute.xlu1 %8924 }
 0x596   : > { %8946 = vst.msk [vmem:[%s367_s12 + $0x18] sm:$0xff] %vm8942_vm9, %v8925_v11  ;;  %v8919_v19 = vpop.permute.xlu0 %8918 }
 0x597   : > { %8943 = vst.msk [vmem:[%s367_s12] sm:$0xff] %vm8942_vm9, %v8919_v19 }
 0x599   : > { %v8923_v29 = vpop.permute.xlu1 %8922 }
 0x59a   : > { %8945 = vst.msk [vmem:[%s367_s12 + $0x10] sm:$0xff] %vm8942_vm9, %v8923_v29 }
 0x59c   : > { %v8927_v47 = vpop.permute.xlu0 %8926 }
 0x59d   : > { %8947 = vst.msk [vmem:[%s367_s12 + $0x20] sm:$0xff] %vm8942_vm9, %v8927_v47  ;;  %v8929_v38 = vpop.permute.xlu1 %8928 }
 0x59e   : > { %8948 = vst.msk [vmem:[%s367_s12 + $0x28] sm:$0xff] %vm8942_vm9, %v8929_v38 }
 0x5a0   : > { %v8931_v63 = vpop.permute.xlu0 %8930 }
 0x5a1   : > { %8949 = vst.msk [vmem:[%s367_s12 + $0x30] sm:$0xff] %vm8942_vm9, %v8931_v63  ;;  %v8933_v36 = vpop.permute.xlu1 %8932 }
 0x5a2   : > { %8950 = vst.msk [vmem:[%s367_s12 + $0x38] sm:$0xff] %vm8942_vm9, %v8933_v36 }
 0x604   : > { %v11710_v4 = vpop.f32.mrf.mxu1  ;;  %v11732_v6 = vpop.f32.mrf.mxu0 }
 0x606   : > { %v8166_v28 = vpop.f32.mrf.mxu1  ;;  %v8352_v41 = vpop.f32.mrf.mxu0 }
 0x60d   : > { %v11721_v17 = vpop.f32.mrf.mxu1 }
 0x60e   : > { %v8253_v15 = vadd.f32 %v11721_v17, %v11710_v4  ;;  %v11754_v25 = vpop.f32.mrf.mxu0 }
 0x60f   : > { %v8247_v26 = vpop.f32.mrf.mxu1 }
 0x610   : > { %v8248_v58 = vadd.f32 %v8247_v26, %v8166_v28  ;;  %v8362_v2 = vadd.f32 %v11732_v6, %v8253_v15  ;;  %v8534_v62 = vpop.f32.mrf.mxu0 }
 0x612   : > { %v8361_v48 = vadd.f32 %v8352_v41, %v8248_v58 }
 0x617   : > { %v11743_v14 = vpop.f32.mrf.mxu1 }
 0x618   : > { %v8451_v27 = vadd.f32 %v11743_v14, %v8362_v2  ;;  %v11776_v13 = vpop.f32.mrf.mxu0 }
 0x619   : > { %v8441_v24 = vpop.f32.mrf.mxu1 }
 0x61a   : > { %v8450_v30 = vadd.f32 %v8441_v24, %v8361_v48  ;;  %v8544_v3 = vadd.f32 %v11754_v25, %v8451_v27  ;;  %v8712_v60 = vpop.f32.mrf.mxu0 }
 0x61c   : > { %v8543_v16 = vadd.f32 %v8534_v62, %v8450_v30 }
 0x621   : > { %v11765_v23 = vpop.f32.mrf.mxu1 }
 0x622   : > { %v8636_v37 = vadd.f32 %v11765_v23, %v8544_v3  ;;  %v11798_v50 = vpop.f32.mrf.mxu0 }
 0x623   : > { %v8626_v51 = vpop.f32.mrf.mxu1 }
 0x624   : > { %v8635_v55 = vadd.f32 %v8626_v51, %v8543_v16  ;;  %v8722_v59 = vadd.f32 %v11776_v13, %v8636_v37  ;;  %v8891_v21 = vpop.f32.mrf.mxu0 }
 0x626   : > { %v8721_v18 = vadd.f32 %v8712_v60, %v8635_v55 }
 0x629   : > { %v11787_v32 = vpop.f32.mrf.mxu1 }
 0x62a   : > { %v8812_v39 = vadd.f32 %v11787_v32, %v8722_v59 }
 0x62b   : > { %v8802_v0 = vpop.f32.mrf.mxu1 }
 0x62c   : > { %v8901_v52 = vadd.f32 %v11798_v50, %v8812_v39  ;;  %v8811_v10 = vadd.f32 %v8802_v0, %v8721_v18 }
 0x62e   : > { %v8909_v1 = vadd.f32 %v9831_v5, %v8901_v52  ;;  %v8900_v9 = vadd.f32 %v8891_v21, %v8811_v10 }
 0x630   : > { %8953 = vst.msk [vmem:[%s372_s20 + $0x8] sm:$0xff] %vm8951_vm7, %v8909_v1  ;;  %v8908_v44 = vadd.f32 %v9831_v5, %v8900_v9 }
 0x632   : > { %8952 = vst.msk [vmem:[%s372_s20] sm:$0xff] %vm8951_vm7, %v8908_v44 }
 0x633 PF: > { %s21_s13 = sadd.s32 1, %s11845_s13  }
 0x634   : > { %p18_p4 = scmp.ge.s32.totalorder %s21_s13, 4  }
 0x636   :  { %20 = sbr.rel (!%p18_p4) target bundleno = 1 (0x1), region = 134 }

</bundles_post_ra>
